<compile_context>
chip_gen: v7x
topology: tpu7x:2x2x1
jax: 0.10.0
libtpu: 0.0.40
codegen_flags: <defaults>
</compile_context>

<pallas_src>
import math
from functools import partial

import jax
import jax.numpy as jnp
from jax.experimental import pallas as pl
from jax.experimental.pallas import tpu as pltpu


def _round_up(x, m):
    return ((x + m - 1) // m) * m


def _gelu(x):
    # TODO(synk): tanh-form GELU (tanh lowers to the EUP slot) instead of torch's
    # erf-exact F.gelu; |err| <~ 1e-3 absolute on activations.
    c = math.sqrt(2.0 / math.pi)
    return 0.5 * x * (1.0 + jnp.tanh(c * (x + 0.044715 * x * x * x)))


# -----------------------------------------------------------------------------
# Fused kernel: num_layers x TransformerBatchNormEncoderLayer + classification head
# grid = (batch_tiles,)  — layers are a static in-kernel loop, weights VMEM-resident.
# -----------------------------------------------------------------------------
def _encoder_stack_kernel(h0_ref,
                          wqkv_ref, bqkv_ref, wo_ref, bo_ref,
                          bn1s_ref, bn1b_ref,
                          w1_ref, b1_ref, w2_ref, b2_ref,
                          bn2s_ref, bn2b_ref,
                          wd_ref, bd_ref, wout_ref, bout_ref,
                          out_ref,
                          *, n_heads, n_layers):
    Bt, S, D = h0_ref.shape
    hd = D // n_heads
    scale = 1.0 / math.sqrt(hd)

    x2 = h0_ref[...].reshape(Bt * S, D)                       # (Bt*S, D) f32, live carry

    for li in range(n_layers):
        # ---- multi-head self attention ------------------------------------------------
        # Single fused QKV projection (bf16 operands, f32 accumulation).
        qkv = jnp.dot(x2.astype(jnp.bfloat16), wqkv_ref[li],
                      preferred_element_type=jnp.float32) + bqkv_ref[li]   # (Bt*S, 3D)

        wo_l = wo_ref[li]                                      # (D, D) bf16, resident
        attn = None
        for h in range(n_heads):                               # static head loop
            q = qkv[:, h * hd:(h + 1) * hd].reshape(Bt, S, hd).astype(jnp.bfloat16)
            k = qkv[:, D + h * hd:D + (h + 1) * hd].reshape(Bt, S, hd).astype(jnp.bfloat16)
            v = qkv[:, 2 * D + h * hd:2 * D + (h + 1) * hd].reshape(Bt, S, hd).astype(jnp.bfloat16)

            s = jnp.einsum('bqd,bkd->bqk', q, k,
                           preferred_element_type=jnp.float32) * scale     # (Bt, S, S) f32
            m = jnp.max(s, axis=-1, keepdims=True)
            p = jnp.exp(s - m)
            p = p * pl.reciprocal(jnp.sum(p, axis=-1, keepdims=True), approx=True)
            ctx = jnp.einsum('bqk,bkd->bqd', p.astype(jnp.bfloat16), v,
                             preferred_element_type=jnp.float32)           # (Bt, S, hd)

            # Out-projection as an accumulating K=hd matmul into a lane-dense (Bt*S, D)
            # f32 accumulator — replaces the old ctx_scratch merge + masked stores.
            part = jnp.dot(ctx.reshape(Bt * S, hd).astype(jnp.bfloat16),
                           wo_l[h * hd:(h + 1) * hd, :],
                           preferred_element_type=jnp.float32)
            attn = part if attn is None else attn + part
        attn = attn + bo_ref[li]

        # residual (dropout1 = identity) + BatchNorm1d (eval, folded affine)
        x2 = x2 + attn
        x2 = x2 * bn1s_ref[li] + bn1b_ref[li]

        # ---- feed-forward (GELU) -------------------------------------------------------
        ff = jnp.dot(x2.astype(jnp.bfloat16), w1_ref[li],
                     preferred_element_type=jnp.float32) + b1_ref[li]
        ff = _gelu(ff)
        ff = jnp.dot(ff.astype(jnp.bfloat16), w2_ref[li],
                     preferred_element_type=jnp.float32) + b2_ref[li]
        x2 = x2 + ff                                           # residual (dropout2 = identity)
        x2 = x2 * bn2s_ref[li] + bn2b_ref[li]

    # ---- classification head ----------------------------------------------------------
    y = _gelu(x2).reshape(Bt, S, D)
    # AvgPool2d((max_len, 1)) + squeeze; S == max_len (full sequence in one block).
    pooled = jnp.sum(y, axis=1) * (1.0 / S)                    # (Bt, D)
    hdn = jnp.dot(pooled.astype(jnp.bfloat16), wd_ref[...],
                  preferred_element_type=jnp.float32) + bd_ref[...]
    out_ref[...] = jnp.dot(hdn.astype(jnp.bfloat16), wout_ref[...],
                           preferred_element_type=jnp.float32) + bout_ref[...]


# -----------------------------------------------------------------------------
# Python wrapper
# -----------------------------------------------------------------------------
def ts_transformer_forward(X, params, *, n_heads):
    B, S, Fd = X.shape
    D = params['w_inp'].shape[1]
    assert D % n_heads == 0
    assert params['w_dense1'].shape[0] == D                    # dense1 = Linear(128, 128)

    # Input projection (K=feat_dim far too shallow for the MXU) + sqrt(d_model) scale
    # + fixed positional encoding: done in XLA, pe broadcast (never tiled over batch).
    h0 = (jnp.einsum('bsf,fd->bsd', X, params['w_inp']) + params['b_inp']) * math.sqrt(D)
    h0 = (h0 + params['pe'][None, :S, :]).astype(jnp.float32)

    # Lane-dense head output: pad ft_size up to a multiple of 128, slice afterwards.
    ft_size = params['w_out'].shape[1]
    ft_pad = _round_up(ft_size, 128)
    w_out_p = jnp.zeros((D, ft_pad), params['w_out'].dtype).at[:, :ft_size].set(params['w_out'])
    b_out_p = jnp.zeros((1, ft_pad), jnp.float32).at[:, :ft_size].set(params['b_out'])

    # Batch tiling: round up to 8 (sublane), cap at 256 rows; when the batch is big
    # enough, split into >= 2 tiles so the "parallel" axis feeds both v7x TensorCores.
    bt = min(_round_up(B, 8), 256)
    if B >= 16 and -(-B // bt) < 2:
        bt = _round_up(-(-B // 2), 8)
    nb = -(-B // bt)
    b_pad = nb * bt
    if b_pad != B:
        h0 = jnp.pad(h0, ((0, b_pad - B), (0, 0), (0, 0)))

    enc = params['enc']
    L = enc['wqkv'].shape[0]
    FF = enc['w1'].shape[-1]

    def full(shape):  # whole stacked array resident in VMEM across all grid steps
        nd = len(shape)
        return pl.BlockSpec(shape, lambda b, _nd=nd: (0,) * _nd)

    in_specs = [
        pl.BlockSpec((bt, S, D), lambda b: (b, 0, 0)),         # activation (batch-tiled)
        full((L, D, 3 * D)), full((L, 1, 3 * D)),              # wqkv, bqkv
        full((L, D, D)), full((L, 1, D)),                      # wo, bo
        full((L, 1, D)), full((L, 1, D)),                      # bn1 scale/bias
        full((L, D, FF)), full((L, 1, FF)),                    # w1, b1
        full((L, FF, D)), full((L, 1, D)),                     # w2, b2
        full((L, 1, D)), full((L, 1, D)),                      # bn2 scale/bias
        full((D, 128)), full((1, 128)),                        # dense1
        full((D, ft_pad)), full((1, ft_pad)),                  # output_layer (lane-padded)
    ]

    out = pl.pallas_call(
        partial(_encoder_stack_kernel, n_heads=n_heads, n_layers=L),
        out_shape=jax.ShapeDtypeStruct((b_pad, ft_pad), jnp.float32),
        grid=(nb,),
        in_specs=in_specs,
        out_specs=pl.BlockSpec((bt, ft_pad), lambda b: (b, 0)),
        compiler_params=pltpu.CompilerParams(
            dimension_semantics=("parallel",),
            vmem_limit_bytes=48 * 1024 * 1024),
    )(h0,
      enc['wqkv'], enc['bqkv'], enc['wo'], enc['bo'],
      enc['bn1_scale'], enc['bn1_bias'],
      enc['w1'], enc['b1'], enc['w2'], enc['b2'],
      enc['bn2_scale'], enc['bn2_bias'],
      params['w_dense1'], params['b_dense1'],
      w_out_p, b_out_p)

    return out[:B, :ft_size]


# -----------------------------------------------------------------------------
# Deterministic synthetic parameter initialization
# -----------------------------------------------------------------------------
def make_fixed_pos_encoding(max_len, d_model):
    position = jnp.arange(max_len, dtype=jnp.float32)[:, None]
    div_term = jnp.exp(jnp.arange(0, d_model, 2, dtype=jnp.float32)
                       * (-math.log(10000.0) / d_model))
    pe = jnp.zeros((max_len, d_model), jnp.float32)
    pe = pe.at[:, 0::2].set(jnp.sin(position * div_term))
    pe = pe.at[:, 1::2].set(jnp.cos(position * div_term))
    return pe


def init_params(key, *, feat_dim, max_len, d_model, dim_feedforward,
                num_layers, ft_size):
    def nrm(k, shape, s=0.05):
        return s * jax.random.normal(k, shape, jnp.float32)

    bf = jnp.bfloat16
    L = num_layers
    ks = jax.random.split(key, 16)

    def bn_affine(k):
        k1, k2, k3, k4 = jax.random.split(k, 4)
        gamma = 1.0 + nrm(k1, (L, 1, d_model))
        beta = nrm(k2, (L, 1, d_model))
        rmean = nrm(k3, (L, 1, d_model))
        rvar = 0.5 + jnp.abs(nrm(k4, (L, 1, d_model), 0.2))
        scale = gamma / jnp.sqrt(rvar + 1e-5)
        bias = beta - rmean * scale
        return scale, bias

    bn1_s, bn1_b = bn_affine(ks[0])
    bn2_s, bn2_b = bn_affine(ks[1])

    params = {
        'w_inp': nrm(ks[2], (feat_dim, d_model)),              # f32 (XLA projection)
        'b_inp': nrm(ks[3], (1, d_model)),
        'pe': make_fixed_pos_encoding(max_len, d_model),
        'enc': {                                               # stacked per-layer weights
            'wqkv': nrm(ks[4], (L, d_model, 3 * d_model)).astype(bf),
            'bqkv': nrm(ks[5], (L, 1, 3 * d_model)),
            'wo':   nrm(ks[6], (L, d_model, d_model)).astype(bf),
            'bo':   nrm(ks[7], (L, 1, d_model)),
            'bn1_scale': bn1_s, 'bn1_bias': bn1_b,
            'w1': nrm(ks[8], (L, d_model, dim_feedforward)).astype(bf),
            'b1': nrm(ks[9], (L, 1, dim_feedforward)),
            'w2': nrm(ks[10], (L, dim_feedforward, d_model)).astype(bf),
            'b2': nrm(ks[11], (L, 1, d_model)),
            'bn2_scale': bn2_s, 'bn2_bias': bn2_b,
        },
        'w_dense1': nrm(ks[12], (d_model, 128)).astype(bf),    # dense1 = Linear(128, 128)
        'b_dense1': nrm(ks[13], (1, 128)),
        'w_out': nrm(ks[14], (d_model, ft_size)).astype(bf),   # output_layer = Linear(d_model, ft)
        'b_out': nrm(ks[15], (1, ft_size)),
    }
    return params


if __name__ == "__main__":
    feat_dim, max_len, d_model = 4, 8, 128
    n_heads, num_layers, dim_feedforward, ft_size = 4, 2, 256, 5
    batch = 2

    key = jax.random.PRNGKey(0)
    kx, kp = jax.random.split(key)
    X = jax.random.normal(kx, (batch, max_len, feat_dim), jnp.float32)
    params = init_params(kp, feat_dim=feat_dim, max_len=max_len, d_model=d_model,
                         dim_feedforward=dim_feedforward, num_layers=num_layers,
                         ft_size=ft_size)

    fwd = jax.jit(partial(ts_transformer_forward, n_heads=n_heads))
    out = fwd(X, params)
    jax.block_until_ready(out)
    assert out.shape == (batch, ft_size), out.shape
    print("KERNEL_OK")
</pallas_src>

<mosaic_0001>
module attributes {stable_mosaic.version = 11 : i64} {
  func.func @_encoder_stack_kernel(%arg0: i32, %arg1: memref<8x8x128xf32, #tpu.memory_space<vmem>>, %arg2: memref<2x128x384xbf16, #tpu.memory_space<vmem>>, %arg3: memref<2x1x384xf32, #tpu.memory_space<vmem>>, %arg4: memref<2x128x128xbf16, #tpu.memory_space<vmem>>, %arg5: memref<2x1x128xf32, #tpu.memory_space<vmem>>, %arg6: memref<2x1x128xf32, #tpu.memory_space<vmem>>, %arg7: memref<2x1x128xf32, #tpu.memory_space<vmem>>, %arg8: memref<2x128x256xbf16, #tpu.memory_space<vmem>>, %arg9: memref<2x1x256xf32, #tpu.memory_space<vmem>>, %arg10: memref<2x256x128xbf16, #tpu.memory_space<vmem>>, %arg11: memref<2x1x128xf32, #tpu.memory_space<vmem>>, %arg12: memref<2x1x128xf32, #tpu.memory_space<vmem>>, %arg13: memref<2x1x128xf32, #tpu.memory_space<vmem>>, %arg14: memref<128x128xbf16, #tpu.memory_space<vmem>>, %arg15: memref<1x128xf32, #tpu.memory_space<vmem>>, %arg16: memref<128x128xbf16, #tpu.memory_space<vmem>>, %arg17: memref<1x128xf32, #tpu.memory_space<vmem>>, %arg18: memref<8x128xf32, #tpu.memory_space<vmem>>) attributes {dimension_semantics = [#tpu.dimension_semantics<parallel>], iteration_bounds = array<i64: 1>, scalar_prefetch = 0 : i64, scratch_operands = 0 : i64, tpu.core_type = #tpu.core_type<tc>, window_params = [{transform_indices = @transform_0, window_bounds = array<i64: 8, 8, 128>}, {pipeline_mode = #tpu.pipeline_mode<synchronous>, transform_indices = @transform_1, window_bounds = array<i64: 2, 128, 384>}, {pipeline_mode = #tpu.pipeline_mode<synchronous>, transform_indices = @transform_2, window_bounds = array<i64: 2, 1, 384>}, {pipeline_mode = #tpu.pipeline_mode<synchronous>, transform_indices = @transform_3, window_bounds = array<i64: 2, 128, 128>}, {pipeline_mode = #tpu.pipeline_mode<synchronous>, transform_indices = @transform_4, window_bounds = array<i64: 2, 1, 128>}, {pipeline_mode = #tpu.pipeline_mode<synchronous>, transform_indices = @transform_5, window_bounds = array<i64: 2, 1, 128>}, {pipeline_mode = #tpu.pipeline_mode<synchronous>, transform_indices = @transform_6, window_bounds = array<i64: 2, 1, 128>}, {pipeline_mode = #tpu.pipeline_mode<synchronous>, transform_indices = @transform_7, window_bounds = array<i64: 2, 128, 256>}, {pipeline_mode = #tpu.pipeline_mode<synchronous>, transform_indices = @transform_8, window_bounds = array<i64: 2, 1, 256>}, {pipeline_mode = #tpu.pipeline_mode<synchronous>, transform_indices = @transform_9, window_bounds = array<i64: 2, 256, 128>}, {pipeline_mode = #tpu.pipeline_mode<synchronous>, transform_indices = @transform_10, window_bounds = array<i64: 2, 1, 128>}, {pipeline_mode = #tpu.pipeline_mode<synchronous>, transform_indices = @transform_11, window_bounds = array<i64: 2, 1, 128>}, {pipeline_mode = #tpu.pipeline_mode<synchronous>, transform_indices = @transform_12, window_bounds = array<i64: 2, 1, 128>}, {pipeline_mode = #tpu.pipeline_mode<synchronous>, transform_indices = @transform_13, window_bounds = array<i64: 128, 128>}, {pipeline_mode = #tpu.pipeline_mode<synchronous>, transform_indices = @transform_14, window_bounds = array<i64: 1, 128>}, {pipeline_mode = #tpu.pipeline_mode<synchronous>, transform_indices = @transform_15, window_bounds = array<i64: 128, 128>}, {pipeline_mode = #tpu.pipeline_mode<synchronous>, transform_indices = @transform_16, window_bounds = array<i64: 1, 128>}, {transform_indices = @transform_17, window_bounds = array<i64: 8, 128>}]} {
    %c0 = arith.constant 0 : index
    %c0_0 = arith.constant 0 : index
    %c0_1 = arith.constant 0 : index
    %0 = vector.load %arg1[%c0, %c0_0, %c0_1] : memref<8x8x128xf32, #tpu.memory_space<vmem>>, vector<8x8x128xf32>
    %1 = vector.shape_cast %0 : vector<8x8x128xf32> to vector<64x128xf32>
    %2 = arith.truncf %1 : vector<64x128xf32> to vector<64x128xbf16>
    %c0_2 = arith.constant 0 : index
    %c0_3 = arith.constant 0 : index
    %c0_4 = arith.constant 0 : index
    %3 = vector.load %arg2[%c0_2, %c0_3, %c0_4] : memref<2x128x384xbf16, #tpu.memory_space<vmem>>, vector<1x128x384xbf16>
    %4 = vector.shape_cast %3 : vector<1x128x384xbf16> to vector<128x384xbf16>
    %cst = arith.constant dense<0.000000e+00> : vector<64x384xf32>
    %5 = tpu.matmul %2, %4, %cst {dimension_numbers = #tpu.dot_dimension_numbers<[1], [0], [0], [1], [0, 0, 1, 1], [], []>} : vector<64x128xbf16>, vector<128x384xbf16>, vector<64x384xf32> -> vector<64x384xf32>
    %c0_5 = arith.constant 0 : index
    %c0_6 = arith.constant 0 : index
    %c0_7 = arith.constant 0 : index
    %6 = vector.load %arg3[%c0_5, %c0_6, %c0_7] : memref<2x1x384xf32, #tpu.memory_space<vmem>>, vector<1x1x384xf32>
    %7 = vector.shape_cast %6 : vector<1x1x384xf32> to vector<1x384xf32>
    %8 = vector.broadcast %7 : vector<1x384xf32> to vector<64x384xf32>
    %9 = arith.addf %5, %8 : vector<64x384xf32>
    %c0_8 = arith.constant 0 : index
    %c0_9 = arith.constant 0 : index
    %c0_10 = arith.constant 0 : index
    %10 = vector.load %arg4[%c0_8, %c0_9, %c0_10] : memref<2x128x128xbf16, #tpu.memory_space<vmem>>, vector<1x128x128xbf16>
    %11 = vector.shape_cast %10 : vector<1x128x128xbf16> to vector<128x128xbf16>
    %12 = vector.extract_strided_slice %9 {offsets = [0, 0], sizes = [64, 32], strides = [1, 1]} : vector<64x384xf32> to vector<64x32xf32>
    %13 = vector.shape_cast %12 : vector<64x32xf32> to vector<8x8x32xf32>
    %14 = arith.truncf %13 : vector<8x8x32xf32> to vector<8x8x32xbf16>
    %15 = vector.extract_strided_slice %9 {offsets = [0, 128], sizes = [64, 32], strides = [1, 1]} : vector<64x384xf32> to vector<64x32xf32>
    %16 = vector.shape_cast %15 : vector<64x32xf32> to vector<8x8x32xf32>
    %17 = arith.truncf %16 : vector<8x8x32xf32> to vector<8x8x32xbf16>
    %18 = vector.extract_strided_slice %9 {offsets = [0, 256], sizes = [64, 32], strides = [1, 1]} : vector<64x384xf32> to vector<64x32xf32>
    %19 = vector.shape_cast %18 : vector<64x32xf32> to vector<8x8x32xf32>
    %20 = arith.truncf %19 : vector<8x8x32xf32> to vector<8x8x32xbf16>
    "tpu.trace_start"() <{level = 10 : i32, message = "bqd,bkd->bqk"}> : () -> ()
    %cst_11 = arith.constant dense<0.000000e+00> : vector<8x8x8xf32>
    %21 = tpu.matmul %14, %17, %cst_11 {dimension_numbers = #tpu.dot_dimension_numbers<[2], [2], [1], [1], [0, 0, 0, 1, 1, 1], [0], [0]>} : vector<8x8x32xbf16>, vector<8x8x32xbf16>, vector<8x8x8xf32> -> vector<8x8x8xf32>
    "tpu.trace_stop"() : () -> ()
    %cst_12 = arith.constant 0.176776692 : f32
    %22 = vector.broadcast %cst_12 : f32 to vector<8x8x8xf32>
    %23 = arith.mulf %21, %22 : vector<8x8x8xf32>
    %cst_13 = arith.constant dense<0xFF800000> : vector<8x8xf32>
    %24 = vector.multi_reduction <maximumf>, %23, %cst_13 [2] : vector<8x8x8xf32> to vector<8x8xf32>
    %25 = vector.shape_cast %24 : vector<8x8xf32> to vector<8x8x1xf32>
    %26 = vector.broadcast %25 : vector<8x8x1xf32> to vector<8x8x8xf32>
    %27 = arith.subf %23, %26 : vector<8x8x8xf32>
    %28 = math.exp %27 : vector<8x8x8xf32>
    %cst_14 = arith.constant dense<0.000000e+00> : vector<8x8xf32>
    %29 = vector.multi_reduction <add>, %28, %cst_14 [2] : vector<8x8x8xf32> to vector<8x8xf32>
    %30 = vector.shape_cast %29 : vector<8x8xf32> to vector<8x8x1xf32>
    %31 = tpu.reciprocal %30 {approx = true} : vector<8x8x1xf32> -> vector<8x8x1xf32>
    %32 = vector.broadcast %31 : vector<8x8x1xf32> to vector<8x8x8xf32>
    %33 = arith.mulf %28, %32 : vector<8x8x8xf32>
    %34 = arith.truncf %33 : vector<8x8x8xf32> to vector<8x8x8xbf16>
    "tpu.trace_start"() <{level = 10 : i32, message = "bqk,bkd->bqd"}> : () -> ()
    %cst_15 = arith.constant dense<0.000000e+00> : vector<8x8x32xf32>
    %35 = tpu.matmul %34, %20, %cst_15 {dimension_numbers = #tpu.dot_dimension_numbers<[2], [1], [1], [2], [0, 0, 0, 1, 1, 2], [0], [0]>} : vector<8x8x8xbf16>, vector<8x8x32xbf16>, vector<8x8x32xf32> -> vector<8x8x32xf32>
    "tpu.trace_stop"() : () -> ()
    %36 = vector.shape_cast %35 : vector<8x8x32xf32> to vector<64x32xf32>
    %37 = arith.truncf %36 : vector<64x32xf32> to vector<64x32xbf16>
    %38 = vector.extract_strided_slice %11 {offsets = [0, 0], sizes = [32, 128], strides = [1, 1]} : vector<128x128xbf16> to vector<32x128xbf16>
    %cst_16 = arith.constant dense<0.000000e+00> : vector<64x128xf32>
    %39 = tpu.matmul %37, %38, %cst_16 {dimension_numbers = #tpu.dot_dimension_numbers<[1], [0], [0], [1], [0, 0, 1, 1], [], []>} : vector<64x32xbf16>, vector<32x128xbf16>, vector<64x128xf32> -> vector<64x128xf32>
    %40 = vector.extract_strided_slice %9 {offsets = [0, 32], sizes = [64, 32], strides = [1, 1]} : vector<64x384xf32> to vector<64x32xf32>
    %41 = vector.shape_cast %40 : vector<64x32xf32> to vector<8x8x32xf32>
    %42 = arith.truncf %41 : vector<8x8x32xf32> to vector<8x8x32xbf16>
    %43 = vector.extract_strided_slice %9 {offsets = [0, 160], sizes = [64, 32], strides = [1, 1]} : vector<64x384xf32> to vector<64x32xf32>
    %44 = vector.shape_cast %43 : vector<64x32xf32> to vector<8x8x32xf32>
    %45 = arith.truncf %44 : vector<8x8x32xf32> to vector<8x8x32xbf16>
    %46 = vector.extract_strided_slice %9 {offsets = [0, 288], sizes = [64, 32], strides = [1, 1]} : vector<64x384xf32> to vector<64x32xf32>
    %47 = vector.shape_cast %46 : vector<64x32xf32> to vector<8x8x32xf32>
    %48 = arith.truncf %47 : vector<8x8x32xf32> to vector<8x8x32xbf16>
    "tpu.trace_start"() <{level = 10 : i32, message = "bqd,bkd->bqk"}> : () -> ()
    %cst_17 = arith.constant dense<0.000000e+00> : vector<8x8x8xf32>
    %49 = tpu.matmul %42, %45, %cst_17 {dimension_numbers = #tpu.dot_dimension_numbers<[2], [2], [1], [1], [0, 0, 0, 1, 1, 1], [0], [0]>} : vector<8x8x32xbf16>, vector<8x8x32xbf16>, vector<8x8x8xf32> -> vector<8x8x8xf32>
    "tpu.trace_stop"() : () -> ()
    %cst_18 = arith.constant 0.176776692 : f32
    %50 = vector.broadcast %cst_18 : f32 to vector<8x8x8xf32>
    %51 = arith.mulf %49, %50 : vector<8x8x8xf32>
    %cst_19 = arith.constant dense<0xFF800000> : vector<8x8xf32>
    %52 = vector.multi_reduction <maximumf>, %51, %cst_19 [2] : vector<8x8x8xf32> to vector<8x8xf32>
    %53 = vector.shape_cast %52 : vector<8x8xf32> to vector<8x8x1xf32>
    %54 = vector.broadcast %53 : vector<8x8x1xf32> to vector<8x8x8xf32>
    %55 = arith.subf %51, %54 : vector<8x8x8xf32>
    %56 = math.exp %55 : vector<8x8x8xf32>
    %cst_20 = arith.constant dense<0.000000e+00> : vector<8x8xf32>
    %57 = vector.multi_reduction <add>, %56, %cst_20 [2] : vector<8x8x8xf32> to vector<8x8xf32>
    %58 = vector.shape_cast %57 : vector<8x8xf32> to vector<8x8x1xf32>
    %59 = tpu.reciprocal %58 {approx = true} : vector<8x8x1xf32> -> vector<8x8x1xf32>
    %60 = vector.broadcast %59 : vector<8x8x1xf32> to vector<8x8x8xf32>
    %61 = arith.mulf %56, %60 : vector<8x8x8xf32>
    %62 = arith.truncf %61 : vector<8x8x8xf32> to vector<8x8x8xbf16>
    "tpu.trace_start"() <{level = 10 : i32, message = "bqk,bkd->bqd"}> : () -> ()
    %cst_21 = arith.constant dense<0.000000e+00> : vector<8x8x32xf32>
    %63 = tpu.matmul %62, %48, %cst_21 {dimension_numbers = #tpu.dot_dimension_numbers<[2], [1], [1], [2], [0, 0, 0, 1, 1, 2], [0], [0]>} : vector<8x8x8xbf16>, vector<8x8x32xbf16>, vector<8x8x32xf32> -> vector<8x8x32xf32>
    "tpu.trace_stop"() : () -> ()
    %64 = vector.shape_cast %63 : vector<8x8x32xf32> to vector<64x32xf32>
    %65 = arith.truncf %64 : vector<64x32xf32> to vector<64x32xbf16>
    %66 = vector.extract_strided_slice %11 {offsets = [32, 0], sizes = [32, 128], strides = [1, 1]} : vector<128x128xbf16> to vector<32x128xbf16>
    %cst_22 = arith.constant dense<0.000000e+00> : vector<64x128xf32>
    %67 = tpu.matmul %65, %66, %cst_22 {dimension_numbers = #tpu.dot_dimension_numbers<[1], [0], [0], [1], [0, 0, 1, 1], [], []>} : vector<64x32xbf16>, vector<32x128xbf16>, vector<64x128xf32> -> vector<64x128xf32>
    %68 = arith.addf %39, %67 : vector<64x128xf32>
    %69 = vector.extract_strided_slice %9 {offsets = [0, 64], sizes = [64, 32], strides = [1, 1]} : vector<64x384xf32> to vector<64x32xf32>
    %70 = vector.shape_cast %69 : vector<64x32xf32> to vector<8x8x32xf32>
    %71 = arith.truncf %70 : vector<8x8x32xf32> to vector<8x8x32xbf16>
    %72 = vector.extract_strided_slice %9 {offsets = [0, 192], sizes = [64, 32], strides = [1, 1]} : vector<64x384xf32> to vector<64x32xf32>
    %73 = vector.shape_cast %72 : vector<64x32xf32> to vector<8x8x32xf32>
    %74 = arith.truncf %73 : vector<8x8x32xf32> to vector<8x8x32xbf16>
    %75 = vector.extract_strided_slice %9 {offsets = [0, 320], sizes = [64, 32], strides = [1, 1]} : vector<64x384xf32> to vector<64x32xf32>
    %76 = vector.shape_cast %75 : vector<64x32xf32> to vector<8x8x32xf32>
    %77 = arith.truncf %76 : vector<8x8x32xf32> to vector<8x8x32xbf16>
    "tpu.trace_start"() <{level = 10 : i32, message = "bqd,bkd->bqk"}> : () -> ()
    %cst_23 = arith.constant dense<0.000000e+00> : vector<8x8x8xf32>
    %78 = tpu.matmul %71, %74, %cst_23 {dimension_numbers = #tpu.dot_dimension_numbers<[2], [2], [1], [1], [0, 0, 0, 1, 1, 1], [0], [0]>} : vector<8x8x32xbf16>, vector<8x8x32xbf16>, vector<8x8x8xf32> -> vector<8x8x8xf32>
    "tpu.trace_stop"() : () -> ()
    %cst_24 = arith.constant 0.176776692 : f32
    %79 = vector.broadcast %cst_24 : f32 to vector<8x8x8xf32>
    %80 = arith.mulf %78, %79 : vector<8x8x8xf32>
    %cst_25 = arith.constant dense<0xFF800000> : vector<8x8xf32>
    %81 = vector.multi_reduction <maximumf>, %80, %cst_25 [2] : vector<8x8x8xf32> to vector<8x8xf32>
    %82 = vector.shape_cast %81 : vector<8x8xf32> to vector<8x8x1xf32>
    %83 = vector.broadcast %82 : vector<8x8x1xf32> to vector<8x8x8xf32>
    %84 = arith.subf %80, %83 : vector<8x8x8xf32>
    %85 = math.exp %84 : vector<8x8x8xf32>
    %cst_26 = arith.constant dense<0.000000e+00> : vector<8x8xf32>
    %86 = vector.multi_reduction <add>, %85, %cst_26 [2] : vector<8x8x8xf32> to vector<8x8xf32>
    %87 = vector.shape_cast %86 : vector<8x8xf32> to vector<8x8x1xf32>
    %88 = tpu.reciprocal %87 {approx = true} : vector<8x8x1xf32> -> vector<8x8x1xf32>
    %89 = vector.broadcast %88 : vector<8x8x1xf32> to vector<8x8x8xf32>
    %90 = arith.mulf %85, %89 : vector<8x8x8xf32>
    %91 = arith.truncf %90 : vector<8x8x8xf32> to vector<8x8x8xbf16>
    "tpu.trace_start"() <{level = 10 : i32, message = "bqk,bkd->bqd"}> : () -> ()
    %cst_27 = arith.constant dense<0.000000e+00> : vector<8x8x32xf32>
    %92 = tpu.matmul %91, %77, %cst_27 {dimension_numbers = #tpu.dot_dimension_numbers<[2], [1], [1], [2], [0, 0, 0, 1, 1, 2], [0], [0]>} : vector<8x8x8xbf16>, vector<8x8x32xbf16>, vector<8x8x32xf32> -> vector<8x8x32xf32>
    "tpu.trace_stop"() : () -> ()
    %93 = vector.shape_cast %92 : vector<8x8x32xf32> to vector<64x32xf32>
    %94 = arith.truncf %93 : vector<64x32xf32> to vector<64x32xbf16>
    %95 = vector.extract_strided_slice %11 {offsets = [64, 0], sizes = [32, 128], strides = [1, 1]} : vector<128x128xbf16> to vector<32x128xbf16>
    %cst_28 = arith.constant dense<0.000000e+00> : vector<64x128xf32>
    %96 = tpu.matmul %94, %95, %cst_28 {dimension_numbers = #tpu.dot_dimension_numbers<[1], [0], [0], [1], [0, 0, 1, 1], [], []>} : vector<64x32xbf16>, vector<32x128xbf16>, vector<64x128xf32> -> vector<64x128xf32>
    %97 = arith.addf %68, %96 : vector<64x128xf32>
    %98 = vector.extract_strided_slice %9 {offsets = [0, 96], sizes = [64, 32], strides = [1, 1]} : vector<64x384xf32> to vector<64x32xf32>
    %99 = vector.shape_cast %98 : vector<64x32xf32> to vector<8x8x32xf32>
    %100 = arith.truncf %99 : vector<8x8x32xf32> to vector<8x8x32xbf16>
    %101 = vector.extract_strided_slice %9 {offsets = [0, 224], sizes = [64, 32], strides = [1, 1]} : vector<64x384xf32> to vector<64x32xf32>
    %102 = vector.shape_cast %101 : vector<64x32xf32> to vector<8x8x32xf32>
    %103 = arith.truncf %102 : vector<8x8x32xf32> to vector<8x8x32xbf16>
    %104 = vector.extract_strided_slice %9 {offsets = [0, 352], sizes = [64, 32], strides = [1, 1]} : vector<64x384xf32> to vector<64x32xf32>
    %105 = vector.shape_cast %104 : vector<64x32xf32> to vector<8x8x32xf32>
    %106 = arith.truncf %105 : vector<8x8x32xf32> to vector<8x8x32xbf16>
    "tpu.trace_start"() <{level = 10 : i32, message = "bqd,bkd->bqk"}> : () -> ()
    %cst_29 = arith.constant dense<0.000000e+00> : vector<8x8x8xf32>
    %107 = tpu.matmul %100, %103, %cst_29 {dimension_numbers = #tpu.dot_dimension_numbers<[2], [2], [1], [1], [0, 0, 0, 1, 1, 1], [0], [0]>} : vector<8x8x32xbf16>, vector<8x8x32xbf16>, vector<8x8x8xf32> -> vector<8x8x8xf32>
    "tpu.trace_stop"() : () -> ()
    %cst_30 = arith.constant 0.176776692 : f32
    %108 = vector.broadcast %cst_30 : f32 to vector<8x8x8xf32>
    %109 = arith.mulf %107, %108 : vector<8x8x8xf32>
    %cst_31 = arith.constant dense<0xFF800000> : vector<8x8xf32>
    %110 = vector.multi_reduction <maximumf>, %109, %cst_31 [2] : vector<8x8x8xf32> to vector<8x8xf32>
    %111 = vector.shape_cast %110 : vector<8x8xf32> to vector<8x8x1xf32>
    %112 = vector.broadcast %111 : vector<8x8x1xf32> to vector<8x8x8xf32>
    %113 = arith.subf %109, %112 : vector<8x8x8xf32>
    %114 = math.exp %113 : vector<8x8x8xf32>
    %cst_32 = arith.constant dense<0.000000e+00> : vector<8x8xf32>
    %115 = vector.multi_reduction <add>, %114, %cst_32 [2] : vector<8x8x8xf32> to vector<8x8xf32>
    %116 = vector.shape_cast %115 : vector<8x8xf32> to vector<8x8x1xf32>
    %117 = tpu.reciprocal %116 {approx = true} : vector<8x8x1xf32> -> vector<8x8x1xf32>
    %118 = vector.broadcast %117 : vector<8x8x1xf32> to vector<8x8x8xf32>
    %119 = arith.mulf %114, %118 : vector<8x8x8xf32>
    %120 = arith.truncf %119 : vector<8x8x8xf32> to vector<8x8x8xbf16>
    "tpu.trace_start"() <{level = 10 : i32, message = "bqk,bkd->bqd"}> : () -> ()
    %cst_33 = arith.constant dense<0.000000e+00> : vector<8x8x32xf32>
    %121 = tpu.matmul %120, %106, %cst_33 {dimension_numbers = #tpu.dot_dimension_numbers<[2], [1], [1], [2], [0, 0, 0, 1, 1, 2], [0], [0]>} : vector<8x8x8xbf16>, vector<8x8x32xbf16>, vector<8x8x32xf32> -> vector<8x8x32xf32>
    "tpu.trace_stop"() : () -> ()
    %122 = vector.shape_cast %121 : vector<8x8x32xf32> to vector<64x32xf32>
    %123 = arith.truncf %122 : vector<64x32xf32> to vector<64x32xbf16>
    %124 = vector.extract_strided_slice %11 {offsets = [96, 0], sizes = [32, 128], strides = [1, 1]} : vector<128x128xbf16> to vector<32x128xbf16>
    %cst_34 = arith.constant dense<0.000000e+00> : vector<64x128xf32>
    %125 = tpu.matmul %123, %124, %cst_34 {dimension_numbers = #tpu.dot_dimension_numbers<[1], [0], [0], [1], [0, 0, 1, 1], [], []>} : vector<64x32xbf16>, vector<32x128xbf16>, vector<64x128xf32> -> vector<64x128xf32>
    %126 = arith.addf %97, %125 : vector<64x128xf32>
    %c0_35 = arith.constant 0 : index
    %c0_36 = arith.constant 0 : index
    %c0_37 = arith.constant 0 : index
    %127 = vector.load %arg5[%c0_35, %c0_36, %c0_37] : memref<2x1x128xf32, #tpu.memory_space<vmem>>, vector<1x1x128xf32>
    %128 = vector.shape_cast %127 : vector<1x1x128xf32> to vector<1x128xf32>
    %129 = vector.broadcast %128 : vector<1x128xf32> to vector<64x128xf32>
    %130 = arith.addf %126, %129 : vector<64x128xf32>
    %131 = arith.addf %1, %130 : vector<64x128xf32>
    %c0_38 = arith.constant 0 : index
    %c0_39 = arith.constant 0 : index
    %c0_40 = arith.constant 0 : index
    %132 = vector.load %arg6[%c0_38, %c0_39, %c0_40] : memref<2x1x128xf32, #tpu.memory_space<vmem>>, vector<1x1x128xf32>
    %133 = vector.shape_cast %132 : vector<1x1x128xf32> to vector<1x128xf32>
    %134 = vector.broadcast %133 : vector<1x128xf32> to vector<64x128xf32>
    %135 = arith.mulf %131, %134 : vector<64x128xf32>
    %c0_41 = arith.constant 0 : index
    %c0_42 = arith.constant 0 : index
    %c0_43 = arith.constant 0 : index
    %136 = vector.load %arg7[%c0_41, %c0_42, %c0_43] : memref<2x1x128xf32, #tpu.memory_space<vmem>>, vector<1x1x128xf32>
    %137 = vector.shape_cast %136 : vector<1x1x128xf32> to vector<1x128xf32>
    %138 = vector.broadcast %137 : vector<1x128xf32> to vector<64x128xf32>
    %139 = arith.addf %135, %138 : vector<64x128xf32>
    %140 = arith.truncf %139 : vector<64x128xf32> to vector<64x128xbf16>
    %c0_44 = arith.constant 0 : index
    %c0_45 = arith.constant 0 : index
    %c0_46 = arith.constant 0 : index
    %141 = vector.load %arg8[%c0_44, %c0_45, %c0_46] : memref<2x128x256xbf16, #tpu.memory_space<vmem>>, vector<1x128x256xbf16>
    %142 = vector.shape_cast %141 : vector<1x128x256xbf16> to vector<128x256xbf16>
    %cst_47 = arith.constant dense<0.000000e+00> : vector<64x256xf32>
    %143 = tpu.matmul %140, %142, %cst_47 {dimension_numbers = #tpu.dot_dimension_numbers<[1], [0], [0], [1], [0, 0, 1, 1], [], []>} : vector<64x128xbf16>, vector<128x256xbf16>, vector<64x256xf32> -> vector<64x256xf32>
    %c0_48 = arith.constant 0 : index
    %c0_49 = arith.constant 0 : index
    %c0_50 = arith.constant 0 : index
    %144 = vector.load %arg9[%c0_48, %c0_49, %c0_50] : memref<2x1x256xf32, #tpu.memory_space<vmem>>, vector<1x1x256xf32>
    %145 = vector.shape_cast %144 : vector<1x1x256xf32> to vector<1x256xf32>
    %146 = vector.broadcast %145 : vector<1x256xf32> to vector<64x256xf32>
    %147 = arith.addf %143, %146 : vector<64x256xf32>
    %cst_51 = arith.constant 5.000000e-01 : f32
    %148 = vector.broadcast %cst_51 : f32 to vector<64x256xf32>
    %149 = arith.mulf %148, %147 : vector<64x256xf32>
    %cst_52 = arith.constant 4.471500e-02 : f32
    %150 = vector.broadcast %cst_52 : f32 to vector<64x256xf32>
    %151 = arith.mulf %150, %147 : vector<64x256xf32>
    %152 = arith.mulf %151, %147 : vector<64x256xf32>
    %153 = arith.mulf %152, %147 : vector<64x256xf32>
    %154 = arith.addf %147, %153 : vector<64x256xf32>
    %cst_53 = arith.constant 0.797884583 : f32
    %155 = vector.broadcast %cst_53 : f32 to vector<64x256xf32>
    %156 = arith.mulf %155, %154 : vector<64x256xf32>
    %157 = math.tanh %156 : vector<64x256xf32>
    %cst_54 = arith.constant 1.000000e+00 : f32
    %158 = vector.broadcast %cst_54 : f32 to vector<64x256xf32>
    %159 = arith.addf %158, %157 : vector<64x256xf32>
    %160 = arith.mulf %149, %159 : vector<64x256xf32>
    %161 = arith.truncf %160 : vector<64x256xf32> to vector<64x256xbf16>
    %c0_55 = arith.constant 0 : index
    %c0_56 = arith.constant 0 : index
    %c0_57 = arith.constant 0 : index
    %162 = vector.load %arg10[%c0_55, %c0_56, %c0_57] : memref<2x256x128xbf16, #tpu.memory_space<vmem>>, vector<1x256x128xbf16>
    %163 = vector.shape_cast %162 : vector<1x256x128xbf16> to vector<256x128xbf16>
    %cst_58 = arith.constant dense<0.000000e+00> : vector<64x128xf32>
    %164 = tpu.matmul %161, %163, %cst_58 {dimension_numbers = #tpu.dot_dimension_numbers<[1], [0], [0], [1], [0, 0, 1, 1], [], []>} : vector<64x256xbf16>, vector<256x128xbf16>, vector<64x128xf32> -> vector<64x128xf32>
    %c0_59 = arith.constant 0 : index
    %c0_60 = arith.constant 0 : index
    %c0_61 = arith.constant 0 : index
    %165 = vector.load %arg11[%c0_59, %c0_60, %c0_61] : memref<2x1x128xf32, #tpu.memory_space<vmem>>, vector<1x1x128xf32>
    %166 = vector.shape_cast %165 : vector<1x1x128xf32> to vector<1x128xf32>
    %167 = vector.broadcast %166 : vector<1x128xf32> to vector<64x128xf32>
    %168 = arith.addf %164, %167 : vector<64x128xf32>
    %169 = arith.addf %139, %168 : vector<64x128xf32>
    %c0_62 = arith.constant 0 : index
    %c0_63 = arith.constant 0 : index
    %c0_64 = arith.constant 0 : index
    %170 = vector.load %arg12[%c0_62, %c0_63, %c0_64] : memref<2x1x128xf32, #tpu.memory_space<vmem>>, vector<1x1x128xf32>
    %171 = vector.shape_cast %170 : vector<1x1x128xf32> to vector<1x128xf32>
    %172 = vector.broadcast %171 : vector<1x128xf32> to vector<64x128xf32>
    %173 = arith.mulf %169, %172 : vector<64x128xf32>
    %c0_65 = arith.constant 0 : index
    %c0_66 = arith.constant 0 : index
    %c0_67 = arith.constant 0 : index
    %174 = vector.load %arg13[%c0_65, %c0_66, %c0_67] : memref<2x1x128xf32, #tpu.memory_space<vmem>>, vector<1x1x128xf32>
    %175 = vector.shape_cast %174 : vector<1x1x128xf32> to vector<1x128xf32>
    %176 = vector.broadcast %175 : vector<1x128xf32> to vector<64x128xf32>
    %177 = arith.addf %173, %176 : vector<64x128xf32>
    %178 = arith.truncf %177 : vector<64x128xf32> to vector<64x128xbf16>
    %c1 = arith.constant 1 : index
    %c0_68 = arith.constant 0 : index
    %c0_69 = arith.constant 0 : index
    %179 = vector.load %arg2[%c1, %c0_68, %c0_69] : memref<2x128x384xbf16, #tpu.memory_space<vmem>>, vector<1x128x384xbf16>
    %180 = vector.shape_cast %179 : vector<1x128x384xbf16> to vector<128x384xbf16>
    %cst_70 = arith.constant dense<0.000000e+00> : vector<64x384xf32>
    %181 = tpu.matmul %178, %180, %cst_70 {dimension_numbers = #tpu.dot_dimension_numbers<[1], [0], [0], [1], [0, 0, 1, 1], [], []>} : vector<64x128xbf16>, vector<128x384xbf16>, vector<64x384xf32> -> vector<64x384xf32>
    %c1_71 = arith.constant 1 : index
    %c0_72 = arith.constant 0 : index
    %c0_73 = arith.constant 0 : index
    %182 = vector.load %arg3[%c1_71, %c0_72, %c0_73] : memref<2x1x384xf32, #tpu.memory_space<vmem>>, vector<1x1x384xf32>
    %183 = vector.shape_cast %182 : vector<1x1x384xf32> to vector<1x384xf32>
    %184 = vector.broadcast %183 : vector<1x384xf32> to vector<64x384xf32>
    %185 = arith.addf %181, %184 : vector<64x384xf32>
    %c1_74 = arith.constant 1 : index
    %c0_75 = arith.constant 0 : index
    %c0_76 = arith.constant 0 : index
    %186 = vector.load %arg4[%c1_74, %c0_75, %c0_76] : memref<2x128x128xbf16, #tpu.memory_space<vmem>>, vector<1x128x128xbf16>
    %187 = vector.shape_cast %186 : vector<1x128x128xbf16> to vector<128x128xbf16>
    %188 = vector.extract_strided_slice %185 {offsets = [0, 0], sizes = [64, 32], strides = [1, 1]} : vector<64x384xf32> to vector<64x32xf32>
    %189 = vector.shape_cast %188 : vector<64x32xf32> to vector<8x8x32xf32>
    %190 = arith.truncf %189 : vector<8x8x32xf32> to vector<8x8x32xbf16>
    %191 = vector.extract_strided_slice %185 {offsets = [0, 128], sizes = [64, 32], strides = [1, 1]} : vector<64x384xf32> to vector<64x32xf32>
    %192 = vector.shape_cast %191 : vector<64x32xf32> to vector<8x8x32xf32>
    %193 = arith.truncf %192 : vector<8x8x32xf32> to vector<8x8x32xbf16>
    %194 = vector.extract_strided_slice %185 {offsets = [0, 256], sizes = [64, 32], strides = [1, 1]} : vector<64x384xf32> to vector<64x32xf32>
    %195 = vector.shape_cast %194 : vector<64x32xf32> to vector<8x8x32xf32>
    %196 = arith.truncf %195 : vector<8x8x32xf32> to vector<8x8x32xbf16>
    "tpu.trace_start"() <{level = 10 : i32, message = "bqd,bkd->bqk"}> : () -> ()
    %cst_77 = arith.constant dense<0.000000e+00> : vector<8x8x8xf32>
    %197 = tpu.matmul %190, %193, %cst_77 {dimension_numbers = #tpu.dot_dimension_numbers<[2], [2], [1], [1], [0, 0, 0, 1, 1, 1], [0], [0]>} : vector<8x8x32xbf16>, vector<8x8x32xbf16>, vector<8x8x8xf32> -> vector<8x8x8xf32>
    "tpu.trace_stop"() : () -> ()
    %cst_78 = arith.constant 0.176776692 : f32
    %198 = vector.broadcast %cst_78 : f32 to vector<8x8x8xf32>
    %199 = arith.mulf %197, %198 : vector<8x8x8xf32>
    %cst_79 = arith.constant dense<0xFF800000> : vector<8x8xf32>
    %200 = vector.multi_reduction <maximumf>, %199, %cst_79 [2] : vector<8x8x8xf32> to vector<8x8xf32>
    %201 = vector.shape_cast %200 : vector<8x8xf32> to vector<8x8x1xf32>
    %202 = vector.broadcast %201 : vector<8x8x1xf32> to vector<8x8x8xf32>
    %203 = arith.subf %199, %202 : vector<8x8x8xf32>
    %204 = math.exp %203 : vector<8x8x8xf32>
    %cst_80 = arith.constant dense<0.000000e+00> : vector<8x8xf32>
    %205 = vector.multi_reduction <add>, %204, %cst_80 [2] : vector<8x8x8xf32> to vector<8x8xf32>
    %206 = vector.shape_cast %205 : vector<8x8xf32> to vector<8x8x1xf32>
    %207 = tpu.reciprocal %206 {approx = true} : vector<8x8x1xf32> -> vector<8x8x1xf32>
    %208 = vector.broadcast %207 : vector<8x8x1xf32> to vector<8x8x8xf32>
    %209 = arith.mulf %204, %208 : vector<8x8x8xf32>
    %210 = arith.truncf %209 : vector<8x8x8xf32> to vector<8x8x8xbf16>
    "tpu.trace_start"() <{level = 10 : i32, message = "bqk,bkd->bqd"}> : () -> ()
    %cst_81 = arith.constant dense<0.000000e+00> : vector<8x8x32xf32>
    %211 = tpu.matmul %210, %196, %cst_81 {dimension_numbers = #tpu.dot_dimension_numbers<[2], [1], [1], [2], [0, 0, 0, 1, 1, 2], [0], [0]>} : vector<8x8x8xbf16>, vector<8x8x32xbf16>, vector<8x8x32xf32> -> vector<8x8x32xf32>
    "tpu.trace_stop"() : () -> ()
    %212 = vector.shape_cast %211 : vector<8x8x32xf32> to vector<64x32xf32>
    %213 = arith.truncf %212 : vector<64x32xf32> to vector<64x32xbf16>
    %214 = vector.extract_strided_slice %187 {offsets = [0, 0], sizes = [32, 128], strides = [1, 1]} : vector<128x128xbf16> to vector<32x128xbf16>
    %cst_82 = arith.constant dense<0.000000e+00> : vector<64x128xf32>
    %215 = tpu.matmul %213, %214, %cst_82 {dimension_numbers = #tpu.dot_dimension_numbers<[1], [0], [0], [1], [0, 0, 1, 1], [], []>} : vector<64x32xbf16>, vector<32x128xbf16>, vector<64x128xf32> -> vector<64x128xf32>
    %216 = vector.extract_strided_slice %185 {offsets = [0, 32], sizes = [64, 32], strides = [1, 1]} : vector<64x384xf32> to vector<64x32xf32>
    %217 = vector.shape_cast %216 : vector<64x32xf32> to vector<8x8x32xf32>
    %218 = arith.truncf %217 : vector<8x8x32xf32> to vector<8x8x32xbf16>
    %219 = vector.extract_strided_slice %185 {offsets = [0, 160], sizes = [64, 32], strides = [1, 1]} : vector<64x384xf32> to vector<64x32xf32>
    %220 = vector.shape_cast %219 : vector<64x32xf32> to vector<8x8x32xf32>
    %221 = arith.truncf %220 : vector<8x8x32xf32> to vector<8x8x32xbf16>
    %222 = vector.extract_strided_slice %185 {offsets = [0, 288], sizes = [64, 32], strides = [1, 1]} : vector<64x384xf32> to vector<64x32xf32>
    %223 = vector.shape_cast %222 : vector<64x32xf32> to vector<8x8x32xf32>
    %224 = arith.truncf %223 : vector<8x8x32xf32> to vector<8x8x32xbf16>
    "tpu.trace_start"() <{level = 10 : i32, message = "bqd,bkd->bqk"}> : () -> ()
    %cst_83 = arith.constant dense<0.000000e+00> : vector<8x8x8xf32>
    %225 = tpu.matmul %218, %221, %cst_83 {dimension_numbers = #tpu.dot_dimension_numbers<[2], [2], [1], [1], [0, 0, 0, 1, 1, 1], [0], [0]>} : vector<8x8x32xbf16>, vector<8x8x32xbf16>, vector<8x8x8xf32> -> vector<8x8x8xf32>
    "tpu.trace_stop"() : () -> ()
    %cst_84 = arith.constant 0.176776692 : f32
    %226 = vector.broadcast %cst_84 : f32 to vector<8x8x8xf32>
    %227 = arith.mulf %225, %226 : vector<8x8x8xf32>
    %cst_85 = arith.constant dense<0xFF800000> : vector<8x8xf32>
    %228 = vector.multi_reduction <maximumf>, %227, %cst_85 [2] : vector<8x8x8xf32> to vector<8x8xf32>
    %229 = vector.shape_cast %228 : vector<8x8xf32> to vector<8x8x1xf32>
    %230 = vector.broadcast %229 : vector<8x8x1xf32> to vector<8x8x8xf32>
    %231 = arith.subf %227, %230 : vector<8x8x8xf32>
    %232 = math.exp %231 : vector<8x8x8xf32>
    %cst_86 = arith.constant dense<0.000000e+00> : vector<8x8xf32>
    %233 = vector.multi_reduction <add>, %232, %cst_86 [2] : vector<8x8x8xf32> to vector<8x8xf32>
    %234 = vector.shape_cast %233 : vector<8x8xf32> to vector<8x8x1xf32>
    %235 = tpu.reciprocal %234 {approx = true} : vector<8x8x1xf32> -> vector<8x8x1xf32>
    %236 = vector.broadcast %235 : vector<8x8x1xf32> to vector<8x8x8xf32>
    %237 = arith.mulf %232, %236 : vector<8x8x8xf32>
    %238 = arith.truncf %237 : vector<8x8x8xf32> to vector<8x8x8xbf16>
    "tpu.trace_start"() <{level = 10 : i32, message = "bqk,bkd->bqd"}> : () -> ()
    %cst_87 = arith.constant dense<0.000000e+00> : vector<8x8x32xf32>
    %239 = tpu.matmul %238, %224, %cst_87 {dimension_numbers = #tpu.dot_dimension_numbers<[2], [1], [1], [2], [0, 0, 0, 1, 1, 2], [0], [0]>} : vector<8x8x8xbf16>, vector<8x8x32xbf16>, vector<8x8x32xf32> -> vector<8x8x32xf32>
    "tpu.trace_stop"() : () -> ()
    %240 = vector.shape_cast %239 : vector<8x8x32xf32> to vector<64x32xf32>
    %241 = arith.truncf %240 : vector<64x32xf32> to vector<64x32xbf16>
    %242 = vector.extract_strided_slice %187 {offsets = [32, 0], sizes = [32, 128], strides = [1, 1]} : vector<128x128xbf16> to vector<32x128xbf16>
    %cst_88 = arith.constant dense<0.000000e+00> : vector<64x128xf32>
    %243 = tpu.matmul %241, %242, %cst_88 {dimension_numbers = #tpu.dot_dimension_numbers<[1], [0], [0], [1], [0, 0, 1, 1], [], []>} : vector<64x32xbf16>, vector<32x128xbf16>, vector<64x128xf32> -> vector<64x128xf32>
    %244 = arith.addf %215, %243 : vector<64x128xf32>
    %245 = vector.extract_strided_slice %185 {offsets = [0, 64], sizes = [64, 32], strides = [1, 1]} : vector<64x384xf32> to vector<64x32xf32>
    %246 = vector.shape_cast %245 : vector<64x32xf32> to vector<8x8x32xf32>
    %247 = arith.truncf %246 : vector<8x8x32xf32> to vector<8x8x32xbf16>
    %248 = vector.extract_strided_slice %185 {offsets = [0, 192], sizes = [64, 32], strides = [1, 1]} : vector<64x384xf32> to vector<64x32xf32>
    %249 = vector.shape_cast %248 : vector<64x32xf32> to vector<8x8x32xf32>
    %250 = arith.truncf %249 : vector<8x8x32xf32> to vector<8x8x32xbf16>
    %251 = vector.extract_strided_slice %185 {offsets = [0, 320], sizes = [64, 32], strides = [1, 1]} : vector<64x384xf32> to vector<64x32xf32>
    %252 = vector.shape_cast %251 : vector<64x32xf32> to vector<8x8x32xf32>
    %253 = arith.truncf %252 : vector<8x8x32xf32> to vector<8x8x32xbf16>
    "tpu.trace_start"() <{level = 10 : i32, message = "bqd,bkd->bqk"}> : () -> ()
    %cst_89 = arith.constant dense<0.000000e+00> : vector<8x8x8xf32>
    %254 = tpu.matmul %247, %250, %cst_89 {dimension_numbers = #tpu.dot_dimension_numbers<[2], [2], [1], [1], [0, 0, 0, 1, 1, 1], [0], [0]>} : vector<8x8x32xbf16>, vector<8x8x32xbf16>, vector<8x8x8xf32> -> vector<8x8x8xf32>
    "tpu.trace_stop"() : () -> ()
    %cst_90 = arith.constant 0.176776692 : f32
    %255 = vector.broadcast %cst_90 : f32 to vector<8x8x8xf32>
    %256 = arith.mulf %254, %255 : vector<8x8x8xf32>
    %cst_91 = arith.constant dense<0xFF800000> : vector<8x8xf32>
    %257 = vector.multi_reduction <maximumf>, %256, %cst_91 [2] : vector<8x8x8xf32> to vector<8x8xf32>
    %258 = vector.shape_cast %257 : vector<8x8xf32> to vector<8x8x1xf32>
    %259 = vector.broadcast %258 : vector<8x8x1xf32> to vector<8x8x8xf32>
    %260 = arith.subf %256, %259 : vector<8x8x8xf32>
    %261 = math.exp %260 : vector<8x8x8xf32>
    %cst_92 = arith.constant dense<0.000000e+00> : vector<8x8xf32>
    %262 = vector.multi_reduction <add>, %261, %cst_92 [2] : vector<8x8x8xf32> to vector<8x8xf32>
    %263 = vector.shape_cast %262 : vector<8x8xf32> to vector<8x8x1xf32>
    %264 = tpu.reciprocal %263 {approx = true} : vector<8x8x1xf32> -> vector<8x8x1xf32>
    %265 = vector.broadcast %264 : vector<8x8x1xf32> to vector<8x8x8xf32>
    %266 = arith.mulf %261, %265 : vector<8x8x8xf32>
    %267 = arith.truncf %266 : vector<8x8x8xf32> to vector<8x8x8xbf16>
    "tpu.trace_start"() <{level = 10 : i32, message = "bqk,bkd->bqd"}> : () -> ()
    %cst_93 = arith.constant dense<0.000000e+00> : vector<8x8x32xf32>
    %268 = tpu.matmul %267, %253, %cst_93 {dimension_numbers = #tpu.dot_dimension_numbers<[2], [1], [1], [2], [0, 0, 0, 1, 1, 2], [0], [0]>} : vector<8x8x8xbf16>, vector<8x8x32xbf16>, vector<8x8x32xf32> -> vector<8x8x32xf32>
    "tpu.trace_stop"() : () -> ()
    %269 = vector.shape_cast %268 : vector<8x8x32xf32> to vector<64x32xf32>
    %270 = arith.truncf %269 : vector<64x32xf32> to vector<64x32xbf16>
    %271 = vector.extract_strided_slice %187 {offsets = [64, 0], sizes = [32, 128], strides = [1, 1]} : vector<128x128xbf16> to vector<32x128xbf16>
    %cst_94 = arith.constant dense<0.000000e+00> : vector<64x128xf32>
    %272 = tpu.matmul %270, %271, %cst_94 {dimension_numbers = #tpu.dot_dimension_numbers<[1], [0], [0], [1], [0, 0, 1, 1], [], []>} : vector<64x32xbf16>, vector<32x128xbf16>, vector<64x128xf32> -> vector<64x128xf32>
    %273 = arith.addf %244, %272 : vector<64x128xf32>
    %274 = vector.extract_strided_slice %185 {offsets = [0, 96], sizes = [64, 32], strides = [1, 1]} : vector<64x384xf32> to vector<64x32xf32>
    %275 = vector.shape_cast %274 : vector<64x32xf32> to vector<8x8x32xf32>
    %276 = arith.truncf %275 : vector<8x8x32xf32> to vector<8x8x32xbf16>
    %277 = vector.extract_strided_slice %185 {offsets = [0, 224], sizes = [64, 32], strides = [1, 1]} : vector<64x384xf32> to vector<64x32xf32>
    %278 = vector.shape_cast %277 : vector<64x32xf32> to vector<8x8x32xf32>
    %279 = arith.truncf %278 : vector<8x8x32xf32> to vector<8x8x32xbf16>
    %280 = vector.extract_strided_slice %185 {offsets = [0, 352], sizes = [64, 32], strides = [1, 1]} : vector<64x384xf32> to vector<64x32xf32>
    %281 = vector.shape_cast %280 : vector<64x32xf32> to vector<8x8x32xf32>
    %282 = arith.truncf %281 : vector<8x8x32xf32> to vector<8x8x32xbf16>
    "tpu.trace_start"() <{level = 10 : i32, message = "bqd,bkd->bqk"}> : () -> ()
    %cst_95 = arith.constant dense<0.000000e+00> : vector<8x8x8xf32>
    %283 = tpu.matmul %276, %279, %cst_95 {dimension_numbers = #tpu.dot_dimension_numbers<[2], [2], [1], [1], [0, 0, 0, 1, 1, 1], [0], [0]>} : vector<8x8x32xbf16>, vector<8x8x32xbf16>, vector<8x8x8xf32> -> vector<8x8x8xf32>
    "tpu.trace_stop"() : () -> ()
    %cst_96 = arith.constant 0.176776692 : f32
    %284 = vector.broadcast %cst_96 : f32 to vector<8x8x8xf32>
    %285 = arith.mulf %283, %284 : vector<8x8x8xf32>
    %cst_97 = arith.constant dense<0xFF800000> : vector<8x8xf32>
    %286 = vector.multi_reduction <maximumf>, %285, %cst_97 [2] : vector<8x8x8xf32> to vector<8x8xf32>
    %287 = vector.shape_cast %286 : vector<8x8xf32> to vector<8x8x1xf32>
    %288 = vector.broadcast %287 : vector<8x8x1xf32> to vector<8x8x8xf32>
    %289 = arith.subf %285, %288 : vector<8x8x8xf32>
    %290 = math.exp %289 : vector<8x8x8xf32>
    %cst_98 = arith.constant dense<0.000000e+00> : vector<8x8xf32>
    %291 = vector.multi_reduction <add>, %290, %cst_98 [2] : vector<8x8x8xf32> to vector<8x8xf32>
    %292 = vector.shape_cast %291 : vector<8x8xf32> to vector<8x8x1xf32>
    %293 = tpu.reciprocal %292 {approx = true} : vector<8x8x1xf32> -> vector<8x8x1xf32>
    %294 = vector.broadcast %293 : vector<8x8x1xf32> to vector<8x8x8xf32>
    %295 = arith.mulf %290, %294 : vector<8x8x8xf32>
    %296 = arith.truncf %295 : vector<8x8x8xf32> to vector<8x8x8xbf16>
    "tpu.trace_start"() <{level = 10 : i32, message = "bqk,bkd->bqd"}> : () -> ()
    %cst_99 = arith.constant dense<0.000000e+00> : vector<8x8x32xf32>
    %297 = tpu.matmul %296, %282, %cst_99 {dimension_numbers = #tpu.dot_dimension_numbers<[2], [1], [1], [2], [0, 0, 0, 1, 1, 2], [0], [0]>} : vector<8x8x8xbf16>, vector<8x8x32xbf16>, vector<8x8x32xf32> -> vector<8x8x32xf32>
    "tpu.trace_stop"() : () -> ()
    %298 = vector.shape_cast %297 : vector<8x8x32xf32> to vector<64x32xf32>
    %299 = arith.truncf %298 : vector<64x32xf32> to vector<64x32xbf16>
    %300 = vector.extract_strided_slice %187 {offsets = [96, 0], sizes = [32, 128], strides = [1, 1]} : vector<128x128xbf16> to vector<32x128xbf16>
    %cst_100 = arith.constant dense<0.000000e+00> : vector<64x128xf32>
    %301 = tpu.matmul %299, %300, %cst_100 {dimension_numbers = #tpu.dot_dimension_numbers<[1], [0], [0], [1], [0, 0, 1, 1], [], []>} : vector<64x32xbf16>, vector<32x128xbf16>, vector<64x128xf32> -> vector<64x128xf32>
    %302 = arith.addf %273, %301 : vector<64x128xf32>
    %c1_101 = arith.constant 1 : index
    %c0_102 = arith.constant 0 : index
    %c0_103 = arith.constant 0 : index
    %303 = vector.load %arg5[%c1_101, %c0_102, %c0_103] : memref<2x1x128xf32, #tpu.memory_space<vmem>>, vector<1x1x128xf32>
    %304 = vector.shape_cast %303 : vector<1x1x128xf32> to vector<1x128xf32>
    %305 = vector.broadcast %304 : vector<1x128xf32> to vector<64x128xf32>
    %306 = arith.addf %302, %305 : vector<64x128xf32>
    %307 = arith.addf %177, %306 : vector<64x128xf32>
    %c1_104 = arith.constant 1 : index
    %c0_105 = arith.constant 0 : index
    %c0_106 = arith.constant 0 : index
    %308 = vector.load %arg6[%c1_104, %c0_105, %c0_106] : memref<2x1x128xf32, #tpu.memory_space<vmem>>, vector<1x1x128xf32>
    %309 = vector.shape_cast %308 : vector<1x1x128xf32> to vector<1x128xf32>
    %310 = vector.broadcast %309 : vector<1x128xf32> to vector<64x128xf32>
    %311 = arith.mulf %307, %310 : vector<64x128xf32>
    %c1_107 = arith.constant 1 : index
    %c0_108 = arith.constant 0 : index
    %c0_109 = arith.constant 0 : index
    %312 = vector.load %arg7[%c1_107, %c0_108, %c0_109] : memref<2x1x128xf32, #tpu.memory_space<vmem>>, vector<1x1x128xf32>
    %313 = vector.shape_cast %312 : vector<1x1x128xf32> to vector<1x128xf32>
    %314 = vector.broadcast %313 : vector<1x128xf32> to vector<64x128xf32>
    %315 = arith.addf %311, %314 : vector<64x128xf32>
    %316 = arith.truncf %315 : vector<64x128xf32> to vector<64x128xbf16>
    %c1_110 = arith.constant 1 : index
    %c0_111 = arith.constant 0 : index
    %c0_112 = arith.constant 0 : index
    %317 = vector.load %arg8[%c1_110, %c0_111, %c0_112] : memref<2x128x256xbf16, #tpu.memory_space<vmem>>, vector<1x128x256xbf16>
    %318 = vector.shape_cast %317 : vector<1x128x256xbf16> to vector<128x256xbf16>
    %cst_113 = arith.constant dense<0.000000e+00> : vector<64x256xf32>
    %319 = tpu.matmul %316, %318, %cst_113 {dimension_numbers = #tpu.dot_dimension_numbers<[1], [0], [0], [1], [0, 0, 1, 1], [], []>} : vector<64x128xbf16>, vector<128x256xbf16>, vector<64x256xf32> -> vector<64x256xf32>
    %c1_114 = arith.constant 1 : index
    %c0_115 = arith.constant 0 : index
    %c0_116 = arith.constant 0 : index
    %320 = vector.load %arg9[%c1_114, %c0_115, %c0_116] : memref<2x1x256xf32, #tpu.memory_space<vmem>>, vector<1x1x256xf32>
    %321 = vector.shape_cast %320 : vector<1x1x256xf32> to vector<1x256xf32>
    %322 = vector.broadcast %321 : vector<1x256xf32> to vector<64x256xf32>
    %323 = arith.addf %319, %322 : vector<64x256xf32>
    %cst_117 = arith.constant 5.000000e-01 : f32
    %324 = vector.broadcast %cst_117 : f32 to vector<64x256xf32>
    %325 = arith.mulf %324, %323 : vector<64x256xf32>
    %cst_118 = arith.constant 4.471500e-02 : f32
    %326 = vector.broadcast %cst_118 : f32 to vector<64x256xf32>
    %327 = arith.mulf %326, %323 : vector<64x256xf32>
    %328 = arith.mulf %327, %323 : vector<64x256xf32>
    %329 = arith.mulf %328, %323 : vector<64x256xf32>
    %330 = arith.addf %323, %329 : vector<64x256xf32>
    %cst_119 = arith.constant 0.797884583 : f32
    %331 = vector.broadcast %cst_119 : f32 to vector<64x256xf32>
    %332 = arith.mulf %331, %330 : vector<64x256xf32>
    %333 = math.tanh %332 : vector<64x256xf32>
    %cst_120 = arith.constant 1.000000e+00 : f32
    %334 = vector.broadcast %cst_120 : f32 to vector<64x256xf32>
    %335 = arith.addf %334, %333 : vector<64x256xf32>
    %336 = arith.mulf %325, %335 : vector<64x256xf32>
    %337 = arith.truncf %336 : vector<64x256xf32> to vector<64x256xbf16>
    %c1_121 = arith.constant 1 : index
    %c0_122 = arith.constant 0 : index
    %c0_123 = arith.constant 0 : index
    %338 = vector.load %arg10[%c1_121, %c0_122, %c0_123] : memref<2x256x128xbf16, #tpu.memory_space<vmem>>, vector<1x256x128xbf16>
    %339 = vector.shape_cast %338 : vector<1x256x128xbf16> to vector<256x128xbf16>
    %cst_124 = arith.constant dense<0.000000e+00> : vector<64x128xf32>
    %340 = tpu.matmul %337, %339, %cst_124 {dimension_numbers = #tpu.dot_dimension_numbers<[1], [0], [0], [1], [0, 0, 1, 1], [], []>} : vector<64x256xbf16>, vector<256x128xbf16>, vector<64x128xf32> -> vector<64x128xf32>
    %c1_125 = arith.constant 1 : index
    %c0_126 = arith.constant 0 : index
    %c0_127 = arith.constant 0 : index
    %341 = vector.load %arg11[%c1_125, %c0_126, %c0_127] : memref<2x1x128xf32, #tpu.memory_space<vmem>>, vector<1x1x128xf32>
    %342 = vector.shape_cast %341 : vector<1x1x128xf32> to vector<1x128xf32>
    %343 = vector.broadcast %342 : vector<1x128xf32> to vector<64x128xf32>
    %344 = arith.addf %340, %343 : vector<64x128xf32>
    %345 = arith.addf %315, %344 : vector<64x128xf32>
    %c1_128 = arith.constant 1 : index
    %c0_129 = arith.constant 0 : index
    %c0_130 = arith.constant 0 : index
    %346 = vector.load %arg12[%c1_128, %c0_129, %c0_130] : memref<2x1x128xf32, #tpu.memory_space<vmem>>, vector<1x1x128xf32>
    %347 = vector.shape_cast %346 : vector<1x1x128xf32> to vector<1x128xf32>
    %348 = vector.broadcast %347 : vector<1x128xf32> to vector<64x128xf32>
    %349 = arith.mulf %345, %348 : vector<64x128xf32>
    %c1_131 = arith.constant 1 : index
    %c0_132 = arith.constant 0 : index
    %c0_133 = arith.constant 0 : index
    %350 = vector.load %arg13[%c1_131, %c0_132, %c0_133] : memref<2x1x128xf32, #tpu.memory_space<vmem>>, vector<1x1x128xf32>
    %351 = vector.shape_cast %350 : vector<1x1x128xf32> to vector<1x128xf32>
    %352 = vector.broadcast %351 : vector<1x128xf32> to vector<64x128xf32>
    %353 = arith.addf %349, %352 : vector<64x128xf32>
    %cst_134 = arith.constant 5.000000e-01 : f32
    %354 = vector.broadcast %cst_134 : f32 to vector<64x128xf32>
    %355 = arith.mulf %354, %353 : vector<64x128xf32>
    %cst_135 = arith.constant 4.471500e-02 : f32
    %356 = vector.broadcast %cst_135 : f32 to vector<64x128xf32>
    %357 = arith.mulf %356, %353 : vector<64x128xf32>
    %358 = arith.mulf %357, %353 : vector<64x128xf32>
    %359 = arith.mulf %358, %353 : vector<64x128xf32>
    %360 = arith.addf %353, %359 : vector<64x128xf32>
    %cst_136 = arith.constant 0.797884583 : f32
    %361 = vector.broadcast %cst_136 : f32 to vector<64x128xf32>
    %362 = arith.mulf %361, %360 : vector<64x128xf32>
    %363 = math.tanh %362 : vector<64x128xf32>
    %cst_137 = arith.constant 1.000000e+00 : f32
    %364 = vector.broadcast %cst_137 : f32 to vector<64x128xf32>
    %365 = arith.addf %364, %363 : vector<64x128xf32>
    %366 = arith.mulf %355, %365 : vector<64x128xf32>
    %367 = vector.shape_cast %366 : vector<64x128xf32> to vector<8x8x128xf32>
    %cst_138 = arith.constant dense<0.000000e+00> : vector<8x128xf32>
    %368 = vector.multi_reduction <add>, %367, %cst_138 [1] : vector<8x8x128xf32> to vector<8x128xf32>
    %cst_139 = arith.constant 1.250000e-01 : f32
    %369 = vector.broadcast %cst_139 : f32 to vector<8x128xf32>
    %370 = arith.mulf %368, %369 : vector<8x128xf32>
    %371 = arith.truncf %370 : vector<8x128xf32> to vector<8x128xbf16>
    %c0_140 = arith.constant 0 : index
    %c0_141 = arith.constant 0 : index
    %372 = vector.load %arg14[%c0_140, %c0_141] : memref<128x128xbf16, #tpu.memory_space<vmem>>, vector<128x128xbf16>
    %cst_142 = arith.constant dense<0.000000e+00> : vector<8x128xf32>
    %373 = tpu.matmul %371, %372, %cst_142 {dimension_numbers = #tpu.dot_dimension_numbers<[1], [0], [0], [1], [0, 0, 1, 1], [], []>} : vector<8x128xbf16>, vector<128x128xbf16>, vector<8x128xf32> -> vector<8x128xf32>
    %c0_143 = arith.constant 0 : index
    %c0_144 = arith.constant 0 : index
    %374 = vector.load %arg15[%c0_143, %c0_144] : memref<1x128xf32, #tpu.memory_space<vmem>>, vector<1x128xf32>
    %375 = vector.broadcast %374 : vector<1x128xf32> to vector<8x128xf32>
    %376 = arith.addf %373, %375 : vector<8x128xf32>
    %377 = arith.truncf %376 : vector<8x128xf32> to vector<8x128xbf16>
    %c0_145 = arith.constant 0 : index
    %c0_146 = arith.constant 0 : index
    %378 = vector.load %arg16[%c0_145, %c0_146] : memref<128x128xbf16, #tpu.memory_space<vmem>>, vector<128x128xbf16>
    %cst_147 = arith.constant dense<0.000000e+00> : vector<8x128xf32>
    %379 = tpu.matmul %377, %378, %cst_147 {dimension_numbers = #tpu.dot_dimension_numbers<[1], [0], [0], [1], [0, 0, 1, 1], [], []>} : vector<8x128xbf16>, vector<128x128xbf16>, vector<8x128xf32> -> vector<8x128xf32>
    %c0_148 = arith.constant 0 : index
    %c0_149 = arith.constant 0 : index
    %380 = vector.load %arg17[%c0_148, %c0_149] : memref<1x128xf32, #tpu.memory_space<vmem>>, vector<1x128xf32>
    %381 = vector.broadcast %380 : vector<1x128xf32> to vector<8x128xf32>
    %382 = arith.addf %379, %381 : vector<8x128xf32>
    %c0_150 = arith.constant 0 : index
    %c0_151 = arith.constant 0 : index
    %383 = vector.load %arg18[%c0_150, %c0_151] : memref<8x128xf32, #tpu.memory_space<vmem>>, vector<8x128xf32>
    tpu.vector_store %arg18[%c0_150, %c0_151], %382 {strides = array<i32>} : memref<8x128xf32, #tpu.memory_space<vmem>>, vector<8x128xf32>,
    return
  }
  func.func @transform_0(%arg0: i32) -> (i32, i32, i32) {
    %c0_i32 = arith.constant 0 : i32
    %c0_i32_0 = arith.constant 0 : i32
    %c0_i32_1 = arith.constant 0 : i32
    return %arg0, %c0_i32, %c0_i32_0 : i32, i32, i32
  }
  func.func @transform_1(%arg0: i32) -> (i32, i32, i32) {
    %c0_i32 = arith.constant 0 : i32
    %c0_i32_0 = arith.constant 0 : i32
    %c0_i32_1 = arith.constant 0 : i32
    %c0_i32_2 = arith.constant 0 : i32
    return %c0_i32, %c0_i32_0, %c0_i32_1 : i32, i32, i32
  }
  func.func @transform_2(%arg0: i32) -> (i32, i32, i32) {
    %c0_i32 = arith.constant 0 : i32
    %c0_i32_0 = arith.constant 0 : i32
    %c0_i32_1 = arith.constant 0 : i32
    %c0_i32_2 = arith.constant 0 : i32
    return %c0_i32, %c0_i32_0, %c0_i32_1 : i32, i32, i32
  }
  func.func @transform_3(%arg0: i32) -> (i32, i32, i32) {
    %c0_i32 = arith.constant 0 : i32
    %c0_i32_0 = arith.constant 0 : i32
    %c0_i32_1 = arith.constant 0 : i32
    %c0_i32_2 = arith.constant 0 : i32
    return %c0_i32, %c0_i32_0, %c0_i32_1 : i32, i32, i32
  }
  func.func @transform_4(%arg0: i32) -> (i32, i32, i32) {
    %c0_i32 = arith.constant 0 : i32
    %c0_i32_0 = arith.constant 0 : i32
    %c0_i32_1 = arith.constant 0 : i32
    %c0_i32_2 = arith.constant 0 : i32
    return %c0_i32, %c0_i32_0, %c0_i32_1 : i32, i32, i32
  }
  func.func @transform_5(%arg0: i32) -> (i32, i32, i32) {
    %c0_i32 = arith.constant 0 : i32
    %c0_i32_0 = arith.constant 0 : i32
    %c0_i32_1 = arith.constant 0 : i32
    %c0_i32_2 = arith.constant 0 : i32
    return %c0_i32, %c0_i32_0, %c0_i32_1 : i32, i32, i32
  }
  func.func @transform_6(%arg0: i32) -> (i32, i32, i32) {
    %c0_i32 = arith.constant 0 : i32
    %c0_i32_0 = arith.constant 0 : i32
    %c0_i32_1 = arith.constant 0 : i32
    %c0_i32_2 = arith.constant 0 : i32
    return %c0_i32, %c0_i32_0, %c0_i32_1 : i32, i32, i32
  }
  func.func @transform_7(%arg0: i32) -> (i32, i32, i32) {
    %c0_i32 = arith.constant 0 : i32
    %c0_i32_0 = arith.constant 0 : i32
    %c0_i32_1 = arith.constant 0 : i32
    %c0_i32_2 = arith.constant 0 : i32
    return %c0_i32, %c0_i32_0, %c0_i32_1 : i32, i32, i32
  }
  func.func @transform_8(%arg0: i32) -> (i32, i32, i32) {
    %c0_i32 = arith.constant 0 : i32
    %c0_i32_0 = arith.constant 0 : i32
    %c0_i32_1 = arith.constant 0 : i32
    %c0_i32_2 = arith.constant 0 : i32
    return %c0_i32, %c0_i32_0, %c0_i32_1 : i32, i32, i32
  }
  func.func @transform_9(%arg0: i32) -> (i32, i32, i32) {
    %c0_i32 = arith.constant 0 : i32
    %c0_i32_0 = arith.constant 0 : i32
    %c0_i32_1 = arith.constant 0 : i32
    %c0_i32_2 = arith.constant 0 : i32
    return %c0_i32, %c0_i32_0, %c0_i32_1 : i32, i32, i32
  }
  func.func @transform_10(%arg0: i32) -> (i32, i32, i32) {
    %c0_i32 = arith.constant 0 : i32
    %c0_i32_0 = arith.constant 0 : i32
    %c0_i32_1 = arith.constant 0 : i32
    %c0_i32_2 = arith.constant 0 : i32
    return %c0_i32, %c0_i32_0, %c0_i32_1 : i32, i32, i32
  }
  func.func @transform_11(%arg0: i32) -> (i32, i32, i32) {
    %c0_i32 = arith.constant 0 : i32
    %c0_i32_0 = arith.constant 0 : i32
    %c0_i32_1 = arith.constant 0 : i32
    %c0_i32_2 = arith.constant 0 : i32
    return %c0_i32, %c0_i32_0, %c0_i32_1 : i32, i32, i32
  }
  func.func @transform_12(%arg0: i32) -> (i32, i32, i32) {
    %c0_i32 = arith.constant 0 : i32
    %c0_i32_0 = arith.constant 0 : i32
    %c0_i32_1 = arith.constant 0 : i32
    %c0_i32_2 = arith.constant 0 : i32
    return %c0_i32, %c0_i32_0, %c0_i32_1 : i32, i32, i32
  }
  func.func @transform_13(%arg0: i32) -> (i32, i32) {
    %c0_i32 = arith.constant 0 : i32
    %c0_i32_0 = arith.constant 0 : i32
    %c0_i32_1 = arith.constant 0 : i32
    return %c0_i32, %c0_i32_0 : i32, i32
  }
  func.func @transform_14(%arg0: i32) -> (i32, i32) {
    %c0_i32 = arith.constant 0 : i32
    %c0_i32_0 = arith.constant 0 : i32
    %c0_i32_1 = arith.constant 0 : i32
    return %c0_i32, %c0_i32_0 : i32, i32
  }
  func.func @transform_15(%arg0: i32) -> (i32, i32) {
    %c0_i32 = arith.constant 0 : i32
    %c0_i32_0 = arith.constant 0 : i32
    %c0_i32_1 = arith.constant 0 : i32
    return %c0_i32, %c0_i32_0 : i32, i32
  }
  func.func @transform_16(%arg0: i32) -> (i32, i32) {
    %c0_i32 = arith.constant 0 : i32
    %c0_i32_0 = arith.constant 0 : i32
    %c0_i32_1 = arith.constant 0 : i32
    return %c0_i32, %c0_i32_0 : i32, i32
  }
  func.func @transform_17(%arg0: i32) -> (i32, i32) {
    %c0_i32 = arith.constant 0 : i32
    %c0_i32_0 = arith.constant 0 : i32
    return %arg0, %c0_i32 : i32, i32
  }
}

</mosaic_0001>

<bundles_post_ra>
// kernel: ts_transformer_forward.1
= control target key start
LH: loop header
LB: loop body
LE: loop exit
PB: predicated region body
PF: predicated region fallthrough
CT: control target
= control target key end

     0   :  { %s15323_s0 = inlined_call_operand.vmem [shape: f32[8,8,128], index: 0, kind: input, shape index: {}]   ;;  %s15324_s1 = inlined_call_operand.vmem [shape: bf16[2,128,384], index: 1, kind: input, shape index: {}]   ;;  %s15325_s2 = inlined_call_operand.vmem [shape: f32[2,1,384], index: 2, kind: input, shape index: {}]   ;;  %s15326_s3 = inlined_call_operand.hbm [shape: bf16[2,128,128], index: 3, kind: input, shape index: {}]   ;;  %s15327_s4 = inlined_call_operand.vmem [shape: f32[2,1,128], index: 4, kind: input, shape index: {}]   ;;  %s15328_s5 = inlined_call_operand.vmem [shape: f32[2,1,128], index: 5, kind: input, shape index: {}]   ;;  %s15329_s6 = inlined_call_operand.vmem [shape: f32[2,1,128], index: 6, kind: input, shape index: {}]   ;;  %s15330_s7 = inlined_call_operand.hbm [shape: bf16[2,128,256], index: 7, kind: input, shape index: {}]   ;;  %s15331_s8 = inlined_call_operand.vmem [shape: f32[2,1,256], index: 8, kind: input, shape index: {}]   ;;  %s15332_s9 = inlined_call_operand.hbm [shape: bf16[2,256,128], index: 9, kind: input, shape index: {}]   ;;  %s15333_s10 = inlined_call_operand.vmem [shape: f32[2,1,128], index: 10, kind: input, shape index: {}]   ;;  %s15334_s11 = inlined_call_operand.vmem [shape: f32[2,1,128], index: 11, kind: input, shape index: {}]   ;;  %s15335_s12 = inlined_call_operand.hbm [shape: f32[2,1,128], index: 12, kind: input, shape index: {}]   ;;  %s15336_s13 = inlined_call_operand.vmem [shape: bf16[128,128], index: 13, kind: input, shape index: {}]   ;;  %s15337_s14 = inlined_call_operand.vmem [shape: f32[1,128], index: 14, kind: input, shape index: {}]   ;;  %s15338_s15 = inlined_call_operand.vmem [shape: bf16[128,128], index: 15, kind: input, shape index: {}]   ;;  %s15339_s16 = inlined_call_operand.vmem [shape: f32[1,128], index: 16, kind: input, shape index: {}]   ;;  %s15340_s17 = inlined_call_operand.vmem [shape: f32[8,128], index: 17, kind: output, shape index: {}]  }
   0x1   :  { %15349 = sst [smem:[#allocation13_spill]] %s15323_s0 }
   0x2   :  { %15350 = sst [smem:[#allocation14_spill]] %s15324_s1 }
   0x3   :  { %22 = vsyncpa [#allocation3], 0 }
   0x4   :  { %23 = vsyncpa [#allocation5], 0 }
   0x5   :  { %24 = vsyncpa [#allocation8], 0  ;;  %s12752_s24 = smov [#allocation4]   ;;  %s12658_s28 = scalar_lea.hbm %s15330_s7, 4096 }
   0x6   :  { %s54_s25 = sshll.u32 %s12752_s24, 4  ;;  %p12659_p0 = scmp.ne.s32.totalorder %s15330_s7, %s12658_s28  ;;  %s55_s25 = int_to_ptr.vmem [resolvable:$true] %s54_s25 }
   0x7   :  { %p12662_p1 = scmp.lt.u32.totalorder %s12658_s28, %s15330_s7 }
   0x9   :  { %p12664_p2 = pnand %p12662_p1, %p12659_p0 }
   0xb   :  { %12667 = shalt.err (!%p12664_p2)
}
   0xc   :  { %s12668_s19 = scalar_lea.vmem %s55_s25, 4096  ;;  %p12673_p4 = scmp.lt.s32.totalorder %s55_s25, %s55_s25 }
   0xd   :  { %p12669_p3 = scmp.ne.s32.totalorder %s55_s25, %s12668_s19  ;;  %p12674_p5 = scmp.lt.s32.totalorder %s12668_s19, %s12668_s19 }
   0xf   :  { %p12675_p6 = por %p12674_p5, %p12673_p4 }
  0x11   :  { %p12676_p7 = pnand %p12675_p6, %p12669_p3 }
  0x13   :  { %12679 = shalt.err (!%p12676_p7)
}
  0x14   :  { %s12753_s1 = smov 128   ;;  %s12754_s20 = smov 8  }
  0x15   :  { %60 = dma.hbm_to_vmem [thread:$0]  %s15330_s7, 4096, %s55_s25, [#allocation5], %s12753_s1, %s12753_s1, %s12754_s20  }
  0x16   :  { %s12755_s23 = smov [#allocation2]   ;;  %s12680_s28 = scalar_lea.hbm %s15326_s3, 2048 }
  0x17   :  { %s36_s24 = sshll.u32 %s12755_s23, 4  ;;  %p12681_p8 = scmp.ne.s32.totalorder %s15326_s3, %s12680_s28  ;;  %s37_s24 = int_to_ptr.vmem [resolvable:$true] %s36_s24 }
  0x18   :  { %p12684_p9 = scmp.lt.u32.totalorder %s12680_s28, %s15326_s3 }
  0x1a   :  { %p12686_p10 = pnand %p12684_p9, %p12681_p8 }
  0x1c   :  { %12689 = shalt.err (!%p12686_p10)
}
  0x1d   :  { %s12690_s19 = scalar_lea.vmem %s37_s24, 2048  ;;  %p12695_p12 = scmp.lt.s32.totalorder %s37_s24, %s37_s24 }
  0x1e   :  { %p12691_p11 = scmp.ne.s32.totalorder %s37_s24, %s12690_s19  ;;  %p12696_p13 = scmp.lt.s32.totalorder %s12690_s19, %s12690_s19 }
  0x20   :  { %p12697_p0 = por %p12696_p13, %p12695_p12 }
  0x22   :  { %p12698_p1 = pnand %p12697_p0, %p12691_p11 }
  0x24   :  { %12701 = shalt.err (!%p12698_p1)
}
  0x25   :  { %s12756_s7 = smov 64   ;;  %s12757_s25 = smov 4  }
  0x26   :  { %42 = dma.hbm_to_vmem [thread:$0]  %s15326_s3, 2048, %s37_s24, [#allocation3], %s12756_s7, %s12756_s7, %s12757_s25  }
  0x27   :  { %s12758_s21 = smov [#allocation6]   ;;  %s12759_s23 = smov [#allocation7]  }
  0x28   :  { %s68_s22 = sshll.u32 %s12758_s21, 4  ;;  %s84_s26 = sshll.u32 %s12759_s23, 4  ;;  %s69_s22 = int_to_ptr.vmem [resolvable:$true] %s68_s22  ;;  %s12883_s26 = int_to_ptr.vmem [resolvable:$true] %s84_s26 }
  0x29   :  { %s12702_s29 = scalar_lea.hbm %s15332_s9, 4096 }
  0x2a   :  { %p12703_p2 = scmp.ne.s32.totalorder %s15332_s9, %s12702_s29  ;;  %p12706_p3 = scmp.lt.u32.totalorder %s12702_s29, %s15332_s9 }
  0x2c   :  { %p12708_p4 = pnand %p12706_p3, %p12703_p2 }
  0x2e   :  { %12711 = shalt.err (!%p12708_p4)
}
  0x2f   :  { %s12712_s3 = scalar_lea.vmem %s69_s22, 4096  ;;  %p12717_p6 = scmp.lt.s32.totalorder %s69_s22, %s69_s22 }
  0x30   :  { %p12713_p5 = scmp.ne.s32.totalorder %s69_s22, %s12712_s3  ;;  %p12718_p7 = scmp.lt.s32.totalorder %s12712_s3, %s12712_s3 }
  0x32   :  { %p12719_p8 = por %p12718_p7, %p12717_p6 }
  0x34   :  { %p12720_p9 = pnand %p12719_p8, %p12713_p5 }
  0x36   :  { %12723 = shalt.err (!%p12720_p9)
}
  0x37   :  { %74 = dma.hbm_to_vmem [thread:$0]  %s15332_s9, 4096, %s69_s22, [#allocation5], %s12756_s7, %s12756_s7, %s12757_s25  }
  0x38   :  { %s12724_s23 = scalar_lea.hbm %s15335_s12, 32 }
  0x39   :  { %p12725_p10 = scmp.ne.s32.totalorder %s15335_s12, %s12724_s23  ;;  %p12728_p11 = scmp.lt.u32.totalorder %s12724_s23, %s15335_s12 }
  0x3b   :  { %p12730_p12 = pnand %p12728_p11, %p12725_p10 }
  0x3d   :  { %12733 = shalt.err (!%p12730_p12)
}
  0x3e   :  { %s12734_s30 = scalar_lea.vmem %s12883_s26, 32  ;;  %p12739_p0 = scmp.lt.s32.totalorder %s12883_s26, %s12883_s26 }
  0x3f   :  { %p12735_p13 = scmp.ne.s32.totalorder %s12883_s26, %s12734_s30  ;;  %p12740_p1 = scmp.lt.s32.totalorder %s12734_s30, %s12734_s30 }
  0x41   :  { %p12741_p2 = por %p12740_p1, %p12739_p0 }
  0x43   :  { %p12742_p3 = pnand %p12741_p2, %p12735_p13 }
  0x45   :  { %12745 = shalt.err (!%p12742_p3)
}
  0x46   :  { %s12760_s9 = smov 16   ;;  %s12761_s25 = smov 1  }
  0x47   :  { %90 = dma.hbm_to_vmem [thread:$0]  %s15335_s12, 32, %s12883_s26, [#allocation8], %s12760_s9, %s12760_s9, %s12761_s25  }
  0x48   :  { %12746 = dma.done.wait [#allocation3], 2048  }
  0x49   :  { %12747 = vsyncadd [#allocation3], 4294965248 }
  0x4a   :  { %12748 = dma.done.wait [#allocation5], 8192  }
  0x4b   :  { %12749 = vsyncadd [#allocation5], 4294959104 }
  0x4c   :  { %12750 = dma.done.wait [#allocation8], 32  }
  0x4d   :  { %12751 = vsyncadd [#allocation8], 4294967264  ;;  %v15344_v0 = vmov 0   ;;  %s15351_s24 = sld [smem:[#allocation14_spill]]  ;;  %s15352_s18 = sld [smem:[#allocation13_spill]]  ;;  %v15346_v37 = vmov 0.0   ;;  %v158_v38 = vlaneseq }
  0x4e   :  { %333 = vmatprep.mubr.bf16.mxu0 %v15344_v0  ;;  %vm12764_vm0 = vmmov 0   ;;  %v156_v41 = vld [vmem:[%s15325_s2] sm:$0x7]  ;;  %vm479_vm1 = vcmask 261120   ;;  %vm956_vm2 = vcmask 1043456   ;;  %vm856_vm3 = vcmask 64512  }
  0x4f   :  { %v13022_v39 = vshrl.u32 %v158_v38, 7  ;;  %s12765_s1 = smov 96   ;;  %s12766_s20 = smov 32   ;;  %vm10116_vm4 = vcmask 1041409   ;;  %vm10118_vm5 = vcmask 1042434   ;;  %vm10120_vm6 = vcmask 1043459  }
  0x50   :  { %vm10122_vm7 = vcmask 1044484   ;;  %vm10124_vm8 = vcmask 1045509   ;;  %vm10126_vm9 = vcmask 1046534   ;;  %vm10128_vm10 = vcmask 1047559  }
  0x51   :  { %v13025_v40 = vsub.s32 1, %v13022_v39  ;;  %v13034_v43 = vsub.s32 0, %v13022_v39  ;;  %v15343_v53 = vsub.s32 2, %v13022_v39 }
  0x53   :  { %v12138_v1 = vld [vmem:[%s15351_s24 + $0x4] ss:$12 sps:$4 sm:$0xff]   ;;  %v12140_v2 = vld [vmem:[%s15351_s24] ss:$12 sps:$4 sm:$0xff]   ;;  %v12141_v3 = vld [vmem:[%s15351_s24 + $0x1c] ss:$12 sps:$4 sm:$0xff]   ;;  %v13031_v42 = vrot.slane %v156_v41, %v13025_v40  ;;  %v13038_v49 = vrot.slane %v156_v41, %v13034_v43  ;;  %v13053_v61 = vrot.slane %v156_v41, %v15343_v53 }
  0x54   :  { %301 = vmatprep.subr.bf16.mxu0 %v12138_v1  ;;  %v12143_v4 = vld [vmem:[%s15351_s24 + $0x18] ss:$12 sps:$4 sm:$0xff]   ;;  %v12144_v5 = vld [vmem:[%s15351_s24 + $0x34] ss:$12 sps:$4 sm:$0xff]   ;;  %v12146_v6 = vld [vmem:[%s15351_s24 + $0x30] ss:$12 sps:$4 sm:$0xff]  }
  0x55   :  { %302 = vmatpush1.bf16.msra.mxu0 %v12140_v2  ;;  %v12147_v7 = vld [vmem:[%s15351_s24 + $0x4c] ss:$12 sps:$4 sm:$0xff]   ;;  %v112_v8 = vld [vmem:[%s15352_s18] sm:$0xff]  ;;  %v12149_v9 = vld [vmem:[%s15351_s24 + $0x48] ss:$12 sps:$4 sm:$0xff]   ;;  %15353 = vst [vmem:[#allocation12_spill] sm:$0xff] %v13025_v40 }
  0x56   :  { %303 = vmatprep.subr.bf16.mxu0 %v12141_v3  ;;  %v113_v10 = vld [vmem:[%s15352_s18 + $0x8] sm:$0xff]  ;;  %v12150_v11 = vld [vmem:[%s15351_s24 + $0x64] ss:$12 sps:$4 sm:$0xff]   ;;  %v12156_v19 = vld [vmem:[%s15351_s24 + $0x94] ss:$12 sps:$4 sm:$0xff]  }
  0x57   :  { %v120_v12 = vpack.c.bf16 %v113_v10, %v112_v8  ;;  %v12152_v13 = vld [vmem:[%s15351_s24 + $0x60] ss:$12 sps:$4 sm:$0xff]   ;;  %v12162_v14 = vld [vmem:[%s15351_s24 + $0x8] ss:$12 sps:$4 sm:$0xff]   ;;  %v12164_v17 = vld [vmem:[%s15351_s24 + $0x38] ss:$12 sps:$4 sm:$0xff]  }
  0x58   :  { %v12163_v15 = vld [vmem:[%s15351_s24 + $0x20] ss:$12 sps:$4 sm:$0xff]   ;;  %v12153_v16 = vld [vmem:[%s15351_s24 + $0x7c] ss:$12 sps:$4 sm:$0xff]   ;;  %11123 = vmatprep.subr.bf16.mxu1 %v12162_v14  ;;  %v12155_v18 = vld [vmem:[%s15351_s24 + $0x78] ss:$12 sps:$4 sm:$0xff]  }
  0x59   :  { %304 = vmatpush1.bf16.msra.mxu0 %v12143_v4  ;;  %11139 = vmatprep.mubr.bf16.mxu1 %v120_v12  ;;  %v12158_v20 = vld [vmem:[%s15351_s24 + $0x90] ss:$12 sps:$4 sm:$0xff]   ;;  %v12159_v22 = vld [vmem:[%s15351_s24 + $0xac] ss:$12 sps:$4 sm:$0xff]   ;;  %v12166_v23 = vld [vmem:[%s15351_s24 + $0x68] ss:$12 sps:$4 sm:$0xff]  }
  0x5a   :  { %305 = vmatprep.subr.bf16.mxu0 %v12144_v5  ;;  %11124 = vmatpush3.bf16.msra.mxu1 %v12162_v14  ;;  %v12165_v21 = vld [vmem:[%s15351_s24 + $0x50] ss:$12 sps:$4 sm:$0xff]   ;;  %v12161_v24 = vld [vmem:[%s15351_s24 + $0xa8] ss:$12 sps:$4 sm:$0xff]   ;;  %v12167_v25 = vld [vmem:[%s15351_s24 + $0x80] ss:$12 sps:$4 sm:$0xff]  }
  0x5b   :  { %11125 = vmatprep.subr.bf16.mxu1 %v12163_v15  ;;  %v12168_v26 = vld [vmem:[%s15351_s24 + $0x98] ss:$12 sps:$4 sm:$0xff]   ;;  %v114_v27 = vld [vmem:[%s15352_s18 + $0x10] sm:$0xff]  ;;  %v117_v32 = vld [vmem:[%s15352_s18 + $0x28] sm:$0xff] }
  0x5c   :  { %v115_v28 = vld [vmem:[%s15352_s18 + $0x18] sm:$0xff]  ;;  %v116_v31 = vld [vmem:[%s15352_s18 + $0x20] sm:$0xff]  ;;  %v118_v34 = vld [vmem:[%s15352_s18 + $0x30] sm:$0xff] }
  0x5d   :  { %306 = vmatpush1.bf16.msra.mxu0 %v12146_v6  ;;  %v12169_v29 = vld [vmem:[%s15351_s24 + $0xb0] ss:$12 sps:$4 sm:$0xff]   ;;  %v121_v30 = vpack.c.bf16 %v115_v28, %v114_v27  ;;  %v122_v33 = vpack.c.bf16 %v117_v32, %v116_v31 }
  0x5e   :  { %307 = vmatprep.subr.bf16.mxu0 %v12147_v7  ;;  %11126 = vmatpush3.bf16.msra.mxu1 %v12163_v15  ;;  %v119_v35 = vld [vmem:[%s15352_s18 + $0x38] sm:$0xff] }
  0x5f   :  { %11127 = vmatprep.subr.bf16.mxu1 %v12164_v17  ;;  %v123_v36 = vpack.c.bf16 %v119_v35, %v118_v34 }
  0x61   :  { %308 = vmatpush1.bf16.msra.mxu0 %v12149_v9 }
  0x62   :  { %309 = vmatprep.subr.bf16.mxu0 %v12150_v11  ;;  %11128 = vmatpush3.bf16.msra.mxu1 %v12164_v17 }
  0x63   :  { %11129 = vmatprep.subr.bf16.mxu1 %v12165_v21 }
  0x65   :  { %310 = vmatpush1.bf16.msra.mxu0 %v12152_v13 }
  0x66   :  { %311 = vmatprep.subr.bf16.mxu0 %v12153_v16  ;;  %11130 = vmatpush3.bf16.msra.mxu1 %v12165_v21 }
  0x67   :  { %11131 = vmatprep.subr.bf16.mxu1 %v12166_v23 }
  0x69   :  { %312 = vmatpush1.bf16.msra.mxu0 %v12155_v18 }
  0x6a   :  { %313 = vmatprep.subr.bf16.mxu0 %v12156_v19  ;;  %11132 = vmatpush3.bf16.msra.mxu1 %v12166_v23 }
  0x6b   :  { %11133 = vmatprep.subr.bf16.mxu1 %v12167_v25 }
  0x6d   :  { %314 = vmatpush1.bf16.msra.mxu0 %v12158_v20 }
  0x6e   :  { %315 = vmatprep.subr.bf16.mxu0 %v12159_v22  ;;  %11134 = vmatpush3.bf16.msra.mxu1 %v12167_v25 }
  0x6f   :  { %11135 = vmatprep.subr.bf16.mxu1 %v12168_v26 }
  0x71   :  { %316 = vmatpush1.bf16.msra.mxu0 %v12161_v24 }
  0x72   :  { %11136 = vmatpush3.bf16.msra.mxu1 %v12168_v26  ;;  %11159 = vmatprep.subr.bf16.mxu0 %v15346_v37 }
  0x73   :  { %11137 = vmatprep.subr.bf16.mxu1 %v12169_v29 }
  0x74   :  { %334 = vmatmul.mubr.bf16.vlgmr.msra.gmra.mrb[0].mxu0 %v120_v12 }
  0x75   :  { %343 = vmatprep.mubr.bf16.mxu0 %v15344_v0 }
  0x76   :  { %11138 = vmatpush3.bf16.msra.mxu1 %v12169_v29 }
  0x77   :  { %11147 = vmatprep.subr.bf16.mxu1 %v15346_v37 }
  0x79   :  { %11140 = vmatmul.mubr.bf16.vlgmr.msra.gmra.mrb[0].mxu1 %v121_v30 }
  0x7a   :  { %11143 = vmatprep.mubr.bf16.mxu1 %v122_v33 }
  0x7c   :  { %344 = vmatmul.mubr.bf16.gmra.mrb[4].mxu0 %v121_v30 }
  0x7d   :  { %353 = vmatprep.mubr.bf16.mxu0 %v15344_v0 }
  0x81   :  { %11144 = vmatmul.mubr.bf16.gmra.mrb[4].mxu1 %v123_v36 }
  0x82   :  { %11149 = vmatprep.mubr.msk.bf16.mxu1 %vm12764_vm0, %v15346_v37 }
  0x84   :  { %354 = vmatmul.mubr.bf16.gmra.mrb[8].mxu0 %v122_v33 }
  0x85   :  { %363 = vmatprep.mubr.bf16.mxu0 %v15344_v0 }
  0x8c   :  { %364 = vmatmul.mubr.bf16.gmra.mrb[12].mxu0 %v123_v36 }
  0x8d   :  { %11161 = vmatprep.mubr.msk.bf16.mxu0 %vm12764_vm0, %v15346_v37 }
 0x147   :  { %v335_v44 = vpop.f32.mrb[0].mxu0 }
 0x148   :  { %v337_v45 = vpop.f32.mrb[1].mxu0  ;;  %v336_v54 = vadd.f32 %v335_v44, %v13038_v49 }
 0x149   :  { %v338_v46 = vadd.f32 %v337_v45, %v13031_v42  ;;  %v339_v47 = vpop.f32.mrb[2].mxu0 }
 0x14a   :  { %v341_v48 = vpop.f32.mrb[3].mxu0  ;;  %v13055_v62 = vpack.c.bf16 %v336_v54, %v336_v54  ;;  %v340_v7 = vadd.f32 %v339_v47, %v13038_v49 }
 0x14b   :  { %v13040_v50 = vpack.c.bf16 %v338_v46, %v338_v46  ;;  %v342_v51 = vadd.f32 %v341_v48, %v13031_v42 }
 0x14c   :  { %v11141_v4 = vpop.f32.mrb[0].mxu1  ;;  %v13085_v18 = vpack.c.bf16 %v340_v7, %v340_v7 }
 0x14d   :  { %v484_v52 = vsel %vm479_vm1, %v13040_v50, 0  ;;  %v13048_v57 = vpack.c.bf16 %v342_v51, %v342_v51  ;;  %v13067_v5 = vadd.f32 %v11141_v4, %v13053_v61  ;;  %v13069_v6 = vpop.f32.mrb[1].mxu1 }
 0x14e   :  { %11148 = vmatpush3.bf16.xpose.msra.mxu1 %v484_v52  ;;  %v11142_v10 = vpop.f32.mrb[2].mxu1 }
 0x14f   :  { %v345_v55 = vpop.f32.mrb[4].mxu0  ;;  %11153 = vmatprep.subr.bf16.mxu1 %v15346_v37  ;;  %v530_v2 = vsel %vm479_vm1, %v13048_v57, 0  ;;  %v13078_v12 = vadd.f32 %v11142_v10, %v13053_v61  ;;  %v13080_v13 = vpop.f32.mrb[3].mxu1 }
 0x150   :  { %v347_v56 = vpop.f32.mrb[5].mxu0  ;;  %v346_v8 = vadd.f32 %v345_v55, %v13038_v49 }
 0x151   :  { %v348_v58 = vadd.f32 %v347_v56, %v13031_v42  ;;  %v349_v59 = vpop.f32.mrb[6].mxu0 }
 0x152   :  { %v351_v60 = vpop.f32.mrb[7].mxu0  ;;  %v13087_v19 = vpack.c.bf16 %v346_v8, %v346_v8  ;;  %v350_v27 = vadd.f32 %v349_v59, %v13038_v49 }
 0x153   :  { %v13057_v63 = vpack.c.bf16 %v348_v58, %v348_v58  ;;  %v352_v1 = vadd.f32 %v351_v60, %v13031_v42 }
 0x154   :  { %v11145_v24 = vpop.f32.mrb[4].mxu1  ;;  %v13123_v45 = vpack.c.bf16 %v350_v27, %v350_v27 }
 0x155   :  { %11150 = vmatmul.mubr.msk.bf16.vlgmr.msra.gmra.mrb[8].mxu1 %vm479_vm1, %v13055_v62  ;;  %v576_v3 = vsel %vm479_vm1, %v13057_v63, 0  ;;  %v13082_v14 = vpack.c.bf16 %v352_v1, %v352_v1  ;;  %v13101_v25 = vadd.f32 %v11145_v24, %v13053_v61  ;;  %v424_v26 = vpop.f32.mrb[5].mxu1 }
 0x156   :  { %11154 = vmatpush3.bf16.xpose.msra.mxu1 %v530_v2  ;;  %11160 = vmatpush3.bf16.xpose.msra.mxu0 %v576_v3  ;;  %v13110_v30 = vadd.f32 %v424_v26, %v13053_v61  ;;  %v11146_v31 = vpop.f32.mrb[6].mxu1  ;;  %v412_v2 = vadd.f32 %v13080_v13, %v13053_v61 }
 0x157   :  { %v355_v9 = vpop.f32.mrb[8].mxu0  ;;  %11155 = vmatprep.mubr.msk.bf16.mxu1 %vm12764_vm0, %v15346_v37  ;;  %11165 = vmatprep.subr.bf16.mxu1 %v15346_v37  ;;  %v622_v22 = vsel %vm479_vm1, %v13082_v14, 0  ;;  %v13115_v33 = vadd.f32 %v11146_v31, %v13053_v61  ;;  %v427_v34 = vpop.f32.mrb[7].mxu1 }
 0x158   :  { %v357_v11 = vpop.f32.mrb[9].mxu0  ;;  %11171 = vmatprep.subr.bf16.mxu0 %v15346_v37  ;;  %v356_v28 = vadd.f32 %v355_v9, %v13038_v49  ;;  %v13121_v41 = vadd.f32 %v427_v34, %v13053_v61  ;;  %v13176_v4 = vpack.c.bf16 %v412_v2, %v412_v2 }
 0x159   :  { %v358_v15 = vadd.f32 %v357_v11, %v13031_v42  ;;  %v359_v16 = vpop.f32.mrb[10].mxu0 }
 0x15a   :  { %v361_v17 = vpop.f32.mrb[11].mxu0  ;;  %v13125_v46 = vpack.c.bf16 %v356_v28, %v356_v28  ;;  %v360_v55 = vadd.f32 %v359_v16, %v13038_v49  ;;  %v1004_v8 = vsel %vm956_vm2, %v13176_v4, 0 }
 0x15b   :  { %v13089_v20 = vpack.c.bf16 %v358_v15, %v358_v15  ;;  %v362_v21 = vadd.f32 %v361_v17, %v13031_v42 }
 0x15c   :  { %v13150_v58 = vpack.c.bf16 %v360_v55, %v360_v55 }
 0x15d   :  { %11156 = vmatmul.mubr.msk.bf16.vlgmr.msra.gmra.mrb[12].mxu1 %vm479_vm1, %v13085_v18  ;;  %11162 = vmatmul.mubr.msk.bf16.vlgmr.msra.gmra.mrb[16].mxu0 %vm479_vm1, %v13087_v19  ;;  %v668_v23 = vsel %vm479_vm1, %v13089_v20, 0  ;;  %v13117_v35 = vpack.c.bf16 %v362_v21, %v362_v21 }
 0x15e   :  { %11166 = vmatpush3.bf16.xpose.msra.mxu1 %v622_v22  ;;  %11172 = vmatpush3.bf16.xpose.msra.mxu0 %v668_v23 }
 0x15f   :  { %v365_v29 = vpop.f32.mrb[12].mxu0  ;;  %11167 = vmatprep.mubr.msk.bf16.mxu1 %vm12764_vm0, %v15346_v37  ;;  %11173 = vmatprep.mubr.msk.bf16.mxu0 %vm12764_vm0, %v15346_v37  ;;  %v714_v52 = vsel %vm479_vm1, %v13117_v35, 0 }
 0x160   :  { %v367_v32 = vpop.f32.mrb[13].mxu0  ;;  %11177 = vmatprep.subr.bf16.mxu1 %v15346_v37  ;;  %11183 = vmatprep.subr.bf16.mxu0 %v15346_v37  ;;  %v366_v51 = vadd.f32 %v365_v29, %v13038_v49 }
 0x161   :  { %v368_v36 = vadd.f32 %v367_v32, %v13031_v42  ;;  %v369_v38 = vpop.f32.mrb[14].mxu0 }
 0x162   :  { %v371_v44 = vpop.f32.mrb[15].mxu0  ;;  %v370_v60 = vadd.f32 %v369_v38, %v13038_v49  ;;  %v409_v49 = vadd.f32 %v13069_v6, %v13053_v61 }
 0x163   :  { %v13127_v47 = vpack.c.bf16 %v368_v36, %v368_v36  ;;  %v372_v48 = vadd.f32 %v371_v44, %v13031_v42  ;;  %v13148_v42 = vpack.c.bf16 %v366_v51, %v366_v51 }
 0x164   :  { %v13164_v1 = vpack.c.bf16 %v370_v60, %v370_v60  ;;  %v13174_v3 = vpack.c.bf16 %v409_v49, %v409_v49 }
 0x165   :  { %11168 = vmatmul.mubr.msk.bf16.vlgmr.msra.gmra.mrb[16].mxu1 %vm479_vm1, %v13123_v45  ;;  %11174 = vmatmul.mubr.msk.bf16.vlgmr.msra.gmra.mrb[20].mxu0 %vm479_vm1, %v13125_v46  ;;  %v760_v54 = vsel %vm479_vm1, %v13127_v47, 0  ;;  %v13140_v56 = vpack.c.bf16 %v372_v48, %v372_v48 }
 0x166   :  { %11178 = vmatpush3.bf16.xpose.msra.mxu1 %v714_v52  ;;  %11184 = vmatpush3.bf16.xpose.msra.mxu0 %v760_v54  ;;  %v958_v7 = vsel %vm956_vm2, %v13174_v3, 0 }
 0x167   :  { %11179 = vmatprep.mubr.msk.bf16.mxu1 %vm12764_vm0, %v15346_v37  ;;  %11185 = vmatprep.mubr.msk.bf16.mxu0 %vm12764_vm0, %v15346_v37  ;;  %v806_v59 = vsel %vm479_vm1, %v13140_v56, 0 }
 0x168   :  { %11189 = vmatprep.subr.bf16.mxu1 %v15346_v37  ;;  %11195 = vmatprep.subr.bf16.mxu0 %v15346_v37 }
 0x16d   :  { %11180 = vmatmul.mubr.msk.bf16.vlgmr.msra.gmra.mrb[20].mxu1 %vm479_vm1, %v13150_v58  ;;  %11186 = vmatmul.mubr.msk.bf16.vlgmr.msra.gmra.mrb[24].mxu0 %vm479_vm1, %v13148_v42 }
 0x16e   :  { %11190 = vmatpush3.bf16.xpose.msra.mxu1 %v806_v59  ;;  %11191 = vmatprep.mubr.msk.bf16.mxu1 %vm12764_vm0, %v15346_v37 }
 0x16f   :  { %11201 = vmatprep.subr.bf16.mxu1 %v15346_v37  ;;  %11197 = vmatprep.mubr.msk.bf16.mxu0 %vm12764_vm0, %v15346_v37 }
 0x170   :  { %11196 = vmatpush3.bf16.msra.mxu0 %v958_v7 }
 0x171   :  { %11207 = vmatprep.subr.bf16.mxu0 %v15346_v37 }
 0x175   :  { %11192 = vmatmul.mubr.msk.bf16.vlgmr.msra.gmra.mrb[24].mxu1 %vm479_vm1, %v13164_v1 }
 0x176   :  { %11203 = vmatprep.mubr.msk.bf16.mxu1 %vm12764_vm0, %v15346_v37  ;;  %11202 = vmatpush3.bf16.msra.mxu1 %v1004_v8 }
 0x177   :  { %11213 = vmatprep.subr.bf16.mxu1 %v15346_v37 }
 0x228   :  { %v520_v6 = vpop.f32.mrb[8].mxu1 }
 0x229   :  { %v11151_v61 = vpop.f32.mrb[9].mxu1  ;;  %v848_v9 = vmul.f32 0.17677669, %v520_v6 }
 0x22a   :  { %v523_v10 = vpop.f32.mrb[10].mxu1 }
 0x22b   :  { %v11152_v11 = vpop.f32.mrb[11].mxu1  ;;  %v857_v13 = vsel %vm856_vm3, %v848_v9, -inf }
 0x22c   :  { %858 = vmax.xlane.f32.xlu0 %v857_v13 }
 0x230   :  { %v566_v15 = vpop.f32.mrb[12].mxu1  ;;  %v612_v16 = vpop.f32.mrb[16].mxu0 }
 0x231   :  { %v11157_v17 = vpop.f32.mrb[13].mxu1  ;;  %v11163_v21 = vpop.f32.mrb[17].mxu0  ;;  %v850_v22 = vmul.f32 0.17677669, %v612_v16  ;;  %v849_v23 = vmul.f32 0.17677669, %v566_v15 }
 0x232   :  { %v569_v24 = vpop.f32.mrb[14].mxu1  ;;  %v615_v26 = vpop.f32.mrb[18].mxu0 }
 0x233   :  { %v11158_v27 = vpop.f32.mrb[15].mxu1  ;;  %v11164_v28 = vpop.f32.mrb[19].mxu0  ;;  %v863_v29 = vsel %vm856_vm3, %v850_v22, -inf  ;;  %v860_v31 = vsel %vm856_vm3, %v849_v23, -inf }
 0x234   :  { %864 = vmax.xlane.f32.xlu1 %v863_v29  ;;  %861 = vmax.xlane.f32.xlu0 %v860_v31 }
 0x238   :  { %v658_v32 = vpop.f32.mrb[16].mxu1  ;;  %v704_v34 = vpop.f32.mrb[20].mxu0 }
 0x239   :  { %v11169_v36 = vpop.f32.mrb[17].mxu1  ;;  %v852_v38 = vmul.f32 0.17677669, %v704_v34  ;;  %v851_v44 = vmul.f32 0.17677669, %v658_v32  ;;  %v11175_v48 = vpop.f32.mrb[21].mxu0 }
 0x23a   :  { %v661_v51 = vpop.f32.mrb[18].mxu1  ;;  %v707_v52 = vpop.f32.mrb[22].mxu0 }
 0x23b   :  { %v11170_v54 = vpop.f32.mrb[19].mxu1  ;;  %v869_v55 = vsel %vm856_vm3, %v852_v38, -inf  ;;  %v866_v59 = vsel %vm856_vm3, %v851_v44, -inf  ;;  %v11176_v60 = vpop.f32.mrb[23].mxu0 }
 0x23c   :  { %870 = vmax.xlane.f32.xlu0 %v869_v55  ;;  %867 = vmax.xlane.f32.xlu1 %v866_v59 }
 0x240   :  { %v750_v49 = vpop.f32.mrb[20].mxu1  ;;  %v796_v2 = vpop.f32.mrb[24].mxu0 }
 0x241   :  { %v11181_v7 = vpop.f32.mrb[21].mxu1  ;;  %v854_v8 = vmul.f32 0.17677669, %v796_v2  ;;  %v853_v6 = vmul.f32 0.17677669, %v750_v49  ;;  %v11187_v61 = vpop.f32.mrb[25].mxu0 }
 0x242   :  { %v753_v10 = vpop.f32.mrb[22].mxu1  ;;  %v799_v11 = vpop.f32.mrb[26].mxu0 }
 0x243   :  { %v875_v13 = vsel %vm856_vm3, %v854_v8, -inf  ;;  %v872_v15 = vsel %vm856_vm3, %v853_v6, -inf  ;;  %v11182_v16 = vpop.f32.mrb[23].mxu1  ;;  %v11188_v17 = vpop.f32.mrb[27].mxu0 }
 0x244   :  { %876 = vmax.xlane.f32.xlu0 %v875_v13  ;;  %873 = vmax.xlane.f32.xlu1 %v872_v15 }
 0x248   :  { %v842_v21 = vpop.f32.mrb[24].mxu1 }
 0x249   :  { %v13191_v24 = vmul.f32 0.17677669, %v842_v21  ;;  %v11193_v26 = vpop.f32.mrb[25].mxu1 }
 0x24a   :  { %v845_v27 = vpop.f32.mrb[26].mxu1 }
 0x24b   :  { %v878_v28 = vsel %vm856_vm3, %v13191_v24, -inf  ;;  %v11194_v29 = vpop.f32.mrb[27].mxu1 }
 0x24c   :  { %879 = vmax.xlane.f32.xlu1 %v878_v28 }
 0x2b9   :  { %v859_v31 = vpop.xlane.xlu0 %858 }
 0x2ba   :  { %v881_v32 = vsub.f32 %v848_v9, %v859_v31 }
 0x2bc   :  { %v889_v34 = vmul.f32 1.442695, %v881_v32 }
 0x2be   :  { %12314 = vpow2.f32 %v889_v34 }
 0x2c1   :  { %v865_v36 = vpop.xlane.xlu1 %864  ;;  %v862_v48 = vpop.xlane.xlu0 %861 }
 0x2c2   :  { %v883_v51 = vsub.f32 %v850_v22, %v865_v36  ;;  %v882_v52 = vsub.f32 %v849_v23, %v862_v48 }
 0x2c4   :  { %v893_v54 = vmul.f32 1.442695, %v883_v51  ;;  %v891_v55 = vmul.f32 1.442695, %v882_v52 }
 0x2c6   :  { %12316 = vpow2.f32 %v893_v54 }
 0x2c7   :  { %12318 = vpow2.f32 %v891_v55 }
 0x2c8   :  { %v13195_v59 = vpop.eup %12314 }
 0x2c9   :  { %v871_v60 = vpop.xlane.xlu0 %870  ;;  %v868_v49 = vpop.xlane.xlu1 %867  ;;  %v905_v2 = vsel %vm856_vm3, %v13195_v59, 0.0 }
 0x2ca   :  { %v885_v7 = vsub.f32 %v852_v38, %v871_v60  ;;  %v884_v61 = vsub.f32 %v851_v44, %v868_v49  ;;  %906 = vadd.xlane.f32.xlu0 %v905_v2  ;;  %v13262_v49 = vpack.c.bf16 %v13067_v5, %v13067_v5 }
 0x2cc   :  { %v897_v9 = vmul.f32 1.442695, %v885_v7  ;;  %v895_v10 = vmul.f32 1.442695, %v884_v61  ;;  %v1050_v61 = vsel %vm956_vm2, %v13262_v49, 0 }
 0x2ce   :  { %12320 = vpow2.f32 %v897_v9 }
 0x2cf   :  { %12322 = vpow2.f32 %v895_v10 }
 0x2d0   :  { %v13199_v22 = vpop.eup %12316 }
 0x2d1   :  { %v13201_v23 = vpop.eup %12318  ;;  %v877_v11 = vpop.xlane.xlu0 %876  ;;  %v911_v15 = vsel %vm856_vm3, %v13199_v22, 0.0 }
 0x2d2   :  { %v874_v13 = vpop.xlane.xlu1 %873  ;;  %v887_v16 = vsub.f32 %v854_v8, %v877_v11  ;;  %912 = vadd.xlane.f32.xlu0 %v911_v15  ;;  %v908_v38 = vsel %vm856_vm3, %v13201_v23, 0.0  ;;  %v13278_v15 = vpack.c.bf16 %v13078_v12, %v13078_v12 }
 0x2d3   :  { %v886_v17 = vsub.f32 %v853_v6, %v874_v13  ;;  %909 = vadd.xlane.f32.xlu1 %v908_v38 }
 0x2d4   :  { %v901_v44 = vmul.f32 1.442695, %v887_v16 }
 0x2d5   :  { %v899_v21 = vmul.f32 1.442695, %v886_v17 }
 0x2d6   :  { %12324 = vpow2.f32 %v901_v44 }
 0x2d7   :  { %12326 = vpow2.f32 %v899_v21 }
 0x2d8   :  { %v13207_v26 = vpop.eup %12320 }
 0x2d9   :  { %v13209_v27 = vpop.eup %12322  ;;  %v917_v28 = vsel %vm856_vm3, %v13207_v26, 0.0  ;;  %v880_v34 = vpop.xlane.xlu1 %879 }
 0x2da   :  { %918 = vadd.xlane.f32.xlu0 %v917_v28  ;;  %v914_v8 = vsel %vm856_vm3, %v13209_v27, 0.0  ;;  %v888_v36 = vsub.f32 %v13191_v24, %v880_v34  ;;  %v13294_v28 = vpack.c.bf16 %v13101_v25, %v13101_v25 }
 0x2db   :  { %915 = vadd.xlane.f32.xlu1 %v914_v8 }
 0x2dc   :  { %v903_v48 = vmul.f32 1.442695, %v888_v36 }
 0x2de   :  { %12328 = vpow2.f32 %v903_v48 }
 0x2e0   :  { %v13215_v6 = vpop.eup %12324 }
 0x2e1   :  { %v13217_v29 = vpop.eup %12326  ;;  %v923_v31 = vsel %vm856_vm3, %v13215_v6, 0.0 }
 0x2e2   :  { %924 = vadd.xlane.f32.xlu0 %v923_v31  ;;  %v920_v32 = vsel %vm856_vm3, %v13217_v29, 0.0  ;;  %v13300_v31 = vpack.c.bf16 %v13121_v41, %v13121_v41 }
 0x2e3   :  { %921 = vadd.xlane.f32.xlu1 %v920_v32 }
 0x2e4   :  { %v1188_v25 = vsel %vm956_vm2, %v13300_v31, 0 }
 0x2e8   :  { %v13242_v51 = vpop.eup %12328 }
 0x2e9   :  { %v926_v52 = vsel %vm856_vm3, %v13242_v51, 0.0 }
 0x2f4   :  { %1382 = vrot.lane.b32.xlu1 %v13048_v57, %s12765_s1 }
 0x2f8   :  { %1327 = vrot.lane.b32.xlu1 %v13055_v62, %s12765_s1  ;;  %1330 = vrot.lane.b32.xlu0 %v13040_v50, %s12765_s1 }
 0x2fc   :  { %1434 = vrot.lane.b32.xlu0 %v13057_v63, %s12765_s1 }
 0x300   :  { %1431 = vrot.lane.b32.xlu0 %v13087_v19, %s12765_s1 }
 0x304   :  { %1538 = vrot.lane.b32.xlu0 %v13089_v20, %s12765_s1 }
 0x308   :  { %1535 = vrot.lane.b32.xlu0 %v13125_v46, %s12765_s1 }
 0x30c   :  { %1642 = vrot.lane.b32.xlu0 %v13127_v47, %s12765_s1 }
 0x310   :  { %1639 = vrot.lane.b32.xlu0 %v13148_v42, %s12765_s1 }
 0x31c   :  { %927 = vadd.xlane.f32.xlu1 %v926_v52  ;;  %v1234_v52 = vsel %vm956_vm2, %v13294_v28, 0 }
 0x32d   :  { %1379 = vrot.lane.b32.xlu1 %v13085_v18, %s12765_s1 }
 0x331   :  { %1486 = vrot.lane.b32.xlu1 %v13082_v14, %s12765_s1 }
 0x335   :  { %1483 = vrot.lane.b32.xlu1 %v13123_v45, %s12765_s1 }
 0x339   :  { %1590 = vrot.lane.b32.xlu1 %v13117_v35, %s12765_s1 }
 0x33d   :  { %1587 = vrot.lane.b32.xlu1 %v13150_v58, %s12765_s1 }
 0x341   :  { %1694 = vrot.lane.b32.xlu1 %v13140_v56, %s12765_s1 }
 0x345   :  { %1691 = vrot.lane.b32.xlu1 %v13164_v1, %s12765_s1 }
 0x357   :  { %v907_v24 = vpop.xlane.xlu0 %906 }
 0x358   :  { %12330 = vrcp.f32 %v907_v24  ;;  %v13318_v24 = vpack.c.bf16 %v13115_v33, %v13115_v33 }
 0x35f   :  { %v913_v54 = vpop.xlane.xlu0 %912 }
 0x360   :  { %12332 = vrcp.f32 %v913_v54  ;;  %v910_v55 = vpop.xlane.xlu1 %909 }
 0x361   :  { %12334 = vrcp.f32 %v910_v55 }
 0x362   :  { %v12331_v60 = vpop.eup %12330 }
 0x363   :  { %v937_v2 = vmul.f32 %v12331_v60, %v13195_v59  ;;  %v13273_v59 = vpack.c.bf16 %v13110_v30, %v13110_v30  ;;  %v1096_v30 = vsel %vm956_vm2, %v13278_v15, 0 }
 0x365   :  { %v945_v7 = vpack.c.bf16 %v937_v2, %v937_v2  ;;  %v1142_v44 = vsel %vm956_vm2, %v13273_v59, 0 }
 0x367   :  { %11198 = vmatmul.mubr.msk.bf16.vlgmr.msra.gmra.mrb[28].mxu0 %vm856_vm3, %v945_v7  ;;  %v919_v9 = vpop.xlane.xlu0 %918 }
 0x368   :  { %11208 = vmatpush3.bf16.msra.mxu0 %v1050_v61  ;;  %12336 = vrcp.f32 %v919_v9  ;;  %v916_v10 = vpop.xlane.xlu1 %915  ;;  %11209 = vmatprep.mubr.msk.bf16.mxu0 %vm12764_vm0, %v15346_v37 }
 0x369   :  { %12338 = vrcp.f32 %v916_v10  ;;  %11219 = vmatprep.subr.bf16.mxu0 %v15346_v37 }
 0x36a   :  { %v12333_v5 = vpop.eup %12332 }
 0x36b   :  { %v12335_v11 = vpop.eup %12334  ;;  %v939_v13 = vmul.f32 %v12333_v5, %v13199_v22 }
 0x36c   :  { %v938_v16 = vmul.f32 %v12335_v11, %v13201_v23 }
 0x36d   :  { %v947_v17 = vpack.c.bf16 %v939_v13, %v939_v13 }
 0x36e   :  { %v946_v38 = vpack.c.bf16 %v938_v16, %v938_v16 }
 0x36f   :  { %11210 = vmatmul.mubr.msk.bf16.vlgmr.msra.gmra.mrb[32].mxu0 %vm856_vm3, %v947_v17  ;;  %v925_v21 = vpop.xlane.xlu0 %924 }
 0x370   :  { %11220 = vmatpush3.bf16.msra.mxu0 %v1142_v44  ;;  %12340 = vrcp.f32 %v925_v21  ;;  %11204 = vmatmul.mubr.msk.bf16.vlgmr.msra.gmra.mrb[28].mxu1 %vm856_vm3, %v946_v38  ;;  %v922_v22 = vpop.xlane.xlu1 %921 }
 0x371   :  { %11214 = vmatpush3.bf16.msra.mxu1 %v1096_v30  ;;  %12342 = vrcp.f32 %v922_v22  ;;  %11215 = vmatprep.mubr.msk.bf16.mxu1 %vm12764_vm0, %v15346_v37 }
 0x372   :  { %v12337_v12 = vpop.eup %12336  ;;  %11221 = vmatprep.mubr.msk.bf16.mxu0 %vm12764_vm0, %v15346_v37  ;;  %11225 = vmatprep.subr.bf16.mxu1 %v15346_v37 }
 0x373   :  { %v12339_v23 = vpop.eup %12338  ;;  %11231 = vmatprep.subr.bf16.mxu0 %v15346_v37  ;;  %v941_v8 = vmul.f32 %v12337_v12, %v13207_v26  ;;  %v1331_v48 = vpop.permute.xlu0 %1330 }
 0x374   :  { %v940_v32 = vmul.f32 %v12339_v23, %v13209_v27  ;;  %v1336_v7 = vsel %vm479_vm1, %v1331_v48, 0  ;;  %v1383_v61 = vpop.permute.xlu1 %1382 }
 0x375   :  { %v949_v34 = vpack.c.bf16 %v941_v8, %v941_v8  ;;  %v1388_v23 = vsel %vm479_vm1, %v1383_v61, 0 }
 0x376   :  { %v948_v36 = vpack.c.bf16 %v940_v32, %v940_v32 }
 0x377   :  { %11222 = vmatmul.mubr.msk.bf16.vlgmr.msra.gmra.mrb[36].mxu0 %vm856_vm3, %v949_v34  ;;  %v1435_v55 = vpop.permute.xlu0 %1434 }
 0x378   :  { %11232 = vmatpush3.bf16.msra.mxu0 %v1234_v52  ;;  %11216 = vmatmul.mubr.msk.bf16.vlgmr.msra.gmra.mrb[32].mxu1 %vm856_vm3, %v948_v36  ;;  %v1440_v9 = vsel %vm479_vm1, %v1435_v55, 0 }
 0x379   :  { %11226 = vmatpush3.bf16.msra.mxu1 %v1188_v25  ;;  %11227 = vmatprep.mubr.msk.bf16.mxu1 %vm12764_vm0, %v15346_v37 }
 0x37a   :  { %v12341_v41 = vpop.eup %12340  ;;  %11233 = vmatprep.mubr.msk.bf16.mxu0 %vm12764_vm0, %v15346_v37  ;;  %11237 = vmatprep.subr.bf16.mxu1 %v15346_v37 }
 0x37b   :  { %v12343_v26 = vpop.eup %12342  ;;  %v943_v27 = vmul.f32 %v12341_v41, %v13215_v6  ;;  %11243 = vmatprep.subr.bf16.mxu0 %v15346_v37  ;;  %v1280_v6 = vsel %vm956_vm2, %v13318_v24, 0  ;;  %v1432_v33 = vpop.permute.xlu0 %1431 }
 0x37c   :  { %v942_v54 = vmul.f32 %v12343_v26, %v13217_v29  ;;  %v1328_v29 = vpop.permute.xlu1 %1327 }
 0x37d   :  { %v951_v60 = vpack.c.bf16 %v943_v27, %v943_v27 }
 0x37e   :  { %v950_v2 = vpack.c.bf16 %v942_v54, %v942_v54 }
 0x37f   :  { %11234 = vmatmul.mubr.msk.bf16.vlgmr.msra.gmra.mrb[40].mxu0 %vm856_vm3, %v951_v60  ;;  %v1539_v10 = vpop.permute.xlu0 %1538 }
 0x380   :  { %11228 = vmatmul.mubr.msk.bf16.vlgmr.msra.gmra.mrb[36].mxu1 %vm856_vm3, %v950_v2  ;;  %11245 = vmatprep.mubr.msk.bf16.mxu0 %vm12764_vm0, %v15346_v37  ;;  %v1544_v11 = vsel %vm479_vm1, %v1539_v10, 0 }
 0x381   :  { %11238 = vmatpush3.bf16.msra.mxu1 %v1280_v6  ;;  %11244 = vmatpush3.bf16.xpose.msra.mxu0 %v1336_v7 }
 0x382   :  { %11255 = vmatprep.subr.bf16.mxu0 %v15346_v37  ;;  %11239 = vmatprep.mubr.msk.bf16.mxu1 %vm12764_vm0, %v15346_v37 }
 0x383   :  { %11249 = vmatprep.subr.bf16.mxu1 %v15346_v37  ;;  %v1536_v5 = vpop.permute.xlu0 %1535 }
 0x387   :  { %v1643_v13 = vpop.permute.xlu0 %1642 }
 0x388   :  { %11246 = vmatmul.mubr.msk.bf16.vlgmr.msra.gmra.mrb[44].mxu0 %vm479_vm1, %v1328_v29  ;;  %v1648_v16 = vsel %vm479_vm1, %v1643_v13, 0 }
 0x389   :  { %11256 = vmatpush3.bf16.xpose.msra.mxu0 %v1440_v9  ;;  %11257 = vmatprep.mubr.msk.bf16.mxu0 %vm12764_vm0, %v15346_v37 }
 0x38a   :  { %11267 = vmatprep.subr.bf16.mxu0 %v15346_v37 }
 0x38b   :  { %v1640_v17 = vpop.permute.xlu0 %1639 }
 0x390   :  { %11258 = vmatmul.mubr.msk.bf16.vlgmr.msra.gmra.mrb[48].mxu0 %vm479_vm1, %v1432_v33 }
 0x391   :  { %11268 = vmatpush3.bf16.xpose.msra.mxu0 %v1544_v11  ;;  %11269 = vmatprep.mubr.msk.bf16.mxu0 %vm12764_vm0, %v15346_v37 }
 0x392   :  { %11279 = vmatprep.subr.bf16.mxu0 %v15346_v37 }
 0x398   :  { %11270 = vmatmul.mubr.msk.bf16.vlgmr.msra.gmra.mrb[52].mxu0 %vm479_vm1, %v1536_v5 }
 0x399   :  { %11280 = vmatpush3.bf16.xpose.msra.mxu0 %v1648_v16  ;;  %11281 = vmatprep.mubr.msk.bf16.mxu0 %vm12764_vm0, %v15346_v37 }
 0x39a   :  { %11291 = vmatprep.subr.bf16.mxu0 %v15346_v37 }
 0x3a0   :  { %11282 = vmatmul.mubr.msk.bf16.vlgmr.msra.gmra.mrb[56].mxu0 %vm479_vm1, %v1640_v17 }
 0x3a1   :  { %11293 = vmatprep.mubr.msk.bf16.mxu0 %vm12764_vm0, %v15346_v37 }
 0x3a9   :  { %v928_v38 = vpop.xlane.xlu1 %927 }
 0x3aa   :  { %12344 = vrcp.f32 %v928_v38 }
 0x3ad   :  { %v1380_v44 = vpop.permute.xlu1 %1379 }
 0x3b1   :  { %v1487_v22 = vpop.permute.xlu1 %1486 }
 0x3b2   :  { %v1492_v32 = vsel %vm479_vm1, %v1487_v22, 0 }
 0x3b4   :  { %v12345_v21 = vpop.eup %12344 }
 0x3b5   :  { %v944_v30 = vmul.f32 %v12345_v21, %v13242_v51  ;;  %v1484_v8 = vpop.permute.xlu1 %1483 }
 0x3b7   :  { %v952_v12 = vpack.c.bf16 %v944_v30, %v944_v30 }
 0x3b9   :  { %11240 = vmatmul.mubr.msk.bf16.vlgmr.msra.gmra.mrb[40].mxu1 %vm856_vm3, %v952_v12  ;;  %v1591_v34 = vpop.permute.xlu1 %1590 }
 0x3ba   :  { %11250 = vmatpush3.bf16.xpose.msra.mxu1 %v1388_v23  ;;  %11251 = vmatprep.mubr.msk.bf16.mxu1 %vm12764_vm0, %v15346_v37  ;;  %v1596_v36 = vsel %vm479_vm1, %v1591_v34, 0 }
 0x3bb   :  { %11261 = vmatprep.subr.bf16.mxu1 %v15346_v37 }
 0x3bd   :  { %v1588_v51 = vpop.permute.xlu1 %1587 }
 0x3c1   :  { %11252 = vmatmul.mubr.msk.bf16.vlgmr.msra.gmra.mrb[44].mxu1 %vm479_vm1, %v1380_v44  ;;  %v1695_v48 = vpop.permute.xlu1 %1694 }
 0x3c2   :  { %11262 = vmatpush3.bf16.xpose.msra.mxu1 %v1492_v32  ;;  %11263 = vmatprep.mubr.msk.bf16.mxu1 %vm12764_vm0, %v15346_v37  ;;  %v1700_v52 = vsel %vm479_vm1, %v1695_v48, 0 }
 0x3c3   :  { %11273 = vmatprep.subr.bf16.mxu1 %v15346_v37 }
 0x3c5   :  { %v1692_v25 = vpop.permute.xlu1 %1691 }
 0x3c9   :  { %11264 = vmatmul.mubr.msk.bf16.vlgmr.msra.gmra.mrb[48].mxu1 %vm479_vm1, %v1484_v8 }
 0x3ca   :  { %11274 = vmatpush3.bf16.xpose.msra.mxu1 %v1596_v36  ;;  %11275 = vmatprep.mubr.msk.bf16.mxu1 %vm12764_vm0, %v15346_v37 }
 0x3cb   :  { %11285 = vmatprep.subr.bf16.mxu1 %v15346_v37 }
 0x3d1   :  { %11276 = vmatmul.mubr.msk.bf16.vlgmr.msra.gmra.mrb[52].mxu1 %vm479_vm1, %v1588_v51 }
 0x3d2   :  { %11286 = vmatpush3.bf16.xpose.msra.mxu1 %v1700_v52  ;;  %11287 = vmatprep.mubr.msk.bf16.mxu1 %vm12764_vm0, %v15346_v37 }
 0x3d3   :  { %11297 = vmatprep.subr.bf16.mxu1 %v15346_v37 }
 0x3d9   :  { %11288 = vmatmul.mubr.msk.bf16.vlgmr.msra.gmra.mrb[56].mxu1 %vm479_vm1, %v1692_v25 }
 0x3da   :  { %11299 = vmatprep.mubr.msk.bf16.mxu1 %vm12764_vm0, %v15346_v37 }
 0x43a   :  { %v13374_v41 = vpop.f32.mrb[28].mxu0 }
 0x43b   :  { %v11199_v26 = vpop.f32.mrb[29].mxu0 }
 0x43c   :  { %v997_v27 = vpop.f32.mrb[30].mxu0 }
 0x43d   :  { %v11200_v54 = vpop.f32.mrb[31].mxu0 }
 0x442   :  { %v13376_v55 = vpop.f32.mrb[32].mxu0 }
 0x443   :  { %v13378_v60 = vpop.f32.mrb[28].mxu1  ;;  %v11211_v2 = vpop.f32.mrb[33].mxu0 }
 0x444   :  { %v1322_v7 = vpack.c.bf16 %v13378_v60, %v13374_v41  ;;  %v11205_v6 = vpop.f32.mrb[29].mxu1  ;;  %v1089_v61 = vpop.f32.mrb[34].mxu0 }
 0x445   :  { %v1043_v33 = vpop.f32.mrb[30].mxu1  ;;  %v11212_v29 = vpop.f32.mrb[35].mxu0 }
 0x446   :  { %v11206_v9 = vpop.f32.mrb[31].mxu1 }
 0x44a   :  { %v13382_v10 = vpop.f32.mrb[36].mxu0 }
 0x44b   :  { %v13384_v5 = vpop.f32.mrb[32].mxu1  ;;  %v11223_v11 = vpop.f32.mrb[37].mxu0 }
 0x44c   :  { %v1323_v13 = vpack.c.bf16 %v13384_v5, %v13376_v55  ;;  %v11217_v16 = vpop.f32.mrb[33].mxu1  ;;  %v1181_v17 = vpop.f32.mrb[38].mxu0 }
 0x44d   :  { %v1135_v38 = vpop.f32.mrb[34].mxu1  ;;  %v11224_v44 = vpop.f32.mrb[39].mxu0 }
 0x44e   :  { %v11218_v21 = vpop.f32.mrb[35].mxu1 }
 0x452   :  { %v13388_v30 = vpop.f32.mrb[40].mxu0 }
 0x453   :  { %v13390_v22 = vpop.f32.mrb[36].mxu1  ;;  %v11235_v12 = vpop.f32.mrb[41].mxu0 }
 0x454   :  { %v1324_v23 = vpack.c.bf16 %v13390_v22, %v13382_v10  ;;  %v11229_v8 = vpop.f32.mrb[37].mxu1  ;;  %v1273_v32 = vpop.f32.mrb[42].mxu0 }
 0x455   :  { %v1227_v34 = vpop.f32.mrb[38].mxu1  ;;  %v11236_v51 = vpop.f32.mrb[43].mxu0 }
 0x456   :  { %v11230_v36 = vpop.f32.mrb[39].mxu1 }
 0x45b   :  { %v1372_v48 = vpop.f32.mrb[44].mxu0 }
 0x45c   :  { %v11247_v52 = vpop.f32.mrb[45].mxu0  ;;  %v13394_v25 = vmul.f32 0.17677669, %v1372_v48 }
 0x45d   :  { %v1375_v26 = vpop.f32.mrb[46].mxu0 }
 0x45e   :  { %v11248_v27 = vpop.f32.mrb[47].mxu0  ;;  %v1750_v54 = vsel %vm856_vm3, %v13394_v25, -inf }
 0x45f   :  { %1751 = vmax.xlane.f32.xlu0 %v1750_v54 }
 0x463   :  { %v1476_v2 = vpop.f32.mrb[48].mxu0 }
 0x464   :  { %v11259_v6 = vpop.f32.mrb[49].mxu0  ;;  %v1744_v61 = vmul.f32 0.17677669, %v1476_v2 }
 0x465   :  { %v1479_v33 = vpop.f32.mrb[50].mxu0 }
 0x466   :  { %v11260_v29 = vpop.f32.mrb[51].mxu0  ;;  %v1756_v9 = vsel %vm856_vm3, %v1744_v61, -inf }
 0x467   :  { %1757 = vmax.xlane.f32.xlu0 %v1756_v9 }
 0x46b   :  { %v1580_v11 = vpop.f32.mrb[52].mxu0 }
 0x46c   :  { %v11271_v16 = vpop.f32.mrb[53].mxu0 }
 0x46d   :  { %v1583_v17 = vpop.f32.mrb[54].mxu0 }
 0x46e   :  { %v11272_v38 = vpop.f32.mrb[55].mxu0 }
 0x473   :  { %v1684_v44 = vpop.f32.mrb[56].mxu0 }
 0x474   :  { %v11283_v21 = vpop.f32.mrb[57].mxu0 }
 0x475   :  { %v1687_v12 = vpop.f32.mrb[58].mxu0  ;;  %v1746_v21 = vmul.f32 0.17677669, %v1580_v11 }
 0x476   :  { %v11284_v8 = vpop.f32.mrb[59].mxu0 }
 0x477   :  { %v1762_v12 = vsel %vm856_vm3, %v1746_v21, -inf  ;;  %v1748_v8 = vmul.f32 0.17677669, %v1684_v44 }
 0x48c   :  { %v13399_v32 = vpop.f32.mrb[40].mxu1 }
 0x48d   :  { %v1325_v34 = vpack.c.bf16 %v13399_v32, %v13388_v30  ;;  %v11241_v51 = vpop.f32.mrb[41].mxu1 }
 0x48e   :  { %v1319_v36 = vpop.f32.mrb[42].mxu1 }
 0x48f   :  { %v11242_v48 = vpop.f32.mrb[43].mxu1 }
 0x494   :  { %v1424_v52 = vpop.f32.mrb[44].mxu1 }
 0x495   :  { %v11253_v26 = vpop.f32.mrb[45].mxu1  ;;  %v1743_v27 = vmul.f32 0.17677669, %v1424_v52 }
 0x496   :  { %v1427_v54 = vpop.f32.mrb[46].mxu1 }
 0x497   :  { %v11254_v2 = vpop.f32.mrb[47].mxu1  ;;  %v1753_v6 = vsel %vm856_vm3, %v1743_v27, -inf  ;;  %v1768_v54 = vsel %vm856_vm3, %v1748_v8, -inf }
 0x498   :  { %1754 = vmax.xlane.f32.xlu1 %v1753_v6 }
 0x49c   :  { %v1528_v33 = vpop.f32.mrb[48].mxu1 }
 0x49d   :  { %v11265_v29 = vpop.f32.mrb[49].mxu1  ;;  %v13404_v9 = vmul.f32 0.17677669, %v1528_v33 }
 0x49e   :  { %v1531_v16 = vpop.f32.mrb[50].mxu1 }
 0x49f   :  { %v11266_v17 = vpop.f32.mrb[51].mxu1  ;;  %v1759_v38 = vsel %vm856_vm3, %v13404_v9, -inf }
 0x4a0   :  { %1760 = vmax.xlane.f32.xlu0 %v1759_v38 }
 0x4a4   :  { %1763 = vmax.xlane.f32.xlu0 %v1762_v12  ;;  %v1632_v51 = vpop.f32.mrb[52].mxu1 }
 0x4a5   :  { %v11277_v36 = vpop.f32.mrb[53].mxu1  ;;  %v13409_v48 = vmul.f32 0.17677669, %v1632_v51 }
 0x4a6   :  { %v1635_v52 = vpop.f32.mrb[54].mxu1 }
 0x4a7   :  { %v11278_v26 = vpop.f32.mrb[55].mxu1  ;;  %v1765_v2 = vsel %vm856_vm3, %v13409_v48, -inf }
 0x4a8   :  { %1769 = vmax.xlane.f32.xlu0 %v1768_v54  ;;  %1766 = vmax.xlane.f32.xlu1 %v1765_v2 }
 0x4ac   :  { %v1736_v6 = vpop.f32.mrb[56].mxu1 }
 0x4ad   :  { %v11289_v11 = vpop.f32.mrb[57].mxu1  ;;  %v13420_v44 = vmul.f32 0.17677669, %v1736_v6 }
 0x4ae   :  { %v1739_v33 = vpop.f32.mrb[58].mxu1 }
 0x4af   :  { %v11290_v29 = vpop.f32.mrb[59].mxu1  ;;  %v1771_v16 = vsel %vm856_vm3, %v13420_v44, -inf }
 0x4b9   :  { %1896 = vrot.lane.b32.xlu1 %v13176_v4, %s12765_s1 }
 0x4bd   :  { %1945 = vrot.lane.b32.xlu1 %v13262_v49, %s12765_s1 }
 0x4be   :  { %1847 = vrot.lane.b32.xlu0 %v13174_v3, %s12765_s1 }
 0x4e1   :  { %1772 = vmax.xlane.f32.xlu1 %v1771_v16 }
 0x4ec   :  { %v1752_v17 = vpop.xlane.xlu0 %1751 }
 0x4ed   :  { %v1774_v38 = vsub.f32 %v13394_v25, %v1752_v17 }
 0x4ef   :  { %v1782_v12 = vmul.f32 1.442695, %v1774_v38 }
 0x4f1   :  { %12346 = vpow2.f32 %v1782_v12 }
 0x4f2   :  { %1994 = vrot.lane.b32.xlu1 %v13278_v15, %s12765_s1 }
 0x4f4   :  { %v1758_v51 = vpop.xlane.xlu0 %1757 }
 0x4f5   :  { %v1776_v36 = vsub.f32 %v1744_v61, %v1758_v51 }
 0x4f7   :  { %v1786_v52 = vmul.f32 1.442695, %v1776_v36 }
 0x4f9   :  { %12348 = vpow2.f32 %v1786_v52 }
 0x4fb   :  { %v13427_v26 = vpop.eup %12346 }
 0x4fc   :  { %v1798_v54 = vsel %vm856_vm3, %v13427_v26, 0.0 }
 0x4fd   :  { %1799 = vadd.xlane.f32.xlu0 %v1798_v54 }
 0x503   :  { %v13431_v2 = vpop.eup %12348 }
 0x504   :  { %v1804_v25 = vsel %vm856_vm3, %v13431_v2, 0.0 }
 0x505   :  { %1805 = vadd.xlane.f32.xlu0 %v1804_v25 }
 0x51b   :  { %2043 = vrot.lane.b32.xlu0 %v13273_v59, %s12765_s1 }
 0x525   :  { %v1755_v6 = vpop.xlane.xlu1 %1754 }
 0x526   :  { %v1775_v11 = vsub.f32 %v1743_v27, %v1755_v6 }
 0x528   :  { %v1784_v61 = vmul.f32 1.442695, %v1775_v11 }
 0x52a   :  { %12350 = vpow2.f32 %v1784_v61 }
 0x52d   :  { %v1761_v33 = vpop.xlane.xlu0 %1760 }
 0x531   :  { %v1764_v29 = vpop.xlane.xlu0 %1763 }
 0x532   :  { %v1778_v16 = vsub.f32 %v1746_v21, %v1764_v29 }
 0x534   :  { %v13437_v17 = vpop.eup %12350  ;;  %v1790_v38 = vmul.f32 1.442695, %v1778_v16 }
 0x535   :  { %v1770_v12 = vpop.xlane.xlu0 %1769  ;;  %v1767_v51 = vpop.xlane.xlu1 %1766  ;;  %v1801_v36 = vsel %vm856_vm3, %v13437_v17, 0.0 }
 0x536   :  { %12352 = vpow2.f32 %v1790_v38  ;;  %v1780_v52 = vsub.f32 %v1748_v8, %v1770_v12  ;;  %1802 = vadd.xlane.f32.xlu1 %v1801_v36  ;;  %v1779_v16 = vsub.f32 %v13409_v48, %v1767_v51 }
 0x538   :  { %v1794_v54 = vmul.f32 1.442695, %v1780_v52  ;;  %v1792_v38 = vmul.f32 1.442695, %v1779_v16 }
 0x539   :  { %v1848_v25 = vpop.permute.xlu0 %1847  ;;  %v1897_v53 = vpop.permute.xlu1 %1896 }
 0x53a   :  { %12354 = vpow2.f32 %v1794_v54  ;;  %v1853_v27 = vsel %vm956_vm2, %v1848_v25, 0  ;;  %v1902_v6 = vsel %vm956_vm2, %v1897_v53, 0  ;;  %v1777_v53 = vsub.f32 %v13404_v9, %v1761_v33 }
 0x53b   :  { %11292 = vmatpush3.bf16.msra.mxu0 %v1853_v27  ;;  %11298 = vmatpush3.bf16.msra.mxu1 %v1902_v6 }
 0x53c   :  { %11303 = vmatprep.subr.bf16.mxu0 %v15346_v37  ;;  %11309 = vmatprep.subr.bf16.mxu1 %v15346_v37  ;;  %v1788_v29 = vmul.f32 1.442695, %v1777_v53 }
 0x53d   :  { %v1946_v9 = vpop.permute.xlu1 %1945 }
 0x53e   :  { %12356 = vpow2.f32 %v1788_v29  ;;  %v1951_v29 = vsel %vm956_vm2, %v1946_v9, 0 }
 0x53f   :  { %12358 = vpow2.f32 %v1792_v38 }
 0x540   :  { %v13445_v21 = vpop.eup %12352 }
 0x541   :  { %v1810_v8 = vsel %vm856_vm3, %v13445_v21, 0.0 }
 0x542   :  { %1811 = vadd.xlane.f32.xlu0 %v1810_v8 }
 0x544   :  { %v13449_v11 = vpop.eup %12354 }
 0x545   :  { %v1816_v61 = vsel %vm856_vm3, %v13449_v11, 0.0 }
 0x546   :  { %1817 = vadd.xlane.f32.xlu0 %v1816_v61 }
 0x547   :  { %2092 = vrot.lane.b32.xlu1 %v13300_v31, %s12765_s1 }
 0x548   :  { %v13463_v12 = vpop.eup %12356 }
 0x549   :  { %v1807_v48 = vsel %vm856_vm3, %v13463_v12, 0.0  ;;  %v13469_v33 = vpop.eup %12358 }
 0x54a   :  { %v1813_v36 = vsel %vm856_vm3, %v13469_v33, 0.0 }
 0x55c   :  { %2141 = vrot.lane.b32.xlu0 %v13294_v28, %s12765_s1 }
 0x560   :  { %2422 = vrot.lane.b32.xlu0 %v13040_v50, %s12756_s7 }
 0x564   :  { %2472 = vrot.lane.b32.xlu0 %v13048_v57, %s12756_s7 }
 0x568   :  { %2522 = vrot.lane.b32.xlu0 %v13057_v63, %s12756_s7 }
 0x56b   :  { %1808 = vadd.xlane.f32.xlu1 %v1807_v48 }
 0x56c   :  { %2572 = vrot.lane.b32.xlu0 %v13082_v14, %s12756_s7 }
 0x56e   :  { %v1773_v51 = vpop.xlane.xlu1 %1772 }
 0x56f   :  { %v1781_v52 = vsub.f32 %v13420_v44, %v1773_v51  ;;  %1814 = vadd.xlane.f32.xlu1 %v1813_v36 }
 0x570   :  { %2622 = vrot.lane.b32.xlu0 %v13089_v20, %s12756_s7 }
 0x571   :  { %v1796_v54 = vmul.f32 1.442695, %v1781_v52 }
 0x573   :  { %12360 = vpow2.f32 %v1796_v54 }
 0x574   :  { %2620 = vrot.lane.b32.xlu0 %v13125_v46, %s12756_s7 }
 0x578   :  { %2722 = vrot.lane.b32.xlu0 %v13127_v47, %s12756_s7 }
 0x57c   :  { %2720 = vrot.lane.b32.xlu0 %v13148_v42, %s12756_s7 }
 0x57d   :  { %v13484_v25 = vpop.eup %12360 }
 0x57e   :  { %v1819_v44 = vsel %vm856_vm3, %v13484_v25, 0.0 }
 0x57f   :  { %1820 = vadd.xlane.f32.xlu1 %v1819_v44 }
 0x58a   :  { %v1800_v27 = vpop.xlane.xlu0 %1799 }
 0x58b   :  { %12362 = vrcp.f32 %v1800_v27 }
 0x590   :  { %2190 = vrot.lane.b32.xlu1 %v13318_v24, %s12765_s1 }
 0x592   :  { %v1806_v6 = vpop.xlane.xlu0 %1805 }
 0x593   :  { %12364 = vrcp.f32 %v1806_v6 }
 0x594   :  { %2420 = vrot.lane.b32.xlu1 %v13055_v62, %s12756_s7 }
 0x595   :  { %v12363_v8 = vpop.eup %12362 }
 0x596   :  { %v1830_v61 = vmul.f32 %v12363_v8, %v13427_v26  ;;  %v2044_v38 = vpop.permute.xlu0 %2043 }
 0x597   :  { %v2049_v9 = vsel %vm956_vm2, %v2044_v38, 0 }
 0x598   :  { %2470 = vrot.lane.b32.xlu1 %v13085_v18, %s12756_s7  ;;  %v1838_v53 = vpack.c.bf16 %v1830_v61, %v1830_v61 }
 0x59a   :  { %11294 = vmatmul.mubr.msk.bf16.vlgmr.msra.gmra.mrb[60].mxu0 %vm856_vm3, %v1838_v53 }
 0x59b   :  { %11304 = vmatpush3.bf16.msra.mxu0 %v1951_v29  ;;  %11305 = vmatprep.mubr.msk.bf16.mxu0 %vm12764_vm0, %v15346_v37 }
 0x59c   :  { %2520 = vrot.lane.b32.xlu1 %v13087_v19, %s12756_s7  ;;  %11315 = vmatprep.subr.bf16.mxu0 %v15346_v37 }
 0x59d   :  { %v12365_v16 = vpop.eup %12364 }
 0x59e   :  { %v1832_v26 = vmul.f32 %v12365_v16, %v13431_v2  ;;  %v1995_v2 = vpop.permute.xlu1 %1994 }
 0x59f   :  { %v2000_v27 = vsel %vm956_vm2, %v1995_v2, 0 }
 0x5a0   :  { %2570 = vrot.lane.b32.xlu1 %v13123_v45, %s12756_s7  ;;  %v1840_v48 = vpack.c.bf16 %v1832_v26, %v1832_v26 }
 0x5a2   :  { %11306 = vmatmul.mubr.msk.bf16.vlgmr.msra.gmra.mrb[64].mxu0 %vm856_vm3, %v1840_v48 }
 0x5a3   :  { %11316 = vmatpush3.bf16.msra.mxu0 %v2049_v9  ;;  %11317 = vmatprep.mubr.msk.bf16.mxu0 %vm12764_vm0, %v15346_v37 }
 0x5a4   :  { %2672 = vrot.lane.b32.xlu1 %v13117_v35, %s12756_s7  ;;  %11327 = vmatprep.subr.bf16.mxu0 %v15346_v37 }
 0x5a8   :  { %2670 = vrot.lane.b32.xlu1 %v13150_v58, %s12756_s7 }
 0x5ac   :  { %2772 = vrot.lane.b32.xlu1 %v13140_v56, %s12756_s7 }
 0x5b0   :  { %2770 = vrot.lane.b32.xlu1 %v13164_v1, %s12756_s7 }
 0x5c3   :  { %v1803_v51 = vpop.xlane.xlu1 %1802 }
 0x5c4   :  { %12366 = vrcp.f32 %v1803_v51 }
 0x5c7   :  { %v2093_v48 = vpop.permute.xlu1 %2092 }
 0x5ce   :  { %v12367_v36 = vpop.eup %12366 }
 0x5cf   :  { %v1812_v52 = vpop.xlane.xlu0 %1811  ;;  %v1831_v54 = vmul.f32 %v12367_v36, %v13437_v17 }
 0x5d0   :  { %12368 = vrcp.f32 %v1812_v52 }
 0x5d1   :  { %v1839_v44 = vpack.c.bf16 %v1831_v54, %v1831_v54  ;;  %v2098_v54 = vsel %vm956_vm2, %v2093_v48, 0 }
 0x5d3   :  { %v1818_v6 = vpop.xlane.xlu0 %1817  ;;  %11300 = vmatmul.mubr.msk.bf16.vlgmr.msra.gmra.mrb[60].mxu1 %vm856_vm3, %v1839_v44 }
 0x5d4   :  { %12370 = vrcp.f32 %v1818_v6  ;;  %11310 = vmatpush3.bf16.msra.mxu1 %v2000_v27  ;;  %11311 = vmatprep.mubr.msk.bf16.mxu1 %vm12764_vm0, %v15346_v37 }
 0x5d5   :  { %11321 = vmatprep.subr.bf16.mxu1 %v15346_v37 }
 0x5d7   :  { %v2142_v53 = vpop.permute.xlu0 %2141 }
 0x5d8   :  { %v2147_v16 = vsel %vm956_vm2, %v2142_v53, 0 }
 0x5da   :  { %v12369_v8 = vpop.eup %12368 }
 0x5db   :  { %v1834_v61 = vmul.f32 %v12369_v8, %v13445_v21 }
 0x5dd   :  { %v1842_v29 = vpack.c.bf16 %v1834_v61, %v1834_v61 }
 0x5de   :  { %v12371_v17 = vpop.eup %12370 }
 0x5df   :  { %11318 = vmatmul.mubr.msk.bf16.vlgmr.msra.gmra.mrb[68].mxu0 %vm856_vm3, %v1842_v29  ;;  %v1836_v26 = vmul.f32 %v12371_v17, %v13449_v11 }
 0x5e0   :  { %11328 = vmatpush3.bf16.msra.mxu0 %v2147_v16  ;;  %11329 = vmatprep.mubr.msk.bf16.mxu0 %vm12764_vm0, %v15346_v37 }
 0x5e1   :  { %v1844_v38 = vpack.c.bf16 %v1836_v26, %v1836_v26 }
 0x5e7   :  { %11330 = vmatmul.mubr.msk.bf16.vlgmr.msra.gmra.mrb[72].mxu0 %vm856_vm3, %v1844_v38 }
 0x5f8   :  { %v1809_v9 = vpop.xlane.xlu1 %1808 }
 0x5f9   :  { %12372 = vrcp.f32 %v1809_v9 }
 0x5fc   :  { %v1815_v21 = vpop.xlane.xlu1 %1814 }
 0x5fd   :  { %12374 = vrcp.f32 %v1815_v21 }
 0x603   :  { %v12373_v2 = vpop.eup %12372 }
 0x604   :  { %v1833_v51 = vmul.f32 %v12373_v2, %v13463_v12 }
 0x606   :  { %v1841_v36 = vpack.c.bf16 %v1833_v51, %v1833_v51 }
 0x607   :  { %v12375_v52 = vpop.eup %12374 }
 0x608   :  { %11312 = vmatmul.mubr.msk.bf16.vlgmr.msra.gmra.mrb[64].mxu1 %vm856_vm3, %v1841_v36  ;;  %v1835_v11 = vmul.f32 %v12375_v52, %v13469_v33  ;;  %v2423_v33 = vpop.permute.xlu0 %2422 }
 0x609   :  { %11322 = vmatpush3.bf16.msra.mxu1 %v2098_v54  ;;  %11323 = vmatprep.mubr.msk.bf16.mxu1 %vm12764_vm0, %v15346_v37  ;;  %v2428_v29 = vsel %vm479_vm1, %v2423_v33, 0 }
 0x60a   :  { %11333 = vmatprep.subr.bf16.mxu1 %v15346_v37  ;;  %v1843_v27 = vpack.c.bf16 %v1835_v11, %v1835_v11  ;;  %v12170_v11 = vld [vmem:[#allocation2 + $0x10] sm:$0xff]  }
 0x60b   :  { %11339 = vmatprep.subr.bf16.mxu0 %v12170_v11 }
 0x60c   :  { %v1821_v44 = vpop.xlane.xlu1 %1820  ;;  %v2473_v16 = vpop.permute.xlu0 %2472  ;;  %11340 = vmatpush3.bf16.msra.mxu0 %v12170_v11 }
 0x60d   :  { %12376 = vrcp.f32 %v1821_v44  ;;  %v2478_v38 = vsel %vm479_vm1, %v2473_v16, 0  ;;  %v12171_v44 = vld [vmem:[#allocation2 + $0x18] sm:$0xff]  }
 0x60e   :  { %11341 = vmatprep.subr.bf16.mxu0 %v12171_v44 }
 0x610   :  { %11324 = vmatmul.mubr.msk.bf16.vlgmr.msra.gmra.mrb[68].mxu1 %vm856_vm3, %v1843_v27  ;;  %v2191_v12 = vpop.permute.xlu1 %2190  ;;  %11342 = vmatpush3.bf16.msra.mxu0 %v12171_v44 }
 0x611   :  { %v2196_v6 = vsel %vm956_vm2, %v2191_v12, 0  ;;  %11335 = vmatprep.mubr.msk.bf16.mxu1 %vm12764_vm0, %v15346_v37 }
 0x612   :  { %11334 = vmatpush3.bf16.msra.mxu1 %v2196_v6 }
 0x613   :  { %11363 = vmatprep.subr.bf16.mxu1 %v15346_v37 }
 0x614   :  { %v2421_v17 = vpop.permute.xlu1 %2420 }
 0x617   :  { %v12377_v8 = vpop.eup %12376 }
 0x618   :  { %v1837_v61 = vmul.f32 %v12377_v8, %v13484_v25  ;;  %v2471_v26 = vpop.permute.xlu1 %2470  ;;  %v2523_v25 = vpop.permute.xlu0 %2522  ;;  %v12172_v8 = vld [vmem:[#allocation2] sm:$0xff]  }
 0x619   :  { %v2528_v9 = vsel %vm479_vm1, %v2523_v25, 0  ;;  %11351 = vmatprep.subr.bf16.mxu0 %v12172_v8 }
 0x61a   :  { %v1845_v53 = vpack.c.bf16 %v1837_v61, %v1837_v61 }
 0x61c   :  { %11336 = vmatmul.mubr.msk.bf16.vlgmr.msra.gmra.mrb[72].mxu1 %vm856_vm3, %v1845_v53  ;;  %v2521_v48 = vpop.permute.xlu1 %2520  ;;  %v2573_v2 = vpop.permute.xlu0 %2572 }
 0x61d   :  { %11364 = vmatpush3.bf16.xpose.msra.mxu1 %v2428_v29  ;;  %11365 = vmatprep.mubr.msk.bf16.mxu1 %vm12764_vm0, %v15346_v37  ;;  %v2578_v51 = vsel %vm479_vm1, %v2573_v2, 0 }
 0x61e   :  { %11369 = vmatprep.subr.bf16.mxu1 %v15346_v37 }
 0x620   :  { %v2571_v21 = vpop.permute.xlu1 %2570 }
 0x624   :  { %11366 = vmatmul.mubr.msk.bf16.vlgmr.msra.gmra.mrb[76].mxu1 %vm479_vm1, %v2421_v17  ;;  %v2673_v36 = vpop.permute.xlu1 %2672 }
 0x625   :  { %11370 = vmatpush3.bf16.xpose.msra.mxu1 %v2478_v38  ;;  %11371 = vmatprep.mubr.msk.bf16.mxu1 %vm12764_vm0, %v15346_v37  ;;  %v2678_v54 = vsel %vm479_vm1, %v2673_v36, 0 }
 0x626   :  { %11375 = vmatprep.subr.bf16.mxu1 %v15346_v37 }
 0x628   :  { %v2671_v52 = vpop.permute.xlu1 %2670 }
 0x62c   :  { %11372 = vmatmul.mubr.msk.bf16.vlgmr.msra.gmra.mrb[80].mxu1 %vm479_vm1, %v2471_v26  ;;  %v2773_v27 = vpop.permute.xlu1 %2772 }
 0x62d   :  { %11376 = vmatpush3.bf16.xpose.msra.mxu1 %v2528_v9  ;;  %11377 = vmatprep.mubr.msk.bf16.mxu1 %vm12764_vm0, %v15346_v37  ;;  %v2778_v12 = vsel %vm479_vm1, %v2773_v27, 0 }
 0x62e   :  { %11381 = vmatprep.subr.bf16.mxu1 %v15346_v37 }
 0x630   :  { %v2771_v6 = vpop.permute.xlu1 %2770 }
 0x634   :  { %11378 = vmatmul.mubr.msk.bf16.vlgmr.msra.gmra.mrb[84].mxu1 %vm479_vm1, %v2521_v48 }
 0x635   :  { %11382 = vmatpush3.bf16.xpose.msra.mxu1 %v2578_v51  ;;  %11383 = vmatprep.mubr.msk.bf16.mxu1 %vm12764_vm0, %v15346_v37 }
 0x636   :  { %11393 = vmatprep.subr.bf16.mxu1 %v15346_v37 }
 0x63c   :  { %11384 = vmatmul.mubr.msk.bf16.vlgmr.msra.gmra.mrb[88].mxu1 %vm479_vm1, %v2571_v21 }
 0x63d   :  { %11394 = vmatpush3.bf16.xpose.msra.mxu1 %v2678_v54  ;;  %11395 = vmatprep.mubr.msk.bf16.mxu1 %vm12764_vm0, %v15346_v37 }
 0x63e   :  { %11405 = vmatprep.subr.bf16.mxu1 %v15346_v37 }
 0x644   :  { %11396 = vmatmul.mubr.msk.bf16.vlgmr.msra.gmra.mrb[92].mxu1 %vm479_vm1, %v2671_v52 }
 0x645   :  { %11406 = vmatpush3.bf16.xpose.msra.mxu1 %v2778_v12  ;;  %11407 = vmatprep.mubr.msk.bf16.mxu1 %vm12764_vm0, %v15346_v37 }
 0x646   :  { %11417 = vmatprep.subr.bf16.mxu1 %v15346_v37 }
 0x64c   :  { %11408 = vmatmul.mubr.msk.bf16.vlgmr.msra.gmra.mrb[96].mxu1 %vm479_vm1, %v2771_v6 }
 0x64d   :  { %11419 = vmatprep.mubr.msk.bf16.mxu1 %vm12764_vm0, %v15346_v37 }
 0x66d   :  { %v1889_v61 = vpop.f32.mrb[60].mxu0 }
 0x66e   :  { %v11295_v33 = vpop.f32.mrb[61].mxu0 }
 0x66f   :  { %v1892_v53 = vpop.f32.mrb[62].mxu0 }
 0x670   :  { %v11296_v29 = vpop.f32.mrb[63].mxu0 }
 0x671   :  { %v12173_v29 = vld [vmem:[#allocation2 + $0x8] sm:$0xff]  }
 0x675   :  { %v1987_v17 = vpop.f32.mrb[64].mxu0 }
 0x676   :  { %v11307_v16 = vpop.f32.mrb[65].mxu0 }
 0x677   :  { %v1990_v26 = vpop.f32.mrb[66].mxu0 }
 0x678   :  { %v11308_v38 = vpop.f32.mrb[67].mxu0 }
 0x6a6   :  { %v1938_v25 = vpop.f32.mrb[60].mxu1 }
 0x6a7   :  { %v2238_v48 = vpack.c.bf16 %v1938_v25, %v1889_v61  ;;  %v11301_v9 = vpop.f32.mrb[61].mxu1 }
 0x6a8   :  { %v1941_v21 = vpop.f32.mrb[62].mxu1 }
 0x6a9   :  { %v11302_v2 = vpop.f32.mrb[63].mxu1  ;;  %11343 = vmatprep.mubr.msk.bf16.mxu0 %vm479_vm1, %v2238_v48 }
 0x6b2   :  { %v2085_v51 = vpop.f32.mrb[68].mxu0 }
 0x6b3   :  { %v11319_v36 = vpop.f32.mrb[69].mxu0 }
 0x6b4   :  { %v2088_v52 = vpop.f32.mrb[70].mxu0 }
 0x6b5   :  { %v11320_v54 = vpop.f32.mrb[71].mxu0 }
 0x6ba   :  { %v2183_v11 = vpop.f32.mrb[72].mxu0 }
 0x6bb   :  { %v11331_v44 = vpop.f32.mrb[73].mxu0 }
 0x6bc   :  { %v2186_v27 = vpop.f32.mrb[74].mxu0 }
 0x6bd   :  { %v11332_v12 = vpop.f32.mrb[75].mxu0 }
 0x6db   :  { %v2036_v6 = vpop.f32.mrb[64].mxu1 }
 0x6dc   :  { %v2239_v33 = vpack.c.bf16 %v2036_v6, %v1987_v17  ;;  %v11313_v53 = vpop.f32.mrb[65].mxu1 }
 0x6dd   :  { %v2039_v16 = vpop.f32.mrb[66].mxu1 }
 0x6de   :  { %v11314_v26 = vpop.f32.mrb[67].mxu1  ;;  %11344 = vmatmul.mubr.msk.bf16.vlgmr.msra.gmra.mrb[76].mxu0 %vm479_vm1, %v2239_v33 }
 0x6df   :  { %11352 = vmatpush3.bf16.msra.mxu0 %v12172_v8  ;;  %v2623_v8 = vpop.permute.xlu0 %2622 }
 0x6e0   :  { %11353 = vmatprep.subr.bf16.mxu0 %v12173_v29  ;;  %v2628_v12 = vsel %vm479_vm1, %v2623_v8, 0 }
 0x6e3   :  { %v2134_v61 = vpop.f32.mrb[68].mxu1  ;;  %11354 = vmatpush3.bf16.msra.mxu0 %v12173_v29  ;;  %v2621_v33 = vpop.permute.xlu0 %2620 }
 0x6e4   :  { %v2240_v38 = vpack.c.bf16 %v2134_v61, %v2085_v51  ;;  %v11325_v25 = vpop.f32.mrb[69].mxu1  ;;  %11387 = vmatprep.subr.bf16.mxu0 %v15346_v37 }
 0x6e5   :  { %v2137_v48 = vpop.f32.mrb[70].mxu1 }
 0x6e6   :  { %v11326_v9 = vpop.f32.mrb[71].mxu1  ;;  %11347 = vmatprep.mubr.msk.bf16.mxu0 %vm479_vm1, %v2240_v38 }
 0x6e7   :  { %v2723_v10 = vpop.permute.xlu0 %2722 }
 0x6e8   :  { %v2728_v16 = vsel %vm479_vm1, %v2723_v10, 0 }
 0x6eb   :  { %v2721_v38 = vpop.permute.xlu0 %2720 }
 0x6ef   :  { %v2232_v21 = vpop.f32.mrb[72].mxu1 }
 0x6f0   :  { %v2241_v17 = vpack.c.bf16 %v2232_v21, %v2183_v11  ;;  %v11337_v2 = vpop.f32.mrb[73].mxu1 }
 0x6f1   :  { %v2235_v36 = vpop.f32.mrb[74].mxu1 }
 0x6f2   :  { %v11338_v52 = vpop.f32.mrb[75].mxu1  ;;  %11348 = vmatmul.mubr.msk.bf16.gmra.mrb[80].mxu0 %vm479_vm1, %v2241_v17 }
 0x6f3   :  { %11355 = vmatprep.mubr.msk.bf16.mxu0 %vm479_vm1, %v1322_v7 }
 0x6f7   :  { %v2464_v51 = vpop.f32.mrb[76].mxu1 }
 0x6f8   :  { %v13586_v54 = vmul.f32 0.17677669, %v2464_v51  ;;  %v11367_v44 = vpop.f32.mrb[77].mxu1 }
 0x6f9   :  { %v2467_v27 = vpop.f32.mrb[78].mxu1 }
 0x6fa   :  { %11356 = vmatmul.mubr.msk.bf16.vlgmr.msra.gmra.mrb[76].mxu0 %vm479_vm1, %v1323_v13  ;;  %v11368_v11 = vpop.f32.mrb[79].mxu1  ;;  %v2828_v6 = vsel %vm856_vm3, %v13586_v54, -inf }
 0x6fb   :  { %11388 = vmatpush3.bf16.xpose.msra.mxu0 %v2628_v12  ;;  %11359 = vmatprep.mubr.msk.bf16.mxu0 %vm479_vm1, %v1324_v23 }
 0x6fc   :  { %2829 = vmax.xlane.f32.xlu0 %v2828_v6  ;;  %11399 = vmatprep.subr.bf16.mxu0 %v15346_v37 }
 0x6ff   :  { %v2514_v41 = vpop.f32.mrb[80].mxu1 }
 0x700   :  { %v2821_v60 = vmul.f32 0.17677669, %v2514_v41  ;;  %v11373_v7 = vpop.f32.mrb[81].mxu1 }
 0x701   :  { %v2517_v55 = vpop.f32.mrb[82].mxu1 }
 0x702   :  { %11360 = vmatmul.mubr.msk.bf16.gmra.mrb[80].mxu0 %vm479_vm1, %v1325_v34  ;;  %v11374_v5 = vpop.f32.mrb[83].mxu1  ;;  %v2831_v13 = vsel %vm856_vm3, %v2821_v60, -inf }
 0x703   :  { %2832 = vmax.xlane.f32.xlu1 %v2831_v13  ;;  %11389 = vmatprep.mubr.msk.bf16.mxu0 %vm12764_vm0, %v15346_v37 }
 0x707   :  { %v2564_v22 = vpop.f32.mrb[84].mxu1 }
 0x708   :  { %v13607_v23 = vmul.f32 0.17677669, %v2564_v22  ;;  %v11379_v53 = vpop.f32.mrb[85].mxu1 }
 0x709   :  { %v2567_v29 = vpop.f32.mrb[86].mxu1 }
 0x70a   :  { %v11380_v26 = vpop.f32.mrb[87].mxu1  ;;  %11390 = vmatmul.mubr.msk.bf16.vlgmr.msra.gmra.mrb[84].mxu0 %vm479_vm1, %v2621_v33  ;;  %v2834_v30 = vsel %vm856_vm3, %v13607_v23, -inf }
 0x70b   :  { %11400 = vmatpush3.bf16.xpose.msra.mxu0 %v2728_v16  ;;  %2835 = vmax.xlane.f32.xlu0 %v2834_v30 }
 0x70c   :  { %11401 = vmatprep.mubr.msk.bf16.mxu0 %vm12764_vm0, %v15346_v37  ;;  %11411 = vmatprep.subr.bf16.mxu0 %v15346_v37 }
 0x70f   :  { %v2614_v32 = vpop.f32.mrb[88].mxu1 }
 0x710   :  { %v2823_v34 = vmul.f32 0.17677669, %v2614_v32  ;;  %v11385_v61 = vpop.f32.mrb[89].mxu1 }
 0x711   :  { %v2617_v25 = vpop.f32.mrb[90].mxu1 }
 0x712   :  { %v11386_v48 = vpop.f32.mrb[91].mxu1  ;;  %11402 = vmatmul.mubr.msk.bf16.vlgmr.msra.gmra.mrb[88].mxu0 %vm479_vm1, %v2721_v38  ;;  %v2837_v9 = vsel %vm856_vm3, %v2823_v34, -inf }
 0x713   :  { %2838 = vmax.xlane.f32.xlu0 %v2837_v9  ;;  %11413 = vmatprep.mubr.msk.bf16.mxu0 %vm12764_vm0, %v15346_v37 }
 0x717   :  { %v2714_v21 = vpop.f32.mrb[92].mxu1 }
 0x718   :  { %v2825_v17 = vmul.f32 0.17677669, %v2714_v21  ;;  %v11397_v2 = vpop.f32.mrb[93].mxu1 }
 0x719   :  { %v2717_v36 = vpop.f32.mrb[94].mxu1 }
 0x71a   :  { %v11398_v52 = vpop.f32.mrb[95].mxu1  ;;  %v2843_v8 = vsel %vm856_vm3, %v2825_v17, -inf }
 0x71b   :  { %2844 = vmax.xlane.f32.xlu1 %v2843_v8 }
 0x71f   :  { %v2814_v51 = vpop.f32.mrb[96].mxu1 }
 0x720   :  { %v2827_v44 = vmul.f32 0.17677669, %v2814_v51  ;;  %v11409_v27 = vpop.f32.mrb[97].mxu1 }
 0x721   :  { %v2817_v12 = vpop.f32.mrb[98].mxu1 }
 0x722   :  { %v11410_v11 = vpop.f32.mrb[99].mxu1  ;;  %v2849_v6 = vsel %vm856_vm3, %v2827_v44, -inf }
 0x723   :  { %2850 = vmax.xlane.f32.xlu1 %v2849_v6 }
 0x789   :  { %v2830_v55 = vpop.xlane.xlu0 %2829 }
 0x790   :  { %v2833_v41 = vpop.xlane.xlu1 %2832 }
 0x791   :  { %v2853_v7 = vsub.f32 %v2821_v60, %v2833_v41 }
 0x793   :  { %v2862_v33 = vmul.f32 1.442695, %v2853_v7 }
 0x795   :  { %12378 = vpow2.f32 %v2862_v33 }
 0x798   :  { %v2836_v5 = vpop.xlane.xlu0 %2835 }
 0x799   :  { %v2854_v36 = vsub.f32 %v13607_v23, %v2836_v5 }
 0x79f   :  { %v13622_v13 = vpop.eup %12378 }
 0x7a0   :  { %v2839_v10 = vpop.xlane.xlu0 %2838  ;;  %v2879_v22 = vsel %vm856_vm3, %v13622_v13, 0.0 }
 0x7a1   :  { %v2855_v53 = vsub.f32 %v2823_v34, %v2839_v10  ;;  %2880 = vadd.xlane.f32.xlu1 %v2879_v22 }
 0x7a3   :  { %v2866_v29 = vmul.f32 1.442695, %v2855_v53 }
 0x7a5   :  { %12380 = vpow2.f32 %v2866_v29 }
 0x7a8   :  { %v2845_v16 = vpop.xlane.xlu1 %2844 }
 0x7a9   :  { %v2857_v26 = vsub.f32 %v2825_v17, %v2845_v16  ;;  %v2852_v17 = vsub.f32 %v13586_v54, %v2830_v55 }
 0x7ab   :  { %v2870_v30 = vmul.f32 1.442695, %v2857_v26  ;;  %v2860_v2 = vmul.f32 1.442695, %v2852_v17 }
 0x7ad   :  { %12382 = vpow2.f32 %v2870_v30 }
 0x7af   :  { %v13626_v32 = vpop.eup %12380 }
 0x7b0   :  { %v2851_v60 = vpop.xlane.xlu1 %2850  ;;  %v2885_v61 = vsel %vm856_vm3, %v13626_v32, 0.0 }
 0x7b1   :  { %v2859_v38 = vsub.f32 %v2827_v44, %v2851_v60  ;;  %2886 = vadd.xlane.f32.xlu1 %v2885_v61  ;;  %v2864_v44 = vmul.f32 1.442695, %v2854_v36 }
 0x7b3   :  { %v2874_v25 = vmul.f32 1.442695, %v2859_v38 }
 0x7b5   :  { %12384 = vpow2.f32 %v2874_v25 }
 0x7b6   :  { %12386 = vpow2.f32 %v2860_v2 }
 0x7b7   :  { %v13630_v48 = vpop.eup %12382  ;;  %12388 = vpow2.f32 %v2864_v44 }
 0x7b8   :  { %v2891_v34 = vsel %vm856_vm3, %v13630_v48, 0.0 }
 0x7b9   :  { %2892 = vadd.xlane.f32.xlu1 %v2891_v34 }
 0x7bf   :  { %v13634_v9 = vpop.eup %12384 }
 0x7c0   :  { %v2897_v21 = vsel %vm856_vm3, %v13634_v9, 0.0  ;;  %v13660_v55 = vpop.eup %12386 }
 0x7c1   :  { %2898 = vadd.xlane.f32.xlu1 %v2897_v21  ;;  %v2876_v5 = vsel %vm856_vm3, %v13660_v55, 0.0  ;;  %v13666_v10 = vpop.eup %12388 }
 0x7d2   :  { %2972 = vrot.lane.b32.xlu1 %v13176_v4, %s12756_s7 }
 0x7d6   :  { %3020 = vrot.lane.b32.xlu1 %v13262_v49, %s12756_s7 }
 0x7da   :  { %3068 = vrot.lane.b32.xlu1 %v13278_v15, %s12756_s7 }
 0x7dd   :  { %v2664_v52 = vpop.f32.mrb[84].mxu0 }
 0x7de   :  { %v13646_v8 = vmul.f32 0.17677669, %v2664_v52  ;;  %v11391_v51 = vpop.f32.mrb[85].mxu0  ;;  %3164 = vrot.lane.b32.xlu1 %v13300_v31, %s12756_s7 }
 0x7df   :  { %v2667_v27 = vpop.f32.mrb[86].mxu0 }
 0x7e0   :  { %v11392_v12 = vpop.f32.mrb[87].mxu0  ;;  %v2840_v54 = vsel %vm856_vm3, %v13646_v8, -inf }
 0x7e1   :  { %2841 = vmax.xlane.f32.xlu0 %v2840_v54 }
 0x7e2   :  { %3260 = vrot.lane.b32.xlu1 %v13318_v24, %s12756_s7 }
 0x7e5   :  { %v2764_v23 = vpop.f32.mrb[88].mxu0 }
 0x7e6   :  { %v13654_v11 = vmul.f32 0.17677669, %v2764_v23  ;;  %v11403_v6 = vpop.f32.mrb[89].mxu0  ;;  %3409 = vrot.lane.b32.xlu1 %v13055_v62, %s12766_s20  ;;  %v2882_v62 = vsel %vm856_vm3, %v13666_v10, 0.0 }
 0x7e7   :  { %v2767_v41 = vpop.f32.mrb[90].mxu0 }
 0x7e8   :  { %v11404_v7 = vpop.f32.mrb[91].mxu0  ;;  %v2846_v33 = vsel %vm856_vm3, %v13654_v11, -inf }
 0x7e9   :  { %2847 = vmax.xlane.f32.xlu0 %v2846_v33 }
 0x7ea   :  { %3459 = vrot.lane.b32.xlu1 %v13085_v18, %s12766_s20 }
 0x7ed   :  { %2877 = vadd.xlane.f32.xlu0 %v2876_v5 }
 0x7ee   :  { %3561 = vrot.lane.b32.xlu1 %v13082_v14, %s12766_s20 }
 0x7f1   :  { %2883 = vadd.xlane.f32.xlu0 %v2882_v62 }
 0x7f2   :  { %3559 = vrot.lane.b32.xlu1 %v13123_v45, %s12766_s20 }
 0x7f6   :  { %3661 = vrot.lane.b32.xlu1 %v13117_v35, %s12766_s20 }
 0x7fa   :  { %3659 = vrot.lane.b32.xlu1 %v13150_v58, %s12766_s20 }
 0x7fe   :  { %3761 = vrot.lane.b32.xlu1 %v13140_v56, %s12766_s20 }
 0x802   :  { %3759 = vrot.lane.b32.xlu1 %v13164_v1, %s12766_s20 }
 0x807   :  { %2924 = vrot.lane.b32.xlu0 %v13174_v3, %s12756_s7 }
 0x80b   :  { %3116 = vrot.lane.b32.xlu0 %v13273_v59, %s12756_s7 }
 0x82e   :  { %v2881_v14 = vpop.xlane.xlu1 %2880 }
 0x82f   :  { %12390 = vrcp.f32 %v2881_v14 }
 0x839   :  { %v12391_v35 = vpop.eup %12390 }
 0x83a   :  { %v2909_v58 = vmul.f32 %v12391_v35, %v13622_v13 }
 0x83c   :  { %v2917_v1 = vpack.c.bf16 %v2909_v58, %v2909_v58 }
 0x83e   :  { %v2887_v18 = vpop.xlane.xlu1 %2886 }
 0x83f   :  { %12392 = vrcp.f32 %v2887_v18 }
 0x846   :  { %v2893_v45 = vpop.xlane.xlu1 %2892 }
 0x847   :  { %12394 = vrcp.f32 %v2893_v45 }
 0x849   :  { %v12393_v29 = vpop.eup %12392 }
 0x84a   :  { %v2911_v26 = vmul.f32 %v12393_v29, %v13626_v32 }
 0x84c   :  { %v2919_v60 = vpack.c.bf16 %v2911_v26, %v2911_v26 }
 0x84e   :  { %v2899_v22 = vpop.xlane.xlu1 %2898 }
 0x84f   :  { %12396 = vrcp.f32 %v2899_v22 }
 0x851   :  { %v12395_v61 = vpop.eup %12394 }
 0x852   :  { %v2973_v53 = vpop.permute.xlu1 %2972  ;;  %v2913_v32 = vmul.f32 %v12395_v61, %v13630_v48 }
 0x853   :  { %v2978_v56 = vsel %vm956_vm2, %v2973_v53, 0 }
 0x854   :  { %11418 = vmatpush3.bf16.msra.mxu1 %v2978_v56  ;;  %v2921_v21 = vpack.c.bf16 %v2913_v32, %v2913_v32 }
 0x855   :  { %11429 = vmatprep.subr.bf16.mxu1 %v15346_v37 }
 0x856   :  { %v3021_v16 = vpop.permute.xlu1 %3020 }
 0x857   :  { %11420 = vmatmul.mubr.msk.bf16.vlgmr.msra.gmra.mrb[100].mxu1 %vm856_vm3, %v2917_v1  ;;  %v3026_v45 = vsel %vm956_vm2, %v3021_v16, 0  ;;  %v12174_v1 = vld [vmem:[#allocation2 + $0x20] sm:$0xff]  }
 0x858   :  { %11431 = vmatprep.mubr.msk.bf16.mxu1 %vm12764_vm0, %v15346_v37 }
 0x859   :  { %v12397_v17 = vpop.eup %12396 }
 0x85a   :  { %v3069_v30 = vpop.permute.xlu1 %3068  ;;  %v2915_v36 = vmul.f32 %v12397_v17, %v13634_v9 }
 0x85b   :  { %v3074_v13 = vsel %vm956_vm2, %v3069_v30, 0 }
 0x85c   :  { %11430 = vmatpush3.bf16.msra.mxu1 %v3074_v13  ;;  %v2923_v52 = vpack.c.bf16 %v2915_v36, %v2915_v36 }
 0x85d   :  { %11441 = vmatprep.subr.bf16.mxu1 %v15346_v37 }
 0x85e   :  { %v3165_v38 = vpop.permute.xlu1 %3164 }
 0x85f   :  { %v3170_v25 = vsel %vm956_vm2, %v3165_v38, 0  ;;  %11432 = vmatmul.mubr.msk.bf16.vlgmr.msra.gmra.mrb[104].mxu1 %vm856_vm3, %v2919_v60  ;;  %v12175_v60 = vld [vmem:[#allocation2 + $0x28] sm:$0xff]  }
 0x860   :  { %11442 = vmatpush3.bf16.msra.mxu1 %v3170_v25  ;;  %11443 = vmatprep.mubr.msk.bf16.mxu1 %vm12764_vm0, %v15346_v37 }
 0x861   :  { %11453 = vmatprep.subr.bf16.mxu1 %v15346_v37 }
 0x862   :  { %v3261_v34 = vpop.permute.xlu1 %3260 }
 0x863   :  { %v3266_v2 = vsel %vm956_vm2, %v3261_v34, 0 }
 0x867   :  { %11444 = vmatmul.mubr.msk.bf16.vlgmr.msra.gmra.mrb[108].mxu1 %vm856_vm3, %v2921_v21 }
 0x868   :  { %11454 = vmatpush3.bf16.msra.mxu1 %v3266_v2  ;;  %11455 = vmatprep.mubr.msk.bf16.mxu1 %vm12764_vm0, %v15346_v37 }
 0x869   :  { %11471 = vmatprep.subr.bf16.mxu1 %v15346_v37 }
 0x86e   :  { %v2842_v51 = vpop.xlane.xlu0 %2841 }
 0x86f   :  { %v2856_v44 = vsub.f32 %v13646_v8, %v2842_v51  ;;  %11456 = vmatmul.mubr.msk.bf16.vlgmr.msra.gmra.mrb[112].mxu1 %vm856_vm3, %v2923_v52 }
 0x870   :  { %11473 = vmatprep.mubr.msk.bf16.mxu1 %vm12764_vm0, %v15346_v37 }
 0x871   :  { %v2868_v48 = vmul.f32 1.442695, %v2856_v44 }
 0x873   :  { %12398 = vpow2.f32 %v2868_v48 }
 0x876   :  { %v2848_v27 = vpop.xlane.xlu0 %2847 }
 0x877   :  { %v2858_v12 = vsub.f32 %v13654_v11, %v2848_v27 }
 0x879   :  { %v2872_v54 = vmul.f32 1.442695, %v2858_v12 }
 0x87a   :  { %v2878_v23 = vpop.xlane.xlu0 %2877 }
 0x87b   :  { %12400 = vpow2.f32 %v2872_v54 }
 0x87c   :  { %12402 = vrcp.f32 %v2878_v23 }
 0x87d   :  { %v12399_v9 = vpop.eup %12398 }
 0x87e   :  { %v2884_v6 = vpop.xlane.xlu0 %2883  ;;  %v2888_v41 = vsel %vm856_vm3, %v12399_v9, 0.0 }
 0x87f   :  { %2889 = vadd.xlane.f32.xlu0 %v2888_v41  ;;  %12404 = vrcp.f32 %v2884_v6 }
 0x882   :  { %v2925_v8 = vpop.permute.xlu0 %2924 }
 0x883   :  { %v2930_v7 = vsel %vm956_vm2, %v2925_v8, 0 }
 0x884   :  { %11412 = vmatpush3.bf16.msra.mxu0 %v2930_v7 }
 0x885   :  { %v12401_v33 = vpop.eup %12400  ;;  %11423 = vmatprep.subr.bf16.mxu0 %v15346_v37 }
 0x886   :  { %v12403_v5 = vpop.eup %12402  ;;  %v2894_v11 = vsel %vm856_vm3, %v12401_v33, 0.0  ;;  %v3117_v22 = vpop.permute.xlu0 %3116 }
 0x887   :  { %2895 = vadd.xlane.f32.xlu0 %v2894_v11  ;;  %v2908_v62 = vmul.f32 %v12403_v5, %v13660_v55  ;;  %v3122_v53 = vsel %vm956_vm2, %v3117_v22, 0 }
 0x889   :  { %v2916_v14 = vpack.c.bf16 %v2908_v62, %v2908_v62  ;;  %v12405_v18 = vpop.eup %12404 }
 0x88a   :  { %v2910_v35 = vmul.f32 %v12405_v18, %v13666_v10 }
 0x88b   :  { %11414 = vmatmul.mubr.msk.bf16.vlgmr.msra.gmra.mrb[92].mxu0 %vm856_vm3, %v2916_v14 }
 0x88c   :  { %11424 = vmatpush3.bf16.msra.mxu0 %v3026_v45  ;;  %11425 = vmatprep.mubr.msk.bf16.mxu0 %vm12764_vm0, %v15346_v37  ;;  %v2918_v58 = vpack.c.bf16 %v2910_v35, %v2910_v35 }
 0x88d   :  { %11435 = vmatprep.subr.bf16.mxu0 %v15346_v37 }
 0x893   :  { %11426 = vmatmul.mubr.msk.bf16.vlgmr.msra.gmra.mrb[96].mxu0 %vm856_vm3, %v2918_v58 }
 0x894   :  { %11436 = vmatpush3.bf16.msra.mxu0 %v3122_v53  ;;  %11437 = vmatprep.mubr.msk.bf16.mxu0 %vm12764_vm0, %v15346_v37 }
 0x895   :  { %11447 = vmatprep.subr.bf16.mxu0 %v15346_v37 }
 0x89d   :  { %3212 = vrot.lane.b32.xlu0 %v13294_v28, %s12756_s7 }
 0x8a1   :  { %3411 = vrot.lane.b32.xlu0 %v13040_v50, %s12766_s20 }
 0x8a5   :  { %3461 = vrot.lane.b32.xlu0 %v13048_v57, %s12766_s20 }
 0x8a9   :  { %3511 = vrot.lane.b32.xlu0 %v13057_v63, %s12766_s20  ;;  %v3410_v63 = vpop.permute.xlu1 %3409 }
 0x8ad   :  { %3509 = vrot.lane.b32.xlu0 %v13087_v19, %s12766_s20 }
 0x8b1   :  { %3611 = vrot.lane.b32.xlu0 %v13089_v20, %s12766_s20  ;;  %v3460_v20 = vpop.permute.xlu1 %3459 }
 0x8b5   :  { %3609 = vrot.lane.b32.xlu0 %v13125_v46, %s12766_s20  ;;  %v3562_v26 = vpop.permute.xlu1 %3561 }
 0x8b6   :  { %v3567_v21 = vsel %vm479_vm1, %v3562_v26, 0 }
 0x8b9   :  { %3711 = vrot.lane.b32.xlu0 %v13127_v47, %s12766_s20  ;;  %v3560_v38 = vpop.permute.xlu1 %3559 }
 0x8bd   :  { %3709 = vrot.lane.b32.xlu0 %v13148_v42, %s12766_s20  ;;  %v3662_v2 = vpop.permute.xlu1 %3661 }
 0x8be   :  { %v3667_v48 = vsel %vm479_vm1, %v3662_v2, 0 }
 0x8c1   :  { %v3660_v51 = vpop.permute.xlu1 %3659 }
 0x8c5   :  { %v3762_v12 = vpop.permute.xlu1 %3761 }
 0x8c6   :  { %v3767_v6 = vsel %vm479_vm1, %v3762_v12, 0 }
 0x90c   :  { %v2890_v50 = vpop.xlane.xlu0 %2889 }
 0x90d   :  { %12406 = vrcp.f32 %v2890_v50 }
 0x914   :  { %v2896_v57 = vpop.xlane.xlu0 %2895 }
 0x915   :  { %12408 = vrcp.f32 %v2896_v57 }
 0x917   :  { %v12407_v55 = vpop.eup %12406 }
 0x918   :  { %v3213_v10 = vpop.permute.xlu0 %3212  ;;  %v2912_v19 = vmul.f32 %v12407_v55, %v12399_v9 }
 0x919   :  { %v3218_v29 = vsel %vm956_vm2, %v3213_v10, 0 }
 0x91a   :  { %v2920_v56 = vpack.c.bf16 %v2912_v19, %v2912_v19 }
 0x91c   :  { %v3412_v46 = vpop.permute.xlu0 %3411  ;;  %11438 = vmatmul.mubr.msk.bf16.vlgmr.msra.gmra.mrb[100].mxu0 %vm856_vm3, %v2920_v56 }
 0x91d   :  { %v3417_v47 = vsel %vm479_vm1, %v3412_v46, 0  ;;  %11448 = vmatpush3.bf16.msra.mxu0 %v3218_v29  ;;  %11449 = vmatprep.mubr.msk.bf16.mxu0 %vm12764_vm0, %v15346_v37 }
 0x91e   :  { %11472 = vmatpush3.bf16.xpose.msra.mxu1 %v3417_v47  ;;  %11459 = vmatprep.subr.bf16.mxu0 %v12174_v1 }
 0x91f   :  { %v12409_v42 = vpop.eup %12408  ;;  %11477 = vmatprep.subr.bf16.mxu1 %v15346_v37 }
 0x920   :  { %v2914_v16 = vmul.f32 %v12409_v42, %v12401_v33  ;;  %v3462_v30 = vpop.permute.xlu0 %3461  ;;  %v3760_v33 = vpop.permute.xlu1 %3759 }
 0x921   :  { %v3467_v61 = vsel %vm479_vm1, %v3462_v30, 0 }
 0x922   :  { %v2922_v13 = vpack.c.bf16 %v2914_v16, %v2914_v16 }
 0x924   :  { %11450 = vmatmul.mubr.msk.bf16.vlgmr.msra.gmra.mrb[104].mxu0 %vm856_vm3, %v2922_v13  ;;  %v3512_v22 = vpop.permute.xlu0 %3511 }
 0x925   :  { %11474 = vmatmul.mubr.msk.bf16.vlgmr.msra.gmra.mrb[116].mxu1 %vm479_vm1, %v3410_v63  ;;  %11460 = vmatpush3.bf16.msra.mxu0 %v12174_v1  ;;  %v3517_v63 = vsel %vm479_vm1, %v3512_v22, 0 }
 0x926   :  { %11478 = vmatpush3.bf16.xpose.msra.mxu1 %v3467_v61  ;;  %11479 = vmatprep.mubr.msk.bf16.mxu1 %vm12764_vm0, %v15346_v37 }
 0x927   :  { %11489 = vmatprep.subr.bf16.mxu1 %v15346_v37  ;;  %11461 = vmatprep.subr.bf16.mxu0 %v12175_v60 }
 0x928   :  { %v3510_v29 = vpop.permute.xlu0 %3509 }
 0x929   :  { %11462 = vmatpush3.bf16.msra.mxu0 %v12175_v60 }
 0x92a   :  { %v3014_v25 = vpop.f32.mrb[100].mxu1  ;;  %11483 = vmatprep.subr.bf16.mxu0 %v15346_v37 }
 0x92b   :  { %v11421_v32 = vpop.f32.mrb[101].mxu1 }
 0x92c   :  { %v3017_v34 = vpop.f32.mrb[102].mxu1 }
 0x92d   :  { %v11422_v17 = vpop.f32.mrb[103].mxu1  ;;  %11480 = vmatmul.mubr.msk.bf16.vlgmr.msra.gmra.mrb[120].mxu1 %vm479_vm1, %v3460_v20 }
 0x92e   :  { %11490 = vmatpush3.bf16.xpose.msra.mxu1 %v3567_v21  ;;  %11491 = vmatprep.mubr.msk.bf16.mxu1 %vm12764_vm0, %v15346_v37 }
 0x92f   :  { %11501 = vmatprep.subr.bf16.mxu1 %v15346_v37 }
 0x932   :  { %v3110_v36 = vpop.f32.mrb[104].mxu1 }
 0x933   :  { %v11433_v52 = vpop.f32.mrb[105].mxu1 }
 0x934   :  { %v3113_v44 = vpop.f32.mrb[106].mxu1 }
 0x935   :  { %v11434_v27 = vpop.f32.mrb[107].mxu1  ;;  %11492 = vmatmul.mubr.msk.bf16.vlgmr.msra.gmra.mrb[124].mxu1 %vm479_vm1, %v3560_v38  ;;  %v3612_v38 = vpop.permute.xlu0 %3611 }
 0x936   :  { %11502 = vmatpush3.bf16.xpose.msra.mxu1 %v3667_v48  ;;  %11503 = vmatprep.mubr.msk.bf16.mxu1 %vm12764_vm0, %v15346_v37 }
 0x937   :  { %11513 = vmatprep.subr.bf16.mxu1 %v15346_v37 }
 0x939   :  { %v3610_v21 = vpop.permute.xlu0 %3609 }
 0x93a   :  { %v3206_v54 = vpop.f32.mrb[108].mxu1 }
 0x93b   :  { %v11445_v23 = vpop.f32.mrb[109].mxu1 }
 0x93c   :  { %v3209_v9 = vpop.f32.mrb[110].mxu1 }
 0x93d   :  { %v11446_v41 = vpop.f32.mrb[111].mxu1  ;;  %11504 = vmatmul.mubr.msk.bf16.vlgmr.msra.gmra.mrb[128].mxu1 %vm479_vm1, %v3660_v51  ;;  %v3712_v48 = vpop.permute.xlu0 %3711 }
 0x93e   :  { %11514 = vmatpush3.bf16.xpose.msra.mxu1 %v3767_v6  ;;  %11515 = vmatprep.mubr.msk.bf16.mxu1 %vm12764_vm0, %v15346_v37 }
 0x93f   :  { %11525 = vmatprep.subr.bf16.mxu1 %v15346_v37 }
 0x941   :  { %v3710_v41 = vpop.permute.xlu0 %3709 }
 0x942   :  { %v3302_v8 = vpop.f32.mrb[112].mxu1 }
 0x943   :  { %v11457_v7 = vpop.f32.mrb[113].mxu1 }
 0x944   :  { %v3305_v5 = vpop.f32.mrb[114].mxu1 }
 0x945   :  { %v11458_v11 = vpop.f32.mrb[115].mxu1  ;;  %11516 = vmatmul.mubr.msk.bf16.vlgmr.msra.gmra.mrb[132].mxu1 %vm479_vm1, %v3760_v33 }
 0x946   :  { %11527 = vmatprep.mubr.msk.bf16.mxu1 %vm12764_vm0, %v15346_v37 }
 0x95e   :  { %v2966_v62 = vpop.f32.mrb[92].mxu0 }
 0x95f   :  { %v3308_v14 = vpack.c.bf16 %v3014_v25, %v2966_v62  ;;  %v11415_v18 = vpop.f32.mrb[93].mxu0 }
 0x960   :  { %v2969_v45 = vpop.f32.mrb[94].mxu0 }
 0x961   :  { %v11416_v35 = vpop.f32.mrb[95].mxu0  ;;  %11463 = vmatprep.mubr.msk.bf16.mxu0 %vm479_vm1, %v3308_v14 }
 0x966   :  { %v3062_v58 = vpop.f32.mrb[96].mxu0 }
 0x967   :  { %v3309_v53 = vpack.c.bf16 %v3110_v36, %v3062_v58  ;;  %v11427_v50 = vpop.f32.mrb[97].mxu0  ;;  %v3617_v36 = vsel %vm479_vm1, %v3612_v38, 0 }
 0x968   :  { %v3065_v57 = vpop.f32.mrb[98].mxu0 }
 0x969   :  { %v11428_v55 = vpop.f32.mrb[99].mxu0  ;;  %11464 = vmatmul.mubr.msk.bf16.vlgmr.msra.gmra.mrb[76].mxu0 %vm479_vm1, %v3309_v53 }
 0x96a   :  { %11484 = vmatpush3.bf16.xpose.msra.mxu0 %v3517_v63 }
 0x96b   :  { %11495 = vmatprep.subr.bf16.mxu0 %v15346_v37 }
 0x9ef   :  { %v3158_v10 = vpop.f32.mrb[100].mxu0 }
 0x9f0   :  { %v3310_v19 = vpack.c.bf16 %v3206_v54, %v3158_v10  ;;  %v11439_v56 = vpop.f32.mrb[101].mxu0  ;;  %v3717_v54 = vsel %vm479_vm1, %v3712_v48, 0 }
 0x9f1   :  { %v3161_v1 = vpop.f32.mrb[102].mxu0 }
 0x9f2   :  { %v11440_v20 = vpop.f32.mrb[103].mxu0  ;;  %11467 = vmatprep.mubr.msk.bf16.mxu0 %vm479_vm1, %v3310_v19 }
 0x9f7   :  { %v3254_v46 = vpop.f32.mrb[104].mxu0 }
 0x9f8   :  { %v3311_v47 = vpack.c.bf16 %v3302_v8, %v3254_v46  ;;  %v11451_v42 = vpop.f32.mrb[105].mxu0  ;;  %v3453_v16 = vpop.f32.mrb[116].mxu1 }
 0x9f9   :  { %v3809_v26 = vmul.f32 0.17677669, %v3453_v16  ;;  %v3257_v30 = vpop.f32.mrb[106].mxu0  ;;  %v11475_v13 = vpop.f32.mrb[117].mxu1 }
 0x9fa   :  { %v11452_v60 = vpop.f32.mrb[107].mxu0  ;;  %11468 = vmatmul.mubr.msk.bf16.gmra.mrb[80].mxu0 %vm479_vm1, %v3311_v47  ;;  %v3456_v61 = vpop.f32.mrb[118].mxu1 }
 0x9fb   :  { %v11476_v25 = vpop.f32.mrb[119].mxu1  ;;  %v3817_v32 = vsel %vm856_vm3, %v3809_v26, -inf  ;;  %11485 = vmatprep.mubr.msk.bf16.mxu0 %vm12764_vm0, %v15346_v37 }
 0x9fc   :  { %3818 = vmax.xlane.f32.xlu0 %v3817_v32 }
 0xa00   :  { %v3503_v34 = vpop.f32.mrb[120].mxu1 }
 0xa01   :  { %v3810_v17 = vmul.f32 0.17677669, %v3503_v34  ;;  %v11481_v2 = vpop.f32.mrb[121].mxu1 }
 0xa02   :  { %v3506_v52 = vpop.f32.mrb[122].mxu1  ;;  %11486 = vmatmul.mubr.msk.bf16.vlgmr.msra.gmra.mrb[108].mxu0 %vm479_vm1, %v3510_v29 }
 0xa03   :  { %11496 = vmatpush3.bf16.xpose.msra.mxu0 %v3617_v36  ;;  %v11482_v51 = vpop.f32.mrb[123].mxu1  ;;  %v3820_v44 = vsel %vm856_vm3, %v3810_v17, -inf  ;;  %11497 = vmatprep.mubr.msk.bf16.mxu0 %vm12764_vm0, %v15346_v37 }
 0xa04   :  { %3821 = vmax.xlane.f32.xlu1 %v3820_v44  ;;  %11507 = vmatprep.subr.bf16.mxu0 %v15346_v37 }
 0xa08   :  { %v3603_v27 = vpop.f32.mrb[124].mxu1 }
 0xa09   :  { %v11493_v12 = vpop.f32.mrb[125].mxu1  ;;  %v3812_v46 = vmul.f32 0.17677669, %v3603_v27 }
 0xa0a   :  { %v3606_v23 = vpop.f32.mrb[126].mxu1  ;;  %11498 = vmatmul.mubr.msk.bf16.vlgmr.msra.gmra.mrb[112].mxu0 %vm479_vm1, %v3610_v21 }
 0xa0b   :  { %11508 = vmatpush3.bf16.xpose.msra.mxu0 %v3717_v54  ;;  %v11494_v9 = vpop.f32.mrb[127].mxu1  ;;  %11509 = vmatprep.mubr.msk.bf16.mxu0 %vm12764_vm0, %v15346_v37  ;;  %v3826_v16 = vsel %vm856_vm3, %v3812_v46, -inf }
 0xa0c   :  { %11519 = vmatprep.subr.bf16.mxu0 %v15346_v37 }
 0xa10   :  { %v3703_v6 = vpop.f32.mrb[128].mxu1 }
 0xa11   :  { %v13797_v8 = vmul.f32 0.17677669, %v3703_v6  ;;  %v11505_v7 = vpop.f32.mrb[129].mxu1 }
 0xa12   :  { %v3706_v33 = vpop.f32.mrb[130].mxu1  ;;  %11510 = vmatmul.mubr.msk.bf16.vlgmr.msra.gmra.mrb[116].mxu0 %vm479_vm1, %v3710_v41 }
 0xa13   :  { %v11506_v5 = vpop.f32.mrb[131].mxu1  ;;  %v3832_v11 = vsel %vm856_vm3, %v13797_v8, -inf  ;;  %11521 = vmatprep.mubr.msk.bf16.mxu0 %vm12764_vm0, %v15346_v37 }
 0xa14   :  { %3833 = vmax.xlane.f32.xlu1 %v3832_v11 }
 0xa18   :  { %v3803_v62 = vpop.f32.mrb[132].mxu1 }
 0xa19   :  { %v3816_v14 = vmul.f32 0.17677669, %v3803_v62  ;;  %v11517_v18 = vpop.f32.mrb[133].mxu1 }
 0xa1a   :  { %v3806_v45 = vpop.f32.mrb[134].mxu1 }
 0xa1b   :  { %v11518_v35 = vpop.f32.mrb[135].mxu1  ;;  %v3838_v22 = vsel %vm856_vm3, %v3816_v14, -inf }
 0xa1c   :  { %3839 = vmax.xlane.f32.xlu1 %v3838_v22 }
 0xa89   :  { %v3819_v55 = vpop.xlane.xlu0 %3818 }
 0xa8a   :  { %v3841_v10 = vsub.f32 %v3809_v26, %v3819_v55 }
 0xa8c   :  { %v3849_v19 = vmul.f32 1.442695, %v3841_v10 }
 0xa91   :  { %v3822_v58 = vpop.xlane.xlu1 %3821 }
 0xa92   :  { %v3842_v53 = vsub.f32 %v3810_v17, %v3822_v58 }
 0xa94   :  { %v3851_v50 = vmul.f32 1.442695, %v3842_v53 }
 0xa96   :  { %12410 = vpow2.f32 %v3851_v50 }
 0xa97   :  { %12412 = vpow2.f32 %v3849_v19 }
 0xaa0   :  { %v13805_v57 = vpop.eup %12410 }
 0xaa1   :  { %v3868_v63 = vsel %vm856_vm3, %v13805_v57, 0.0  ;;  %v12413_v25 = vpop.eup %12412  ;;  %v3834_v51 = vpop.xlane.xlu1 %3833 }
 0xaa2   :  { %3869 = vadd.xlane.f32.xlu1 %v3868_v63  ;;  %v3865_v32 = vsel %vm856_vm3, %v12413_v25, 0.0  ;;  %v3846_v6 = vsub.f32 %v13797_v8, %v3834_v51 }
 0xaa9   :  { %v3840_v44 = vpop.xlane.xlu1 %3839 }
 0xaaa   :  { %v3848_v48 = vsub.f32 %v3816_v14, %v3840_v44 }
 0xaac   :  { %v3863_v27 = vmul.f32 1.442695, %v3848_v48 }
 0xaae   :  { %12414 = vpow2.f32 %v3863_v27 }
 0xab8   :  { %v13816_v12 = vpop.eup %12414 }
 0xab9   :  { %v3886_v54 = vsel %vm856_vm3, %v13816_v12, 0.0 }
 0xad5   :  { %v3553_v56 = vpop.f32.mrb[108].mxu0 }
 0xad6   :  { %v3811_v1 = vmul.f32 0.17677669, %v3553_v56  ;;  %v11487_v20 = vpop.f32.mrb[109].mxu0 }
 0xad7   :  { %v3556_v29 = vpop.f32.mrb[110].mxu0 }
 0xad8   :  { %v11488_v47 = vpop.f32.mrb[111].mxu0  ;;  %v3823_v42 = vsel %vm856_vm3, %v3811_v1, -inf }
 0xad9   :  { %3824 = vmax.xlane.f32.xlu0 %v3823_v42 }
 0xadd   :  { %v3653_v30 = vpop.f32.mrb[112].mxu0  ;;  %3827 = vmax.xlane.f32.xlu0 %v3826_v16 }
 0xade   :  { %v3813_v13 = vmul.f32 0.17677669, %v3653_v30  ;;  %v11499_v60 = vpop.f32.mrb[113].mxu0 }
 0xadf   :  { %v3656_v61 = vpop.f32.mrb[114].mxu0 }
 0xae0   :  { %v11500_v38 = vpop.f32.mrb[115].mxu0  ;;  %v3829_v26 = vsel %vm856_vm3, %v3813_v13, -inf }
 0xae1   :  { %3830 = vmax.xlane.f32.xlu0 %v3829_v26 }
 0xae5   :  { %v3753_v34 = vpop.f32.mrb[116].mxu0  ;;  %3866 = vadd.xlane.f32.xlu0 %v3865_v32 }
 0xae6   :  { %v3815_v21 = vmul.f32 0.17677669, %v3753_v34  ;;  %v11511_v17 = vpop.f32.mrb[117].mxu0 }
 0xae7   :  { %v3756_v2 = vpop.f32.mrb[118].mxu0 }
 0xae8   :  { %v11512_v36 = vpop.f32.mrb[119].mxu0  ;;  %v3835_v52 = vsel %vm856_vm3, %v3815_v21, -inf }
 0xae9   :  { %3836 = vmax.xlane.f32.xlu0 %v3835_v52 }
 0xaff   :  { %3913 = vrot.lane.b32.xlu0 %v13174_v3, %s12766_s20  ;;  %v3859_v3 = vmul.f32 1.442695, %v3846_v6 }
 0xb1e   :  { %3887 = vadd.xlane.f32.xlu0 %v3886_v54 }
 0xb66   :  { %v3825_v23 = vpop.xlane.xlu0 %3824 }
 0xb67   :  { %v3843_v9 = vsub.f32 %v3811_v1, %v3825_v23 }
 0xb69   :  { %v3853_v41 = vmul.f32 1.442695, %v3843_v9 }
 0xb6a   :  { %v3828_v7 = vpop.xlane.xlu0 %3827 }
 0xb6b   :  { %12416 = vpow2.f32 %v3853_v41  ;;  %v3844_v33 = vsub.f32 %v3812_v46, %v3828_v7 }
 0xb6d   :  { %v3855_v5 = vmul.f32 1.442695, %v3844_v33 }
 0xb6e   :  { %v3831_v11 = vpop.xlane.xlu0 %3830 }
 0xb6f   :  { %12418 = vpow2.f32 %v3855_v5  ;;  %v3845_v62 = vsub.f32 %v3813_v13, %v3831_v11 }
 0xb70   :  { %12420 = vpow2.f32 %v3859_v3 }
 0xb71   :  { %v3857_v14 = vmul.f32 1.442695, %v3845_v62 }
 0xb72   :  { %v3867_v18 = vpop.xlane.xlu0 %3866 }
 0xb73   :  { %12422 = vpow2.f32 %v3857_v14 }
 0xb74   :  { %12424 = vrcp.f32 %v3867_v18 }
 0xb75   :  { %v12417_v45 = vpop.eup %12416 }
 0xb76   :  { %v3837_v35 = vpop.xlane.xlu0 %3836  ;;  %v3871_v22 = vsel %vm856_vm3, %v12417_v45, 0.0 }
 0xb77   :  { %3872 = vadd.xlane.f32.xlu0 %v3871_v22  ;;  %v3847_v29 = vsub.f32 %v3815_v21, %v3837_v35 }
 0xb79   :  { %v13822_v8 = vpop.eup %12418  ;;  %v3861_v46 = vmul.f32 1.442695, %v3847_v29  ;;  %v12187_v29 = vld [vmem:[#allocation4 + $0x30] ss:$8 sps:$4 sm:$0xff]  }
 0xb7a   :  { %v3914_v58 = vpop.permute.xlu0 %3913  ;;  %v3874_v53 = vsel %vm856_vm3, %v13822_v8, 0.0  ;;  %v13826_v50 = vpop.eup %12420 }
 0xb7b   :  { %v3919_v63 = vsel %vm956_vm2, %v3914_v58, 0  ;;  %3875 = vadd.xlane.f32.xlu1 %v3874_v53  ;;  %v3880_v19 = vsel %vm856_vm3, %v13826_v50, 0.0  ;;  %12426 = vpow2.f32 %v3861_v46  ;;  %v12192_v46 = vld [vmem:[#allocation4 + $0x44] ss:$8 sps:$4 sm:$0xff]  }
 0xb7c   :  { %11520 = vmatpush3.bf16.msra.mxu0 %v3919_v63  ;;  %v12178_v63 = vld [vmem:[#allocation4] ss:$8 sps:$4 sm:$0xff]  }
 0xb7d   :  { %v12423_v55 = vpop.eup %12422  ;;  %11531 = vmatprep.subr.bf16.mxu0 %v15346_v37 }
 0xb7e   :  { %v12425_v10 = vpop.eup %12424  ;;  %v3877_v56 = vsel %vm856_vm3, %v12423_v55, 0.0 }
 0xb7f   :  { %3881 = vadd.xlane.f32.xlu1 %v3880_v19  ;;  %3878 = vadd.xlane.f32.xlu0 %v3877_v56  ;;  %v3897_v1 = vmul.f32 %v12425_v10, %v12413_v25  ;;  %v12183_v10 = vld [vmem:[#allocation4 + $0x14] ss:$8 sps:$4 sm:$0xff]   ;;  %v12181_v19 = vld [vmem:[#allocation4 + $0x10] ss:$8 sps:$4 sm:$0xff]   ;;  %v12186_v56 = vld [vmem:[#allocation4 + $0x24] ss:$8 sps:$4 sm:$0xff]  }
 0xb81   :  { %v3905_v20 = vpack.c.bf16 %v3897_v1, %v3897_v1  ;;  %v12184_v1 = vld [vmem:[#allocation4 + $0x20] ss:$8 sps:$4 sm:$0xff]  }
 0xb83   :  { %11522 = vmatmul.mubr.msk.bf16.vlgmr.msra.gmra.mrb[120].mxu0 %vm856_vm3, %v3905_v20  ;;  %v12189_v20 = vld [vmem:[#allocation4 + $0x34] ss:$8 sps:$4 sm:$0xff]  }
 0xb84   :  { %11533 = vmatprep.mubr.msk.bf16.mxu0 %vm12764_vm0, %v15346_v37 }
 0xb85   :  { %v13848_v47 = vpop.eup %12426 }
 0xb90   :  { %3961 = vrot.lane.b32.xlu1 %v13176_v4, %s12766_s20  ;;  %v3883_v4 = vsel %vm856_vm3, %v13848_v47, 0.0 }
 0xb94   :  { %4057 = vrot.lane.b32.xlu1 %v13278_v15, %s12766_s20 }
 0xb95   :  { %4009 = vrot.lane.b32.xlu0 %v13262_v49, %s12766_s20  ;;  %v3870_v49 = vpop.xlane.xlu1 %3869 }
 0xb96   :  { %12428 = vrcp.f32 %v3870_v49 }
 0xb98   :  { %4105 = vrot.lane.b32.xlu1 %v13273_v59, %s12766_s20 }
 0xb99   :  { %4201 = vrot.lane.b32.xlu0 %v13294_v28, %s12766_s20 }
 0xb9c   :  { %4153 = vrot.lane.b32.xlu1 %v13300_v31, %s12766_s20 }
 0xba0   :  { %v12429_v31 = vpop.eup %12428 }
 0xba1   :  { %v3898_v13 = vmul.f32 %v12429_v31, %v13805_v57 }
 0xba3   :  { %v3906_v32 = vpack.c.bf16 %v3898_v13, %v3898_v13 }
 0xbab   :  { %v3888_v59 = vpop.xlane.xlu0 %3887 }
 0xbc0   :  { %3884 = vadd.xlane.f32.xlu1 %v3883_v4 }
 0xbd1   :  { %4249 = vrot.lane.b32.xlu1 %v13318_v24, %s12766_s20 }
 0xc04   :  { %v3873_v15 = vpop.xlane.xlu0 %3872 }
 0xc05   :  { %12430 = vrcp.f32 %v3873_v15 }
 0xc08   :  { %v3876_v28 = vpop.xlane.xlu1 %3875 }
 0xc09   :  { %12432 = vrcp.f32 %v3876_v28 }
 0xc0c   :  { %v3879_v42 = vpop.xlane.xlu0 %3878  ;;  %v3882_v16 = vpop.xlane.xlu1 %3881 }
 0xc0d   :  { %12434 = vrcp.f32 %v3879_v42 }
 0xc0e   :  { %12436 = vrcp.f32 %v3882_v16 }
 0xc0f   :  { %v12431_v30 = vpop.eup %12430  ;;  %12438 = vrcp.f32 %v3888_v59 }
 0xc10   :  { %v4010_v60 = vpop.permute.xlu0 %4009  ;;  %v3962_v61 = vpop.permute.xlu1 %3961  ;;  %v3899_v38 = vmul.f32 %v12431_v30, %v12417_v45 }
 0xc11   :  { %v4015_v26 = vsel %vm956_vm2, %v4010_v60, 0  ;;  %v3967_v24 = vsel %vm956_vm2, %v3962_v61, 0 }
 0xc12   :  { %11526 = vmatpush3.bf16.msra.mxu1 %v3967_v24  ;;  %11532 = vmatpush3.bf16.msra.mxu0 %v4015_v26  ;;  %v3907_v25 = vpack.c.bf16 %v3899_v38, %v3899_v38 }
 0xc13   :  { %11537 = vmatprep.subr.bf16.mxu1 %v15346_v37  ;;  %11543 = vmatprep.subr.bf16.mxu0 %v15346_v37  ;;  %v12433_v34 = vpop.eup %12432 }
 0xc14   :  { %v4058_v21 = vpop.permute.xlu1 %4057  ;;  %v3900_v2 = vmul.f32 %v12433_v34, %v13822_v8  ;;  %v4202_v44 = vpop.permute.xlu0 %4201 }
 0xc15   :  { %v4063_v57 = vsel %vm956_vm2, %v4058_v21, 0  ;;  %11528 = vmatmul.mubr.msk.bf16.vlgmr.msra.gmra.mrb[136].mxu1 %vm856_vm3, %v3906_v32  ;;  %11534 = vmatmul.mubr.msk.bf16.vlgmr.msra.gmra.mrb[124].mxu0 %vm856_vm3, %v3907_v25  ;;  %v4207_v9 = vsel %vm956_vm2, %v4202_v44, 0 }
 0xc16   :  { %11538 = vmatpush3.bf16.msra.mxu1 %v4063_v57  ;;  %11539 = vmatprep.mubr.msk.bf16.mxu1 %vm12764_vm0, %v15346_v37  ;;  %v3908_v27 = vpack.c.bf16 %v3900_v2, %v3900_v2 }
 0xc17   :  { %v12435_v17 = vpop.eup %12434  ;;  %11545 = vmatprep.mubr.msk.bf16.mxu0 %vm12764_vm0, %v15346_v37  ;;  %11549 = vmatprep.subr.bf16.mxu1 %v15346_v37 }
 0xc18   :  { %v4106_v36 = vpop.permute.xlu1 %4105  ;;  %v3901_v52 = vmul.f32 %v12435_v17, %v12423_v55  ;;  %v12437_v54 = vpop.eup %12436  ;;  %v12180_v55 = vld [vmem:[#allocation4 + $0x4] ss:$8 sps:$4 sm:$0xff]  }
 0xc19   :  { %v4111_v51 = vsel %vm956_vm2, %v4106_v36, 0  ;;  %v3902_v41 = vmul.f32 %v12437_v54, %v13826_v50  ;;  %v12439_v33 = vpop.eup %12438  ;;  %v12177_v50 = vld [vmem:[#allocation2 + $0x38] sm:$0xff]  }
 0xc1a   :  { %11544 = vmatpush3.bf16.msra.mxu0 %v4111_v51  ;;  %v3909_v48 = vpack.c.bf16 %v3901_v52, %v3901_v52  ;;  %v3904_v5 = vmul.f32 %v12439_v33, %v13816_v12  ;;  %v12176_v12 = vld [vmem:[#allocation2 + $0x30] sm:$0xff]   ;;  %v12198_v33 = vld [vmem:[#allocation4 + $0x64] ss:$8 sps:$4 sm:$0xff]  }
 0xc1b   :  { %11555 = vmatprep.subr.bf16.mxu0 %v15346_v37  ;;  %v3910_v7 = vpack.c.bf16 %v3902_v41, %v3902_v41  ;;  %v12195_v41 = vld [vmem:[#allocation4 + $0x54] ss:$8 sps:$4 sm:$0xff]  }
 0xc1c   :  { %v4154_v23 = vpop.permute.xlu1 %4153  ;;  %v3912_v14 = vpack.c.bf16 %v3904_v5, %v3904_v5  ;;  %v12199_v5 = vld [vmem:[#allocation4 + $0x70] ss:$8 sps:$4 sm:$0xff]  }
 0xc1d   :  { %v4159_v6 = vsel %vm956_vm2, %v4154_v23, 0  ;;  %11540 = vmatmul.mubr.msk.bf16.vlgmr.msra.gmra.mrb[140].mxu1 %vm856_vm3, %v3908_v27  ;;  %11546 = vmatmul.mubr.msk.bf16.vlgmr.msra.gmra.mrb[128].mxu0 %vm856_vm3, %v3909_v48 }
 0xc1e   :  { %11550 = vmatpush3.bf16.msra.mxu1 %v4159_v6  ;;  %11556 = vmatpush3.bf16.msra.mxu0 %v4207_v9 }
 0xc1f   :  { %11551 = vmatprep.mubr.msk.bf16.mxu1 %vm12764_vm0, %v15346_v37  ;;  %11561 = vmatprep.subr.bf16.mxu1 %v15346_v37 }
 0xc20   :  { %11557 = vmatprep.mubr.msk.bf16.mxu0 %vm12764_vm0, %v15346_v37  ;;  %11567 = vmatprep.subr.bf16.mxu0 %v12176_v12 }
 0xc25   :  { %11552 = vmatmul.mubr.msk.bf16.vlgmr.msra.gmra.mrb[144].mxu1 %vm856_vm3, %v3910_v7  ;;  %v12193_v7 = vld [vmem:[#allocation4 + $0x50] ss:$8 sps:$4 sm:$0xff]  }
 0xc26   :  { %11563 = vmatprep.mubr.msk.bf16.mxu1 %vm12764_vm0, %v15346_v37 }
 0xc4d   :  { %v3885_v3 = vpop.xlane.xlu1 %3884 }
 0xc4e   :  { %12440 = vrcp.f32 %v3885_v3  ;;  %v12196_v3 = vld [vmem:[#allocation4 + $0x60] ss:$8 sps:$4 sm:$0xff]  }
 0xc51   :  { %v4250_v11 = vpop.permute.xlu1 %4249 }
 0xc52   :  { %v4255_v62 = vsel %vm956_vm2, %v4250_v11, 0  ;;  %v12201_v11 = vld [vmem:[#allocation4 + $0x74] ss:$8 sps:$4 sm:$0xff]  }
 0xc53   :  { %11562 = vmatpush3.bf16.msra.mxu1 %v4255_v62  ;;  %v10452_v62 = vld [vmem:[%s15327_s4] ss:$0 sm:$0xff] }
 0xc54   :  { %4563 = vmatprep.subr.bf16.mxu1 %v12180_v55 }
 0xc56   :  { %v3955_v18 = vpop.f32.mrb[120].mxu0  ;;  %11564 = vmatmul.mubr.msk.bf16.vlgmr.msra.gmra.mrb[148].mxu1 %vm856_vm3, %v3912_v14 }
 0xc57   :  { %v11523_v45 = vpop.f32.mrb[121].mxu0  ;;  %4595 = vmatprep.mubr.bf16.mxu1 %v15344_v0  ;;  %4564 = vmatpush1.bf16.msra.mxu1 %v12178_v63 }
 0xc58   :  { %v12441_v35 = vpop.eup %12440  ;;  %v3958_v22 = vpop.f32.mrb[122].mxu0  ;;  %4565 = vmatprep.subr.bf16.mxu1 %v12183_v10  ;;  %v12651_v10 = vld [vmem:[%s15352_s18 + $0x8] sm:$0xff] }
 0xc59   :  { %v11524_v8 = vpop.f32.mrb[123].mxu0  ;;  %v3903_v58 = vmul.f32 %v12441_v35, %v13848_v47  ;;  %v12190_v47 = vld [vmem:[#allocation4 + $0x40] ss:$8 sps:$4 sm:$0xff]  }
 0xc5a   :  { %v10453_v22 = vld [vmem:[%s15328_s5] ss:$0 sm:$0xff] }
 0xc5b   :  { %v3911_v53 = vpack.c.bf16 %v3903_v58, %v3903_v58  ;;  %4566 = vmatpush1.bf16.msra.mxu1 %v12181_v19  ;;  %v12650_v58 = vld [vmem:[%s15352_s18] sm:$0xff] }
 0xc5c   :  { %4567 = vmatprep.subr.bf16.mxu1 %v12186_v56  ;;  %v10454_v56 = vld [vmem:[%s15329_s6] ss:$0 sm:$0xff] }
 0xc5d   :  { %11558 = vmatmul.mubr.msk.bf16.vlgmr.msra.gmra.mrb[132].mxu0 %vm856_vm3, %v3911_v53 }
 0xc5e   :  { %11568 = vmatpush3.bf16.msra.mxu0 %v12176_v12 }
 0xc5f   :  { %11569 = vmatprep.subr.bf16.mxu0 %v12177_v50  ;;  %4568 = vmatpush1.bf16.msra.mxu1 %v12184_v1  ;;  %v12652_v1 = vld [vmem:[%s15352_s18 + $0x18] sm:$0xff] }
 0xc60   :  { %4569 = vmatprep.subr.bf16.mxu1 %v12189_v20 }
 0xc62   :  { %11570 = vmatpush3.bf16.msra.mxu0 %v12177_v50 }
 0xc63   :  { %4570 = vmatpush1.bf16.msra.mxu1 %v12187_v29 }
 0xc64   :  { %4571 = vmatprep.subr.bf16.mxu1 %v12192_v46  ;;  %v12653_v46 = vld [vmem:[%s15352_s18 + $0x10] sm:$0xff] }
 0xc67   :  { %4572 = vmatpush1.bf16.msra.mxu1 %v12190_v47 }
 0xc68   :  { %4573 = vmatprep.subr.bf16.mxu1 %v12195_v41 }
 0xc6b   :  { %4574 = vmatpush1.bf16.msra.mxu1 %v12193_v7 }
 0xc6c   :  { %4575 = vmatprep.subr.bf16.mxu1 %v12198_v33  ;;  %v12202_v33 = vld [vmem:[#allocation6 + $0x40] sm:$0xff]  }
 0xc6d   :  { %10861 = vmatprep.subr.bf16.mxu0 %v12202_v33 }
 0xc6f   :  { %4576 = vmatpush1.bf16.msra.mxu1 %v12196_v3  ;;  %v12203_v3 = vld [vmem:[#allocation6] sm:$0xff]  }
 0xc70   :  { %4577 = vmatprep.subr.bf16.mxu1 %v12201_v11  ;;  %v12205_v11 = vld [vmem:[#allocation6 + $0x8] sm:$0xff]  }
 0xc73   :  { %4578 = vmatpush1.bf16.msra.mxu1 %v12199_v5  ;;  %v12204_v5 = vld [vmem:[#allocation6 + $0x48] sm:$0xff]  }
 0xce8   :  { %v4003_v4 = vpop.f32.mrb[136].mxu1  ;;  %v4051_v49 = vpop.f32.mrb[124].mxu0 }
 0xce9   :  { %v4297_v59 = vpack.c.bf16 %v4003_v4, %v3955_v18  ;;  %v11529_v15 = vpop.f32.mrb[137].mxu1  ;;  %v11535_v28 = vpop.f32.mrb[125].mxu0 }
 0xcea   :  { %v4006_v31 = vpop.f32.mrb[138].mxu1  ;;  %v4054_v42 = vpop.f32.mrb[126].mxu0 }
 0xceb   :  { %v11530_v16 = vpop.f32.mrb[139].mxu1  ;;  %v11536_v30 = vpop.f32.mrb[127].mxu0  ;;  %11571 = vmatprep.mubr.msk.bf16.mxu0 %vm479_vm1, %v4297_v59 }
 0xcf0   :  { %v4099_v13 = vpop.f32.mrb[140].mxu1  ;;  %v4147_v60 = vpop.f32.mrb[128].mxu0 }
 0xcf1   :  { %v4298_v61 = vpack.c.bf16 %v4099_v13, %v4051_v49  ;;  %v11541_v38 = vpop.f32.mrb[141].mxu1  ;;  %v11547_v26 = vpop.f32.mrb[129].mxu0 }
 0xcf2   :  { %v4102_v24 = vpop.f32.mrb[142].mxu1  ;;  %v4150_v25 = vpop.f32.mrb[130].mxu0  ;;  %v12654_v26 = vld [vmem:[%s15352_s18 + $0x20] sm:$0xff] }
 0xcf3   :  { %v11542_v32 = vpop.f32.mrb[143].mxu1  ;;  %v11548_v34 = vpop.f32.mrb[131].mxu0  ;;  %11572 = vmatmul.mubr.msk.bf16.vlgmr.msra.gmra.mrb[76].mxu0 %vm479_vm1, %v4298_v61 }
 0xcf4   :  { %10862 = vmatpush3.bf16.msra.mxu0 %v12203_v3 }
 0xcf5   :  { %10863 = vmatprep.subr.bf16.mxu0 %v12204_v5 }
 0xcf8   :  { %v4195_v21 = vpop.f32.mrb[144].mxu1  ;;  %10864 = vmatpush3.bf16.msra.mxu0 %v12205_v11 }
 0xcf9   :  { %v4299_v57 = vpack.c.bf16 %v4195_v21, %v4147_v60  ;;  %v11553_v17 = vpop.f32.mrb[145].mxu1 }
 0xcfa   :  { %v4198_v2 = vpop.f32.mrb[146].mxu1 }
 0xcfb   :  { %v11554_v36 = vpop.f32.mrb[147].mxu1  ;;  %11575 = vmatprep.mubr.msk.bf16.mxu0 %vm479_vm1, %v4299_v57  ;;  %v12655_v57 = vld [vmem:[%s15352_s18 + $0x28] sm:$0xff]  ;;  %v12656_v2 = vld [vmem:[%s15352_s18 + $0x38] sm:$0xff] }
 0xd29   :  { %v4291_v52 = vpop.f32.mrb[148].mxu1 }
 0xd2a   :  { %v11565_v51 = vpop.f32.mrb[149].mxu1 }
 0xd2b   :  { %v4294_v44 = vpop.f32.mrb[150].mxu1  ;;  %v12657_v51 = vld [vmem:[%s15352_s18 + $0x30] sm:$0xff] }
 0xd2c   :  { %v11566_v48 = vpop.f32.mrb[151].mxu1 }
 0xd30   :  { %v4243_v27 = vpop.f32.mrb[132].mxu0 }
 0xd31   :  { %v4300_v54 = vpack.c.bf16 %v4291_v52, %v4243_v27  ;;  %v11559_v23 = vpop.f32.mrb[133].mxu0 }
 0xd32   :  { %v4246_v9 = vpop.f32.mrb[134].mxu0 }
 0xd33   :  { %v11560_v6 = vpop.f32.mrb[135].mxu0  ;;  %11576 = vmatmul.mubr.msk.bf16.gmra.mrb[80].mxu0 %vm479_vm1, %v4300_v54 }
 0xdc6   :  { %v11573_v14 = vpop.f32.mrb[76].mxu0 }
 0xdc7   :  { %v4359_v18 = vpop.f32.mrb[77].mxu0  ;;  %v4407_v63 = vadd.f32 %v11573_v14, %v10452_v62  ;;  %v12207_v14 = vld [vmem:[#allocation6 + $0x10] sm:$0xff]  }
 0xdc8   :  { %v4405_v45 = vadd.f32 %v10452_v62, %v4359_v18  ;;  %v11574_v35 = vpop.f32.mrb[78].mxu0  ;;  %v12208_v18 = vld [vmem:[#allocation6 + $0x58] sm:$0xff]  }
 0xdc9   :  { %v4362_v8 = vpop.f32.mrb[79].mxu0  ;;  %v4408_v12 = vadd.f32 %v11574_v35, %v10452_v62  ;;  %v4415_v47 = vadd.f32 %v12653_v46, %v4407_v63  ;;  %v12210_v35 = vld [vmem:[#allocation6 + $0x60] sm:$0xff]   ;;  %v12217_v63 = vld [vmem:[#allocation6 + $0x38] sm:$0xff]  }
 0xdca   :  { %v4413_v53 = vadd.f32 %v12650_v58, %v4405_v45  ;;  %v4406_v50 = vadd.f32 %v10452_v62, %v4362_v8  ;;  %v12209_v45 = vld [vmem:[#allocation6 + $0x18] sm:$0xff]   ;;  %v12212_v8 = vld [vmem:[#allocation6 + $0x68] sm:$0xff]  }
 0xdcb   :  { %v4416_v20 = vadd.f32 %v12652_v1, %v4408_v12  ;;  %v4430_v28 = vmul.f32 %v10453_v22, %v4415_v47  ;;  %v12213_v58 = vld [vmem:[#allocation6 + $0x28] sm:$0xff]   ;;  %v12215_v12 = vld [vmem:[#allocation6 + $0x30] sm:$0xff]   ;;  %v12221_v1 = vld [vmem:[%s15351_s24 + $0xd8] ss:$12 sps:$4 sm:$0xff]  }
 0xdcc   :  { %v4428_v55 = vmul.f32 %v10453_v22, %v4413_v53  ;;  %v4414_v19 = vadd.f32 %v12651_v10, %v4406_v50  ;;  %v12214_v53 = vld [vmem:[#allocation6 + $0x70] sm:$0xff]   ;;  %v12216_v50 = vld [vmem:[#allocation6 + $0x78] sm:$0xff]  }
 0xdcd   :  { %v4431_v59 = vmul.f32 %v10453_v22, %v4416_v20  ;;  %v13923_v42 = vadd.f32 %v10454_v56, %v4430_v28  ;;  %v12220_v10 = vld [vmem:[%s15351_s24 + $0xc4] ss:$12 sps:$4 sm:$0xff]   ;;  %v12226_v20 = vld [vmem:[%s15351_s24 + $0xf4] ss:$12 sps:$4 sm:$0xff]   ;;  %v12230_v46 = vld [vmem:[%s15351_s24 + $0x10c] ss:$12 sps:$4 sm:$0xff]  }
 0xdce   :  { %v4429_v29 = vmul.f32 %v10453_v22, %v4414_v19  ;;  %v13914_v4 = vadd.f32 %v10454_v56, %v4428_v55  ;;  %v12218_v55 = vld [vmem:[%s15351_s24 + $0xc0] ss:$12 sps:$4 sm:$0xff]   ;;  %v12223_v19 = vld [vmem:[%s15351_s24 + $0xdc] ss:$12 sps:$4 sm:$0xff]   ;;  %5209 = vmatprep.subr.bf16.mxu1 %v12220_v10 }
 0xdcf   :  { %v13921_v31 = vadd.f32 %v10454_v56, %v4431_v59  ;;  %v12228_v47 = vld [vmem:[%s15351_s24 + $0x108] ss:$12 sps:$4 sm:$0xff]   ;;  %v4471_v59 = vld [vmem:[%s15331_s8] sm:$0x3] }
 0xdd0   :  { %v13916_v49 = vadd.f32 %v10454_v56, %v4429_v29  ;;  %v12224_v29 = vld [vmem:[%s15351_s24 + $0xf0] ss:$12 sps:$4 sm:$0xff]   ;;  %v13991_v28 = vrot.slane %v4471_v59, %v13025_v40 }
 0xdd1   :  { %v4452_v16 = vpack.c.bf16 %v13921_v31, %v13923_v42 }
 0xdd2   :  { %v4451_v15 = vpack.c.bf16 %v13916_v49, %v13914_v4 }
 0xdd4   :  { %4596 = vmatmul.mubr.bf16.vlgmr.msra.gmra.mrb[152].mxu1 %v4451_v15  ;;  %v13988_v15 = vrot.slane %v4471_v59, %v13034_v43 }
 0xdd5   :  { %4605 = vmatprep.mubr.bf16.mxu1 %v15344_v0  ;;  %5210 = vmatpush1.bf16.msra.mxu1 %v12218_v55 }
 0xdd6   :  { %5211 = vmatprep.subr.bf16.mxu1 %v12223_v19 }
 0xdd9   :  { %5212 = vmatpush1.bf16.msra.mxu1 %v12221_v1 }
 0xdda   :  { %5213 = vmatprep.subr.bf16.mxu1 %v12226_v20 }
 0xddc   :  { %4606 = vmatmul.mubr.bf16.gmra.mrb[156].mxu1 %v4452_v16 }
 0xddd   :  { %4615 = vmatprep.mubr.bf16.mxu1 %v15344_v0  ;;  %5214 = vmatpush1.bf16.msra.mxu1 %v12224_v29 }
 0xdde   :  { %5215 = vmatprep.subr.bf16.mxu1 %v12230_v46 }
 0xde1   :  { %5216 = vmatpush1.bf16.msra.mxu1 %v12228_v47 }
 0xe06   :  { %v11577_v30 = vpop.f32.mrb[80].mxu0 }
 0xe07   :  { %v4375_v13 = vpop.f32.mrb[81].mxu0  ;;  %v4411_v34 = vadd.f32 %v11577_v30, %v10452_v62 }
 0xe08   :  { %v4409_v60 = vadd.f32 %v10452_v62, %v4375_v13  ;;  %v11578_v61 = vpop.f32.mrb[82].mxu0 }
 0xe09   :  { %v4378_v38 = vpop.f32.mrb[83].mxu0  ;;  %v4412_v25 = vadd.f32 %v11578_v61, %v10452_v62  ;;  %v4419_v44 = vadd.f32 %v12657_v51, %v4411_v34 }
 0xe0a   :  { %v4417_v24 = vadd.f32 %v12654_v26, %v4409_v60  ;;  %v4410_v32 = vadd.f32 %v10452_v62, %v4378_v38  ;;  %v12206_v62 = vld [vmem:[#allocation6 + $0x50] sm:$0xff]  }
 0xe0b   :  { %v4420_v36 = vadd.f32 %v12656_v2, %v4412_v25  ;;  %v4434_v9 = vmul.f32 %v10453_v22, %v4419_v44  ;;  %10865 = vmatprep.subr.bf16.mxu0 %v12206_v62 }
 0xe0c   :  { %v4432_v21 = vmul.f32 %v10453_v22, %v4417_v24  ;;  %v4418_v17 = vadd.f32 %v12655_v57, %v4410_v32  ;;  %10866 = vmatpush3.bf16.msra.mxu0 %v12207_v14 }
 0xe0d   :  { %v4435_v54 = vmul.f32 %v10453_v22, %v4420_v36  ;;  %v13949_v41 = vadd.f32 %v10454_v56, %v4434_v9  ;;  %10867 = vmatprep.subr.bf16.mxu0 %v12208_v18 }
 0xe0e   :  { %v4433_v52 = vmul.f32 %v10453_v22, %v4418_v17  ;;  %v13940_v48 = vadd.f32 %v10454_v56, %v4432_v21  ;;  %v12211_v22 = vld [vmem:[#allocation6 + $0x20] sm:$0xff]  }
 0xe0f   :  { %v13947_v6 = vadd.f32 %v10454_v56, %v4435_v54 }
 0xe10   :  { %v13942_v27 = vadd.f32 %v10454_v56, %v4433_v52  ;;  %10868 = vmatpush3.bf16.msra.mxu0 %v12209_v45  ;;  %v13966_v56 = vld [vmem:[%s15351_s24 + $0xc8] ss:$12 sps:$4 sm:$0xff]  }
 0xe11   :  { %v4454_v7 = vpack.c.bf16 %v13947_v6, %v13949_v41  ;;  %10869 = vmatprep.subr.bf16.mxu0 %v12210_v35 }
 0xe12   :  { %v4453_v23 = vpack.c.bf16 %v13942_v27, %v13940_v48 }
 0xe14   :  { %4616 = vmatmul.mubr.bf16.gmra.mrb[160].mxu1 %v4453_v23  ;;  %10870 = vmatpush3.bf16.msra.mxu0 %v12211_v22 }
 0xe15   :  { %4625 = vmatprep.mubr.bf16.mxu1 %v15344_v0  ;;  %10871 = vmatprep.subr.bf16.mxu0 %v12212_v8 }
 0xe18   :  { %10872 = vmatpush3.bf16.msra.mxu0 %v12213_v58 }
 0xe19   :  { %10873 = vmatprep.subr.bf16.mxu0 %v12214_v53 }
 0xe1c   :  { %4626 = vmatmul.mubr.bf16.gmra.mrb[164].mxu1 %v4454_v7  ;;  %10874 = vmatpush3.bf16.msra.mxu0 %v12215_v12 }
 0xe1d   :  { %5241 = vmatprep.mubr.bf16.mxu1 %v15344_v0  ;;  %10875 = vmatprep.subr.bf16.mxu0 %v12216_v50 }
 0xe20   :  { %10876 = vmatpush3.bf16.msra.mxu0 %v12217_v63 }
 0xe21   :  { %11579 = vmatprep.subr.bf16.mxu0 %v13966_v56 }
 0xea7   :  { %v4597_v16 = vpop.f32.mrb[152].mxu1 }
 0xea8   :  { %v13994_v30 = vadd.f32 %v4597_v16, %v13988_v15  ;;  %v4599_v13 = vpop.f32.mrb[153].mxu1 }
 0xea9   :  { %v13997_v60 = vadd.f32 %v4599_v13, %v13991_v28  ;;  %v4601_v61 = vpop.f32.mrb[154].mxu1 }
 0xeaa   :  { %v4652_v38 = vmul.f32 0.044715, %v13994_v30  ;;  %v14001_v26 = vadd.f32 %v4601_v61, %v13988_v15  ;;  %v4603_v24 = vpop.f32.mrb[155].mxu1 }
 0xeab   :  { %v4653_v25 = vmul.f32 0.044715, %v13997_v60  ;;  %v14005_v32 = vadd.f32 %v4603_v24, %v13991_v28 }
 0xeac   :  { %v4668_v34 = vmul.f32 %v4652_v38, %v13994_v30  ;;  %v4654_v21 = vmul.f32 0.044715, %v14001_v26 }
 0xead   :  { %v4669_v57 = vmul.f32 %v4653_v25, %v13997_v60  ;;  %v4655_v17 = vmul.f32 0.044715, %v14005_v32 }
 0xeae   :  { %v4684_v2 = vmul.f32 %v4668_v34, %v13994_v30  ;;  %v4670_v36 = vmul.f32 %v4654_v21, %v14001_v26 }
 0xeaf   :  { %v4685_v52 = vmul.f32 %v4669_v57, %v13997_v60  ;;  %v4671_v51 = vmul.f32 %v4655_v17, %v14005_v32  ;;  %v4607_v44 = vpop.f32.mrb[156].mxu1 }
 0xeb0   :  { %v4700_v54 = vadd.f32 %v4684_v2, %v13994_v30  ;;  %v4686_v23 = vmul.f32 %v4670_v36, %v14001_v26  ;;  %v14018_v9 = vadd.f32 %v4607_v44, %v13988_v15  ;;  %v4609_v7 = vpop.f32.mrb[157].mxu1  ;;  %v4636_v44 = vmul.f32 0.5, %v13994_v30  ;;  %v12231_v30 = vld [vmem:[%s15351_s24 + $0xe0] ss:$12 sps:$4 sm:$0xff]  }
 0xeb1   :  { %v4687_v33 = vmul.f32 %v4671_v51, %v14005_v32  ;;  %v14022_v3 = vadd.f32 %v4609_v7, %v13991_v28  ;;  %v4611_v5 = vpop.f32.mrb[158].mxu1  ;;  %v4701_v11 = vadd.f32 %v4685_v52, %v13997_v60  ;;  %v4637_v7 = vmul.f32 0.5, %v13997_v60 }
 0xeb2   :  { %v4716_v62 = vmul.f32 0.7978846, %v4700_v54  ;;  %v4702_v14 = vadd.f32 %v4686_v23, %v14001_v26  ;;  %v4656_v18 = vmul.f32 0.044715, %v14018_v9  ;;  %v4612_v45 = vadd.f32 %v4611_v5, %v13988_v15  ;;  %v4613_v35 = vpop.f32.mrb[159].mxu1 }
 0xeb3   :  { %v4657_v22 = vmul.f32 0.044715, %v14022_v3  ;;  %v4614_v8 = vadd.f32 %v4613_v35, %v13991_v28  ;;  %v4703_v58 = vadd.f32 %v4687_v33, %v14005_v32  ;;  %v4717_v53 = vmul.f32 0.7978846, %v4701_v11 }
 0xeb4   :  { %12442 = vtanh.f32 %v4716_v62  ;;  %v4718_v12 = vmul.f32 0.7978846, %v4702_v14  ;;  %v4672_v50 = vmul.f32 %v4656_v18, %v14018_v9  ;;  %v4658_v63 = vmul.f32 0.044715, %v4612_v45 }
 0xeb5   :  { %v4673_v55 = vmul.f32 %v4657_v22, %v14022_v3  ;;  %v4659_v10 = vmul.f32 0.044715, %v4614_v8  ;;  %v4719_v19 = vmul.f32 0.7978846, %v4703_v58  ;;  %12444 = vtanh.f32 %v4717_v53 }
 0xeb6   :  { %12446 = vtanh.f32 %v4718_v12  ;;  %v4688_v1 = vmul.f32 %v4672_v50, %v14018_v9  ;;  %v4674_v20 = vmul.f32 %v4658_v63, %v4612_v45  ;;  %v4638_v54 = vmul.f32 0.5, %v14001_v26 }
 0xeb7   :  { %v4689_v29 = vmul.f32 %v4673_v55, %v14022_v3  ;;  %v4675_v46 = vmul.f32 %v4659_v10, %v4614_v8  ;;  %12448 = vtanh.f32 %v4719_v19  ;;  %v4639_v33 = vmul.f32 0.5, %v14005_v32 }
 0xeb8   :  { %v4690_v47 = vmul.f32 %v4674_v20, %v4612_v45  ;;  %v4704_v59 = vadd.f32 %v4688_v1, %v14018_v9  ;;  %v4640_v32 = vmul.f32 0.5, %v14018_v9  ;;  %v4642_v63 = vmul.f32 0.5, %v4612_v45 }
 0xeb9   :  { %v4691_v16 = vmul.f32 %v4675_v46, %v4614_v8  ;;  %v4705_v13 = vadd.f32 %v4689_v29, %v14022_v3  ;;  %v4641_v10 = vmul.f32 0.5, %v14022_v3  ;;  %v4643_v19 = vmul.f32 0.5, %v4614_v8 }
 0xeba   :  { %v4706_v61 = vadd.f32 %v4690_v47, %v4612_v45  ;;  %v4720_v38 = vmul.f32 0.7978846, %v4704_v59 }
 0xebb   :  { %v4707_v24 = vadd.f32 %v4691_v16, %v4614_v8  ;;  %v4721_v25 = vmul.f32 0.7978846, %v4705_v13 }
 0xebc   :  { %v4722_v34 = vmul.f32 0.7978846, %v4706_v61  ;;  %12450 = vtanh.f32 %v4720_v38 }
 0xebd   :  { %v4723_v21 = vmul.f32 0.7978846, %v4707_v24  ;;  %12452 = vtanh.f32 %v4721_v25 }
 0xebe   :  { %v12443_v57 = vpop.eup %12442  ;;  %12454 = vtanh.f32 %v4722_v34 }
 0xebf   :  { %v12445_v17 = vpop.eup %12444  ;;  %v4748_v2 = vadd.f32 1.0, %v12443_v57  ;;  %12456 = vtanh.f32 %v4723_v21 }
 0xec0   :  { %v12447_v36 = vpop.eup %12446  ;;  %v4749_v52 = vadd.f32 1.0, %v12445_v17 }
 0xec1   :  { %v12449_v51 = vpop.eup %12448  ;;  %v4750_v23 = vadd.f32 1.0, %v12447_v36  ;;  %v4764_v11 = vmul.f32 %v4748_v2, %v4636_v44 }
 0xec2   :  { %v4751_v5 = vadd.f32 1.0, %v12449_v51  ;;  %v4765_v14 = vmul.f32 %v4749_v52, %v4637_v7 }
 0xec3   :  { %v4766_v62 = vmul.f32 %v4750_v23, %v4638_v54 }
 0xec4   :  { %v4767_v18 = vmul.f32 %v4751_v5, %v4639_v33 }
 0xec5   :  { %v4780_v35 = vpack.c.bf16 %v4766_v62, %v4764_v11 }
 0xec6   :  { %v12451_v22 = vpop.eup %12450  ;;  %v4781_v58 = vpack.c.bf16 %v4767_v18, %v4765_v14 }
 0xec7   :  { %v12453_v53 = vpop.eup %12452  ;;  %v4752_v12 = vadd.f32 1.0, %v12451_v22 }
 0xec8   :  { %v12455_v26 = vpop.eup %12454  ;;  %4955 = vmatprep.mubr.bf16.mxu0 %v4781_v58  ;;  %v4753_v50 = vadd.f32 1.0, %v12453_v53 }
 0xec9   :  { %v12457_v60 = vpop.eup %12456  ;;  %4956 = vmatmul.mubr.bf16.vlgmr.msra.gmra.mrb[136].mxu0 %v4780_v35  ;;  %v4754_v55 = vadd.f32 1.0, %v12455_v26  ;;  %v4768_v20 = vmul.f32 %v4752_v12, %v4640_v32 }
 0xeca   :  { %v4755_v1 = vadd.f32 1.0, %v12457_v60  ;;  %11580 = vmatpush3.bf16.msra.mxu0 %v13966_v56  ;;  %v4769_v46 = vmul.f32 %v4753_v50, %v4641_v10 }
 0xecb   :  { %v4770_v29 = vmul.f32 %v4754_v55, %v4642_v63  ;;  %11581 = vmatprep.subr.bf16.mxu0 %v12231_v30 }
 0xecc   :  { %v4771_v47 = vmul.f32 %v4755_v1, %v4643_v19 }
 0xecd   :  { %v4782_v59 = vpack.c.bf16 %v4770_v29, %v4768_v20 }
 0xece   :  { %v4783_v16 = vpack.c.bf16 %v4771_v47, %v4769_v46  ;;  %11582 = vmatpush3.bf16.msra.mxu0 %v12231_v30 }
 0xed0   :  { %4963 = vmatprep.mubr.bf16.mxu0 %v4783_v16 }
 0xed1   :  { %4964 = vmatmul.mubr.bf16.gmra.mrb[140].mxu0 %v4782_v59 }
 0xee7   :  { %v4617_v13 = vpop.f32.mrb[160].mxu1 }
 0xee8   :  { %v14048_v9 = vadd.f32 %v4617_v13, %v13988_v15  ;;  %v4619_v45 = vpop.f32.mrb[161].mxu1 }
 0xee9   :  { %v14051_v3 = vadd.f32 %v4619_v45, %v13991_v28  ;;  %v4621_v8 = vpop.f32.mrb[162].mxu1 }
 0xeea   :  { %v4660_v56 = vmul.f32 0.044715, %v14048_v9  ;;  %v14055_v61 = vadd.f32 %v4621_v8, %v13988_v15  ;;  %v4623_v38 = vpop.f32.mrb[163].mxu1 }
 0xeeb   :  { %v4661_v24 = vmul.f32 0.044715, %v14051_v3  ;;  %v14059_v25 = vadd.f32 %v4623_v38, %v13991_v28 }
 0xeec   :  { %v4676_v34 = vmul.f32 %v4660_v56, %v14048_v9  ;;  %v4662_v21 = vmul.f32 0.044715, %v14055_v61 }
 0xeed   :  { %v4677_v57 = vmul.f32 %v4661_v24, %v14051_v3  ;;  %v4663_v17 = vmul.f32 0.044715, %v14059_v25 }
 0xeee   :  { %v4692_v2 = vmul.f32 %v4676_v34, %v14048_v9  ;;  %v4678_v36 = vmul.f32 %v4662_v21, %v14055_v61 }
 0xeef   :  { %v4693_v52 = vmul.f32 %v4677_v57, %v14051_v3  ;;  %v4679_v51 = vmul.f32 %v4663_v17, %v14059_v25  ;;  %v4627_v44 = vpop.f32.mrb[164].mxu1 }
 0xef0   :  { %v4694_v54 = vmul.f32 %v4678_v36, %v14055_v61  ;;  %v14071_v23 = vadd.f32 %v4627_v44, %v13988_v15  ;;  %v4629_v7 = vpop.f32.mrb[165].mxu1  ;;  %v4708_v33 = vadd.f32 %v4692_v2, %v14048_v9  ;;  %v4644_v36 = vmul.f32 0.5, %v14048_v9 }
 0xef1   :  { %v4695_v5 = vmul.f32 %v4679_v51, %v14059_v25  ;;  %v14076_v11 = vadd.f32 %v4629_v7, %v13991_v28  ;;  %v4631_v62 = vpop.f32.mrb[166].mxu1  ;;  %v4709_v14 = vadd.f32 %v4693_v52, %v14051_v3  ;;  %v4646_v52 = vmul.f32 0.5, %v14055_v61 }
 0xef2   :  { %v4664_v18 = vmul.f32 0.044715, %v14071_v23  ;;  %v4632_v35 = vadd.f32 %v4631_v62, %v13988_v15  ;;  %v4633_v22 = vpop.f32.mrb[167].mxu1  ;;  %v4710_v58 = vadd.f32 %v4694_v54, %v14055_v61  ;;  %v4724_v53 = vmul.f32 0.7978846, %v4708_v33 }
 0xef3   :  { %v4665_v12 = vmul.f32 0.044715, %v14076_v11  ;;  %v4634_v30 = vadd.f32 %v4633_v22, %v13991_v28  ;;  %v4711_v26 = vadd.f32 %v4695_v5, %v14059_v25  ;;  %v4725_v50 = vmul.f32 0.7978846, %v4709_v14 }
 0xef4   :  { %v4680_v60 = vmul.f32 %v4664_v18, %v14071_v23  ;;  %v4666_v32 = vmul.f32 0.044715, %v4632_v35  ;;  %v4726_v63 = vmul.f32 0.7978846, %v4710_v58  ;;  %12458 = vtanh.f32 %v4724_v53 }
 0xef5   :  { %v4681_v55 = vmul.f32 %v4665_v12, %v14076_v11  ;;  %v4667_v10 = vmul.f32 0.044715, %v4634_v30  ;;  %v4727_v15 = vmul.f32 0.7978846, %v4711_v26  ;;  %12460 = vtanh.f32 %v4725_v50 }
 0xef6   :  { %v4696_v19 = vmul.f32 %v4680_v60, %v14071_v23  ;;  %v4682_v1 = vmul.f32 %v4666_v32, %v4632_v35  ;;  %12462 = vtanh.f32 %v4726_v63  ;;  %v4645_v44 = vmul.f32 0.5, %v14051_v3 }
 0xef7   :  { %v4697_v20 = vmul.f32 %v4681_v55, %v14076_v11  ;;  %v4683_v28 = vmul.f32 %v4667_v10, %v4634_v30  ;;  %12464 = vtanh.f32 %v4727_v15  ;;  %v4647_v54 = vmul.f32 0.5, %v14059_v25 }
 0xef8   :  { %v4698_v29 = vmul.f32 %v4682_v1, %v4632_v35  ;;  %v4712_v46 = vadd.f32 %v4696_v19, %v14071_v23  ;;  %v4648_v61 = vmul.f32 0.5, %v14071_v23  ;;  %v4650_v3 = vmul.f32 0.5, %v4632_v35  ;;  %v12234_v23 = vld [vmem:[%s15351_s24 + $0x124] ss:$12 sps:$4 sm:$0xff]  }
 0xef9   :  { %v4699_v47 = vmul.f32 %v4683_v28, %v4634_v30  ;;  %v4713_v59 = vadd.f32 %v4697_v20, %v14076_v11  ;;  %v4649_v25 = vmul.f32 0.5, %v14076_v11  ;;  %v4651_v32 = vmul.f32 0.5, %v4634_v30  ;;  %v12232_v28 = vld [vmem:[%s15351_s24 + $0x120] ss:$12 sps:$4 sm:$0xff]   ;;  %v12235_v11 = vld [vmem:[%s15351_s24 + $0xf8] ss:$12 sps:$4 sm:$0xff]   ;;  %5217 = vmatprep.subr.bf16.mxu1 %v12234_v23 }
 0xefa   :  { %v4714_v16 = vadd.f32 %v4698_v29, %v4632_v35  ;;  %v4728_v13 = vmul.f32 0.7978846, %v4712_v46  ;;  %11583 = vmatprep.subr.bf16.mxu0 %v12235_v11  ;;  %5218 = vmatpush1.bf16.msra.mxu1 %v12232_v28  ;;  %v12238_v35 = vld [vmem:[%s15351_s24 + $0x13c] ss:$12 sps:$4 sm:$0xff]   ;;  %v12236_v29 = vld [vmem:[%s15351_s24 + $0x138] ss:$12 sps:$4 sm:$0xff]  }
 0xefb   :  { %v4715_v45 = vadd.f32 %v4699_v47, %v4634_v30  ;;  %v4729_v8 = vmul.f32 0.7978846, %v4713_v59  ;;  %11584 = vmatpush3.bf16.msra.mxu0 %v12235_v11  ;;  %v12239_v30 = vld [vmem:[%s15351_s24 + $0x110] ss:$12 sps:$4 sm:$0xff]   ;;  %5219 = vmatprep.subr.bf16.mxu1 %v12238_v35  ;;  %v12242_v46 = vld [vmem:[%s15351_s24 + $0x154] ss:$12 sps:$4 sm:$0xff]  }
 0xefc   :  { %v4730_v56 = vmul.f32 0.7978846, %v4714_v16  ;;  %12466 = vtanh.f32 %v4728_v13  ;;  %11585 = vmatprep.subr.bf16.mxu0 %v12239_v30  ;;  %v12243_v47 = vld [vmem:[%s15351_s24 + $0x128] ss:$12 sps:$4 sm:$0xff]   ;;  %v12240_v59 = vld [vmem:[%s15351_s24 + $0x150] ss:$12 sps:$4 sm:$0xff]  }
 0xefd   :  { %v4731_v38 = vmul.f32 0.7978846, %v4715_v45  ;;  %12468 = vtanh.f32 %v4729_v8  ;;  %v12246_v16 = vld [vmem:[%s15351_s24 + $0x16c] ss:$12 sps:$4 sm:$0xff]   ;;  %v12244_v45 = vld [vmem:[%s15351_s24 + $0x168] ss:$12 sps:$4 sm:$0xff]  }
 0xefe   :  { %v12459_v24 = vpop.eup %12458  ;;  %12470 = vtanh.f32 %v4730_v56  ;;  %5220 = vmatpush1.bf16.msra.mxu1 %v12236_v29  ;;  %v12247_v13 = vld [vmem:[%s15351_s24 + $0x140] ss:$12 sps:$4 sm:$0xff]   ;;  %v12248_v8 = vld [vmem:[%s15351_s24 + $0x158] ss:$12 sps:$4 sm:$0xff]   ;;  %v12249_v56 = vld [vmem:[%s15351_s24 + $0x170] ss:$12 sps:$4 sm:$0xff]  }
 0xeff   :  { %v12461_v34 = vpop.eup %12460  ;;  %v4756_v21 = vadd.f32 1.0, %v12459_v24  ;;  %12472 = vtanh.f32 %v4731_v38  ;;  %11586 = vmatpush3.bf16.msra.mxu0 %v12239_v30  ;;  %5221 = vmatprep.subr.bf16.mxu1 %v12242_v46  ;;  %v10471_v24 = vld [vmem:[%s15333_s10] ss:$0 sm:$0xff] }
 0xf00   :  { %v12463_v57 = vpop.eup %12462  ;;  %v4757_v17 = vadd.f32 1.0, %v12461_v34  ;;  %11587 = vmatprep.subr.bf16.mxu0 %v12243_v47 }
 0xf01   :  { %v12465_v2 = vpop.eup %12464  ;;  %v4758_v51 = vadd.f32 1.0, %v12463_v57  ;;  %v4772_v33 = vmul.f32 %v4756_v21, %v4644_v36 }
 0xf02   :  { %v4759_v7 = vadd.f32 1.0, %v12465_v2  ;;  %v4773_v62 = vmul.f32 %v4757_v17, %v4645_v44  ;;  %5222 = vmatpush1.bf16.msra.mxu1 %v12240_v59 }
 0xf03   :  { %v4774_v5 = vmul.f32 %v4758_v51, %v4646_v52  ;;  %11588 = vmatpush3.bf16.msra.mxu0 %v12243_v47  ;;  %5223 = vmatprep.subr.bf16.mxu1 %v12246_v16  ;;  %v10488_v52 = vld [vmem:[%s15334_s11] ss:$0 sm:$0xff] }
 0xf04   :  { %v4775_v14 = vmul.f32 %v4759_v7, %v4647_v54  ;;  %11589 = vmatprep.subr.bf16.mxu0 %v12247_v13 }
 0xf05   :  { %v4784_v18 = vpack.c.bf16 %v4774_v5, %v4772_v33  ;;  %v10489_v5 = vld [vmem:[#allocation7] ss:$0 sm:$0xff] }
 0xf06   :  { %v12467_v22 = vpop.eup %12466  ;;  %v4785_v58 = vpack.c.bf16 %v4775_v14, %v4773_v62  ;;  %5224 = vmatpush1.bf16.msra.mxu1 %v12244_v45 }
 0xf07   :  { %v12469_v53 = vpop.eup %12468  ;;  %v4760_v12 = vadd.f32 1.0, %v12467_v22  ;;  %11590 = vmatpush3.bf16.msra.mxu0 %v12247_v13  ;;  %11615 = vmatprep.subr.bf16.mxu1 %v15346_v37 }
 0xf08   :  { %v12471_v26 = vpop.eup %12470  ;;  %4971 = vmatprep.mubr.bf16.mxu0 %v4785_v58  ;;  %v4761_v9 = vadd.f32 1.0, %v12469_v53  ;;  %11591 = vmatprep.subr.bf16.mxu0 %v12248_v8 }
 0xf09   :  { %v12473_v50 = vpop.eup %12472  ;;  %4972 = vmatmul.mubr.bf16.gmra.mrb[144].mxu0 %v4784_v18  ;;  %v4762_v60 = vadd.f32 1.0, %v12471_v26  ;;  %v4776_v55 = vmul.f32 %v4760_v12, %v4648_v61 }
 0xf0a   :  { %v4763_v63 = vadd.f32 1.0, %v12473_v50  ;;  %v4777_v15 = vmul.f32 %v4761_v9, %v4649_v25 }
 0xf0b   :  { %v4778_v10 = vmul.f32 %v4762_v60, %v4650_v3  ;;  %11592 = vmatpush3.bf16.msra.mxu0 %v12248_v8 }
 0xf0c   :  { %v4779_v19 = vmul.f32 %v4763_v63, %v4651_v32  ;;  %11593 = vmatprep.subr.bf16.mxu0 %v12249_v56 }
 0xf0d   :  { %v4786_v1 = vpack.c.bf16 %v4778_v10, %v4776_v55 }
 0xf0e   :  { %v4787_v20 = vpack.c.bf16 %v4779_v19, %v4777_v15 }
 0xf0f   :  { %11594 = vmatpush3.bf16.msra.mxu0 %v12249_v56 }
 0xf10   :  { %4979 = vmatprep.mubr.bf16.mxu0 %v4787_v20  ;;  %11603 = vmatprep.subr.bf16.mxu0 %v15346_v37 }
 0xf11   :  { %4980 = vmatmul.mubr.bf16.gmra.mrb[148].mxu0 %v4786_v1 }
 0xf9c   :  { %v10877_v38 = vpop.f32.mrb[136].mxu0 }
 0xf9d   :  { %v10878_v34 = vpop.f32.mrb[137].mxu0 }
 0xf9e   :  { %v10879_v21 = vadd.f32 %v10878_v34, %v10877_v38  ;;  %v10880_v57 = vpop.f32.mrb[138].mxu0 }
 0xf9f   :  { %v10881_v17 = vpop.f32.mrb[139].mxu0 }
 0xfa0   :  { %v4958_v2 = vadd.f32 %v10879_v21, %v10471_v24  ;;  %v10882_v36 = vadd.f32 %v10881_v17, %v10880_v57 }
 0xfa2   :  { %v4988_v51 = vadd.f32 %v4958_v2, %v13914_v4  ;;  %v4961_v44 = vadd.f32 %v10882_v36, %v10471_v24 }
 0xfa4   :  { %v5003_v54 = vmul.f32 %v10488_v52, %v4988_v51  ;;  %v4989_v7 = vadd.f32 %v4961_v44, %v13916_v49  ;;  %v10883_v33 = vpop.f32.mrb[140].mxu0 }
 0xfa5   :  { %v10884_v62 = vpop.f32.mrb[141].mxu0 }
 0xfa6   :  { %v5004_v14 = vmul.f32 %v10488_v52, %v4989_v7  ;;  %v10885_v18 = vadd.f32 %v10884_v62, %v10883_v33  ;;  %v10886_v22 = vpop.f32.mrb[142].mxu0  ;;  %v14149_v53 = vadd.f32 %v10489_v5, %v5003_v54 }
 0xfa7   :  { %v10887_v58 = vpop.f32.mrb[143].mxu0 }
 0xfa8   :  { %v14151_v12 = vadd.f32 %v10489_v5, %v5004_v14  ;;  %v4966_v26 = vadd.f32 %v10885_v18, %v10471_v24  ;;  %v10888_v9 = vadd.f32 %v10887_v58, %v10886_v22 }
 0xfaa   :  { %v5026_v4 = vpack.c.bf16 %v14151_v12, %v14149_v53  ;;  %v4990_v50 = vadd.f32 %v4966_v26, %v13923_v42  ;;  %v4969_v61 = vadd.f32 %v10888_v9, %v10471_v24 }
 0xfac   :  { %v5005_v49 = vmul.f32 %v10488_v52, %v4990_v50  ;;  %v4991_v3 = vadd.f32 %v4969_v61, %v13921_v31  ;;  %5242 = vmatmul.mubr.bf16.vlgmr.msra.gmra.mrb[168].mxu1 %v5026_v4  ;;  %11595 = vmatprep.mubr.bf16.mxu0 %v5026_v4 }
 0xfad   :  { %5251 = vmatprep.mubr.bf16.mxu1 %v15344_v0 }
 0xfae   :  { %v5006_v60 = vmul.f32 %v10488_v52, %v4991_v3  ;;  %v14158_v25 = vadd.f32 %v10489_v5, %v5005_v49 }
 0xfb0   :  { %v14160_v32 = vadd.f32 %v10489_v5, %v5006_v60 }
 0xfb2   :  { %v5027_v63 = vpack.c.bf16 %v14160_v32, %v14158_v25 }
 0xfb4   :  { %5252 = vmatmul.mubr.bf16.gmra.mrb[172].mxu1 %v5027_v63  ;;  %11596 = vmatmul.mubr.bf16.vlgmr.msra.gmra.mrb[152].mxu0 %v5027_v63 }
 0xfb5   :  { %5261 = vmatprep.mubr.bf16.mxu1 %v15344_v0 }
 0xfdc   :  { %v10889_v42 = vpop.f32.mrb[144].mxu0 }
 0xfdd   :  { %v10890_v55 = vpop.f32.mrb[145].mxu0 }
 0xfde   :  { %v10891_v10 = vadd.f32 %v10890_v55, %v10889_v42  ;;  %v10892_v31 = vpop.f32.mrb[146].mxu0 }
 0xfdf   :  { %v10893_v15 = vpop.f32.mrb[147].mxu0 }
 0xfe0   :  { %v4974_v19 = vadd.f32 %v10891_v10, %v10471_v24  ;;  %v10894_v1 = vadd.f32 %v10893_v15, %v10892_v31 }
 0xfe2   :  { %v4992_v20 = vadd.f32 %v4974_v19, %v13940_v48  ;;  %v4977_v28 = vadd.f32 %v10894_v1, %v10471_v24 }
 0xfe4   :  { %v5007_v23 = vmul.f32 %v10488_v52, %v4992_v20  ;;  %v4993_v11 = vadd.f32 %v4977_v28, %v13942_v27  ;;  %v10895_v35 = vpop.f32.mrb[148].mxu0 }
 0xfe5   :  { %v10896_v30 = vpop.f32.mrb[149].mxu0 }
 0xfe6   :  { %v5008_v29 = vmul.f32 %v10488_v52, %v4993_v11  ;;  %v10897_v46 = vadd.f32 %v10896_v30, %v10895_v35  ;;  %v10898_v47 = vpop.f32.mrb[150].mxu0  ;;  %v14167_v45 = vadd.f32 %v10489_v5, %v5007_v23 }
 0xfe7   :  { %v10899_v59 = vpop.f32.mrb[151].mxu0 }
 0xfe8   :  { %v4982_v16 = vadd.f32 %v10897_v46, %v10471_v24  ;;  %v10900_v13 = vadd.f32 %v10899_v59, %v10898_v47  ;;  %v14169_v8 = vadd.f32 %v10489_v5, %v5008_v29 }
 0xfea   :  { %v4994_v56 = vadd.f32 %v4982_v16, %v13949_v41  ;;  %v4985_v38 = vadd.f32 %v10900_v13, %v10471_v24  ;;  %v5028_v48 = vpack.c.bf16 %v14169_v8, %v14167_v45 }
 0xfec   :  { %v5009_v34 = vmul.f32 %v10488_v52, %v4994_v56  ;;  %v4995_v27 = vadd.f32 %v4985_v38, %v13947_v6  ;;  %5262 = vmatmul.mubr.bf16.gmra.mrb[176].mxu1 %v5028_v48  ;;  %11599 = vmatprep.mubr.bf16.mxu0 %v5028_v48  ;;  %v14189_v6 = vld [vmem:[%s15325_s2 + $0x3] sm:$0x7] }
 0xfed   :  { %5271 = vmatprep.mubr.bf16.mxu1 %v15344_v0  ;;  %v14193_v41 = vrot.slane %v14189_v6, %v13025_v40  ;;  %v14198_v54 = vrot.slane %v14189_v6, %v13034_v43 }
 0xfee   :  { %v5010_v21 = vmul.f32 %v10488_v52, %v4995_v27  ;;  %v14176_v57 = vadd.f32 %v10489_v5, %v5009_v34 }
 0xff0   :  { %v14178_v17 = vadd.f32 %v10489_v5, %v5010_v21 }
 0xff2   :  { %v5029_v2 = vpack.c.bf16 %v14178_v17, %v14176_v57 }
 0xff4   :  { %5272 = vmatmul.mubr.bf16.gmra.mrb[180].mxu1 %v5029_v2  ;;  %11600 = vmatmul.mubr.bf16.gmra.mrb[156].mxu0 %v5029_v2  ;;  %v15354_v2 = vsub.s32 2, %v13022_v39 }
 0xff5   :  { %11605 = vmatprep.mubr.msk.bf16.mxu0 %vm12764_vm0, %v15346_v37  ;;  %11617 = vmatprep.mubr.msk.bf16.mxu1 %vm12764_vm0, %v15346_v37 }
0x107f   :  { %v5243_v24 = vpop.f32.mrb[168].mxu1 }
0x1080   :  { %v5245_v36 = vpop.f32.mrb[169].mxu1  ;;  %v5244_v62 = vadd.f32 %v5243_v24, %v14198_v54  ;;  %v14278_v24 = vrot.slane %v14189_v6, %v15354_v2 }
0x1081   :  { %v5246_v52 = vadd.f32 %v5245_v36, %v14193_v41  ;;  %v5247_v51 = vpop.f32.mrb[170].mxu1 }
0x1082   :  { %v5249_v44 = vpop.f32.mrb[171].mxu1  ;;  %v14218_v3 = vpack.c.bf16 %v5244_v62, %v5244_v62  ;;  %v5248_v10 = vadd.f32 %v5247_v51, %v14198_v54 }
0x1083   :  { %v14200_v7 = vpack.c.bf16 %v5246_v52, %v5246_v52  ;;  %v5250_v33 = vadd.f32 %v5249_v44, %v14193_v41 }
0x1084   :  { %v14237_v19 = vpack.c.bf16 %v5248_v10, %v5248_v10 }
0x1085   :  { %v5392_v5 = vsel %vm479_vm1, %v14200_v7, 0  ;;  %v14211_v26 = vpack.c.bf16 %v5250_v33, %v5250_v33 }
0x1086   :  { %11604 = vmatpush3.bf16.xpose.msra.mxu0 %v5392_v5 }
0x1087   :  { %v5253_v14 = vpop.f32.mrb[172].mxu1  ;;  %v14206_v18 = vpop.f32.mrb[152].mxu0  ;;  %11609 = vmatprep.subr.bf16.mxu0 %v15346_v37  ;;  %v5438_v42 = vsel %vm479_vm1, %v14211_v26, 0 }
0x1088   :  { %v5255_v22 = vpop.f32.mrb[173].mxu1  ;;  %v14209_v58 = vpop.f32.mrb[153].mxu0  ;;  %v5254_v31 = vadd.f32 %v5253_v14, %v14198_v54 }
0x1089   :  { %v5256_v9 = vadd.f32 %v5255_v22, %v14193_v41  ;;  %v5257_v4 = vpop.f32.mrb[174].mxu1  ;;  %v14214_v50 = vpop.f32.mrb[154].mxu0  ;;  %v5317_v6 = vadd.f32 %v14209_v58, %v14278_v24 }
0x108a   :  { %v5259_v61 = vpop.f32.mrb[175].mxu1  ;;  %v14216_v49 = vpop.f32.mrb[155].mxu0  ;;  %v14239_v1 = vpack.c.bf16 %v5254_v31, %v5254_v31  ;;  %v5258_v28 = vadd.f32 %v5257_v4, %v14198_v54 }
0x108b   :  { %v14220_v60 = vpack.c.bf16 %v5256_v9, %v5256_v9  ;;  %v5260_v63 = vadd.f32 %v5259_v61, %v14193_v41 }
0x108c   :  { %v14253_v23 = vpack.c.bf16 %v5258_v28, %v5258_v28 }
0x108d   :  { %11606 = vmatmul.mubr.msk.bf16.vlgmr.msra.gmra.mrb[160].mxu0 %vm479_vm1, %v14218_v3  ;;  %v5484_v55 = vsel %vm479_vm1, %v14220_v60, 0  ;;  %v14235_v15 = vpack.c.bf16 %v5260_v63, %v5260_v63  ;;  %v14314_v63 = vpack.c.bf16 %v5317_v6, %v5317_v6 }
0x108e   :  { %11610 = vmatpush3.bf16.xpose.msra.mxu0 %v5438_v42  ;;  %11616 = vmatpush3.bf16.xpose.msra.mxu1 %v5484_v55 }
0x108f   :  { %11611 = vmatprep.mubr.msk.bf16.mxu0 %vm12764_vm0, %v15346_v37  ;;  %11621 = vmatprep.subr.bf16.mxu0 %v15346_v37  ;;  %v5530_v20 = vsel %vm479_vm1, %v14235_v15, 0  ;;  %v5864_v31 = vsel %vm956_vm2, %v14314_v63, 0 }
0x1090   :  { %11627 = vmatprep.subr.bf16.mxu1 %v15346_v37 }
0x1095   :  { %11612 = vmatmul.mubr.msk.bf16.vlgmr.msra.gmra.mrb[164].mxu0 %vm479_vm1, %v14237_v19  ;;  %11618 = vmatmul.mubr.msk.bf16.vlgmr.msra.gmra.mrb[184].mxu1 %vm479_vm1, %v14239_v1 }
0x1096   :  { %11622 = vmatpush3.bf16.xpose.msra.mxu0 %v5530_v20  ;;  %11623 = vmatprep.mubr.msk.bf16.mxu0 %vm12764_vm0, %v15346_v37 }
0x1097   :  { %11633 = vmatprep.subr.bf16.mxu0 %v15346_v37  ;;  %11629 = vmatprep.mubr.msk.bf16.mxu1 %vm12764_vm0, %v15346_v37 }
0x109d   :  { %11624 = vmatmul.mubr.msk.bf16.vlgmr.msra.gmra.mrb[168].mxu0 %vm479_vm1, %v14253_v23 }
0x109e   :  { %11635 = vmatprep.mubr.msk.bf16.mxu0 %vm12764_vm0, %v15346_v37 }
0x10bf   :  { %v5263_v11 = vpop.f32.mrb[176].mxu1 }
0x10c0   :  { %v5265_v35 = vpop.f32.mrb[177].mxu1  ;;  %v5264_v56 = vadd.f32 %v5263_v11, %v14198_v54 }
0x10c1   :  { %v5266_v30 = vadd.f32 %v5265_v35, %v14193_v41  ;;  %v5267_v29 = vpop.f32.mrb[178].mxu1 }
0x10c2   :  { %v5269_v46 = vpop.f32.mrb[179].mxu1  ;;  %v5268_v36 = vadd.f32 %v5267_v29, %v14198_v54  ;;  %v14287_v62 = vpack.c.bf16 %v5264_v56, %v5264_v56 }
0x10c3   :  { %v14260_v47 = vpack.c.bf16 %v5266_v30, %v5266_v30  ;;  %v5270_v59 = vadd.f32 %v5269_v46, %v14193_v41 }
0x10c4   :  { %v14294_v22 = vpack.c.bf16 %v5268_v36, %v5268_v36 }
0x10c5   :  { %v14263_v16 = vpack.c.bf16 %v5270_v59, %v5270_v59  ;;  %v5576_v13 = vsel %vm479_vm1, %v14260_v47, 0 }
0x10c6   :  { %11628 = vmatpush3.bf16.xpose.msra.mxu1 %v5576_v13 }
0x10c7   :  { %v5273_v38 = vpop.f32.mrb[180].mxu1  ;;  %v14268_v48 = vpop.f32.mrb[156].mxu0  ;;  %v5622_v34 = vsel %vm479_vm1, %v14263_v16, 0  ;;  %11639 = vmatprep.subr.bf16.mxu1 %v15346_v37 }
0x10c8   :  { %v5275_v27 = vpop.f32.mrb[181].mxu1  ;;  %v14273_v21 = vpop.f32.mrb[157].mxu0  ;;  %11634 = vmatpush3.bf16.xpose.msra.mxu0 %v5622_v34  ;;  %v5274_v61 = vadd.f32 %v5273_v38, %v14198_v54 }
0x10c9   :  { %v5276_v52 = vadd.f32 %v5275_v27, %v14193_v41  ;;  %v5277_v51 = vpop.f32.mrb[182].mxu1  ;;  %v14282_v44 = vpop.f32.mrb[158].mxu0  ;;  %11645 = vmatprep.subr.bf16.mxu0 %v15346_v37 }
0x10ca   :  { %v5279_v33 = vpop.f32.mrb[183].mxu1  ;;  %v14285_v5 = vpop.f32.mrb[159].mxu0  ;;  %v5278_v42 = vadd.f32 %v5277_v51, %v14198_v54  ;;  %v14320_v55 = vpack.c.bf16 %v5274_v61, %v5274_v61 }
0x10cb   :  { %v14289_v14 = vpack.c.bf16 %v5276_v52, %v5276_v52  ;;  %v5280_v39 = vadd.f32 %v5279_v33, %v14193_v41  ;;  %v5320_v41 = vadd.f32 %v14216_v49, %v14278_v24 }
0x10cc   :  { %v14322_v10 = vpack.c.bf16 %v5278_v42, %v5278_v42 }
0x10cd   :  { %v14296_v9 = vpack.c.bf16 %v5280_v39, %v5280_v39  ;;  %11630 = vmatmul.mubr.msk.bf16.vlgmr.msra.gmra.mrb[188].mxu1 %vm479_vm1, %v14287_v62  ;;  %v5668_v4 = vsel %vm479_vm1, %v14289_v14, 0  ;;  %v14318_v49 = vpack.c.bf16 %v5320_v41, %v5320_v41 }
0x10ce   :  { %11640 = vmatpush3.bf16.xpose.msra.mxu1 %v5668_v4  ;;  %11641 = vmatprep.mubr.msk.bf16.mxu1 %vm12764_vm0, %v15346_v37 }
0x10cf   :  { %11636 = vmatmul.mubr.msk.bf16.vlgmr.msra.gmra.mrb[172].mxu0 %vm479_vm1, %v14294_v22  ;;  %v5714_v58 = vsel %vm479_vm1, %v14296_v9, 0  ;;  %11651 = vmatprep.subr.bf16.mxu1 %v15346_v37  ;;  %v5910_v54 = vsel %vm956_vm2, %v14318_v49, 0 }
0x10d0   :  { %11646 = vmatpush3.bf16.xpose.msra.mxu0 %v5714_v58  ;;  %11647 = vmatprep.mubr.msk.bf16.mxu0 %vm12764_vm0, %v15346_v37 }
0x10d1   :  { %11657 = vmatprep.subr.bf16.mxu0 %v15346_v37 }
0x10d5   :  { %11642 = vmatmul.mubr.msk.bf16.vlgmr.msra.gmra.mrb[192].mxu1 %vm479_vm1, %v14320_v55 }
0x10d6   :  { %11652 = vmatpush3.bf16.msra.mxu1 %v5864_v31  ;;  %11653 = vmatprep.mubr.msk.bf16.mxu1 %vm12764_vm0, %v15346_v37 }
0x10d7   :  { %11648 = vmatmul.mubr.msk.bf16.vlgmr.msra.gmra.mrb[176].mxu0 %vm479_vm1, %v14322_v10  ;;  %11663 = vmatprep.subr.bf16.mxu1 %v15346_v37 }
0x10d8   :  { %11658 = vmatpush3.bf16.msra.mxu0 %v5910_v54  ;;  %11659 = vmatprep.mubr.msk.bf16.mxu0 %vm12764_vm0, %v15346_v37 }
0x10d9   :  { %11669 = vmatprep.subr.bf16.mxu0 %v15346_v37 }
0x1160   :  { %v5428_v20 = vpop.f32.mrb[160].mxu0 }
0x1161   :  { %v5756_v28 = vmul.f32 0.17677669, %v5428_v20  ;;  %v11607_v11 = vpop.f32.mrb[161].mxu0 }
0x1162   :  { %v5431_v35 = vpop.f32.mrb[162].mxu0 }
0x1163   :  { %v11608_v30 = vpop.f32.mrb[163].mxu0  ;;  %v5764_v29 = vsel %vm856_vm3, %v5756_v28, -inf }
0x1164   :  { %5765 = vmax.xlane.f32.xlu0 %v5764_v29 }
0x1168   :  { %v5474_v46 = vpop.f32.mrb[164].mxu0  ;;  %v5520_v59 = vpop.f32.mrb[184].mxu1 }
0x1169   :  { %v5757_v13 = vmul.f32 0.17677669, %v5474_v46  ;;  %v5758_v56 = vmul.f32 0.17677669, %v5520_v59  ;;  %v11613_v38 = vpop.f32.mrb[165].mxu0  ;;  %v11619_v34 = vpop.f32.mrb[185].mxu1 }
0x116a   :  { %v5477_v27 = vpop.f32.mrb[166].mxu0  ;;  %v5523_v2 = vpop.f32.mrb[186].mxu1 }
0x116b   :  { %v11614_v36 = vpop.f32.mrb[167].mxu0  ;;  %v11620_v52 = vpop.f32.mrb[187].mxu1  ;;  %v5770_v51 = vsel %vm856_vm3, %v5758_v56, -inf  ;;  %v5767_v33 = vsel %vm856_vm3, %v5757_v13, -inf }
0x116c   :  { %5771 = vmax.xlane.f32.xlu0 %v5770_v51  ;;  %5768 = vmax.xlane.f32.xlu1 %v5767_v33 }
0x1170   :  { %v5566_v39 = vpop.f32.mrb[168].mxu0 }
0x1171   :  { %v5759_v6 = vmul.f32 0.17677669, %v5566_v39  ;;  %v11625_v4 = vpop.f32.mrb[169].mxu0 }
0x1172   :  { %v5569_v41 = vpop.f32.mrb[170].mxu0 }
0x1173   :  { %v11626_v61 = vpop.f32.mrb[171].mxu0  ;;  %v5773_v58 = vsel %vm856_vm3, %v5759_v6, -inf }
0x1174   :  { %5774 = vmax.xlane.f32.xlu0 %v5773_v58 }
0x11a0   :  { %v5612_v42 = vpop.f32.mrb[188].mxu1 }
0x11a1   :  { %v5760_v31 = vmul.f32 0.17677669, %v5612_v42  ;;  %v11631_v54 = vpop.f32.mrb[189].mxu1 }
0x11a2   :  { %v5615_v20 = vpop.f32.mrb[190].mxu1  ;;  %v5658_v11 = vpop.f32.mrb[172].mxu0 }
0x11a3   :  { %v5761_v35 = vmul.f32 0.17677669, %v5658_v11  ;;  %v11632_v30 = vpop.f32.mrb[191].mxu1  ;;  %v11637_v29 = vpop.f32.mrb[173].mxu0  ;;  %v5776_v46 = vsel %vm856_vm3, %v5760_v31, -inf }
0x11a4   :  { %5777 = vmax.xlane.f32.xlu0 %v5776_v46  ;;  %v5661_v59 = vpop.f32.mrb[174].mxu0 }
0x11a5   :  { %v11638_v38 = vpop.f32.mrb[175].mxu0  ;;  %v5779_v34 = vsel %vm856_vm3, %v5761_v35, -inf }
0x11a6   :  { %5780 = vmax.xlane.f32.xlu1 %v5779_v34 }
0x11a8   :  { %v5704_v27 = vpop.f32.mrb[192].mxu1 }
0x11a9   :  { %v5762_v2 = vmul.f32 0.17677669, %v5704_v27  ;;  %v11643_v36 = vpop.f32.mrb[193].mxu1 }
0x11aa   :  { %v5707_v52 = vpop.f32.mrb[194].mxu1  ;;  %v5750_v51 = vpop.f32.mrb[176].mxu0 }
0x11ab   :  { %v14344_v33 = vmul.f32 0.17677669, %v5750_v51  ;;  %v11644_v39 = vpop.f32.mrb[195].mxu1  ;;  %v11649_v4 = vpop.f32.mrb[177].mxu0  ;;  %v5782_v41 = vsel %vm856_vm3, %v5762_v2, -inf }
0x11ac   :  { %5783 = vmax.xlane.f32.xlu0 %v5782_v41  ;;  %v5753_v61 = vpop.f32.mrb[178].mxu0 }
0x11ad   :  { %v11650_v58 = vpop.f32.mrb[179].mxu0  ;;  %v5785_v42 = vsel %vm856_vm3, %v14344_v33, -inf }
0x11ae   :  { %5786 = vmax.xlane.f32.xlu1 %v5785_v42 }
0x11f1   :  { %v5766_v54 = vpop.xlane.xlu0 %5765 }
0x11f2   :  { %v5788_v20 = vsub.f32 %v5756_v28, %v5766_v54 }
0x11f4   :  { %v5796_v11 = vmul.f32 1.442695, %v5788_v20 }
0x11f6   :  { %12474 = vpow2.f32 %v5796_v11 }
0x11f9   :  { %v5772_v30 = vpop.xlane.xlu0 %5771  ;;  %v5769_v29 = vpop.xlane.xlu1 %5768 }
0x11fa   :  { %v5790_v46 = vsub.f32 %v5758_v56, %v5772_v30  ;;  %v5789_v59 = vsub.f32 %v5757_v13, %v5769_v29 }
0x11fc   :  { %v5800_v38 = vmul.f32 1.442695, %v5790_v46  ;;  %v5798_v34 = vmul.f32 1.442695, %v5789_v59 }
0x11fe   :  { %12476 = vpow2.f32 %v5800_v38 }
0x11ff   :  { %12478 = vpow2.f32 %v5798_v34 }
0x1200   :  { %v14349_v27 = vpop.eup %12474 }
0x1201   :  { %v5775_v36 = vpop.xlane.xlu0 %5774  ;;  %v5812_v52 = vsel %vm856_vm3, %v14349_v27, 0.0 }
0x1202   :  { %v5791_v51 = vsub.f32 %v5759_v6, %v5775_v36  ;;  %5813 = vadd.xlane.f32.xlu0 %v5812_v52 }
0x1204   :  { %v5802_v39 = vmul.f32 1.442695, %v5791_v51 }
0x1206   :  { %12480 = vpow2.f32 %v5802_v39 }
0x1208   :  { %v14353_v28 = vpop.eup %12476 }
0x1209   :  { %v14355_v4 = vpop.eup %12478  ;;  %v5818_v13 = vsel %vm856_vm3, %v14353_v28, 0.0 }
0x120a   :  { %5819 = vadd.xlane.f32.xlu0 %v5818_v13  ;;  %v5815_v56 = vsel %vm856_vm3, %v14355_v4, 0.0 }
0x120b   :  { %5816 = vadd.xlane.f32.xlu1 %v5815_v56  ;;  %v5325_v56 = vadd.f32 %v14206_v18, %v14278_v24 }
0x1210   :  { %v14361_v41 = vpop.eup %12480 }
0x1211   :  { %v5821_v6 = vsel %vm856_vm3, %v14361_v41, 0.0 }
0x1212   :  { %5822 = vadd.xlane.f32.xlu1 %v5821_v6 }
0x1231   :  { %v5778_v61 = vpop.xlane.xlu0 %5777 }
0x1232   :  { %v5792_v58 = vsub.f32 %v5760_v31, %v5778_v61 }
0x1233   :  { %v5781_v42 = vpop.xlane.xlu1 %5780 }
0x1234   :  { %v5804_v54 = vmul.f32 1.442695, %v5792_v58  ;;  %v5793_v20 = vsub.f32 %v5761_v35, %v5781_v42  ;;  %v14410_v42 = vpack.c.bf16 %v5325_v56, %v5325_v56 }
0x1236   :  { %12482 = vpow2.f32 %v5804_v54  ;;  %v5806_v11 = vmul.f32 1.442695, %v5793_v20  ;;  %v5956_v18 = vsel %vm956_vm2, %v14410_v42, 0 }
0x1238   :  { %12484 = vpow2.f32 %v5806_v11  ;;  %v5333_v11 = vadd.f32 %v14273_v21, %v14278_v24 }
0x1239   :  { %v5784_v30 = vpop.xlane.xlu0 %5783 }
0x123a   :  { %v5794_v29 = vsub.f32 %v5762_v2, %v5784_v30 }
0x123b   :  { %v5787_v2 = vpop.xlane.xlu1 %5786 }
0x123c   :  { %v5808_v46 = vmul.f32 1.442695, %v5794_v29  ;;  %v5795_v52 = vsub.f32 %v14344_v33, %v5787_v2  ;;  %v5328_v29 = vadd.f32 %v14214_v50, %v14278_v24 }
0x123e   :  { %12486 = vpow2.f32 %v5808_v46  ;;  %v5810_v51 = vmul.f32 1.442695, %v5795_v52  ;;  %v14427_v46 = vpack.c.bf16 %v5333_v11, %v5333_v11 }
0x1240   :  { %v14365_v59 = vpop.eup %12482  ;;  %12488 = vpow2.f32 %v5810_v51  ;;  %v6048_v52 = vsel %vm956_vm2, %v14427_v46, 0  ;;  %v5336_v51 = vadd.f32 %v14285_v5, %v14278_v24 }
0x1241   :  { %v5824_v38 = vsel %vm856_vm3, %v14365_v59, 0.0 }
0x1242   :  { %v14369_v34 = vpop.eup %12484  ;;  %5825 = vadd.xlane.f32.xlu0 %v5824_v38  ;;  %v14450_v5 = vpack.c.bf16 %v5336_v51, %v5336_v51 }
0x1243   :  { %v5827_v31 = vsel %vm856_vm3, %v14369_v34, 0.0 }
0x1244   :  { %5828 = vadd.xlane.f32.xlu1 %v5827_v31  ;;  %v14430_v31 = vpack.c.bf16 %v5328_v29, %v5328_v29  ;;  %v6094_v56 = vsel %vm956_vm2, %v14450_v5, 0 }
0x1248   :  { %v14373_v35 = vpop.eup %12486 }
0x1249   :  { %v5830_v36 = vsel %vm856_vm3, %v14373_v35, 0.0 }
0x124a   :  { %5831 = vadd.xlane.f32.xlu0 %v5830_v36  ;;  %v14396_v39 = vpop.eup %12488 }
0x124b   :  { %v5833_v33 = vsel %vm856_vm3, %v14396_v39, 0.0 }
0x1255   :  { %6288 = vrot.lane.b32.xlu1 %v14211_v26, %s12765_s1 }
0x1259   :  { %6233 = vrot.lane.b32.xlu1 %v14218_v3, %s12765_s1 }
0x1260   :  { %6236 = vrot.lane.b32.xlu0 %v14200_v7, %s12765_s1 }
0x1264   :  { %6340 = vrot.lane.b32.xlu0 %v14220_v60, %s12765_s1 }
0x1268   :  { %6337 = vrot.lane.b32.xlu0 %v14239_v1, %s12765_s1 }
0x126c   :  { %6444 = vrot.lane.b32.xlu0 %v14260_v47, %s12765_s1 }
0x1270   :  { %6441 = vrot.lane.b32.xlu0 %v14287_v62, %s12765_s1 }
0x1274   :  { %6548 = vrot.lane.b32.xlu0 %v14289_v14, %s12765_s1 }
0x1278   :  { %6545 = vrot.lane.b32.xlu0 %v14320_v55, %s12765_s1 }
0x127d   :  { %5834 = vadd.xlane.f32.xlu1 %v5833_v33 }
0x128e   :  { %6285 = vrot.lane.b32.xlu1 %v14237_v19, %s12765_s1 }
0x128f   :  { %v5814_v13 = vpop.xlane.xlu0 %5813 }
0x1290   :  { %12490 = vrcp.f32 %v5814_v13 }
0x1292   :  { %6392 = vrot.lane.b32.xlu1 %v14235_v15, %s12765_s1 }
0x1296   :  { %6389 = vrot.lane.b32.xlu1 %v14253_v23, %s12765_s1 }
0x1297   :  { %v5820_v6 = vpop.xlane.xlu0 %5819 }
0x1298   :  { %12492 = vrcp.f32 %v5820_v6  ;;  %v5817_v61 = vpop.xlane.xlu1 %5816 }
0x1299   :  { %12494 = vrcp.f32 %v5817_v61 }
0x129a   :  { %v12491_v58 = vpop.eup %12490  ;;  %6496 = vrot.lane.b32.xlu1 %v14263_v16, %s12765_s1 }
0x129b   :  { %v5844_v54 = vmul.f32 %v12491_v58, %v14349_v27 }
0x129d   :  { %v5852_v20 = vpack.c.bf16 %v5844_v54, %v5844_v54  ;;  %v5344_v54 = vadd.f32 %v14282_v44, %v14278_v24 }
0x129e   :  { %6493 = vrot.lane.b32.xlu1 %v14294_v22, %s12765_s1 }
0x129f   :  { %11654 = vmatmul.mubr.msk.bf16.vlgmr.msra.gmra.mrb[196].mxu1 %vm856_vm3, %v5852_v20  ;;  %v5823_v30 = vpop.xlane.xlu1 %5822  ;;  %v14465_v29 = vpack.c.bf16 %v5344_v54, %v5344_v54 }
0x12a0   :  { %11664 = vmatpush3.bf16.msra.mxu1 %v5956_v18  ;;  %12496 = vrcp.f32 %v5823_v30  ;;  %11665 = vmatprep.mubr.msk.bf16.mxu1 %vm12764_vm0, %v15346_v37 }
0x12a1   :  { %11675 = vmatprep.subr.bf16.mxu1 %v15346_v37 }
0x12a2   :  { %v12493_v27 = vpop.eup %12492  ;;  %6600 = vrot.lane.b32.xlu1 %v14296_v9, %s12765_s1 }
0x12a3   :  { %v12495_v21 = vpop.eup %12494  ;;  %v5846_v38 = vmul.f32 %v12493_v27, %v14353_v28  ;;  %v6002_v28 = vsel %vm956_vm2, %v14430_v31, 0 }
0x12a4   :  { %v5845_v50 = vmul.f32 %v12495_v21, %v14355_v4 }
0x12a5   :  { %v5854_v36 = vpack.c.bf16 %v5846_v38, %v5846_v38 }
0x12a6   :  { %6597 = vrot.lane.b32.xlu1 %v14322_v10, %s12765_s1  ;;  %v5853_v2 = vpack.c.bf16 %v5845_v50, %v5845_v50 }
0x12a7   :  { %11666 = vmatmul.mubr.msk.bf16.vlgmr.msra.gmra.mrb[200].mxu1 %vm856_vm3, %v5854_v36 }
0x12a8   :  { %11660 = vmatmul.mubr.msk.bf16.vlgmr.msra.gmra.mrb[180].mxu0 %vm856_vm3, %v5853_v2  ;;  %11676 = vmatpush3.bf16.msra.mxu1 %v6048_v52 }
0x12a9   :  { %11670 = vmatpush3.bf16.msra.mxu0 %v6002_v28  ;;  %11671 = vmatprep.mubr.msk.bf16.mxu0 %vm12764_vm0, %v15346_v37 }
0x12aa   :  { %v12497_v4 = vpop.eup %12496  ;;  %11681 = vmatprep.subr.bf16.mxu0 %v15346_v37  ;;  %11677 = vmatprep.mubr.msk.bf16.mxu1 %vm12764_vm0, %v15346_v37 }
0x12ab   :  { %v5847_v33 = vmul.f32 %v12497_v4, %v14361_v41  ;;  %11687 = vmatprep.subr.bf16.mxu1 %v15346_v37  ;;  %v5341_v41 = vadd.f32 %v14268_v48, %v14278_v24  ;;  %v6186_v24 = vsel %vm956_vm2, %v14465_v29, 0 }
0x12ad   :  { %v5855_v13 = vpack.c.bf16 %v5847_v33, %v5847_v33  ;;  %v14462_v11 = vpack.c.bf16 %v5341_v41, %v5341_v41 }
0x12af   :  { %v6140_v48 = vsel %vm956_vm2, %v14462_v11, 0 }
0x12b0   :  { %11672 = vmatmul.mubr.msk.bf16.vlgmr.msra.gmra.mrb[184].mxu0 %vm856_vm3, %v5855_v13 }
0x12b1   :  { %11682 = vmatpush3.bf16.msra.mxu0 %v6094_v56  ;;  %11683 = vmatprep.mubr.msk.bf16.mxu0 %vm12764_vm0, %v15346_v37 }
0x12b2   :  { %11693 = vmatprep.subr.bf16.mxu0 %v15346_v37 }
0x12cf   :  { %v5826_v6 = vpop.xlane.xlu0 %5825 }
0x12d0   :  { %12498 = vrcp.f32 %v5826_v6 }
0x12d1   :  { %v5829_v61 = vpop.xlane.xlu1 %5828 }
0x12d2   :  { %12500 = vrcp.f32 %v5829_v61 }
0x12d5   :  { %v6289_v52 = vpop.permute.xlu1 %6288 }
0x12d7   :  { %v5832_v58 = vpop.xlane.xlu0 %5831 }
0x12d8   :  { %12502 = vrcp.f32 %v5832_v58 }
0x12d9   :  { %v6234_v28 = vpop.permute.xlu1 %6233 }
0x12da   :  { %v12499_v20 = vpop.eup %12498 }
0x12db   :  { %v5848_v18 = vmul.f32 %v12499_v20, %v14365_v59  ;;  %v6237_v38 = vpop.permute.xlu0 %6236 }
0x12dc   :  { %v12501_v30 = vpop.eup %12500  ;;  %v6242_v2 = vsel %vm479_vm1, %v6237_v38, 0 }
0x12dd   :  { %v5856_v27 = vpack.c.bf16 %v5848_v18, %v5848_v18  ;;  %v5849_v21 = vmul.f32 %v12501_v30, %v14369_v34 }
0x12df   :  { %11678 = vmatmul.mubr.msk.bf16.vlgmr.msra.gmra.mrb[204].mxu1 %vm856_vm3, %v5856_v27  ;;  %v5857_v50 = vpack.c.bf16 %v5849_v21, %v5849_v21  ;;  %v6341_v34 = vpop.permute.xlu0 %6340  ;;  %v6294_v27 = vsel %vm479_vm1, %v6289_v52, 0 }
0x12e0   :  { %11688 = vmatpush3.bf16.msra.mxu1 %v6140_v48  ;;  %11689 = vmatprep.mubr.msk.bf16.mxu1 %vm12764_vm0, %v15346_v37  ;;  %v6346_v4 = vsel %vm479_vm1, %v6341_v34, 0 }
0x12e1   :  { %11684 = vmatmul.mubr.msk.bf16.vlgmr.msra.gmra.mrb[188].mxu0 %vm856_vm3, %v5857_v50  ;;  %11699 = vmatprep.subr.bf16.mxu1 %v15346_v37 }
0x12e2   :  { %v12503_v44 = vpop.eup %12502  ;;  %11694 = vmatpush3.bf16.msra.mxu0 %v6186_v24  ;;  %11695 = vmatprep.mubr.msk.bf16.mxu0 %vm12764_vm0, %v15346_v37 }
0x12e3   :  { %v5850_v59 = vmul.f32 %v12503_v44, %v14373_v35  ;;  %11705 = vmatprep.subr.bf16.mxu0 %v15346_v37  ;;  %v6338_v51 = vpop.permute.xlu0 %6337 }
0x12e5   :  { %v5858_v36 = vpack.c.bf16 %v5850_v59, %v5850_v59 }
0x12e7   :  { %11690 = vmatmul.mubr.msk.bf16.vlgmr.msra.gmra.mrb[208].mxu1 %vm856_vm3, %v5858_v36  ;;  %v6445_v35 = vpop.permute.xlu0 %6444 }
0x12e8   :  { %11701 = vmatprep.mubr.msk.bf16.mxu1 %vm12764_vm0, %v15346_v37  ;;  %v6450_v13 = vsel %vm479_vm1, %v6445_v35, 0 }
0x12e9   :  { %11700 = vmatpush3.bf16.xpose.msra.mxu1 %v6242_v2 }
0x12ea   :  { %11711 = vmatprep.subr.bf16.mxu1 %v15346_v37 }
0x12eb   :  { %v6442_v33 = vpop.permute.xlu0 %6441 }
0x12ef   :  { %v6549_v56 = vpop.permute.xlu0 %6548 }
0x12f0   :  { %11702 = vmatmul.mubr.msk.bf16.vlgmr.msra.gmra.mrb[212].mxu1 %vm479_vm1, %v6234_v28  ;;  %v6554_v6 = vsel %vm479_vm1, %v6549_v56, 0 }
0x12f1   :  { %11712 = vmatpush3.bf16.xpose.msra.mxu1 %v6346_v4  ;;  %11713 = vmatprep.mubr.msk.bf16.mxu1 %vm12764_vm0, %v15346_v37 }
0x12f2   :  { %11723 = vmatprep.subr.bf16.mxu1 %v15346_v37 }
0x12f3   :  { %v6546_v61 = vpop.permute.xlu0 %6545 }
0x12f8   :  { %11714 = vmatmul.mubr.msk.bf16.vlgmr.msra.gmra.mrb[216].mxu1 %vm479_vm1, %v6338_v51 }
0x12f9   :  { %11724 = vmatpush3.bf16.xpose.msra.mxu1 %v6450_v13  ;;  %11725 = vmatprep.mubr.msk.bf16.mxu1 %vm12764_vm0, %v15346_v37 }
0x12fa   :  { %11735 = vmatprep.subr.bf16.mxu1 %v15346_v37 }
0x1300   :  { %11726 = vmatmul.mubr.msk.bf16.vlgmr.msra.gmra.mrb[220].mxu1 %vm479_vm1, %v6442_v33 }
0x1301   :  { %11736 = vmatpush3.bf16.xpose.msra.mxu1 %v6554_v6  ;;  %11737 = vmatprep.mubr.msk.bf16.mxu1 %vm12764_vm0, %v15346_v37 }
0x1302   :  { %11747 = vmatprep.subr.bf16.mxu1 %v15346_v37 }
0x1308   :  { %11738 = vmatmul.mubr.msk.bf16.vlgmr.msra.gmra.mrb[224].mxu1 %vm479_vm1, %v6546_v61 }
0x1309   :  { %11749 = vmatprep.mubr.msk.bf16.mxu1 %vm12764_vm0, %v15346_v37 }
0x130a   :  { %v5835_v41 = vpop.xlane.xlu1 %5834 }
0x130b   :  { %12504 = vrcp.f32 %v5835_v41 }
0x130e   :  { %v6286_v58 = vpop.permute.xlu1 %6285 }
0x1312   :  { %v6393_v18 = vpop.permute.xlu1 %6392 }
0x1313   :  { %v6398_v38 = vsel %vm479_vm1, %v6393_v18, 0 }
0x1315   :  { %v12505_v54 = vpop.eup %12504 }
0x1316   :  { %v5851_v20 = vmul.f32 %v12505_v54, %v14396_v39  ;;  %v6390_v21 = vpop.permute.xlu1 %6389 }
0x1318   :  { %v5859_v30 = vpack.c.bf16 %v5851_v20, %v5851_v20 }
0x131a   :  { %11696 = vmatmul.mubr.msk.bf16.vlgmr.msra.gmra.mrb[192].mxu0 %vm856_vm3, %v5859_v30  ;;  %v6497_v48 = vpop.permute.xlu1 %6496 }
0x131b   :  { %11706 = vmatpush3.bf16.xpose.msra.mxu0 %v6294_v27  ;;  %11707 = vmatprep.mubr.msk.bf16.mxu0 %vm12764_vm0, %v15346_v37  ;;  %v6502_v50 = vsel %vm479_vm1, %v6497_v48, 0 }
0x131c   :  { %11717 = vmatprep.subr.bf16.mxu0 %v15346_v37 }
0x131e   :  { %v6494_v39 = vpop.permute.xlu1 %6493 }
0x1322   :  { %11708 = vmatmul.mubr.msk.bf16.vlgmr.msra.gmra.mrb[196].mxu0 %vm479_vm1, %v6286_v58  ;;  %v6601_v24 = vpop.permute.xlu1 %6600 }
0x1323   :  { %11718 = vmatpush3.bf16.xpose.msra.mxu0 %v6398_v38  ;;  %11719 = vmatprep.mubr.msk.bf16.mxu0 %vm12764_vm0, %v15346_v37  ;;  %v6606_v44 = vsel %vm479_vm1, %v6601_v24, 0 }
0x1324   :  { %11729 = vmatprep.subr.bf16.mxu0 %v15346_v37 }
0x1326   :  { %v6598_v59 = vpop.permute.xlu1 %6597 }
0x132a   :  { %11720 = vmatmul.mubr.msk.bf16.vlgmr.msra.gmra.mrb[200].mxu0 %vm479_vm1, %v6390_v21 }
0x132b   :  { %11730 = vmatpush3.bf16.xpose.msra.mxu0 %v6502_v50  ;;  %11731 = vmatprep.mubr.msk.bf16.mxu0 %vm12764_vm0, %v15346_v37 }
0x132c   :  { %11741 = vmatprep.subr.bf16.mxu0 %v15346_v37 }
0x1332   :  { %11732 = vmatmul.mubr.msk.bf16.vlgmr.msra.gmra.mrb[204].mxu0 %vm479_vm1, %v6494_v39 }
0x1333   :  { %11742 = vmatpush3.bf16.xpose.msra.mxu0 %v6606_v44  ;;  %11743 = vmatprep.mubr.msk.bf16.mxu0 %vm12764_vm0, %v15346_v37 }
0x1334   :  { %11753 = vmatprep.subr.bf16.mxu0 %v15346_v37 }
0x133a   :  { %11744 = vmatmul.mubr.msk.bf16.vlgmr.msra.gmra.mrb[208].mxu0 %vm479_vm1, %v6598_v59 }
0x133b   :  { %11755 = vmatprep.mubr.msk.bf16.mxu0 %vm12764_vm0, %v15346_v37 }
0x1372   :  { %v14528_v34 = vpop.f32.mrb[196].mxu1 }
0x1373   :  { %v11655_v36 = vpop.f32.mrb[197].mxu1 }
0x1374   :  { %v5903_v2 = vpop.f32.mrb[198].mxu1 }
0x1375   :  { %v11656_v52 = vpop.f32.mrb[199].mxu1 }
0x137a   :  { %v14530_v51 = vpop.f32.mrb[200].mxu1 }
0x137b   :  { %v14532_v28 = vpop.f32.mrb[180].mxu0  ;;  %v11667_v4 = vpop.f32.mrb[201].mxu1 }
0x137c   :  { %v11661_v33 = vpop.f32.mrb[181].mxu0  ;;  %v5995_v13 = vpop.f32.mrb[202].mxu1 }
0x137d   :  { %v5949_v56 = vpop.f32.mrb[182].mxu0  ;;  %v11668_v6 = vpop.f32.mrb[203].mxu1 }
0x137e   :  { %v11662_v61 = vpop.f32.mrb[183].mxu0 }
0x1383   :  { %v14536_v41 = vpop.f32.mrb[184].mxu0 }
0x1384   :  { %v11673_v54 = vpop.f32.mrb[185].mxu0 }
0x1385   :  { %v6041_v20 = vpop.f32.mrb[186].mxu0 }
0x1386   :  { %v11674_v18 = vpop.f32.mrb[187].mxu0 }
0x13b2   :  { %v14540_v30 = vpop.f32.mrb[204].mxu1 }
0x13b3   :  { %v11679_v27 = vpop.f32.mrb[205].mxu1 }
0x13b4   :  { %v6087_v21 = vpop.f32.mrb[206].mxu1  ;;  %v14542_v38 = vpop.f32.mrb[188].mxu0 }
0x13b5   :  { %v11680_v39 = vpop.f32.mrb[207].mxu1  ;;  %v11685_v50 = vpop.f32.mrb[189].mxu0 }
0x13b6   :  { %v6133_v24 = vpop.f32.mrb[190].mxu0 }
0x13b7   :  { %v11686_v44 = vpop.f32.mrb[191].mxu0 }
0x13ba   :  { %v14546_v59 = vpop.f32.mrb[208].mxu1 }
0x13bb   :  { %v11691_v36 = vpop.f32.mrb[209].mxu1 }
0x13bc   :  { %v6179_v2 = vpop.f32.mrb[210].mxu1 }
0x13bd   :  { %v11692_v52 = vpop.f32.mrb[211].mxu1 }
0x13c3   :  { %v6278_v4 = vpop.f32.mrb[212].mxu1 }
0x13c4   :  { %v14548_v33 = vmul.f32 0.17677669, %v6278_v4  ;;  %v11703_v13 = vpop.f32.mrb[213].mxu1 }
0x13c5   :  { %v6281_v56 = vpop.f32.mrb[214].mxu1 }
0x13c6   :  { %v11704_v6 = vpop.f32.mrb[215].mxu1  ;;  %v6656_v61 = vsel %vm856_vm3, %v14548_v33, -inf }
0x13c7   :  { %6657 = vmax.xlane.f32.xlu0 %v6656_v61 }
0x13cb   :  { %v6382_v54 = vpop.f32.mrb[216].mxu1 }
0x13cc   :  { %v14552_v20 = vmul.f32 0.17677669, %v6382_v54  ;;  %v11715_v18 = vpop.f32.mrb[217].mxu1 }
0x13cd   :  { %v6385_v27 = vpop.f32.mrb[218].mxu1 }
0x13ce   :  { %v11716_v21 = vpop.f32.mrb[219].mxu1  ;;  %v6662_v39 = vsel %vm856_vm3, %v14552_v20, -inf }
0x13cf   :  { %6663 = vmax.xlane.f32.xlu0 %v6662_v39 }
0x13d3   :  { %v6486_v50 = vpop.f32.mrb[220].mxu1 }
0x13d4   :  { %v11727_v24 = vpop.f32.mrb[221].mxu1 }
0x13d5   :  { %v6489_v44 = vpop.f32.mrb[222].mxu1 }
0x13d6   :  { %v11728_v36 = vpop.f32.mrb[223].mxu1 }
0x13db   :  { %v6590_v2 = vpop.f32.mrb[224].mxu1 }
0x13dc   :  { %v11739_v52 = vpop.f32.mrb[225].mxu1 }
0x13dd   :  { %v6593_v4 = vpop.f32.mrb[226].mxu1 }
0x13de   :  { %v11740_v13 = vpop.f32.mrb[227].mxu1 }
0x13df   :  { %v6652_v13 = vmul.f32 0.17677669, %v6486_v50 }
0x13ed   :  { %v14556_v56 = vpop.f32.mrb[192].mxu0 }
0x13ee   :  { %v11697_v61 = vpop.f32.mrb[193].mxu0 }
0x13ef   :  { %v6225_v54 = vpop.f32.mrb[194].mxu0 }
0x13f0   :  { %v11698_v18 = vpop.f32.mrb[195].mxu0  ;;  %v6654_v54 = vmul.f32 0.17677669, %v6590_v2 }
0x13f1   :  { %v6668_v18 = vsel %vm856_vm3, %v6652_v13, -inf }
0x13f5   :  { %v6330_v27 = vpop.f32.mrb[196].mxu0 }
0x13f6   :  { %v6649_v21 = vmul.f32 0.17677669, %v6330_v27  ;;  %v11709_v0 = vpop.f32.mrb[197].mxu0 }
0x13f7   :  { %v6333_v39 = vpop.f32.mrb[198].mxu0 }
0x13f8   :  { %v11710_v48 = vpop.f32.mrb[199].mxu0  ;;  %v6659_v24 = vsel %vm856_vm3, %v6649_v21, -inf }
0x13f9   :  { %6660 = vmax.xlane.f32.xlu1 %v6659_v24 }
0x13fd   :  { %v6434_v44 = vpop.f32.mrb[200].mxu0 }
0x13fe   :  { %v14561_v36 = vmul.f32 0.17677669, %v6434_v44  ;;  %v11721_v52 = vpop.f32.mrb[201].mxu0  ;;  %v6674_v44 = vsel %vm856_vm3, %v6654_v54, -inf }
0x13ff   :  { %v6437_v4 = vpop.f32.mrb[202].mxu0 }
0x1400   :  { %v11722_v58 = vpop.f32.mrb[203].mxu0  ;;  %v6665_v61 = vsel %vm856_vm3, %v14561_v36, -inf }
0x1401   :  { %6666 = vmax.xlane.f32.xlu0 %v6665_v61 }
0x1405   :  { %6669 = vmax.xlane.f32.xlu0 %v6668_v18  ;;  %v6538_v0 = vpop.f32.mrb[204].mxu0 }
0x1406   :  { %v14566_v48 = vmul.f32 0.17677669, %v6538_v0  ;;  %v11733_v27 = vpop.f32.mrb[205].mxu0 }
0x1407   :  { %v6541_v39 = vpop.f32.mrb[206].mxu0 }
0x1408   :  { %v11734_v24 = vpop.f32.mrb[207].mxu0  ;;  %v6671_v50 = vsel %vm856_vm3, %v14566_v48, -inf }
0x1409   :  { %6675 = vmax.xlane.f32.xlu0 %v6674_v44  ;;  %6672 = vmax.xlane.f32.xlu1 %v6671_v50 }
0x140d   :  { %v6642_v58 = vpop.f32.mrb[208].mxu0 }
0x140e   :  { %v11745_v52 = vpop.f32.mrb[209].mxu0  ;;  %v14577_v61 = vmul.f32 0.17677669, %v6642_v58 }
0x140f   :  { %v6645_v4 = vpop.f32.mrb[210].mxu0 }
0x1410   :  { %v11746_v2 = vpop.f32.mrb[211].mxu0  ;;  %v6677_v18 = vsel %vm856_vm3, %v14577_v61, -inf }
0x141a   :  { %6802 = vrot.lane.b32.xlu1 %v14318_v49, %s12765_s1 }
0x141e   :  { %6851 = vrot.lane.b32.xlu1 %v14410_v42, %s12765_s1 }
0x141f   :  { %6753 = vrot.lane.b32.xlu0 %v14314_v63, %s12765_s1 }
0x1442   :  { %6678 = vmax.xlane.f32.xlu1 %v6677_v18 }
0x1453   :  { %6900 = vrot.lane.b32.xlu1 %v14430_v31, %s12765_s1 }
0x1454   :  { %v6658_v0 = vpop.xlane.xlu0 %6657 }
0x1455   :  { %v6680_v27 = vsub.f32 %v14548_v33, %v6658_v0 }
0x1457   :  { %v6688_v39 = vmul.f32 1.442695, %v6680_v27 }
0x1459   :  { %12506 = vpow2.f32 %v6688_v39 }
0x145c   :  { %v6664_v24 = vpop.xlane.xlu0 %6663 }
0x145d   :  { %v6682_v44 = vsub.f32 %v14552_v20, %v6664_v24 }
0x145f   :  { %v6692_v50 = vmul.f32 1.442695, %v6682_v44 }
0x1461   :  { %12508 = vpow2.f32 %v6692_v50 }
0x1463   :  { %v14585_v52 = vpop.eup %12506 }
0x1464   :  { %v6704_v58 = vsel %vm856_vm3, %v14585_v52, 0.0 }
0x1465   :  { %6705 = vadd.xlane.f32.xlu0 %v6704_v58 }
0x146b   :  { %v14589_v4 = vpop.eup %12508 }
0x146c   :  { %v6710_v2 = vsel %vm856_vm3, %v14589_v4, 0.0 }
0x146d   :  { %6711 = vadd.xlane.f32.xlu0 %v6710_v2 }
0x1483   :  { %6949 = vrot.lane.b32.xlu0 %v14427_v46, %s12765_s1 }
0x1486   :  { %v6661_v33 = vpop.xlane.xlu1 %6660 }
0x1487   :  { %v6681_v18 = vsub.f32 %v6649_v21, %v6661_v33 }
0x1489   :  { %v6690_v20 = vmul.f32 1.442695, %v6681_v18 }
0x148b   :  { %12510 = vpow2.f32 %v6690_v20 }
0x148e   :  { %v6667_v0 = vpop.xlane.xlu0 %6666 }
0x1492   :  { %v6670_v27 = vpop.xlane.xlu0 %6669 }
0x1493   :  { %v6684_v39 = vsub.f32 %v6652_v13, %v6670_v27  ;;  %v15355_v13 = vmov 0.0  }
0x1495   :  { %v14595_v24 = vpop.eup %12510  ;;  %v6696_v44 = vmul.f32 1.442695, %v6684_v39 }
0x1496   :  { %v6676_v50 = vpop.xlane.xlu0 %6675  ;;  %v6673_v58 = vpop.xlane.xlu1 %6672  ;;  %v6707_v6 = vsel %vm856_vm3, %v14595_v24, 0.0 }
0x1497   :  { %12512 = vpow2.f32 %v6696_v44  ;;  %v6686_v2 = vsub.f32 %v6654_v54, %v6676_v50  ;;  %6708 = vadd.xlane.f32.xlu1 %v6707_v6  ;;  %v6685_v20 = vsub.f32 %v14566_v48, %v6673_v58 }
0x1499   :  { %v6700_v35 = vmul.f32 1.442695, %v6686_v2  ;;  %v6698_v27 = vmul.f32 1.442695, %v6685_v20 }
0x149a   :  { %v6754_v37 = vpop.permute.xlu0 %6753  ;;  %v6803_v40 = vpop.permute.xlu1 %6802 }
0x149b   :  { %12514 = vpow2.f32 %v6700_v35  ;;  %v6759_v21 = vsel %vm956_vm2, %v6754_v37, 0  ;;  %v6808_v33 = vsel %vm956_vm2, %v6803_v40, 0  ;;  %v6683_v37 = vsub.f32 %v14561_v36, %v6667_v0 }
0x149c   :  { %11748 = vmatpush3.bf16.msra.mxu1 %v6759_v21  ;;  %11754 = vmatpush3.bf16.msra.mxu0 %v6808_v33 }
0x149d   :  { %11759 = vmatprep.subr.bf16.mxu1 %v15355_v13  ;;  %11765 = vmatprep.subr.bf16.mxu0 %v15355_v13  ;;  %v6694_v40 = vmul.f32 1.442695, %v6683_v37 }
0x149e   :  { %v6852_v36 = vpop.permute.xlu1 %6851 }
0x149f   :  { %12516 = vpow2.f32 %v6694_v40  ;;  %v6857_v20 = vsel %vm956_vm2, %v6852_v36, 0 }
0x14a0   :  { %12518 = vpow2.f32 %v6698_v27 }
0x14a1   :  { %v14603_v18 = vpop.eup %12512 }
0x14a2   :  { %v6716_v54 = vsel %vm856_vm3, %v14603_v18, 0.0 }
0x14a3   :  { %6717 = vadd.xlane.f32.xlu0 %v6716_v54 }
0x14a5   :  { %v14607_v6 = vpop.eup %12514 }
0x14a6   :  { %v6722_v35 = vsel %vm856_vm3, %v14607_v6, 0.0 }
0x14a7   :  { %6723 = vadd.xlane.f32.xlu0 %v6722_v35 }
0x14a8   :  { %6998 = vrot.lane.b32.xlu1 %v14450_v5, %s12765_s1 }
0x14a9   :  { %v14621_v39 = vpop.eup %12516 }
0x14aa   :  { %v6713_v48 = vsel %vm856_vm3, %v14621_v39, 0.0  ;;  %v14627_v0 = vpop.eup %12518 }
0x14ab   :  { %v6719_v50 = vsel %vm856_vm3, %v14627_v0, 0.0 }
0x14bd   :  { %7047 = vrot.lane.b32.xlu0 %v14462_v11, %s12765_s1 }
0x14c1   :  { %7328 = vrot.lane.b32.xlu0 %v14200_v7, %s12756_s7 }
0x14c5   :  { %7378 = vrot.lane.b32.xlu0 %v14211_v26, %s12756_s7 }
0x14c9   :  { %7428 = vrot.lane.b32.xlu0 %v14220_v60, %s12756_s7 }
0x14cc   :  { %6714 = vadd.xlane.f32.xlu1 %v6713_v48 }
0x14cd   :  { %7478 = vrot.lane.b32.xlu0 %v14235_v15, %s12756_s7 }
0x14cf   :  { %v6679_v44 = vpop.xlane.xlu1 %6678 }
0x14d0   :  { %v6687_v58 = vsub.f32 %v14577_v61, %v6679_v44  ;;  %6720 = vadd.xlane.f32.xlu1 %v6719_v50 }
0x14d1   :  { %7528 = vrot.lane.b32.xlu0 %v14260_v47, %s12756_s7 }
0x14d2   :  { %v6702_v2 = vmul.f32 1.442695, %v6687_v58 }
0x14d4   :  { %12520 = vpow2.f32 %v6702_v2 }
0x14d5   :  { %7526 = vrot.lane.b32.xlu0 %v14287_v62, %s12756_s7 }
0x14d9   :  { %7628 = vrot.lane.b32.xlu0 %v14289_v14, %s12756_s7 }
0x14dd   :  { %7626 = vrot.lane.b32.xlu0 %v14320_v55, %s12756_s7 }
0x14de   :  { %v14642_v21 = vpop.eup %12520 }
0x14df   :  { %v6725_v61 = vsel %vm856_vm3, %v14642_v21, 0.0 }
0x14e0   :  { %6726 = vadd.xlane.f32.xlu1 %v6725_v61 }
0x14f1   :  { %7096 = vrot.lane.b32.xlu1 %v14465_v29, %s12765_s1 }
0x14f2   :  { %v6706_v33 = vpop.xlane.xlu0 %6705 }
0x14f3   :  { %12522 = vrcp.f32 %v6706_v33 }
0x14f5   :  { %7326 = vrot.lane.b32.xlu1 %v14218_v3, %s12756_s7 }
0x14f9   :  { %7376 = vrot.lane.b32.xlu1 %v14237_v19, %s12756_s7 }
0x14fa   :  { %v6712_v54 = vpop.xlane.xlu0 %6711 }
0x14fb   :  { %12524 = vrcp.f32 %v6712_v54 }
0x14fd   :  { %v12523_v35 = vpop.eup %12522  ;;  %7426 = vrot.lane.b32.xlu1 %v14239_v1, %s12756_s7 }
0x14fe   :  { %v6736_v37 = vmul.f32 %v12523_v35, %v14585_v52  ;;  %v6950_v48 = vpop.permute.xlu0 %6949 }
0x14ff   :  { %v6955_v36 = vsel %vm956_vm2, %v6950_v48, 0 }
0x1500   :  { %v6744_v40 = vpack.c.bf16 %v6736_v37, %v6736_v37 }
0x1501   :  { %7476 = vrot.lane.b32.xlu1 %v14253_v23, %s12756_s7 }
0x1502   :  { %11750 = vmatmul.mubr.msk.bf16.vlgmr.msra.gmra.mrb[228].mxu1 %vm856_vm3, %v6744_v40 }
0x1503   :  { %11760 = vmatpush3.bf16.msra.mxu1 %v6857_v20  ;;  %11761 = vmatprep.mubr.msk.bf16.mxu1 %vm12764_vm0, %v15355_v13 }
0x1504   :  { %11771 = vmatprep.subr.bf16.mxu1 %v15355_v13 }
0x1505   :  { %v12525_v27 = vpop.eup %12524  ;;  %7578 = vrot.lane.b32.xlu1 %v14263_v16, %s12756_s7 }
0x1506   :  { %v6738_v52 = vmul.f32 %v12525_v27, %v14589_v4  ;;  %v6901_v4 = vpop.permute.xlu1 %6900 }
0x1507   :  { %v6906_v54 = vsel %vm956_vm2, %v6901_v4, 0 }
0x1508   :  { %v6746_v44 = vpack.c.bf16 %v6738_v52, %v6738_v52 }
0x1509   :  { %7576 = vrot.lane.b32.xlu1 %v14294_v22, %s12756_s7 }
0x150a   :  { %11762 = vmatmul.mubr.msk.bf16.vlgmr.msra.gmra.mrb[232].mxu1 %vm856_vm3, %v6746_v44 }
0x150b   :  { %11772 = vmatpush3.bf16.msra.mxu1 %v6955_v36  ;;  %11773 = vmatprep.mubr.msk.bf16.mxu1 %vm12764_vm0, %v15355_v13 }
0x150c   :  { %11783 = vmatprep.subr.bf16.mxu1 %v15355_v13 }
0x150d   :  { %7678 = vrot.lane.b32.xlu1 %v14296_v9, %s12756_s7 }
0x1511   :  { %7676 = vrot.lane.b32.xlu1 %v14322_v10, %s12756_s7 }
0x1524   :  { %v6709_v50 = vpop.xlane.xlu1 %6708 }
0x1525   :  { %12526 = vrcp.f32 %v6709_v50 }
0x1528   :  { %v6999_v36 = vpop.permute.xlu1 %6998 }
0x152f   :  { %v12527_v58 = vpop.eup %12526 }
0x1530   :  { %v6737_v2 = vmul.f32 %v12527_v58, %v14595_v24  ;;  %v6718_v61 = vpop.xlane.xlu0 %6717 }
0x1531   :  { %12528 = vrcp.f32 %v6718_v61 }
0x1532   :  { %v6745_v33 = vpack.c.bf16 %v6737_v2, %v6737_v2 }
0x1534   :  { %v6724_v35 = vpop.xlane.xlu0 %6723  ;;  %11756 = vmatmul.mubr.msk.bf16.vlgmr.msra.gmra.mrb[212].mxu0 %vm856_vm3, %v6745_v33  ;;  %v7004_v33 = vsel %vm956_vm2, %v6999_v36, 0 }
0x1535   :  { %12530 = vrcp.f32 %v6724_v35  ;;  %11766 = vmatpush3.bf16.msra.mxu0 %v6906_v54  ;;  %11767 = vmatprep.mubr.msk.bf16.mxu0 %vm12764_vm0, %v15355_v13 }
0x1536   :  { %11777 = vmatprep.subr.bf16.mxu0 %v15355_v13 }
0x1538   :  { %v7048_v20 = vpop.permute.xlu0 %7047 }
0x1539   :  { %v7053_v52 = vsel %vm956_vm2, %v7048_v20, 0 }
0x153b   :  { %v12529_v37 = vpop.eup %12528 }
0x153c   :  { %v6740_v40 = vmul.f32 %v12529_v37, %v14603_v18 }
0x153e   :  { %v6748_v24 = vpack.c.bf16 %v6740_v40, %v6740_v40 }
0x153f   :  { %v12531_v27 = vpop.eup %12530 }
0x1540   :  { %11774 = vmatmul.mubr.msk.bf16.vlgmr.msra.gmra.mrb[236].mxu1 %vm856_vm3, %v6748_v24  ;;  %v6742_v48 = vmul.f32 %v12531_v27, %v14607_v6 }
0x1541   :  { %11784 = vmatpush3.bf16.msra.mxu1 %v7053_v52  ;;  %11785 = vmatprep.mubr.msk.bf16.mxu1 %vm12764_vm0, %v15355_v13 }
0x1542   :  { %v6750_v44 = vpack.c.bf16 %v6742_v48, %v6742_v48 }
0x1548   :  { %11786 = vmatmul.mubr.msk.bf16.vlgmr.msra.gmra.mrb[240].mxu1 %vm856_vm3, %v6750_v44 }
0x1559   :  { %v6715_v4 = vpop.xlane.xlu1 %6714 }
0x155a   :  { %12532 = vrcp.f32 %v6715_v4 }
0x155d   :  { %v6721_v18 = vpop.xlane.xlu1 %6720 }
0x155e   :  { %12534 = vrcp.f32 %v6721_v18 }
0x1564   :  { %v12533_v50 = vpop.eup %12532 }
0x1565   :  { %v6739_v58 = vmul.f32 %v12533_v50, %v14621_v39 }
0x1567   :  { %v6747_v2 = vpack.c.bf16 %v6739_v58, %v6739_v58 }
0x1568   :  { %v12535_v61 = vpop.eup %12534 }
0x1569   :  { %11768 = vmatmul.mubr.msk.bf16.vlgmr.msra.gmra.mrb[216].mxu0 %vm856_vm3, %v6747_v2  ;;  %v6741_v6 = vmul.f32 %v12535_v61, %v14627_v0  ;;  %v7329_v0 = vpop.permute.xlu0 %7328 }
0x156a   :  { %11778 = vmatpush3.bf16.msra.mxu0 %v7004_v33  ;;  %11779 = vmatprep.mubr.msk.bf16.mxu0 %vm12764_vm0, %v15355_v13  ;;  %v7334_v27 = vsel %vm479_vm1, %v7329_v0, 0 }
0x156b   :  { %11789 = vmatprep.subr.bf16.mxu0 %v15355_v13  ;;  %v6749_v35 = vpack.c.bf16 %v6741_v6, %v6741_v6 }
0x156d   :  { %v6727_v54 = vpop.xlane.xlu1 %6726  ;;  %v7379_v48 = vpop.permute.xlu0 %7378 }
0x156e   :  { %12536 = vrcp.f32 %v6727_v54  ;;  %v7384_v36 = vsel %vm479_vm1, %v7379_v48, 0  ;;  %v12250_v54 = vld [vmem:[#allocation2 + $0x50] sm:$0xff]  }
0x156f   :  { %11795 = vmatprep.subr.bf16.mxu1 %v12250_v54 }
0x1570   :  { %11796 = vmatpush3.bf16.msra.mxu1 %v12250_v54 }
0x1571   :  { %11780 = vmatmul.mubr.msk.bf16.vlgmr.msra.gmra.mrb[220].mxu0 %vm856_vm3, %v6749_v35  ;;  %v7097_v39 = vpop.permute.xlu1 %7096  ;;  %v12251_v35 = vld [vmem:[#allocation2 + $0x58] sm:$0xff]  }
0x1572   :  { %v7102_v37 = vsel %vm956_vm2, %v7097_v39, 0  ;;  %11791 = vmatprep.mubr.msk.bf16.mxu0 %vm12764_vm0, %v15355_v13  ;;  %11797 = vmatprep.subr.bf16.mxu1 %v12251_v35 }
0x1573   :  { %11790 = vmatpush3.bf16.msra.mxu0 %v7102_v37 }
0x1574   :  { %11819 = vmatprep.subr.bf16.mxu0 %v15355_v13  ;;  %11798 = vmatpush3.bf16.msra.mxu1 %v12251_v35 }
0x1575   :  { %v7327_v52 = vpop.permute.xlu1 %7326 }
0x1578   :  { %v12537_v40 = vpop.eup %12536 }
0x1579   :  { %v6743_v20 = vmul.f32 %v12537_v40, %v14642_v21  ;;  %v7377_v44 = vpop.permute.xlu1 %7376  ;;  %v7429_v21 = vpop.permute.xlu0 %7428 }
0x157a   :  { %v7434_v18 = vsel %vm479_vm1, %v7429_v21, 0 }
0x157b   :  { %v6751_v24 = vpack.c.bf16 %v6743_v20, %v6743_v20  ;;  %v12252_v20 = vld [vmem:[#allocation2 + $0x40] sm:$0xff]  }
0x157c   :  { %11807 = vmatprep.subr.bf16.mxu1 %v12252_v20 }
0x157d   :  { %11792 = vmatmul.mubr.msk.bf16.vlgmr.msra.gmra.mrb[224].mxu0 %vm856_vm3, %v6751_v24  ;;  %v7427_v4 = vpop.permute.xlu1 %7426  ;;  %v7479_v58 = vpop.permute.xlu0 %7478 }
0x157e   :  { %11820 = vmatpush3.bf16.xpose.msra.mxu0 %v7334_v27  ;;  %11821 = vmatprep.mubr.msk.bf16.mxu0 %vm12764_vm0, %v15355_v13  ;;  %v7484_v2 = vsel %vm479_vm1, %v7479_v58, 0 }
0x157f   :  { %11825 = vmatprep.subr.bf16.mxu0 %v15355_v13 }
0x1581   :  { %v7477_v50 = vpop.permute.xlu1 %7476 }
0x1585   :  { %11822 = vmatmul.mubr.msk.bf16.vlgmr.msra.gmra.mrb[228].mxu0 %vm479_vm1, %v7327_v52  ;;  %v7579_v61 = vpop.permute.xlu1 %7578 }
0x1586   :  { %11826 = vmatpush3.bf16.xpose.msra.mxu0 %v7384_v36  ;;  %11827 = vmatprep.mubr.msk.bf16.mxu0 %vm12764_vm0, %v15355_v13  ;;  %v7584_v6 = vsel %vm479_vm1, %v7579_v61, 0 }
0x1587   :  { %11831 = vmatprep.subr.bf16.mxu0 %v15355_v13 }
0x1589   :  { %v7577_v33 = vpop.permute.xlu1 %7576 }
0x158d   :  { %11828 = vmatmul.mubr.msk.bf16.vlgmr.msra.gmra.mrb[232].mxu0 %vm479_vm1, %v7377_v44  ;;  %v7679_v39 = vpop.permute.xlu1 %7678 }
0x158e   :  { %11832 = vmatpush3.bf16.xpose.msra.mxu0 %v7434_v18  ;;  %11833 = vmatprep.mubr.msk.bf16.mxu0 %vm12764_vm0, %v15355_v13  ;;  %v7684_v37 = vsel %vm479_vm1, %v7679_v39, 0 }
0x158f   :  { %11837 = vmatprep.subr.bf16.mxu0 %v15355_v13 }
0x1591   :  { %v7677_v40 = vpop.permute.xlu1 %7676 }
0x1595   :  { %11834 = vmatmul.mubr.msk.bf16.vlgmr.msra.gmra.mrb[236].mxu0 %vm479_vm1, %v7427_v4 }
0x1596   :  { %11838 = vmatpush3.bf16.xpose.msra.mxu0 %v7484_v2  ;;  %11839 = vmatprep.mubr.msk.bf16.mxu0 %vm12764_vm0, %v15355_v13 }
0x1597   :  { %11849 = vmatprep.subr.bf16.mxu0 %v15355_v13 }
0x159d   :  { %11840 = vmatmul.mubr.msk.bf16.vlgmr.msra.gmra.mrb[240].mxu0 %vm479_vm1, %v7477_v50 }
0x159e   :  { %11850 = vmatpush3.bf16.xpose.msra.mxu0 %v7584_v6  ;;  %11851 = vmatprep.mubr.msk.bf16.mxu0 %vm12764_vm0, %v15355_v13 }
0x159f   :  { %11861 = vmatprep.subr.bf16.mxu0 %v15355_v13 }
0x15a5   :  { %11852 = vmatmul.mubr.msk.bf16.vlgmr.msra.gmra.mrb[244].mxu0 %vm479_vm1, %v7577_v33 }
0x15a6   :  { %11862 = vmatpush3.bf16.xpose.msra.mxu0 %v7684_v37  ;;  %11863 = vmatprep.mubr.msk.bf16.mxu0 %vm12764_vm0, %v15355_v13 }
0x15a7   :  { %11873 = vmatprep.subr.bf16.mxu0 %v15355_v13 }
0x15ad   :  { %11864 = vmatmul.mubr.msk.bf16.vlgmr.msra.gmra.mrb[248].mxu0 %vm479_vm1, %v7677_v40 }
0x15ae   :  { %11875 = vmatprep.mubr.msk.bf16.mxu0 %vm12764_vm0, %v15355_v13 }
0x15d5   :  { %v6795_v0 = vpop.f32.mrb[228].mxu1 }
0x15d6   :  { %v11751_v24 = vpop.f32.mrb[229].mxu1 }
0x15d7   :  { %v6798_v27 = vpop.f32.mrb[230].mxu1 }
0x15d8   :  { %v11752_v52 = vpop.f32.mrb[231].mxu1 }
0x15dd   :  { %v6893_v48 = vpop.f32.mrb[232].mxu1 }
0x15de   :  { %v11763_v44 = vpop.f32.mrb[233].mxu1 }
0x15df   :  { %v6896_v36 = vpop.f32.mrb[234].mxu1  ;;  %v12253_v44 = vld [vmem:[#allocation2 + $0x48] sm:$0xff]  }
0x15e0   :  { %v11764_v21 = vpop.f32.mrb[235].mxu1 }
0x1607   :  { %v6844_v4 = vpop.f32.mrb[212].mxu0 }
0x1608   :  { %v7144_v18 = vpack.c.bf16 %v6844_v4, %v6795_v0  ;;  %v11757_v50 = vpop.f32.mrb[213].mxu0 }
0x1609   :  { %v6847_v58 = vpop.f32.mrb[214].mxu0 }
0x160a   :  { %v11758_v2 = vpop.f32.mrb[215].mxu0  ;;  %11799 = vmatprep.mubr.msk.bf16.mxu1 %vm479_vm1, %v7144_v18 }
0x1613   :  { %v6991_v61 = vpop.f32.mrb[236].mxu1 }
0x1614   :  { %v11775_v33 = vpop.f32.mrb[237].mxu1 }
0x1615   :  { %v6994_v6 = vpop.f32.mrb[238].mxu1 }
0x1616   :  { %v11776_v54 = vpop.f32.mrb[239].mxu1 }
0x161b   :  { %v7089_v35 = vpop.f32.mrb[240].mxu1 }
0x161c   :  { %v11787_v39 = vpop.f32.mrb[241].mxu1 }
0x161d   :  { %v7092_v37 = vpop.f32.mrb[242].mxu1 }
0x161e   :  { %v11788_v40 = vpop.f32.mrb[243].mxu1 }
0x163c   :  { %v6942_v24 = vpop.f32.mrb[216].mxu0 }
0x163d   :  { %v7145_v27 = vpack.c.bf16 %v6942_v24, %v6893_v48  ;;  %v11769_v52 = vpop.f32.mrb[217].mxu0 }
0x163e   :  { %v6945_v36 = vpop.f32.mrb[218].mxu0 }
0x163f   :  { %v11770_v21 = vpop.f32.mrb[219].mxu0  ;;  %11800 = vmatmul.mubr.msk.bf16.vlgmr.msra.gmra.mrb[244].mxu1 %vm479_vm1, %v7145_v27 }
0x1640   :  { %11808 = vmatpush3.bf16.msra.mxu1 %v12252_v20  ;;  %v15356_v20 = vpack.c.bf16 %v14532_v28, %v14528_v34  ;;  %v15358_v34 = vpack.c.bf16 %v14542_v38, %v14540_v30 }
0x1641   :  { %11809 = vmatprep.subr.bf16.mxu1 %v12253_v44 }
0x1644   :  { %v7040_v0 = vpop.f32.mrb[220].mxu0  ;;  %11810 = vmatpush3.bf16.msra.mxu1 %v12253_v44 }
0x1645   :  { %v7146_v4 = vpack.c.bf16 %v7040_v0, %v6991_v61  ;;  %v11781_v18 = vpop.f32.mrb[221].mxu0  ;;  %11843 = vmatprep.subr.bf16.mxu1 %v15355_v13  ;;  %v7529_v61 = vpop.permute.xlu0 %7528 }
0x1646   :  { %v7043_v50 = vpop.f32.mrb[222].mxu0  ;;  %v7534_v27 = vsel %vm479_vm1, %v7529_v61, 0 }
0x1647   :  { %v11782_v58 = vpop.f32.mrb[223].mxu0  ;;  %11803 = vmatprep.mubr.msk.bf16.mxu1 %vm479_vm1, %v7146_v4 }
0x1649   :  { %v7527_v0 = vpop.permute.xlu0 %7526 }
0x164d   :  { %v7629_v30 = vpop.permute.xlu0 %7628 }
0x1650   :  { %v7138_v2 = vpop.f32.mrb[224].mxu0 }
0x1651   :  { %v7147_v48 = vpack.c.bf16 %v7138_v2, %v7089_v35  ;;  %v11793_v33 = vpop.f32.mrb[225].mxu0  ;;  %v15357_v35 = vpack.c.bf16 %v14536_v41, %v14530_v51  ;;  %v15359_v41 = vpack.c.bf16 %v14556_v56, %v14546_v59 }
0x1652   :  { %v7141_v6 = vpop.f32.mrb[226].mxu0 }
0x1653   :  { %v11794_v54 = vpop.f32.mrb[227].mxu0  ;;  %11804 = vmatmul.mubr.msk.bf16.gmra.mrb[248].mxu1 %vm479_vm1, %v7147_v48  ;;  %v7634_v48 = vsel %vm479_vm1, %v7629_v30, 0 }
0x1654   :  { %11811 = vmatprep.mubr.msk.bf16.mxu1 %vm479_vm1, %v15356_v20  ;;  %v7627_v20 = vpop.permute.xlu0 %7626 }
0x1658   :  { %v7370_v39 = vpop.f32.mrb[228].mxu0 }
0x1659   :  { %v14744_v37 = vmul.f32 0.17677669, %v7370_v39  ;;  %v11823_v40 = vpop.f32.mrb[229].mxu0 }
0x165a   :  { %v7373_v24 = vpop.f32.mrb[230].mxu0 }
0x165b   :  { %11812 = vmatmul.mubr.msk.bf16.vlgmr.msra.gmra.mrb[244].mxu1 %vm479_vm1, %v15357_v35  ;;  %v11824_v52 = vpop.f32.mrb[231].mxu0  ;;  %v7734_v44 = vsel %vm856_vm3, %v14744_v37, -inf }
0x165c   :  { %11844 = vmatpush3.bf16.xpose.msra.mxu1 %v7534_v27  ;;  %11815 = vmatprep.mubr.msk.bf16.mxu1 %vm479_vm1, %v15358_v34 }
0x165d   :  { %7735 = vmax.xlane.f32.xlu0 %v7734_v44  ;;  %11855 = vmatprep.subr.bf16.mxu1 %v15355_v13 }
0x1660   :  { %v7420_v28 = vpop.f32.mrb[232].mxu0 }
0x1661   :  { %v7727_v36 = vmul.f32 0.17677669, %v7420_v28  ;;  %v11829_v21 = vpop.f32.mrb[233].mxu0 }
0x1662   :  { %v7423_v51 = vpop.f32.mrb[234].mxu0 }
0x1663   :  { %11816 = vmatmul.mubr.msk.bf16.gmra.mrb[248].mxu1 %vm479_vm1, %v15359_v41  ;;  %v11830_v4 = vpop.f32.mrb[235].mxu0  ;;  %v7737_v18 = vsel %vm856_vm3, %v7727_v36, -inf }
0x1664   :  { %7738 = vmax.xlane.f32.xlu1 %v7737_v18  ;;  %11845 = vmatprep.mubr.msk.bf16.mxu1 %vm12764_vm0, %v15355_v13 }
0x1668   :  { %v7470_v38 = vpop.f32.mrb[236].mxu0 }
0x1669   :  { %v14765_v50 = vmul.f32 0.17677669, %v7470_v38  ;;  %v11835_v58 = vpop.f32.mrb[237].mxu0 }
0x166a   :  { %v7473_v2 = vpop.f32.mrb[238].mxu0 }
0x166b   :  { %v11836_v33 = vpop.f32.mrb[239].mxu0  ;;  %11846 = vmatmul.mubr.msk.bf16.vlgmr.msra.gmra.mrb[252].mxu1 %vm479_vm1, %v7527_v0  ;;  %v7740_v59 = vsel %vm856_vm3, %v14765_v50, -inf }
0x166c   :  { %11856 = vmatpush3.bf16.xpose.msra.mxu1 %v7634_v48  ;;  %7741 = vmax.xlane.f32.xlu0 %v7740_v59 }
0x166d   :  { %11857 = vmatprep.mubr.msk.bf16.mxu1 %vm12764_vm0, %v15355_v13  ;;  %11867 = vmatprep.subr.bf16.mxu1 %v15355_v13 }
0x1670   :  { %v7520_v56 = vpop.f32.mrb[240].mxu0 }
0x1671   :  { %v7729_v6 = vmul.f32 0.17677669, %v7520_v56  ;;  %v11841_v54 = vpop.f32.mrb[241].mxu0 }
0x1672   :  { %v7523_v61 = vpop.f32.mrb[242].mxu0 }
0x1673   :  { %v11842_v39 = vpop.f32.mrb[243].mxu0  ;;  %11858 = vmatmul.mubr.msk.bf16.vlgmr.msra.gmra.mrb[0].mxu1 %vm479_vm1, %v7627_v20  ;;  %v7743_v40 = vsel %vm856_vm3, %v7729_v6, -inf }
0x1674   :  { %7744 = vmax.xlane.f32.xlu0 %v7743_v40  ;;  %11869 = vmatprep.mubr.msk.bf16.mxu1 %vm12764_vm0, %v15355_v13 }
0x1678   :  { %v7620_v24 = vpop.f32.mrb[244].mxu0 }
0x1679   :  { %v7731_v27 = vmul.f32 0.17677669, %v7620_v24  ;;  %v11853_v35 = vpop.f32.mrb[245].mxu0 }
0x167a   :  { %v7623_v52 = vpop.f32.mrb[246].mxu0 }
0x167b   :  { %v11854_v44 = vpop.f32.mrb[247].mxu0  ;;  %v7749_v34 = vsel %vm856_vm3, %v7731_v27, -inf }
0x167c   :  { %7750 = vmax.xlane.f32.xlu1 %v7749_v34 }
0x1680   :  { %v7720_v28 = vpop.f32.mrb[248].mxu0 }
0x1681   :  { %v7733_v21 = vmul.f32 0.17677669, %v7720_v28  ;;  %v11865_v0 = vpop.f32.mrb[249].mxu0 }
0x1682   :  { %v7723_v51 = vpop.f32.mrb[250].mxu0 }
0x1683   :  { %v11866_v41 = vpop.f32.mrb[251].mxu0  ;;  %v7755_v4 = vsel %vm856_vm3, %v7733_v21, -inf }
0x1684   :  { %7756 = vmax.xlane.f32.xlu1 %v7755_v4 }
0x16ea   :  { %v7736_v58 = vpop.xlane.xlu0 %7735 }
0x16eb   :  { %v7758_v28 = vsub.f32 %v14744_v37, %v7736_v58 }
0x16f1   :  { %v7739_v18 = vpop.xlane.xlu1 %7738 }
0x16f2   :  { %v7759_v30 = vsub.f32 %v7727_v36, %v7739_v18 }
0x16f4   :  { %v7768_v38 = vmul.f32 1.442695, %v7759_v30 }
0x16f6   :  { %12538 = vpow2.f32 %v7768_v38 }
0x16f9   :  { %v7742_v2 = vpop.xlane.xlu0 %7741 }
0x16fa   :  { %v7760_v0 = vsub.f32 %v14765_v50, %v7742_v2 }
0x16fc   :  { %v7770_v18 = vmul.f32 1.442695, %v7760_v0 }
0x1700   :  { %v14780_v48 = vpop.eup %12538 }
0x1701   :  { %v7745_v33 = vpop.xlane.xlu0 %7744  ;;  %v7785_v59 = vsel %vm856_vm3, %v14780_v48, 0.0 }
0x1702   :  { %v7761_v56 = vsub.f32 %v7729_v6, %v7745_v33  ;;  %7786 = vadd.xlane.f32.xlu1 %v7785_v59 }
0x1704   :  { %v7772_v54 = vmul.f32 1.442695, %v7761_v56 }
0x1706   :  { %12540 = vpow2.f32 %v7772_v54 }
0x1709   :  { %v7751_v20 = vpop.xlane.xlu1 %7750 }
0x170a   :  { %v7763_v61 = vsub.f32 %v7731_v27, %v7751_v20 }
0x170c   :  { %v7776_v39 = vmul.f32 1.442695, %v7763_v61 }
0x170e   :  { %12542 = vpow2.f32 %v7776_v39 }
0x1710   :  { %v14784_v40 = vpop.eup %12540 }
0x1711   :  { %v7757_v36 = vpop.xlane.xlu1 %7756  ;;  %v7791_v24 = vsel %vm856_vm3, %v14784_v40, 0.0 }
0x1712   :  { %v7765_v35 = vsub.f32 %v7733_v21, %v7757_v36  ;;  %7792 = vadd.xlane.f32.xlu1 %v7791_v24  ;;  %v7766_v21 = vmul.f32 1.442695, %v7758_v28 }
0x1714   :  { %v7780_v52 = vmul.f32 1.442695, %v7765_v35 }
0x1716   :  { %12544 = vpow2.f32 %v7780_v52 }
0x1717   :  { %12546 = vpow2.f32 %v7766_v21 }
0x1718   :  { %v14788_v44 = vpop.eup %12542  ;;  %12548 = vpow2.f32 %v7770_v18 }
0x1719   :  { %v7797_v6 = vsel %vm856_vm3, %v14788_v44, 0.0 }
0x171a   :  { %7798 = vadd.xlane.f32.xlu1 %v7797_v6 }
0x1720   :  { %v14792_v34 = vpop.eup %12544 }
0x1721   :  { %v7803_v27 = vsel %vm856_vm3, %v14792_v34, 0.0  ;;  %v14818_v54 = vpop.eup %12546 }
0x1722   :  { %7804 = vadd.xlane.f32.xlu1 %v7803_v27  ;;  %v7782_v20 = vsel %vm856_vm3, %v14818_v54, 0.0  ;;  %v14824_v61 = vpop.eup %12548 }
0x1733   :  { %7878 = vrot.lane.b32.xlu1 %v14318_v49, %s12756_s7 }
0x1737   :  { %7926 = vrot.lane.b32.xlu1 %v14410_v42, %s12756_s7 }
0x173b   :  { %7974 = vrot.lane.b32.xlu1 %v14430_v31, %s12756_s7 }
0x173e   :  { %v7570_v51 = vpop.f32.mrb[252].mxu1 }
0x173f   :  { %v14804_v41 = vmul.f32 0.17677669, %v7570_v51  ;;  %v11847_v4 = vpop.f32.mrb[253].mxu1  ;;  %8070 = vrot.lane.b32.xlu1 %v14450_v5, %s12756_s7 }
0x1740   :  { %v7573_v30 = vpop.f32.mrb[254].mxu1 }
0x1741   :  { %v11848_v38 = vpop.f32.mrb[255].mxu1  ;;  %v7746_v37 = vsel %vm856_vm3, %v14804_v41, -inf }
0x1742   :  { %7747 = vmax.xlane.f32.xlu0 %v7746_v37 }
0x1743   :  { %8166 = vrot.lane.b32.xlu1 %v14465_v29, %s12756_s7 }
0x1746   :  { %v7670_v50 = vpop.f32.mrb[0].mxu1 }
0x1747   :  { %v14812_v58 = vmul.f32 0.17677669, %v7670_v50  ;;  %v11859_v2 = vpop.f32.mrb[1].mxu1  ;;  %8315 = vrot.lane.b32.xlu1 %v14218_v3, %s12766_s20  ;;  %v7788_v3 = vsel %vm856_vm3, %v14824_v61, 0.0 }
0x1748   :  { %v7673_v33 = vpop.f32.mrb[2].mxu1 }
0x1749   :  { %v11860_v59 = vpop.f32.mrb[3].mxu1  ;;  %v7752_v56 = vsel %vm856_vm3, %v14812_v58, -inf }
0x174a   :  { %7753 = vmax.xlane.f32.xlu0 %v7752_v56 }
0x174b   :  { %8365 = vrot.lane.b32.xlu1 %v14237_v19, %s12766_s20 }
0x174e   :  { %7783 = vadd.xlane.f32.xlu0 %v7782_v20 }
0x174f   :  { %8467 = vrot.lane.b32.xlu1 %v14235_v15, %s12766_s20 }
0x1752   :  { %7789 = vadd.xlane.f32.xlu0 %v7788_v3 }
0x1753   :  { %8465 = vrot.lane.b32.xlu1 %v14253_v23, %s12766_s20 }
0x1757   :  { %8567 = vrot.lane.b32.xlu1 %v14263_v16, %s12766_s20 }
0x175b   :  { %8565 = vrot.lane.b32.xlu1 %v14294_v22, %s12766_s20 }
0x175f   :  { %8667 = vrot.lane.b32.xlu1 %v14296_v9, %s12766_s20 }
0x1763   :  { %8665 = vrot.lane.b32.xlu1 %v14322_v10, %s12766_s20 }
0x1768   :  { %7830 = vrot.lane.b32.xlu0 %v14314_v63, %s12756_s7 }
0x176c   :  { %8022 = vrot.lane.b32.xlu0 %v14427_v46, %s12756_s7 }
0x178f   :  { %v7787_v15 = vpop.xlane.xlu1 %7786 }
0x1790   :  { %12550 = vrcp.f32 %v7787_v15 }
0x179a   :  { %v12551_v16 = vpop.eup %12550 }
0x179b   :  { %v7815_v22 = vmul.f32 %v12551_v16, %v14780_v48 }
0x179d   :  { %v7823_v10 = vpack.c.bf16 %v7815_v22, %v7815_v22 }
0x179f   :  { %v7793_v19 = vpop.xlane.xlu1 %7792 }
0x17a0   :  { %12552 = vrcp.f32 %v7793_v19 }
0x17a7   :  { %v7799_v23 = vpop.xlane.xlu1 %7798 }
0x17a8   :  { %12554 = vrcp.f32 %v7799_v23 }
0x17aa   :  { %v12553_v24 = vpop.eup %12552 }
0x17ab   :  { %v7817_v52 = vmul.f32 %v12553_v24, %v14784_v40 }
0x17ad   :  { %v7825_v27 = vpack.c.bf16 %v7817_v52, %v7817_v52 }
0x17af   :  { %v7805_v39 = vpop.xlane.xlu1 %7804 }
0x17b0   :  { %12556 = vrcp.f32 %v7805_v39 }
0x17b2   :  { %v12555_v28 = vpop.eup %12554 }
0x17b3   :  { %v7879_v36 = vpop.permute.xlu1 %7878  ;;  %v7819_v40 = vmul.f32 %v12555_v28, %v14788_v44 }
0x17b4   :  { %v7884_v9 = vsel %vm956_vm2, %v7879_v36, 0 }
0x17b5   :  { %11874 = vmatpush3.bf16.msra.mxu0 %v7884_v9  ;;  %v7827_v4 = vpack.c.bf16 %v7819_v40, %v7819_v40 }
0x17b6   :  { %11885 = vmatprep.subr.bf16.mxu0 %v15355_v13 }
0x17b7   :  { %v7927_v35 = vpop.permute.xlu1 %7926 }
0x17b8   :  { %11876 = vmatmul.mubr.msk.bf16.vlgmr.msra.gmra.mrb[252].mxu0 %vm856_vm3, %v7823_v10  ;;  %v7932_v9 = vsel %vm956_vm2, %v7927_v35, 0 }
0x17b9   :  { %11887 = vmatprep.mubr.msk.bf16.mxu0 %vm12764_vm0, %v15355_v13 }
0x17ba   :  { %v12557_v18 = vpop.eup %12556 }
0x17bb   :  { %v7975_v6 = vpop.permute.xlu1 %7974  ;;  %v7821_v38 = vmul.f32 %v12557_v18, %v14792_v34 }
0x17bc   :  { %v7980_v48 = vsel %vm956_vm2, %v7975_v6, 0 }
0x17bd   :  { %11886 = vmatpush3.bf16.msra.mxu0 %v7980_v48  ;;  %v7829_v37 = vpack.c.bf16 %v7821_v38, %v7821_v38  ;;  %v12254_v48 = vld [vmem:[#allocation2 + $0x60] sm:$0xff]  }
0x17be   :  { %11897 = vmatprep.subr.bf16.mxu0 %v15355_v13 }
0x17bf   :  { %v8071_v21 = vpop.permute.xlu1 %8070 }
0x17c0   :  { %v8076_v0 = vsel %vm956_vm2, %v8071_v21, 0  ;;  %11888 = vmatmul.mubr.msk.bf16.vlgmr.msra.gmra.mrb[0].mxu0 %vm856_vm3, %v7825_v27 }
0x17c1   :  { %11898 = vmatpush3.bf16.msra.mxu0 %v8076_v0  ;;  %11899 = vmatprep.mubr.msk.bf16.mxu0 %vm12764_vm0, %v15355_v13 }
0x17c2   :  { %11909 = vmatprep.subr.bf16.mxu0 %v15355_v13 }
0x17c3   :  { %v8167_v51 = vpop.permute.xlu1 %8166 }
0x17c4   :  { %v8172_v30 = vsel %vm956_vm2, %v8167_v51, 0  ;;  %v12255_v51 = vld [vmem:[#allocation2 + $0x68] sm:$0xff]  }
0x17c8   :  { %11900 = vmatmul.mubr.msk.bf16.vlgmr.msra.gmra.mrb[4].mxu0 %vm856_vm3, %v7827_v4 }
0x17c9   :  { %11910 = vmatpush3.bf16.msra.mxu0 %v8172_v30  ;;  %11911 = vmatprep.mubr.msk.bf16.mxu0 %vm12764_vm0, %v15355_v13 }
0x17ca   :  { %11927 = vmatprep.subr.bf16.mxu0 %v15355_v13 }
0x17cf   :  { %v7748_v50 = vpop.xlane.xlu0 %7747 }
0x17d0   :  { %v7762_v44 = vsub.f32 %v14804_v41, %v7748_v50  ;;  %11912 = vmatmul.mubr.msk.bf16.vlgmr.msra.gmra.mrb[8].mxu0 %vm856_vm3, %v7829_v37 }
0x17d1   :  { %11929 = vmatprep.mubr.msk.bf16.mxu0 %vm12764_vm0, %v15355_v13 }
0x17d2   :  { %v7774_v2 = vmul.f32 1.442695, %v7762_v44 }
0x17d4   :  { %12558 = vpow2.f32 %v7774_v2 }
0x17d7   :  { %v7754_v33 = vpop.xlane.xlu0 %7753 }
0x17d8   :  { %v7764_v59 = vsub.f32 %v14812_v58, %v7754_v33 }
0x17da   :  { %v7778_v56 = vmul.f32 1.442695, %v7764_v59 }
0x17db   :  { %v7784_v20 = vpop.xlane.xlu0 %7783 }
0x17dc   :  { %12560 = vpow2.f32 %v7778_v56 }
0x17dd   :  { %12562 = vrcp.f32 %v7784_v20 }
0x17de   :  { %v12559_v34 = vpop.eup %12558 }
0x17df   :  { %v7790_v3 = vpop.xlane.xlu0 %7789  ;;  %v7794_v15 = vsel %vm856_vm3, %v12559_v34, 0.0 }
0x17e0   :  { %7795 = vadd.xlane.f32.xlu0 %v7794_v15  ;;  %12564 = vrcp.f32 %v7790_v3 }
0x17e3   :  { %v7831_v41 = vpop.permute.xlu0 %7830 }
0x17e4   :  { %v7836_v19 = vsel %vm956_vm2, %v7831_v41, 0 }
0x17e5   :  { %11868 = vmatpush3.bf16.msra.mxu1 %v7836_v19 }
0x17e6   :  { %v12561_v23 = vpop.eup %12560  ;;  %11879 = vmatprep.subr.bf16.mxu1 %v15355_v13 }
0x17e7   :  { %v12563_v16 = vpop.eup %12562  ;;  %v7800_v58 = vsel %vm856_vm3, %v12561_v23, 0.0  ;;  %v8023_v24 = vpop.permute.xlu0 %8022 }
0x17e8   :  { %v7814_v39 = vmul.f32 %v12563_v16, %v14818_v54  ;;  %7801 = vadd.xlane.f32.xlu0 %v7800_v58  ;;  %v8028_v6 = vsel %vm956_vm2, %v8023_v24, 0 }
0x17ea   :  { %v7822_v22 = vpack.c.bf16 %v7814_v39, %v7814_v39  ;;  %v12565_v36 = vpop.eup %12564 }
0x17eb   :  { %v7816_v10 = vmul.f32 %v12565_v36, %v14824_v61 }
0x17ec   :  { %11870 = vmatmul.mubr.msk.bf16.vlgmr.msra.gmra.mrb[4].mxu1 %vm856_vm3, %v7822_v22 }
0x17ed   :  { %11880 = vmatpush3.bf16.msra.mxu1 %v7932_v9  ;;  %11881 = vmatprep.mubr.msk.bf16.mxu1 %vm12764_vm0, %v15355_v13  ;;  %v7824_v52 = vpack.c.bf16 %v7816_v10, %v7816_v10 }
0x17ee   :  { %11891 = vmatprep.subr.bf16.mxu1 %v15355_v13 }
0x17f4   :  { %11882 = vmatmul.mubr.msk.bf16.vlgmr.msra.gmra.mrb[8].mxu1 %vm856_vm3, %v7824_v52 }
0x17f5   :  { %11892 = vmatpush3.bf16.msra.mxu1 %v8028_v6  ;;  %11893 = vmatprep.mubr.msk.bf16.mxu1 %vm12764_vm0, %v15355_v13 }
0x17f6   :  { %11903 = vmatprep.subr.bf16.mxu1 %v15355_v13 }
0x17fe   :  { %8118 = vrot.lane.b32.xlu0 %v14462_v11, %s12756_s7 }
0x1802   :  { %8317 = vrot.lane.b32.xlu0 %v14200_v7, %s12766_s20 }
0x1806   :  { %8367 = vrot.lane.b32.xlu0 %v14211_v26, %s12766_s20 }
0x180a   :  { %8417 = vrot.lane.b32.xlu0 %v14220_v60, %s12766_s20  ;;  %v8316_v60 = vpop.permute.xlu1 %8315 }
0x180e   :  { %8415 = vrot.lane.b32.xlu0 %v14239_v1, %s12766_s20 }
0x1812   :  { %8517 = vrot.lane.b32.xlu0 %v14260_v47, %s12766_s20  ;;  %v8366_v47 = vpop.permute.xlu1 %8365 }
0x1816   :  { %8515 = vrot.lane.b32.xlu0 %v14287_v62, %s12766_s20  ;;  %v8468_v21 = vpop.permute.xlu1 %8467 }
0x1817   :  { %v8473_v50 = vsel %vm479_vm1, %v8468_v21, 0 }
0x181a   :  { %8617 = vrot.lane.b32.xlu0 %v14289_v14, %s12766_s20  ;;  %v8466_v18 = vpop.permute.xlu1 %8465 }
0x181e   :  { %8615 = vrot.lane.b32.xlu0 %v14320_v55, %s12766_s20  ;;  %v8568_v2 = vpop.permute.xlu1 %8567 }
0x1822   :  { %v8566_v56 = vpop.permute.xlu1 %8565 }
0x1826   :  { %v8668_v15 = vpop.permute.xlu1 %8667 }
0x1827   :  { %v8673_v16 = vsel %vm479_vm1, %v8668_v15, 0 }
0x182a   :  { %v8666_v36 = vpop.permute.xlu1 %8665 }
0x186d   :  { %v7796_v7 = vpop.xlane.xlu0 %7795 }
0x186e   :  { %12566 = vrcp.f32 %v7796_v7 }
0x1875   :  { %v7802_v26 = vpop.xlane.xlu0 %7801 }
0x1876   :  { %12568 = vrcp.f32 %v7802_v26 }
0x1878   :  { %v12567_v54 = vpop.eup %12566 }
0x1879   :  { %v7818_v61 = vmul.f32 %v12567_v54, %v12559_v34  ;;  %v8119_v1 = vpop.permute.xlu0 %8118  ;;  %v8573_v34 = vsel %vm479_vm1, %v8568_v2, 0 }
0x187a   :  { %v8124_v27 = vsel %vm956_vm2, %v8119_v1, 0 }
0x187b   :  { %v7826_v35 = vpack.c.bf16 %v7818_v61, %v7818_v61 }
0x187d   :  { %v8318_v62 = vpop.permute.xlu0 %8317  ;;  %11894 = vmatmul.mubr.msk.bf16.vlgmr.msra.gmra.mrb[12].mxu1 %vm856_vm3, %v7826_v35 }
0x187e   :  { %v8323_v14 = vsel %vm479_vm1, %v8318_v62, 0  ;;  %11904 = vmatpush3.bf16.msra.mxu1 %v8124_v27  ;;  %11905 = vmatprep.mubr.msk.bf16.mxu1 %vm12764_vm0, %v15355_v13 }
0x187f   :  { %11928 = vmatpush3.bf16.xpose.msra.mxu0 %v8323_v14  ;;  %11915 = vmatprep.subr.bf16.mxu1 %v12254_v48 }
0x1880   :  { %v12569_v55 = vpop.eup %12568  ;;  %11933 = vmatprep.subr.bf16.mxu0 %v15355_v13 }
0x1881   :  { %v7820_v28 = vmul.f32 %v12569_v55, %v12561_v23  ;;  %v8368_v40 = vpop.permute.xlu0 %8367 }
0x1882   :  { %v8373_v4 = vsel %vm479_vm1, %v8368_v40, 0 }
0x1883   :  { %v7828_v0 = vpack.c.bf16 %v7820_v28, %v7820_v28 }
0x1885   :  { %11906 = vmatmul.mubr.msk.bf16.vlgmr.msra.gmra.mrb[16].mxu1 %vm856_vm3, %v7828_v0 }
0x1886   :  { %11930 = vmatmul.mubr.msk.bf16.vlgmr.msra.gmra.mrb[12].mxu0 %vm479_vm1, %v8316_v60  ;;  %11916 = vmatpush3.bf16.msra.mxu1 %v12254_v48  ;;  %v8418_v60 = vpop.permute.xlu0 %8417 }
0x1887   :  { %11934 = vmatpush3.bf16.xpose.msra.mxu0 %v8373_v4  ;;  %11935 = vmatprep.mubr.msk.bf16.mxu0 %vm12764_vm0, %v15355_v13  ;;  %v8423_v48 = vsel %vm479_vm1, %v8418_v60, 0 }
0x1888   :  { %11945 = vmatprep.subr.bf16.mxu0 %v15355_v13  ;;  %11917 = vmatprep.subr.bf16.mxu1 %v12255_v51 }
0x188a   :  { %11918 = vmatpush3.bf16.msra.mxu1 %v12255_v51  ;;  %v8416_v21 = vpop.permute.xlu0 %8415 }
0x188b   :  { %v7920_v30 = vpop.f32.mrb[252].mxu0  ;;  %11939 = vmatprep.subr.bf16.mxu1 %v15355_v13 }
0x188c   :  { %v11877_v38 = vpop.f32.mrb[253].mxu0 }
0x188d   :  { %v7923_v37 = vpop.f32.mrb[254].mxu0 }
0x188e   :  { %v11878_v44 = vpop.f32.mrb[255].mxu0  ;;  %11936 = vmatmul.mubr.msk.bf16.vlgmr.msra.gmra.mrb[16].mxu0 %vm479_vm1, %v8366_v47 }
0x188f   :  { %11946 = vmatpush3.bf16.xpose.msra.mxu0 %v8473_v50  ;;  %11947 = vmatprep.mubr.msk.bf16.mxu0 %vm12764_vm0, %v15355_v13  ;;  %v8518_v44 = vpop.permute.xlu0 %8517 }
0x1890   :  { %11957 = vmatprep.subr.bf16.mxu0 %v15355_v13 }
0x1893   :  { %v8016_v33 = vpop.f32.mrb[0].mxu0 }
0x1894   :  { %v11889_v59 = vpop.f32.mrb[1].mxu0 }
0x1895   :  { %v8019_v20 = vpop.f32.mrb[2].mxu0 }
0x1896   :  { %v11890_v3 = vpop.f32.mrb[3].mxu0  ;;  %11948 = vmatmul.mubr.msk.bf16.vlgmr.msra.gmra.mrb[20].mxu0 %vm479_vm1, %v8466_v18 }
0x1897   :  { %11958 = vmatpush3.bf16.xpose.msra.mxu0 %v8573_v34  ;;  %11959 = vmatprep.mubr.msk.bf16.mxu0 %vm12764_vm0, %v15355_v13  ;;  %v8523_v3 = vsel %vm479_vm1, %v8518_v44, 0 }
0x1898   :  { %11969 = vmatprep.subr.bf16.mxu0 %v15355_v13 }
0x189b   :  { %v8112_v41 = vpop.f32.mrb[4].mxu0 }
0x189c   :  { %v11901_v19 = vpop.f32.mrb[5].mxu0 }
0x189d   :  { %v8115_v23 = vpop.f32.mrb[6].mxu0 }
0x189e   :  { %v11902_v58 = vpop.f32.mrb[7].mxu0  ;;  %11960 = vmatmul.mubr.msk.bf16.vlgmr.msra.gmra.mrb[24].mxu0 %vm479_vm1, %v8566_v56  ;;  %v8516_v56 = vpop.permute.xlu0 %8515 }
0x189f   :  { %11970 = vmatpush3.bf16.xpose.msra.mxu0 %v8673_v16  ;;  %11971 = vmatprep.mubr.msk.bf16.mxu0 %vm12764_vm0, %v15355_v13 }
0x18a0   :  { %11981 = vmatprep.subr.bf16.mxu0 %v15355_v13 }
0x18a2   :  { %v8618_v23 = vpop.permute.xlu0 %8617 }
0x18a3   :  { %v8208_v39 = vpop.f32.mrb[8].mxu0 }
0x18a4   :  { %v11913_v22 = vpop.f32.mrb[9].mxu0 }
0x18a5   :  { %v8211_v9 = vpop.f32.mrb[10].mxu0  ;;  %v8623_v22 = vsel %vm479_vm1, %v8618_v23, 0 }
0x18a6   :  { %v11914_v10 = vpop.f32.mrb[11].mxu0  ;;  %11972 = vmatmul.mubr.msk.bf16.vlgmr.msra.gmra.mrb[28].mxu0 %vm479_vm1, %v8666_v36 }
0x18a7   :  { %11983 = vmatprep.mubr.msk.bf16.mxu0 %vm12764_vm0, %v15355_v13 }
0x18bf   :  { %v7872_v24 = vpop.f32.mrb[4].mxu1 }
0x18c0   :  { %v8214_v52 = vpack.c.bf16 %v7920_v30, %v7872_v24  ;;  %v11871_v6 = vpop.f32.mrb[5].mxu1 }
0x18c1   :  { %v7875_v7 = vpop.f32.mrb[6].mxu1 }
0x18c2   :  { %v11872_v26 = vpop.f32.mrb[7].mxu1  ;;  %11919 = vmatprep.mubr.msk.bf16.mxu1 %vm479_vm1, %v8214_v52  ;;  %v8616_v52 = vpop.permute.xlu0 %8615 }
0x18c7   :  { %v7968_v54 = vpop.f32.mrb[8].mxu1 }
0x18c8   :  { %v8215_v61 = vpack.c.bf16 %v8016_v33, %v7968_v54  ;;  %v11883_v1 = vpop.f32.mrb[9].mxu1 }
0x18c9   :  { %v7971_v35 = vpop.f32.mrb[10].mxu1 }
0x18ca   :  { %v11884_v47 = vpop.f32.mrb[11].mxu1  ;;  %11920 = vmatmul.mubr.msk.bf16.vlgmr.msra.gmra.mrb[244].mxu1 %vm479_vm1, %v8215_v61 }
0x18cb   :  { %11940 = vmatpush3.bf16.xpose.msra.mxu1 %v8423_v48 }
0x18cc   :  { %11951 = vmatprep.subr.bf16.mxu1 %v15355_v13 }
0x1950   :  { %v8064_v27 = vpop.f32.mrb[12].mxu1 }
0x1951   :  { %v8216_v62 = vpack.c.bf16 %v8112_v41, %v8064_v27  ;;  %v11895_v14 = vpop.f32.mrb[13].mxu1 }
0x1952   :  { %v8067_v55 = vpop.f32.mrb[14].mxu1 }
0x1953   :  { %v11896_v28 = vpop.f32.mrb[15].mxu1  ;;  %11923 = vmatprep.mubr.msk.bf16.mxu1 %vm479_vm1, %v8216_v62 }
0x1958   :  { %v8160_v0 = vpop.f32.mrb[16].mxu1 }
0x1959   :  { %v8217_v40 = vpack.c.bf16 %v8208_v39, %v8160_v0  ;;  %v11907_v51 = vpop.f32.mrb[17].mxu1  ;;  %v8359_v4 = vpop.f32.mrb[12].mxu0 }
0x195a   :  { %v8715_v18 = vmul.f32 0.17677669, %v8359_v4  ;;  %v8163_v30 = vpop.f32.mrb[18].mxu1  ;;  %v11931_v38 = vpop.f32.mrb[13].mxu0 }
0x195b   :  { %v11908_v37 = vpop.f32.mrb[19].mxu1  ;;  %11924 = vmatmul.mubr.msk.bf16.gmra.mrb[248].mxu1 %vm479_vm1, %v8217_v40  ;;  %v8362_v50 = vpop.f32.mrb[14].mxu0 }
0x195c   :  { %v11932_v2 = vpop.f32.mrb[15].mxu0  ;;  %v8723_v33 = vsel %vm856_vm3, %v8715_v18, -inf  ;;  %11941 = vmatprep.mubr.msk.bf16.mxu1 %vm12764_vm0, %v15355_v13 }
0x195d   :  { %8724 = vmax.xlane.f32.xlu0 %v8723_v33 }
0x1961   :  { %v8409_v59 = vpop.f32.mrb[16].mxu0 }
0x1962   :  { %v8716_v20 = vmul.f32 0.17677669, %v8409_v59  ;;  %v11937_v34 = vpop.f32.mrb[17].mxu0 }
0x1963   :  { %v8412_v15 = vpop.f32.mrb[18].mxu0  ;;  %11942 = vmatmul.mubr.msk.bf16.vlgmr.msra.gmra.mrb[20].mxu1 %vm479_vm1, %v8416_v21 }
0x1964   :  { %11952 = vmatpush3.bf16.xpose.msra.mxu1 %v8523_v3  ;;  %v11938_v41 = vpop.f32.mrb[19].mxu0  ;;  %v8726_v19 = vsel %vm856_vm3, %v8716_v20, -inf  ;;  %11953 = vmatprep.mubr.msk.bf16.mxu1 %vm12764_vm0, %v15355_v13 }
0x1965   :  { %8727 = vmax.xlane.f32.xlu1 %v8726_v19  ;;  %11963 = vmatprep.subr.bf16.mxu1 %v15355_v13 }
0x1969   :  { %v8509_v16 = vpop.f32.mrb[20].mxu0 }
0x196a   :  { %v8718_v58 = vmul.f32 0.17677669, %v8509_v16  ;;  %v11949_v39 = vpop.f32.mrb[21].mxu0 }
0x196b   :  { %v8512_v36 = vpop.f32.mrb[22].mxu0  ;;  %11954 = vmatmul.mubr.msk.bf16.vlgmr.msra.gmra.mrb[24].mxu1 %vm479_vm1, %v8516_v56 }
0x196c   :  { %11964 = vmatpush3.bf16.xpose.msra.mxu1 %v8623_v22  ;;  %v11950_v9 = vpop.f32.mrb[23].mxu0  ;;  %v8732_v10 = vsel %vm856_vm3, %v8718_v58, -inf  ;;  %11965 = vmatprep.mubr.msk.bf16.mxu1 %vm12764_vm0, %v15355_v13 }
0x196d   :  { %8733 = vmax.xlane.f32.xlu0 %v8732_v10  ;;  %11975 = vmatprep.subr.bf16.mxu1 %v15355_v13 }
0x1971   :  { %v8609_v24 = vpop.f32.mrb[24].mxu0 }
0x1972   :  { %v8720_v6 = vmul.f32 0.17677669, %v8609_v24  ;;  %v11961_v7 = vpop.f32.mrb[25].mxu0 }
0x1973   :  { %v8612_v26 = vpop.f32.mrb[26].mxu0  ;;  %11966 = vmatmul.mubr.msk.bf16.vlgmr.msra.gmra.mrb[28].mxu1 %vm479_vm1, %v8616_v52 }
0x1974   :  { %v11962_v60 = vpop.f32.mrb[27].mxu0  ;;  %v8738_v54 = vsel %vm856_vm3, %v8720_v6, -inf  ;;  %11977 = vmatprep.mubr.msk.bf16.mxu1 %vm12764_vm0, %v15355_v13 }
0x1975   :  { %8739 = vmax.xlane.f32.xlu1 %v8738_v54 }
0x1979   :  { %v8709_v61 = vpop.f32.mrb[28].mxu0 }
0x197a   :  { %v8722_v1 = vmul.f32 0.17677669, %v8709_v61  ;;  %v11973_v35 = vpop.f32.mrb[29].mxu0 }
0x197b   :  { %v8712_v48 = vpop.f32.mrb[30].mxu0 }
0x197c   :  { %v11974_v47 = vpop.f32.mrb[31].mxu0  ;;  %v8744_v27 = vsel %vm856_vm3, %v8722_v1, -inf }
0x197d   :  { %8745 = vmax.xlane.f32.xlu1 %v8744_v27 }
0x19ea   :  { %v8725_v62 = vpop.xlane.xlu0 %8724 }
0x19eb   :  { %v8747_v14 = vsub.f32 %v8715_v18, %v8725_v62 }
0x19ed   :  { %v8755_v55 = vmul.f32 1.442695, %v8747_v14 }
0x19ef   :  { %12570 = vpow2.f32 %v8755_v55 }
0x19f2   :  { %v8728_v28 = vpop.xlane.xlu1 %8727 }
0x19f3   :  { %v8748_v21 = vsub.f32 %v8716_v20, %v8728_v28 }
0x19f5   :  { %v8757_v0 = vmul.f32 1.442695, %v8748_v21 }
0x19f7   :  { %12572 = vpow2.f32 %v8757_v0 }
0x19f9   :  { %v14961_v40 = vpop.eup %12570 }
0x19fa   :  { %v8734_v51 = vpop.xlane.xlu0 %8733  ;;  %v8771_v4 = vsel %vm856_vm3, %v14961_v40, 0.0 }
0x19fb   :  { %v8750_v30 = vsub.f32 %v8718_v58, %v8734_v51  ;;  %8772 = vadd.xlane.f32.xlu0 %v8771_v4 }
0x19fd   :  { %v8761_v38 = vmul.f32 1.442695, %v8750_v30 }
0x19ff   :  { %12574 = vpow2.f32 %v8761_v38 }
0x1a01   :  { %v12573_v37 = vpop.eup %12572 }
0x1a02   :  { %v8740_v50 = vpop.xlane.xlu1 %8739  ;;  %v8774_v18 = vsel %vm856_vm3, %v12573_v37, 0.0 }
0x1a03   :  { %v8752_v44 = vsub.f32 %v8720_v6, %v8740_v50  ;;  %8775 = vadd.xlane.f32.xlu1 %v8774_v18 }
0x1a05   :  { %v8765_v2 = vmul.f32 1.442695, %v8752_v44 }
0x1a07   :  { %12576 = vpow2.f32 %v8765_v2 }
0x1a09   :  { %v12575_v33 = vpop.eup %12574 }
0x1a0a   :  { %v8746_v59 = vpop.xlane.xlu1 %8745  ;;  %v8780_v56 = vsel %vm856_vm3, %v12575_v33, 0.0 }
0x1a0b   :  { %v8754_v20 = vsub.f32 %v8722_v1, %v8746_v59  ;;  %8781 = vadd.xlane.f32.xlu1 %v8780_v56 }
0x1a0d   :  { %v8769_v34 = vmul.f32 1.442695, %v8754_v20 }
0x1a0f   :  { %12578 = vpow2.f32 %v8769_v34 }
0x1a11   :  { %v14967_v3 = vpop.eup %12576 }
0x1a12   :  { %v8786_v15 = vsel %vm856_vm3, %v14967_v3, 0.0 }
0x1a13   :  { %8787 = vadd.xlane.f32.xlu1 %v8786_v15 }
0x1a19   :  { %v14971_v41 = vpop.eup %12578 }
0x1a1a   :  { %v8792_v19 = vsel %vm856_vm3, %v14971_v41, 0.0 }
0x1a1b   :  { %8793 = vadd.xlane.f32.xlu1 %v8792_v19 }
0x1a2c   :  { %8867 = vrot.lane.b32.xlu1 %v14318_v49, %s12766_s20 }
0x1a30   :  { %8915 = vrot.lane.b32.xlu1 %v14410_v42, %s12766_s20 }
0x1a34   :  { %8963 = vrot.lane.b32.xlu1 %v14430_v31, %s12766_s20 }
0x1a36   :  { %v8459_v23 = vpop.f32.mrb[20].mxu1 }
0x1a37   :  { %v14981_v16 = vmul.f32 0.17677669, %v8459_v23  ;;  %v11943_v58 = vpop.f32.mrb[21].mxu1 }
0x1a38   :  { %v8462_v39 = vpop.f32.mrb[22].mxu1  ;;  %9059 = vrot.lane.b32.xlu1 %v14450_v5, %s12766_s20 }
0x1a39   :  { %v11944_v22 = vpop.f32.mrb[23].mxu1  ;;  %v8729_v36 = vsel %vm856_vm3, %v14981_v16, -inf }
0x1a3a   :  { %8730 = vmax.xlane.f32.xlu0 %v8729_v36 }
0x1a3c   :  { %9155 = vrot.lane.b32.xlu1 %v14465_v29, %s12766_s20 }
0x1a3e   :  { %v8559_v49 = vpop.f32.mrb[24].mxu1 }
0x1a3f   :  { %v14989_v42 = vmul.f32 0.17677669, %v8559_v49  ;;  %v11955_v31 = vpop.f32.mrb[25].mxu1 }
0x1a40   :  { %v8562_v9 = vpop.f32.mrb[26].mxu1 }
0x1a41   :  { %v11956_v10 = vpop.f32.mrb[27].mxu1  ;;  %v8735_v24 = vsel %vm856_vm3, %v14989_v42, -inf }
0x1a42   :  { %8736 = vmax.xlane.f32.xlu0 %v8735_v24 }
0x1a46   :  { %v8659_v52 = vpop.f32.mrb[28].mxu1 }
0x1a47   :  { %v14993_v5 = vmul.f32 0.17677669, %v8659_v52  ;;  %v11967_v6 = vpop.f32.mrb[29].mxu1 }
0x1a48   :  { %v8662_v7 = vpop.f32.mrb[30].mxu1 }
0x1a49   :  { %v11968_v26 = vpop.f32.mrb[31].mxu1  ;;  %v8741_v60 = vsel %vm856_vm3, %v14993_v5, -inf }
0x1a4a   :  { %8742 = vmax.xlane.f32.xlu0 %v8741_v60 }
0x1a60   :  { %8819 = vrot.lane.b32.xlu0 %v14314_v63, %s12766_s20 }
0x1a88   :  { %v8773_v2 = vpop.xlane.xlu0 %8772 }
0x1a90   :  { %v8776_v29 = vpop.xlane.xlu1 %8775 }
0x1a91   :  { %12580 = vrcp.f32 %v8776_v29 }
0x1a98   :  { %v8782_v54 = vpop.xlane.xlu1 %8781 }
0x1a99   :  { %12582 = vrcp.f32 %v8782_v54 }
0x1a9b   :  { %v12581_v1 = vpop.eup %12580 }
0x1a9c   :  { %v8804_v48 = vmul.f32 %v12581_v1, %v12573_v37 }
0x1a9e   :  { %v8812_v62 = vpack.c.bf16 %v8804_v48, %v8804_v48 }
0x1aa0   :  { %v8788_v61 = vpop.xlane.xlu1 %8787 }
0x1aa1   :  { %12584 = vrcp.f32 %v8788_v61 }
0x1aa3   :  { %v12583_v14 = vpop.eup %12582 }
0x1aa4   :  { %v8806_v63 = vmul.f32 %v12583_v14, %v12575_v33 }
0x1aa6   :  { %v8814_v0 = vpack.c.bf16 %v8806_v63, %v8806_v63 }
0x1aa8   :  { %v8794_v35 = vpop.xlane.xlu1 %8793 }
0x1aa9   :  { %12586 = vrcp.f32 %v8794_v35 }
0x1aab   :  { %v12585_v51 = vpop.eup %12584 }
0x1aac   :  { %v8868_v47 = vpop.permute.xlu1 %8867  ;;  %v8808_v38 = vmul.f32 %v12585_v51, %v14967_v3  ;;  %v15360_v3 = vmov 0  }
0x1aad   :  { %v8873_v27 = vsel %vm956_vm2, %v8868_v47, 0 }
0x1aae   :  { %11982 = vmatpush3.bf16.msra.mxu0 %v8873_v27  ;;  %v8816_v50 = vpack.c.bf16 %v8808_v38, %v8808_v38 }
0x1aaf   :  { %11993 = vmatprep.subr.bf16.mxu0 %v15355_v13 }
0x1ab0   :  { %v8916_v55 = vpop.permute.xlu1 %8915 }
0x1ab1   :  { %11984 = vmatmul.mubr.msk.bf16.vlgmr.msra.gmra.mrb[32].mxu0 %vm856_vm3, %v8812_v62  ;;  %v8921_v49 = vsel %vm956_vm2, %v8916_v55, 0 }
0x1ab2   :  { %11995 = vmatprep.mubr.msk.bf16.mxu0 %vm12764_vm0, %v15355_v13 }
0x1ab3   :  { %v12587_v18 = vpop.eup %12586 }
0x1ab4   :  { %v8964_v28 = vpop.permute.xlu1 %8963  ;;  %v8810_v33 = vmul.f32 %v12587_v18, %v14971_v41 }
0x1ab5   :  { %v8969_v21 = vsel %vm956_vm2, %v8964_v28, 0 }
0x1ab6   :  { %11994 = vmatpush3.bf16.msra.mxu0 %v8969_v21  ;;  %v8818_v59 = vpack.c.bf16 %v8810_v33, %v8810_v33 }
0x1ab7   :  { %12005 = vmatprep.subr.bf16.mxu0 %v15355_v13 }
0x1ab8   :  { %v9060_v4 = vpop.permute.xlu1 %9059 }
0x1ab9   :  { %v9065_v30 = vsel %vm956_vm2, %v9060_v4, 0  ;;  %11996 = vmatmul.mubr.msk.bf16.vlgmr.msra.gmra.mrb[36].mxu0 %vm856_vm3, %v8814_v0 }
0x1aba   :  { %12006 = vmatpush3.bf16.msra.mxu0 %v9065_v30  ;;  %12007 = vmatprep.mubr.msk.bf16.mxu0 %vm12764_vm0, %v15355_v13 }
0x1abb   :  { %12017 = vmatprep.subr.bf16.mxu0 %v15355_v13 }
0x1abc   :  { %v9156_v37 = vpop.permute.xlu1 %9155 }
0x1abd   :  { %v9161_v44 = vsel %vm956_vm2, %v9156_v37, 0 }
0x1ac1   :  { %12008 = vmatmul.mubr.msk.bf16.vlgmr.msra.gmra.mrb[40].mxu0 %vm856_vm3, %v8816_v50 }
0x1ac2   :  { %12018 = vmatpush3.bf16.msra.mxu0 %v9161_v44  ;;  %12019 = vmatprep.mubr.msk.bf16.mxu0 %vm12764_vm0, %v15355_v13  ;;  %v12256_v44 = vld [vmem:[#allocation2 + $0x70] sm:$0xff]  }
0x1ac7   :  { %v8731_v56 = vpop.xlane.xlu0 %8730 }
0x1ac8   :  { %v8749_v20 = vsub.f32 %v14981_v16, %v8731_v56 }
0x1ac9   :  { %12020 = vmatmul.mubr.msk.bf16.vlgmr.msra.gmra.mrb[44].mxu0 %vm856_vm3, %v8818_v59 }
0x1aca   :  { %v8759_v34 = vmul.f32 1.442695, %v8749_v20  ;;  %9506 = vmatprep.mubr.bf16.mxu0 %v15360_v3  ;;  %v12257_v20 = vld [vmem:[#allocation2 + $0x78] sm:$0xff]  }
0x1acc   :  { %12588 = vpow2.f32 %v8759_v34 }
0x1acd   :  { %12590 = vrcp.f32 %v8773_v2 }
0x1acf   :  { %v8737_v15 = vpop.xlane.xlu0 %8736 }
0x1ad6   :  { %v12589_v19 = vpop.eup %12588 }
0x1ad7   :  { %v12591_v23 = vpop.eup %12590  ;;  %v8743_v58 = vpop.xlane.xlu0 %8742  ;;  %v8777_v39 = vsel %vm856_vm3, %v12589_v19, 0.0 }
0x1ad8   :  { %8778 = vadd.xlane.f32.xlu0 %v8777_v39  ;;  %v8803_v41 = vmul.f32 %v12591_v23, %v14961_v40  ;;  %v8751_v40 = vsub.f32 %v14989_v42, %v8737_v15  ;;  %v8753_v9 = vsub.f32 %v14993_v5, %v8743_v58  ;;  %v12258_v39 = vld [vmem:[#allocation4 + $0x80] ss:$8 sps:$4 sm:$0xff]  }
0x1ada   :  { %v8811_v16 = vpack.c.bf16 %v8803_v41, %v8803_v41  ;;  %v8763_v31 = vmul.f32 1.442695, %v8751_v40  ;;  %v8767_v10 = vmul.f32 1.442695, %v8753_v9  ;;  %v12260_v41 = vld [vmem:[#allocation4 + $0x84] ss:$8 sps:$4 sm:$0xff]  }
0x1adb   :  { %v8820_v22 = vpop.permute.xlu0 %8819  ;;  %9474 = vmatprep.subr.bf16.mxu0 %v12260_v41  ;;  %v12269_v40 = vld [vmem:[#allocation4 + $0xb4] ss:$8 sps:$4 sm:$0xff]   ;;  %v12272_v9 = vld [vmem:[#allocation4 + $0xc4] ss:$8 sps:$4 sm:$0xff]  }
0x1adc   :  { %v8825_v36 = vsel %vm956_vm2, %v8820_v22, 0  ;;  %12592 = vpow2.f32 %v8763_v31  ;;  %v12263_v22 = vld [vmem:[#allocation4 + $0x94] ss:$8 sps:$4 sm:$0xff]   ;;  %9475 = vmatpush1.bf16.msra.mxu0 %v12258_v39  ;;  %v12267_v31 = vld [vmem:[#allocation4 + $0xb0] ss:$8 sps:$4 sm:$0xff]  }
0x1add   :  { %11976 = vmatpush3.bf16.msra.mxu1 %v8825_v36  ;;  %12594 = vpow2.f32 %v8767_v10  ;;  %v12261_v36 = vld [vmem:[#allocation4 + $0x90] ss:$8 sps:$4 sm:$0xff]   ;;  %9476 = vmatprep.subr.bf16.mxu0 %v12263_v22  ;;  %v12270_v10 = vld [vmem:[#allocation4 + $0xc0] ss:$8 sps:$4 sm:$0xff]  }
0x1ade   :  { %11987 = vmatprep.subr.bf16.mxu1 %v15355_v13 }
0x1ae0   :  { %11978 = vmatmul.mubr.msk.bf16.vlgmr.msra.gmra.mrb[32].mxu1 %vm856_vm3, %v8811_v16  ;;  %v12266_v16 = vld [vmem:[#allocation4 + $0xa4] ss:$8 sps:$4 sm:$0xff]   ;;  %9477 = vmatpush1.bf16.msra.mxu0 %v12261_v36 }
0x1ae1   :  { %11988 = vmatpush3.bf16.msra.mxu1 %v8921_v49  ;;  %11989 = vmatprep.mubr.msk.bf16.mxu1 %vm12764_vm0, %v15355_v13  ;;  %v12264_v49 = vld [vmem:[#allocation4 + $0xa0] ss:$8 sps:$4 sm:$0xff]  }
0x1ae2   :  { %11999 = vmatprep.subr.bf16.mxu1 %v15355_v13  ;;  %9478 = vmatprep.subr.bf16.mxu0 %v12266_v16 }
0x1ae4   :  { %9479 = vmatpush1.bf16.msra.mxu0 %v12264_v49 }
0x1ae5   :  { %9480 = vmatprep.subr.bf16.mxu0 %v12269_v40 }
0x1ae6   :  { %v12593_v24 = vpop.eup %12592 }
0x1ae7   :  { %v8783_v52 = vsel %vm856_vm3, %v12593_v24, 0.0  ;;  %v12595_v6 = vpop.eup %12594 }
0x1ae8   :  { %v8789_v7 = vsel %vm856_vm3, %v12595_v6, 0.0  ;;  %9481 = vmatpush1.bf16.msra.mxu0 %v12267_v31 }
0x1ae9   :  { %9482 = vmatprep.subr.bf16.mxu0 %v12272_v9 }
0x1aec   :  { %9483 = vmatpush1.bf16.msra.mxu0 %v12270_v10 }
0x1aee   :  { %9011 = vrot.lane.b32.xlu0 %v14427_v46, %s12766_s20 }
0x1b0d   :  { %8784 = vadd.xlane.f32.xlu0 %v8783_v52 }
0x1b11   :  { %8790 = vadd.xlane.f32.xlu0 %v8789_v7 }
0x1b27   :  { %9107 = vrot.lane.b32.xlu0 %v14462_v11, %s12766_s20 }
0x1b65   :  { %v8779_v46 = vpop.xlane.xlu0 %8778 }
0x1b66   :  { %12596 = vrcp.f32 %v8779_v46 }
0x1b69   :  { %v9012_v60 = vpop.permute.xlu0 %9011 }
0x1b6a   :  { %v9017_v29 = vsel %vm956_vm2, %v9012_v60, 0 }
0x1b70   :  { %v12597_v42 = vpop.eup %12596 }
0x1b71   :  { %v8805_v26 = vmul.f32 %v12597_v42, %v12589_v19 }
0x1b73   :  { %v8813_v5 = vpack.c.bf16 %v8805_v26, %v8805_v26 }
0x1b75   :  { %11990 = vmatmul.mubr.msk.bf16.vlgmr.msra.gmra.mrb[36].mxu1 %vm856_vm3, %v8813_v5 }
0x1b76   :  { %12000 = vmatpush3.bf16.msra.mxu1 %v9017_v29  ;;  %12001 = vmatprep.mubr.msk.bf16.mxu1 %vm12764_vm0, %v15355_v13 }
0x1b77   :  { %12011 = vmatprep.subr.bf16.mxu1 %v15355_v13 }
0x1b84   :  { %v8909_v54 = vpop.f32.mrb[32].mxu0 }
0x1b85   :  { %v11985_v61 = vpop.f32.mrb[33].mxu0 }
0x1b86   :  { %v8912_v1 = vpop.f32.mrb[34].mxu0 }
0x1b87   :  { %v11986_v11 = vpop.f32.mrb[35].mxu0 }
0x1b8c   :  { %v15042_v35 = vpop.f32.mrb[36].mxu0 }
0x1b8d   :  { %v11997_v48 = vpop.f32.mrb[37].mxu0 }
0x1b8e   :  { %v9008_v47 = vpop.f32.mrb[38].mxu0 }
0x1b8f   :  { %v11998_v27 = vpop.f32.mrb[39].mxu0  ;;  %v12273_v47 = vld [vmem:[#allocation4 + $0xd0] ss:$8 sps:$4 sm:$0xff]  }
0x1b90   :  { %v12278_v27 = vld [vmem:[#allocation4 + $0xe4] ss:$8 sps:$4 sm:$0xff]  }
0x1b94   :  { %v15044_v62 = vpop.f32.mrb[40].mxu0 }
0x1b95   :  { %v12009_v14 = vpop.f32.mrb[41].mxu0 }
0x1b96   :  { %v9104_v55 = vpop.f32.mrb[42].mxu0  ;;  %v12276_v14 = vld [vmem:[#allocation4 + $0xe0] ss:$8 sps:$4 sm:$0xff]  }
0x1b97   :  { %v12010_v63 = vpop.f32.mrb[43].mxu0  ;;  %v12279_v55 = vld [vmem:[#allocation4 + $0xf0] ss:$8 sps:$4 sm:$0xff]  }
0x1b98   :  { %v10636_v63 = vld [vmem:[%s15327_s4 + $0x1] ss:$0 sm:$0xff] }
0x1b9a   :  { %v8785_v28 = vpop.xlane.xlu0 %8784 }
0x1b9b   :  { %12598 = vrcp.f32 %v8785_v28 }
0x1b9c   :  { %v15046_v21 = vpop.f32.mrb[44].mxu0 }
0x1b9d   :  { %v12021_v0 = vpop.f32.mrb[45].mxu0 }
0x1b9e   :  { %v8791_v51 = vpop.xlane.xlu0 %8790  ;;  %v9200_v4 = vpop.f32.mrb[46].mxu0 }
0x1b9f   :  { %12600 = vrcp.f32 %v8791_v51  ;;  %v12022_v30 = vpop.f32.mrb[47].mxu0  ;;  %v10638_v4 = vld [vmem:[%s15328_s5 + $0x1] ss:$0 sm:$0xff] }
0x1ba2   :  { %v9108_v50 = vpop.permute.xlu0 %9107 }
0x1ba3   :  { %v9113_v33 = vsel %vm956_vm2, %v9108_v50, 0 }
0x1ba5   :  { %v12599_v38 = vpop.eup %12598 }
0x1ba6   :  { %v8807_v37 = vmul.f32 %v12599_v38, %v12593_v24 }
0x1ba8   :  { %v8815_v18 = vpack.c.bf16 %v8807_v37, %v8807_v37 }
0x1ba9   :  { %v12601_v2 = vpop.eup %12600 }
0x1baa   :  { %12002 = vmatmul.mubr.msk.bf16.vlgmr.msra.gmra.mrb[40].mxu1 %vm856_vm3, %v8815_v18  ;;  %v8809_v59 = vmul.f32 %v12601_v2, %v12595_v6 }
0x1bab   :  { %12012 = vmatpush3.bf16.msra.mxu1 %v9113_v33  ;;  %12013 = vmatprep.mubr.msk.bf16.mxu1 %vm12764_vm0, %v15355_v13  ;;  %v10640_v33 = vld [vmem:[%s15329_s6 + $0x1] ss:$0 sm:$0xff] }
0x1bac   :  { %12023 = vmatprep.subr.bf16.mxu1 %v12256_v44  ;;  %v8817_v56 = vpack.c.bf16 %v8809_v59, %v8809_v59 }
0x1bb2   :  { %12014 = vmatmul.mubr.msk.bf16.vlgmr.msra.gmra.mrb[44].mxu1 %vm856_vm3, %v8817_v56 }
0x1bb3   :  { %v8861_v34 = vpop.f32.mrb[32].mxu1  ;;  %12024 = vmatpush3.bf16.msra.mxu1 %v12256_v44 }
0x1bb4   :  { %v9203_v15 = vpack.c.bf16 %v8909_v54, %v8861_v34  ;;  %v11979_v19 = vpop.f32.mrb[33].mxu1  ;;  %12025 = vmatprep.subr.bf16.mxu1 %v12257_v20 }
0x1bb5   :  { %v8864_v23 = vpop.f32.mrb[34].mxu1 }
0x1bb6   :  { %v11980_v58 = vpop.f32.mrb[35].mxu1  ;;  %12027 = vmatprep.mubr.msk.bf16.mxu1 %vm479_vm1, %v9203_v15 }
0x1bb7   :  { %12026 = vmatpush3.bf16.msra.mxu1 %v12257_v20 }
0x1c48   :  { %v8957_v24 = vpop.f32.mrb[36].mxu1 }
0x1c49   :  { %v9204_v52 = vpack.c.bf16 %v15042_v35, %v8957_v24  ;;  %v11991_v6 = vpop.f32.mrb[37].mxu1  ;;  %v12275_v35 = vld [vmem:[#allocation4 + $0xd4] ss:$8 sps:$4 sm:$0xff]  }
0x1c4a   :  { %v8960_v7 = vpop.f32.mrb[38].mxu1  ;;  %9484 = vmatprep.subr.bf16.mxu0 %v12275_v35  ;;  %v12291_v35 = vld [vmem:[#allocation6 + $0xa0] sm:$0xff]  }
0x1c4b   :  { %v11992_v46 = vpop.f32.mrb[39].mxu1  ;;  %12028 = vmatmul.mubr.msk.bf16.vlgmr.msra.gmra.mrb[244].mxu1 %vm479_vm1, %v9204_v52  ;;  %9485 = vmatpush1.bf16.msra.mxu0 %v12273_v47  ;;  %v12292_v47 = vld [vmem:[#allocation6 + $0xe8] sm:$0xff]  }
0x1c4c   :  { %9486 = vmatprep.subr.bf16.mxu0 %v12278_v27  ;;  %v12293_v27 = vld [vmem:[#allocation6 + $0xa8] sm:$0xff]  }
0x1c4f   :  { %9487 = vmatpush1.bf16.msra.mxu0 %v12276_v14  ;;  %v12294_v14 = vld [vmem:[#allocation6 + $0xf0] sm:$0xff]  }
0x1c7d   :  { %v9053_v42 = vpop.f32.mrb[40].mxu1 }
0x1c7e   :  { %v9205_v26 = vpack.c.bf16 %v15044_v62, %v9053_v42  ;;  %v12003_v60 = vpop.f32.mrb[41].mxu1  ;;  %v12281_v62 = vld [vmem:[#allocation4 + $0xf4] ss:$8 sps:$4 sm:$0xff]  }
0x1c7f   :  { %v9056_v5 = vpop.f32.mrb[42].mxu1  ;;  %9488 = vmatprep.subr.bf16.mxu0 %v12281_v62  ;;  %v12295_v62 = vld [vmem:[#allocation6 + $0xb0] sm:$0xff]  }
0x1c80   :  { %v12004_v29 = vpop.f32.mrb[43].mxu1  ;;  %12031 = vmatprep.mubr.msk.bf16.mxu1 %vm479_vm1, %v9205_v26  ;;  %9489 = vmatpush1.bf16.msra.mxu0 %v12279_v55  ;;  %v12283_v5 = vld [vmem:[#allocation6 + $0x80] sm:$0xff]   ;;  %v12296_v55 = vld [vmem:[#allocation6 + $0xf8] sm:$0xff]  }
0x1c81   :  { %12035 = vmatprep.subr.bf16.mxu0 %v15355_v13  ;;  %v12284_v29 = vld [vmem:[#allocation6 + $0xc8] sm:$0xff]  }
0x1c85   :  { %v9149_v54 = vpop.f32.mrb[44].mxu1 }
0x1c86   :  { %v9206_v61 = vpack.c.bf16 %v15046_v21, %v9149_v54  ;;  %v12015_v1 = vpop.f32.mrb[45].mxu1  ;;  %v12285_v54 = vld [vmem:[#allocation6 + $0x88] sm:$0xff]  }
0x1c87   :  { %v9152_v11 = vpop.f32.mrb[46].mxu1  ;;  %v12287_v1 = vld [vmem:[#allocation6 + $0x90] sm:$0xff]  }
0x1c88   :  { %v12016_v48 = vpop.f32.mrb[47].mxu1  ;;  %12032 = vmatmul.mubr.msk.bf16.gmra.mrb[248].mxu1 %vm479_vm1, %v9206_v61  ;;  %v12286_v61 = vld [vmem:[#allocation6 + $0xd0] sm:$0xff]   ;;  %v12289_v11 = vld [vmem:[#allocation6 + $0x98] sm:$0xff]  }
0x1c89   :  { %v12290_v48 = vld [vmem:[#allocation6 + $0xe0] sm:$0xff]  }
0x1d1e   :  { %v12029_v28 = vpop.f32.mrb[244].mxu1 }
0x1d1f   :  { %v9265_v21 = vpop.f32.mrb[245].mxu1  ;;  %v9314_v18 = vadd.f32 %v12029_v28, %v10636_v63  ;;  %v10641_v28 = vld [vmem:[%s15331_s8 + $0x2] sm:$0x3] }
0x1d20   :  { %v9312_v0 = vadd.f32 %v10636_v63, %v9265_v21  ;;  %v12030_v51 = vpop.f32.mrb[246].mxu1  ;;  %v15112_v21 = vrot.slane %v10641_v28, %v13034_v43 }
0x1d21   :  { %v9268_v30 = vpop.f32.mrb[247].mxu1  ;;  %v9315_v37 = vadd.f32 %v12030_v51, %v10636_v63  ;;  %v9322_v20 = vadd.f32 %v9314_v18, %v14158_v25 }
0x1d22   :  { %v9320_v38 = vadd.f32 %v9312_v0, %v14149_v53  ;;  %v9313_v50 = vadd.f32 %v10636_v63, %v9268_v30  ;;  %v15361_v0 = vld [vmem:[#allocation12_spill] sm:$0xff] }
0x1d23   :  { %v9323_v59 = vadd.f32 %v9315_v37, %v14160_v32  ;;  %v9338_v23 = vmul.f32 %v10638_v4, %v9322_v20  ;;  %v15115_v51 = vrot.slane %v10641_v28, %v15361_v0 }
0x1d24   :  { %v9336_v44 = vmul.f32 %v10638_v4, %v9320_v38  ;;  %v9321_v2 = vadd.f32 %v9313_v50, %v14151_v12 }
0x1d25   :  { %v9339_v53 = vmul.f32 %v10638_v4, %v9323_v59  ;;  %v15083_v58 = vadd.f32 %v10640_v33, %v9338_v23 }
0x1d26   :  { %v9337_v56 = vmul.f32 %v10638_v4, %v9321_v2  ;;  %v15074_v34 = vadd.f32 %v10640_v33, %v9336_v44 }
0x1d27   :  { %v15081_v12 = vadd.f32 %v10640_v33, %v9339_v53 }
0x1d28   :  { %v15076_v15 = vadd.f32 %v10640_v33, %v9337_v56 }
0x1d29   :  { %v9361_v32 = vpack.c.bf16 %v15081_v12, %v15083_v58 }
0x1d2a   :  { %v9360_v19 = vpack.c.bf16 %v15076_v15, %v15074_v34 }
0x1d2c   :  { %9507 = vmatmul.mubr.bf16.vlgmr.msra.gmra.mrb[48].mxu0 %v9360_v19 }
0x1d2d   :  { %9516 = vmatprep.mubr.bf16.mxu0 %v15360_v3 }
0x1d34   :  { %9517 = vmatmul.mubr.bf16.gmra.mrb[52].mxu0 %v9361_v32 }
0x1d35   :  { %9526 = vmatprep.mubr.bf16.mxu0 %v15360_v3 }
0x1d5b   :  { %v12033_v25 = vpop.f32.mrb[248].mxu1 }
0x1d5c   :  { %v9318_v39 = vadd.f32 %v12033_v25, %v10636_v63  ;;  %v9281_v41 = vpop.f32.mrb[249].mxu1 }
0x1d5d   :  { %v9316_v22 = vadd.f32 %v10636_v63, %v9281_v41  ;;  %v12034_v36 = vpop.f32.mrb[250].mxu1 }
0x1d5e   :  { %v9326_v16 = vadd.f32 %v9318_v39, %v14176_v57  ;;  %v9319_v49 = vadd.f32 %v12034_v36, %v10636_v63  ;;  %v9284_v40 = vpop.f32.mrb[251].mxu1 }
0x1d5f   :  { %v9324_v31 = vadd.f32 %v9316_v22, %v14167_v45  ;;  %v9317_v9 = vadd.f32 %v10636_v63, %v9284_v40  ;;  %v12297_v63 = vld [vmem:[#allocation6 + $0xb8] sm:$0xff]  }
0x1d60   :  { %v9342_v10 = vmul.f32 %v10638_v4, %v9326_v16  ;;  %v9327_v24 = vadd.f32 %v9319_v49, %v14178_v17 }
0x1d61   :  { %v9340_v52 = vmul.f32 %v10638_v4, %v9324_v31  ;;  %v9325_v6 = vadd.f32 %v9317_v9, %v14169_v8  ;;  %v12282_v8 = vld [vmem:[#allocation6 + $0xc0] sm:$0xff]  }
0x1d62   :  { %v15092_v7 = vadd.f32 %v10640_v33, %v9342_v10  ;;  %v9343_v46 = vmul.f32 %v10638_v4, %v9327_v24  ;;  %11065 = vmatprep.subr.bf16.mxu1 %v12282_v8 }
0x1d63   :  { %v9341_v42 = vmul.f32 %v10638_v4, %v9325_v6  ;;  %v15096_v60 = vadd.f32 %v10640_v33, %v9340_v52  ;;  %11066 = vmatpush3.bf16.msra.mxu1 %v12283_v5 }
0x1d64   :  { %v15094_v26 = vadd.f32 %v10640_v33, %v9343_v46  ;;  %11067 = vmatprep.subr.bf16.mxu1 %v12284_v29 }
0x1d65   :  { %v15098_v57 = vadd.f32 %v10640_v33, %v9341_v42 }
0x1d66   :  { %v9363_v17 = vpack.c.bf16 %v15094_v26, %v15092_v7 }
0x1d67   :  { %v9362_v45 = vpack.c.bf16 %v15098_v57, %v15096_v60  ;;  %11068 = vmatpush3.bf16.msra.mxu1 %v12285_v54 }
0x1d68   :  { %11069 = vmatprep.subr.bf16.mxu1 %v12286_v61 }
0x1d69   :  { %9527 = vmatmul.mubr.bf16.gmra.mrb[56].mxu0 %v9362_v45 }
0x1d6a   :  { %9536 = vmatprep.mubr.bf16.mxu0 %v15360_v3  ;;  %v12288_v3 = vld [vmem:[#allocation6 + $0xd8] sm:$0xff]  }
0x1d6b   :  { %11070 = vmatpush3.bf16.msra.mxu1 %v12287_v1 }
0x1d6c   :  { %11071 = vmatprep.subr.bf16.mxu1 %v12288_v3 }
0x1d6f   :  { %11072 = vmatpush3.bf16.msra.mxu1 %v12289_v11 }
0x1d70   :  { %11073 = vmatprep.subr.bf16.mxu1 %v12290_v48 }
0x1d71   :  { %9537 = vmatmul.mubr.bf16.gmra.mrb[60].mxu0 %v9363_v17 }
0x1d72   :  { %12051 = vmatprep.mubr.msk.bf16.mxu0 %vm12764_vm0, %v15355_v13 }
0x1d73   :  { %11074 = vmatpush3.bf16.msra.mxu1 %v12291_v35 }
0x1d74   :  { %11075 = vmatprep.subr.bf16.mxu1 %v12292_v47 }
0x1d77   :  { %11076 = vmatpush3.bf16.msra.mxu1 %v12293_v27 }
0x1d78   :  { %11077 = vmatprep.subr.bf16.mxu1 %v12294_v14 }
0x1d7b   :  { %11078 = vmatpush3.bf16.msra.mxu1 %v12295_v62 }
0x1d7c   :  { %11079 = vmatprep.subr.bf16.mxu1 %v12296_v55 }
0x1d7f   :  { %11080 = vmatpush3.bf16.msra.mxu1 %v12297_v63 }
0x1d80   :  { %12055 = vmatprep.subr.bf16.mxu1 %v15355_v13 }
0x1dff   :  { %v9508_v4 = vpop.f32.mrb[48].mxu0 }
0x1e00   :  { %v15118_v30 = vadd.f32 %v9508_v4, %v15112_v21  ;;  %v9510_v38 = vpop.f32.mrb[49].mxu0 }
0x1e01   :  { %v15121_v37 = vadd.f32 %v9510_v38, %v15115_v51  ;;  %v9512_v50 = vpop.f32.mrb[50].mxu0 }
0x1e02   :  { %v9563_v18 = vmul.f32 0.044715, %v15118_v30  ;;  %v9513_v44 = vadd.f32 %v9512_v50, %v15112_v21  ;;  %v9514_v2 = vpop.f32.mrb[51].mxu0 }
0x1e03   :  { %v9564_v43 = vmul.f32 0.044715, %v15121_v37  ;;  %v15127_v33 = vadd.f32 %v9514_v2, %v15115_v51 }
0x1e04   :  { %v9579_v59 = vmul.f32 %v9563_v18, %v15118_v30  ;;  %v9565_v56 = vmul.f32 0.044715, %v9513_v44 }
0x1e05   :  { %v9580_v20 = vmul.f32 %v9564_v43, %v15121_v37  ;;  %v9566_v53 = vmul.f32 0.044715, %v15127_v33 }
0x1e06   :  { %v9595_v19 = vmul.f32 %v9579_v59, %v15118_v30  ;;  %v9581_v23 = vmul.f32 %v9565_v56, %v9513_v44  ;;  %v9547_v56 = vmul.f32 0.5, %v15118_v30 }
0x1e07   :  { %v9596_v32 = vmul.f32 %v9580_v20, %v15121_v37  ;;  %v9582_v25 = vmul.f32 %v9566_v53, %v15127_v33  ;;  %v9518_v39 = vpop.f32.mrb[52].mxu0  ;;  %v9549_v20 = vmul.f32 0.5, %v9513_v44 }
0x1e08   :  { %v9611_v41 = vadd.f32 %v9595_v19, %v15118_v30  ;;  %v9597_v22 = vmul.f32 %v9581_v23, %v9513_v44  ;;  %v15137_v36 = vadd.f32 %v9518_v39, %v15112_v21  ;;  %v9520_v16 = vpop.f32.mrb[53].mxu0  ;;  %v9548_v23 = vmul.f32 0.5, %v15121_v37 }
0x1e09   :  { %v9598_v49 = vmul.f32 %v9582_v25, %v15127_v33  ;;  %v15141_v40 = vadd.f32 %v9520_v16, %v15115_v51  ;;  %v9522_v31 = vpop.f32.mrb[54].mxu0  ;;  %v9612_v9 = vadd.f32 %v9596_v32, %v15121_v37 }
0x1e0a   :  { %v9627_v10 = vmul.f32 0.7978846, %v9611_v41  ;;  %v9613_v24 = vadd.f32 %v9597_v22, %v9513_v44  ;;  %v9567_v52 = vmul.f32 0.044715, %v15137_v36  ;;  %v9524_v6 = vpop.f32.mrb[55].mxu0  ;;  %v9523_v42 = vadd.f32 %v9522_v31, %v15112_v21 }
0x1e0b   :  { %v9568_v46 = vmul.f32 0.044715, %v15141_v40  ;;  %v9525_v45 = vadd.f32 %v9524_v6, %v15115_v51  ;;  %v9614_v17 = vadd.f32 %v9598_v49, %v15127_v33  ;;  %v9628_v29 = vmul.f32 0.7978846, %v9612_v9 }
0x1e0c   :  { %12602 = vtanh.f32 %v9627_v10  ;;  %v9629_v8 = vmul.f32 0.7978846, %v9613_v24  ;;  %v9583_v5 = vmul.f32 %v9567_v52, %v15137_v36  ;;  %v9569_v61 = vmul.f32 0.044715, %v9523_v42 }
0x1e0d   :  { %v9584_v54 = vmul.f32 %v9568_v46, %v15141_v40  ;;  %v9570_v1 = vmul.f32 0.044715, %v9525_v45  ;;  %v9630_v11 = vmul.f32 0.7978846, %v9614_v17  ;;  %v9550_v41 = vmul.f32 0.5, %v15127_v33 }
0x1e0e   :  { %12604 = vtanh.f32 %v9629_v8  ;;  %v9599_v3 = vmul.f32 %v9583_v5, %v15137_v36  ;;  %v9585_v35 = vmul.f32 %v9569_v61, %v9523_v42  ;;  %v9551_v46 = vmul.f32 0.5, %v15137_v36 }
0x1e0f   :  { %v9600_v48 = vmul.f32 %v9584_v54, %v15141_v40  ;;  %v9586_v47 = vmul.f32 %v9570_v1, %v9525_v45  ;;  %12606 = vtanh.f32 %v9628_v29  ;;  %v9553_v37 = vmul.f32 0.5, %v9523_v42 }
0x1e10   :  { %v9615_v27 = vadd.f32 %v9599_v3, %v15137_v36  ;;  %12608 = vtanh.f32 %v9630_v11  ;;  %v9601_v14 = vmul.f32 %v9585_v35, %v9523_v42  ;;  %v9552_v8 = vmul.f32 0.5, %v15141_v40 }
0x1e11   :  { %v9602_v62 = vmul.f32 %v9586_v47, %v9525_v45  ;;  %v9616_v55 = vadd.f32 %v9600_v48, %v15141_v40  ;;  %v9554_v33 = vmul.f32 0.5, %v9525_v45 }
0x1e12   :  { %v9631_v63 = vmul.f32 0.7978846, %v9615_v27  ;;  %v9617_v28 = vadd.f32 %v9601_v14, %v9523_v42 }
0x1e13   :  { %v9618_v0 = vadd.f32 %v9602_v62, %v9525_v45  ;;  %v9632_v4 = vmul.f32 0.7978846, %v9616_v55 }
0x1e14   :  { %12610 = vtanh.f32 %v9631_v63  ;;  %v9633_v38 = vmul.f32 0.7978846, %v9617_v28 }
0x1e15   :  { %v9634_v50 = vmul.f32 0.7978846, %v9618_v0  ;;  %12612 = vtanh.f32 %v9632_v4 }
0x1e16   :  { %v12603_v18 = vpop.eup %12602  ;;  %12614 = vtanh.f32 %v9633_v38 }
0x1e17   :  { %v9659_v2 = vadd.f32 1.0, %v12603_v18  ;;  %12616 = vtanh.f32 %v9634_v50 }
0x1e18   :  { %v12605_v43 = vpop.eup %12604 }
0x1e19   :  { %v12607_v59 = vpop.eup %12606  ;;  %v9661_v53 = vadd.f32 1.0, %v12605_v43  ;;  %v9675_v25 = vmul.f32 %v9659_v2, %v9547_v56 }
0x1e1a   :  { %v12609_v19 = vpop.eup %12608  ;;  %v9660_v32 = vadd.f32 1.0, %v12607_v59 }
0x1e1b   :  { %v9677_v39 = vmul.f32 %v9661_v53, %v9549_v20  ;;  %v9662_v22 = vadd.f32 1.0, %v12609_v19 }
0x1e1c   :  { %v9676_v49 = vmul.f32 %v9660_v32, %v9548_v23 }
0x1e1d   :  { %v9691_v16 = vpack.c.bf16 %v9677_v39, %v9675_v25  ;;  %v9678_v31 = vmul.f32 %v9662_v22, %v9550_v41 }
0x1e1e   :  { %v12611_v9 = vpop.eup %12610 }
0x1e1f   :  { %v12613_v10 = vpop.eup %12612  ;;  %v9692_v24 = vpack.c.bf16 %v9678_v31, %v9676_v49  ;;  %v9663_v52 = vadd.f32 1.0, %v12611_v9 }
0x1e20   :  { %v12615_v6 = vpop.eup %12614  ;;  %v9664_v30 = vadd.f32 1.0, %v12613_v10 }
0x1e21   :  { %9868 = vmatprep.mubr.bf16.mxu1 %v9692_v24  ;;  %v12617_v44 = vpop.eup %12616  ;;  %v9665_v17 = vadd.f32 1.0, %v12615_v6  ;;  %v9679_v29 = vmul.f32 %v9663_v52, %v9551_v46 }
0x1e22   :  { %9869 = vmatmul.mubr.bf16.vlgmr.msra.gmra.mrb[48].mxu1 %v9691_v16  ;;  %v9666_v5 = vadd.f32 1.0, %v12617_v44  ;;  %v9680_v61 = vmul.f32 %v9664_v30, %v9552_v8 }
0x1e23   :  { %v9681_v54 = vmul.f32 %v9665_v17, %v9553_v37 }
0x1e24   :  { %v9682_v1 = vmul.f32 %v9666_v5, %v9554_v33 }
0x1e25   :  { %v9693_v3 = vpack.c.bf16 %v9681_v54, %v9679_v29 }
0x1e26   :  { %v9694_v11 = vpack.c.bf16 %v9682_v1, %v9680_v61 }
0x1e28   :  { %9876 = vmatprep.mubr.bf16.mxu1 %v9694_v11 }
0x1e2a   :  { %9877 = vmatmul.mubr.bf16.gmra.mrb[52].mxu1 %v9693_v3 }
0x1e3c   :  { %v9528_v48 = vpop.f32.mrb[56].mxu0 }
0x1e3d   :  { %v15161_v35 = vadd.f32 %v9528_v48, %v15112_v21  ;;  %v9530_v36 = vpop.f32.mrb[57].mxu0 }
0x1e3e   :  { %v15164_v42 = vadd.f32 %v9530_v36, %v15115_v51  ;;  %v9532_v47 = vpop.f32.mrb[58].mxu0 }
0x1e3f   :  { %v9571_v40 = vmul.f32 0.044715, %v15161_v35  ;;  %v9533_v45 = vadd.f32 %v9532_v47, %v15112_v21  ;;  %v9534_v27 = vpop.f32.mrb[59].mxu0 }
0x1e40   :  { %v9572_v14 = vmul.f32 0.044715, %v15164_v42  ;;  %v15170_v62 = vadd.f32 %v9534_v27, %v15115_v51 }
0x1e41   :  { %v9587_v55 = vmul.f32 %v9571_v40, %v15161_v35  ;;  %v9573_v63 = vmul.f32 0.044715, %v9533_v45 }
0x1e42   :  { %v9588_v28 = vmul.f32 %v9572_v14, %v15164_v42  ;;  %v9574_v0 = vmul.f32 0.044715, %v15170_v62  ;;  %v9555_v14 = vmul.f32 0.5, %v15161_v35 }
0x1e43   :  { %v9603_v4 = vmul.f32 %v9587_v55, %v15161_v35  ;;  %v9589_v38 = vmul.f32 %v9573_v63, %v9533_v45  ;;  %v9557_v55 = vmul.f32 0.5, %v9533_v45 }
0x1e44   :  { %v9604_v50 = vmul.f32 %v9588_v28, %v15164_v42  ;;  %v9590_v18 = vmul.f32 %v9574_v0, %v15170_v62  ;;  %v9538_v2 = vpop.f32.mrb[60].mxu0  ;;  %v9556_v0 = vmul.f32 0.5, %v15164_v42 }
0x1e45   :  { %v9619_v43 = vadd.f32 %v9603_v4, %v15161_v35  ;;  %v9605_v59 = vmul.f32 %v9589_v38, %v9533_v45  ;;  %v15180_v56 = vadd.f32 %v9538_v2, %v15112_v21  ;;  %v9540_v20 = vpop.f32.mrb[61].mxu0 }
0x1e46   :  { %v9606_v53 = vmul.f32 %v9590_v18, %v15170_v62  ;;  %v15184_v19 = vadd.f32 %v9540_v20, %v15115_v51  ;;  %v9542_v23 = vpop.f32.mrb[62].mxu0  ;;  %v9620_v32 = vadd.f32 %v9604_v50, %v15164_v42  ;;  %v9558_v18 = vmul.f32 0.5, %v15170_v62 }
0x1e47   :  { %v9635_v25 = vmul.f32 0.7978846, %v9619_v43  ;;  %v9621_v39 = vadd.f32 %v9605_v59, %v9533_v45  ;;  %v9575_v41 = vmul.f32 0.044715, %v15180_v56  ;;  %v9544_v22 = vpop.f32.mrb[63].mxu0  ;;  %v9543_v49 = vadd.f32 %v9542_v23, %v15112_v21 }
0x1e48   :  { %v9576_v16 = vmul.f32 0.044715, %v15184_v19  ;;  %v9545_v31 = vadd.f32 %v9544_v22, %v15115_v51  ;;  %v9622_v9 = vadd.f32 %v9606_v53, %v15170_v62  ;;  %v9636_v52 = vmul.f32 0.7978846, %v9620_v32 }
0x1e49   :  { %12618 = vtanh.f32 %v9635_v25  ;;  %v9637_v10 = vmul.f32 0.7978846, %v9621_v39  ;;  %v9591_v24 = vmul.f32 %v9575_v41, %v15180_v56  ;;  %v9577_v30 = vmul.f32 0.044715, %v9543_v49 }
0x1e4a   :  { %v9592_v6 = vmul.f32 %v9576_v16, %v15184_v19  ;;  %v9578_v44 = vmul.f32 0.044715, %v9545_v31  ;;  %v9638_v37 = vmul.f32 0.7978846, %v9622_v9  ;;  %v9559_v41 = vmul.f32 0.5, %v15180_v56 }
0x1e4b   :  { %12620 = vtanh.f32 %v9637_v10  ;;  %v9607_v46 = vmul.f32 %v9591_v24, %v15180_v56  ;;  %v9593_v21 = vmul.f32 %v9577_v30, %v9543_v49  ;;  %v9561_v42 = vmul.f32 0.5, %v9543_v49 }
0x1e4c   :  { %v9608_v17 = vmul.f32 %v9592_v6, %v15184_v19  ;;  %v9594_v8 = vmul.f32 %v9578_v44, %v9545_v31  ;;  %12622 = vtanh.f32 %v9636_v52  ;;  %v9560_v16 = vmul.f32 0.5, %v15184_v19 }
0x1e4d   :  { %v9623_v51 = vadd.f32 %v9607_v46, %v15180_v56  ;;  %12624 = vtanh.f32 %v9638_v37  ;;  %v9609_v33 = vmul.f32 %v9593_v21, %v9543_v49  ;;  %v9562_v62 = vmul.f32 0.5, %v9545_v31  ;;  %v12298_v56 = vld [vmem:[%s15336_s13] sm:$0xff]   ;;  %v12303_v37 = vld [vmem:[%s15336_s13 + $0x28] sm:$0xff]  }
0x1e4e   :  { %v9610_v5 = vmul.f32 %v9594_v8, %v9545_v31  ;;  %v9624_v29 = vadd.f32 %v9608_v17, %v15184_v19  ;;  %12036 = vmatpush3.bf16.msra.mxu0 %v12298_v56  ;;  %v12299_v19 = vld [vmem:[%s15336_s13 + $0x8] sm:$0xff]   ;;  %v12302_v46 = vld [vmem:[%s15336_s13 + $0x20] sm:$0xff]   ;;  %v12304_v17 = vld [vmem:[%s15336_s13 + $0x30] sm:$0xff]  }
0x1e4f   :  { %v9639_v54 = vmul.f32 0.7978846, %v9623_v51  ;;  %v9625_v61 = vadd.f32 %v9609_v33, %v9543_v49  ;;  %12037 = vmatprep.subr.bf16.mxu0 %v15355_v13  ;;  %v12300_v49 = vld [vmem:[%s15336_s13 + $0x10] sm:$0xff]   ;;  %v12305_v8 = vld [vmem:[%s15336_s13 + $0x38] sm:$0xff]   ;;  %v15239_v51 = vld [vmem:[%s15333_s10 + $0x1] ss:$0 sm:$0xff] }
0x1e50   :  { %v9626_v1 = vadd.f32 %v9610_v5, %v9545_v31  ;;  %v9640_v3 = vmul.f32 0.7978846, %v9624_v29  ;;  %v12301_v31 = vld [vmem:[%s15336_s13 + $0x18] sm:$0xff]   ;;  %v12312_v56 = vld [vmem:[%s15338_s15 + $0x30] sm:$0xff]  }
0x1e51   :  { %12626 = vtanh.f32 %v9639_v54  ;;  %v9641_v11 = vmul.f32 0.7978846, %v9625_v61  ;;  %v12306_v54 = vld [vmem:[%s15338_s15] sm:$0xff]  }
0x1e52   :  { %v9642_v48 = vmul.f32 0.7978846, %v9626_v1  ;;  %12628 = vtanh.f32 %v9640_v3  ;;  %12038 = vmatpush3.bf16.msra.mxu0 %v12299_v19  ;;  %12056 = vmatpush3.bf16.msra.mxu1 %v12306_v54 }
0x1e53   :  { %v12619_v36 = vpop.eup %12618  ;;  %12630 = vtanh.f32 %v9641_v11  ;;  %12039 = vmatprep.subr.bf16.mxu0 %v15355_v13  ;;  %v12307_v11 = vld [vmem:[%s15338_s15 + $0x8] sm:$0xff]   ;;  %12057 = vmatprep.subr.bf16.mxu1 %v15355_v13 }
0x1e54   :  { %v9667_v47 = vadd.f32 1.0, %v12619_v36  ;;  %12632 = vtanh.f32 %v9642_v48  ;;  %v15251_v48 = vld [vmem:[%s15334_s11 + $0x1] ss:$0 sm:$0xff] }
0x1e55   :  { %v12621_v40 = vpop.eup %12620 }
0x1e56   :  { %v12623_v27 = vpop.eup %12622  ;;  %v9669_v63 = vadd.f32 1.0, %v12621_v40  ;;  %v9683_v38 = vmul.f32 %v9667_v47, %v9555_v14  ;;  %12040 = vmatpush3.bf16.msra.mxu0 %v12300_v49  ;;  %v15256_v40 = vld [vmem:[#allocation7 + $0x1] ss:$0 sm:$0xff]  ;;  %12058 = vmatpush3.bf16.msra.mxu1 %v12307_v11 }
0x1e57   :  { %v12625_v28 = vpop.eup %12624  ;;  %v9668_v4 = vadd.f32 1.0, %v12623_v27  ;;  %12041 = vmatprep.subr.bf16.mxu0 %v15355_v13  ;;  %12059 = vmatprep.subr.bf16.mxu1 %v15355_v13 }
0x1e58   :  { %v9685_v50 = vmul.f32 %v9669_v63, %v9557_v55  ;;  %v9670_v2 = vadd.f32 1.0, %v12625_v28  ;;  %v12308_v63 = vld [vmem:[%s15338_s15 + $0x10] sm:$0xff]  }
0x1e59   :  { %v9684_v59 = vmul.f32 %v9668_v4, %v9556_v0 }
0x1e5a   :  { %v9695_v43 = vpack.c.bf16 %v9685_v50, %v9683_v38  ;;  %v9686_v20 = vmul.f32 %v9670_v2, %v9558_v18  ;;  %12042 = vmatpush3.bf16.msra.mxu0 %v12301_v31  ;;  %12060 = vmatpush3.bf16.msra.mxu1 %v12308_v63 }
0x1e5b   :  { %v12627_v53 = vpop.eup %12626  ;;  %12043 = vmatprep.subr.bf16.mxu0 %v15355_v13  ;;  %12061 = vmatprep.subr.bf16.mxu1 %v15355_v13 }
0x1e5c   :  { %v12629_v23 = vpop.eup %12628  ;;  %v9696_v32 = vpack.c.bf16 %v9686_v20, %v9684_v59  ;;  %v9671_v25 = vadd.f32 1.0, %v12627_v53 }
0x1e5d   :  { %v12631_v39 = vpop.eup %12630  ;;  %v9672_v35 = vadd.f32 1.0, %v12629_v23 }
0x1e5e   :  { %9884 = vmatprep.mubr.bf16.mxu1 %v9696_v32  ;;  %v12633_v45 = vpop.eup %12632  ;;  %v9673_v22 = vadd.f32 1.0, %v12631_v39  ;;  %v9687_v10 = vmul.f32 %v9671_v25, %v9559_v41  ;;  %12044 = vmatpush3.bf16.msra.mxu0 %v12302_v46 }
0x1e5f   :  { %9885 = vmatmul.mubr.bf16.gmra.mrb[56].mxu1 %v9695_v43  ;;  %v9674_v9 = vadd.f32 1.0, %v12633_v45  ;;  %v9688_v52 = vmul.f32 %v9672_v35, %v9560_v16  ;;  %12045 = vmatprep.subr.bf16.mxu0 %v15355_v13  ;;  %v12309_v43 = vld [vmem:[%s15338_s15 + $0x18] sm:$0xff]   ;;  %v12310_v45 = vld [vmem:[%s15338_s15 + $0x20] sm:$0xff]  }
0x1e60   :  { %v9689_v24 = vmul.f32 %v9673_v22, %v9561_v42  ;;  %12062 = vmatpush3.bf16.msra.mxu1 %v12309_v43 }
0x1e61   :  { %v9690_v6 = vmul.f32 %v9674_v9, %v9562_v62  ;;  %12063 = vmatprep.subr.bf16.mxu1 %v15355_v13 }
0x1e62   :  { %v9697_v30 = vpack.c.bf16 %v9689_v24, %v9687_v10  ;;  %12046 = vmatpush3.bf16.msra.mxu0 %v12303_v37  ;;  %v12311_v24 = vld [vmem:[%s15338_s15 + $0x28] sm:$0xff]  }
0x1e63   :  { %v9698_v44 = vpack.c.bf16 %v9690_v6, %v9688_v52  ;;  %12047 = vmatprep.subr.bf16.mxu0 %v15355_v13 }
0x1e64   :  { %12064 = vmatpush3.bf16.msra.mxu1 %v12310_v45 }
0x1e65   :  { %9892 = vmatprep.mubr.bf16.mxu1 %v9698_v44  ;;  %12065 = vmatprep.subr.bf16.mxu1 %v15355_v13 }
0x1e66   :  { %12048 = vmatpush3.bf16.msra.mxu0 %v12304_v17 }
0x1e67   :  { %9893 = vmatmul.mubr.bf16.gmra.mrb[60].mxu1 %v9697_v30  ;;  %12049 = vmatprep.subr.bf16.mxu0 %v15355_v13 }
0x1e68   :  { %12071 = vmatprep.mubr.msk.bf16.mxu1 %vm12764_vm0, %v15355_v13  ;;  %12066 = vmatpush3.bf16.msra.mxu1 %v12311_v24 }
0x1e69   :  { %12067 = vmatprep.subr.bf16.mxu1 %v15355_v13 }
0x1e6a   :  { %12050 = vmatpush3.bf16.msra.mxu0 %v12305_v8 }
0x1e6c   :  { %12068 = vmatpush3.bf16.msra.mxu1 %v12312_v56 }
0x1e6d   :  { %12069 = vmatprep.subr.bf16.mxu1 %v15355_v13 }
0x1ef5   :  { %v11081_v21 = vpop.f32.mrb[48].mxu1 }
0x1ef6   :  { %v11082_v33 = vpop.f32.mrb[49].mxu1 }
0x1ef7   :  { %v11083_v5 = vadd.f32 %v11082_v33, %v11081_v21  ;;  %v11084_v29 = vpop.f32.mrb[50].mxu1 }
0x1ef8   :  { %v11085_v61 = vpop.f32.mrb[51].mxu1 }
0x1ef9   :  { %v9871_v1 = vadd.f32 %v11083_v5, %v15239_v51  ;;  %v11086_v3 = vadd.f32 %v11085_v61, %v11084_v29 }
0x1efb   :  { %v9901_v36 = vadd.f32 %v9871_v1, %v15074_v34  ;;  %v9874_v47 = vadd.f32 %v11086_v3, %v15239_v51 }
0x1efd   :  { %v9917_v27 = vmul.f32 %v15251_v48, %v9901_v36  ;;  %v9902_v14 = vadd.f32 %v9874_v47, %v15076_v15  ;;  %v11087_v55 = vpop.f32.mrb[52].mxu1 }
0x1efe   :  { %v11088_v28 = vpop.f32.mrb[53].mxu1 }
0x1eff   :  { %v9933_v0 = vadd.f32 %v15256_v40, %v9917_v27  ;;  %v9918_v34 = vmul.f32 %v15251_v48, %v9902_v14  ;;  %v11089_v4 = vadd.f32 %v11088_v28, %v11087_v55  ;;  %v11090_v38 = vpop.f32.mrb[54].mxu1 }
0x1f00   :  { %v11091_v50 = vpop.f32.mrb[55].mxu1 }
0x1f01   :  { %v9949_v18 = vmul.f32 0.044715, %v9933_v0  ;;  %v9934_v2 = vadd.f32 %v15256_v40, %v9918_v34  ;;  %v9879_v15 = vadd.f32 %v11089_v4, %v15239_v51  ;;  %v11092_v59 = vadd.f32 %v11091_v50, %v11090_v38 }
0x1f02   :  { %v9941_v8 = vmul.f32 0.5, %v9933_v0 }
0x1f03   :  { %v9957_v20 = vmul.f32 %v9949_v18, %v9933_v0  ;;  %v9950_v53 = vmul.f32 0.044715, %v9934_v2  ;;  %v9903_v23 = vadd.f32 %v9879_v15, %v15083_v58  ;;  %v9882_v32 = vadd.f32 %v11092_v59, %v15239_v51 }
0x1f04   :  { %v9942_v54 = vmul.f32 0.5, %v9934_v2 }
0x1f05   :  { %v9965_v25 = vmul.f32 %v9957_v20, %v9933_v0  ;;  %v9958_v39 = vmul.f32 %v9950_v53, %v9934_v2  ;;  %v9919_v35 = vmul.f32 %v15251_v48, %v9903_v23  ;;  %v9904_v41 = vadd.f32 %v9882_v32, %v15081_v12 }
0x1f07   :  { %v9973_v42 = vadd.f32 %v9965_v25, %v9933_v0  ;;  %v9966_v22 = vmul.f32 %v9958_v39, %v9934_v2  ;;  %v9935_v16 = vadd.f32 %v15256_v40, %v9919_v35  ;;  %v9920_v58 = vmul.f32 %v15251_v48, %v9904_v41 }
0x1f09   :  { %v9981_v62 = vmul.f32 0.7978846, %v9973_v42  ;;  %v9974_v9 = vadd.f32 %v9966_v22, %v9934_v2  ;;  %v9951_v10 = vmul.f32 0.044715, %v9935_v16  ;;  %v9936_v52 = vadd.f32 %v15256_v40, %v9920_v58 }
0x1f0a   :  { %v9943_v55 = vmul.f32 0.5, %v9935_v16 }
0x1f0b   :  { %12634 = vtanh.f32 %v9981_v62  ;;  %v9982_v12 = vmul.f32 0.7978846, %v9974_v9  ;;  %v9959_v6 = vmul.f32 %v9951_v10, %v9935_v16  ;;  %v9952_v30 = vmul.f32 0.044715, %v9936_v52 }
0x1f0c   :  { %v9944_v0 = vmul.f32 0.5, %v9936_v52 }
0x1f0d   :  { %12636 = vtanh.f32 %v9982_v12  ;;  %v9967_v44 = vmul.f32 %v9959_v6, %v9935_v16  ;;  %v9960_v19 = vmul.f32 %v9952_v30, %v9936_v52 }
0x1f0f   :  { %v9975_v49 = vadd.f32 %v9967_v44, %v9935_v16  ;;  %v9968_v31 = vmul.f32 %v9960_v19, %v9936_v52 }
0x1f11   :  { %v9983_v46 = vmul.f32 0.7978846, %v9975_v49  ;;  %v9976_v37 = vadd.f32 %v9968_v31, %v9936_v52 }
0x1f13   :  { %12638 = vtanh.f32 %v9983_v46  ;;  %v9984_v17 = vmul.f32 0.7978846, %v9976_v37 }
0x1f15   :  { %v12635_v21 = vpop.eup %12634  ;;  %12640 = vtanh.f32 %v9984_v17 }
0x1f16   :  { %v9997_v33 = vadd.f32 1.0, %v12635_v21 }
0x1f17   :  { %v12637_v5 = vpop.eup %12636 }
0x1f18   :  { %v10005_v29 = vmul.f32 %v9997_v33, %v9941_v8  ;;  %v9998_v61 = vadd.f32 1.0, %v12637_v5 }
0x1f1a   :  { %v10013_v1 = vrot.slane %v10005_v29, 4  ;;  %v10006_v3 = vmul.f32 %v9998_v61, %v9942_v54 }
0x1f1c   :  { %v10014_v11 = vadd.f32 %v10013_v1, %v10005_v29  ;;  %v10019_v36 = vrot.slane %v10006_v3, 4 }
0x1f1d   :  { %v12639_v47 = vpop.eup %12638 }
0x1f1e   :  { %v10015_v27 = vrot.slane %v10014_v11, 2  ;;  %v10020_v14 = vadd.f32 %v10019_v36, %v10006_v3  ;;  %v9999_v63 = vadd.f32 1.0, %v12639_v47 }
0x1f1f   :  { %v12641_v13 = vpop.eup %12640 }
0x1f20   :  { %v10016_v28 = vadd.f32 %v10015_v27, %v10014_v11  ;;  %v10021_v34 = vrot.slane %v10020_v14, 2  ;;  %v10007_v4 = vmul.f32 %v9999_v63, %v9943_v55  ;;  %v10000_v38 = vadd.f32 1.0, %v12641_v13 }
0x1f22   :  { %v10017_v50 = vrot.slane %v10016_v28, 1  ;;  %v10022_v18 = vadd.f32 %v10021_v34, %v10020_v14  ;;  %v10025_v15 = vrot.slane %v10007_v4, 4  ;;  %v10008_v2 = vmul.f32 %v10000_v38, %v9944_v0 }
0x1f24   :  { %v10018_v43 = vadd.f32 %v10017_v50, %v10016_v28  ;;  %v10023_v59 = vrot.slane %v10022_v18, 1  ;;  %v10026_v20 = vadd.f32 %v10025_v15, %v10007_v4  ;;  %v10031_v53 = vrot.slane %v10008_v2, 4 }
0x1f26   :  { %v10061_v23 = vmul.f32 0.125, %v10018_v43  ;;  %v10024_v32 = vadd.f32 %v10023_v59, %v10022_v18  ;;  %v10027_v25 = vrot.slane %v10026_v20, 2  ;;  %v10032_v39 = vadd.f32 %v10031_v53, %v10008_v2 }
0x1f28   :  { %v10069_v35 = vpack.c.bf16 %v10061_v23, %v10061_v23  ;;  %v10062_v45 = vmul.f32 0.125, %v10024_v32  ;;  %v10028_v41 = vadd.f32 %v10027_v25, %v10026_v20  ;;  %v10033_v42 = vrot.slane %v10032_v39, 2 }
0x1f2a   :  { %v10070_v22 = vpack.c.bf16 %v10062_v45, %v10062_v45  ;;  %v10029_v16 = vrot.slane %v10028_v41, 1  ;;  %v10034_v58 = vadd.f32 %v10033_v42, %v10032_v39  ;;  %v10108_v62 = vunpack.c.l.b16 %v10069_v35 }
0x1f2c   :  { %v10109_v9 = vunpack.c.l.b16 %v10070_v22  ;;  %v10030_v10 = vadd.f32 %v10029_v16, %v10028_v41  ;;  %v10035_v24 = vrot.slane %v10034_v58, 1 }
0x1f2e   :  { %v10117_v52 = vsel %vm10116_vm4, %v10109_v9, %v10108_v62  ;;  %v10063_v12 = vmul.f32 0.125, %v10030_v10  ;;  %v10036_v6 = vadd.f32 %v10035_v24, %v10034_v58 }
0x1f30   :  { %v10071_v30 = vpack.c.bf16 %v10063_v12, %v10063_v12  ;;  %v10064_v44 = vmul.f32 0.125, %v10036_v6 }
0x1f32   :  { %v10110_v56 = vunpack.c.l.b16 %v10071_v30  ;;  %v11093_v19 = vpop.f32.mrb[56].mxu1  ;;  %v10072_v49 = vpack.c.bf16 %v10064_v44, %v10064_v44 }
0x1f33   :  { %v11094_v31 = vpop.f32.mrb[57].mxu1 }
0x1f34   :  { %v10119_v46 = vsel %vm10118_vm5, %v10110_v56, %v10117_v52  ;;  %v11095_v37 = vadd.f32 %v11094_v31, %v11093_v19  ;;  %v11096_v17 = vpop.f32.mrb[58].mxu1  ;;  %v10111_v21 = vunpack.c.l.b16 %v10072_v49 }
0x1f35   :  { %v11097_v8 = vpop.f32.mrb[59].mxu1 }
0x1f36   :  { %v9887_v33 = vadd.f32 %v11095_v37, %v15239_v51  ;;  %v11098_v5 = vadd.f32 %v11097_v8, %v11096_v17  ;;  %v15293_v29 = vsel %vm10120_vm6, %v10111_v21, %v10119_v46 }
0x1f38   :  { %v9905_v54 = vadd.f32 %v9887_v33, %v15096_v60  ;;  %v9890_v61 = vadd.f32 %v11098_v5, %v15239_v51 }
0x1f3a   :  { %v9921_v1 = vmul.f32 %v15251_v48, %v9905_v54  ;;  %v9906_v3 = vadd.f32 %v9890_v61, %v15098_v57  ;;  %v11099_v11 = vpop.f32.mrb[60].mxu1 }
0x1f3b   :  { %v11100_v36 = vpop.f32.mrb[61].mxu1 }
0x1f3c   :  { %v9937_v47 = vadd.f32 %v15256_v40, %v9921_v1  ;;  %v9922_v27 = vmul.f32 %v15251_v48, %v9906_v3  ;;  %v11101_v14 = vadd.f32 %v11100_v36, %v11099_v11  ;;  %v11102_v55 = vpop.f32.mrb[62].mxu1 }
0x1f3d   :  { %v11103_v63 = vpop.f32.mrb[63].mxu1 }
0x1f3e   :  { %v9953_v13 = vmul.f32 0.044715, %v9937_v47  ;;  %v9938_v28 = vadd.f32 %v15256_v40, %v9922_v27  ;;  %v9895_v60 = vadd.f32 %v11101_v14, %v15239_v51  ;;  %v11104_v34 = vadd.f32 %v11103_v63, %v11102_v55 }
0x1f40   :  { %v9961_v4 = vmul.f32 %v9953_v13, %v9937_v47  ;;  %v9954_v0 = vmul.f32 0.044715, %v9938_v28  ;;  %v9907_v38 = vadd.f32 %v9895_v60, %v15092_v7  ;;  %v9898_v57 = vadd.f32 %v11104_v34, %v15239_v51 }
0x1f42   :  { %v9969_v50 = vmul.f32 %v9961_v4, %v9937_v47  ;;  %v9962_v18 = vmul.f32 %v9954_v0, %v9938_v28  ;;  %v9923_v15 = vmul.f32 %v15251_v48, %v9907_v38  ;;  %v9908_v2 = vadd.f32 %v9898_v57, %v15094_v26 }
0x1f44   :  { %v9977_v43 = vadd.f32 %v9969_v50, %v9937_v47  ;;  %v9970_v59 = vmul.f32 %v9962_v18, %v9938_v28  ;;  %v9939_v20 = vadd.f32 %v15256_v40, %v9923_v15  ;;  %v9924_v53 = vmul.f32 %v15251_v48, %v9908_v2 }
0x1f45   :  { %v9945_v48 = vmul.f32 0.5, %v9937_v47 }
0x1f46   :  { %v9985_v23 = vmul.f32 0.7978846, %v9977_v43  ;;  %v9978_v32 = vadd.f32 %v9970_v59, %v9938_v28  ;;  %v9955_v25 = vmul.f32 0.044715, %v9939_v20  ;;  %v9940_v39 = vadd.f32 %v15256_v40, %v9924_v53 }
0x1f47   :  { %v9946_v40 = vmul.f32 0.5, %v9938_v28  ;;  %v9947_v31 = vmul.f32 0.5, %v9939_v20 }
0x1f48   :  { %12642 = vtanh.f32 %v9985_v23  ;;  %v9986_v7 = vmul.f32 0.7978846, %v9978_v32  ;;  %v9963_v51 = vmul.f32 %v9955_v25, %v9939_v20  ;;  %v9956_v35 = vmul.f32 0.044715, %v9940_v39 }
0x1f49   :  { %v9948_v33 = vmul.f32 0.5, %v9940_v39 }
0x1f4a   :  { %12644 = vtanh.f32 %v9986_v7  ;;  %v9971_v45 = vmul.f32 %v9963_v51, %v9939_v20  ;;  %v9964_v41 = vmul.f32 %v9956_v35, %v9940_v39 }
0x1f4c   :  { %v9979_v42 = vadd.f32 %v9971_v45, %v9939_v20  ;;  %v9972_v26 = vmul.f32 %v9964_v41, %v9940_v39  ;;  %v10679_v41 = vld [vmem:[%s15337_s14] ss:$0 sm:$0xff] }
0x1f4e   :  { %v9987_v22 = vmul.f32 0.7978846, %v9979_v42  ;;  %v9980_v16 = vadd.f32 %v9972_v26, %v9940_v39 }
0x1f50   :  { %12646 = vtanh.f32 %v9987_v22  ;;  %v9988_v58 = vmul.f32 0.7978846, %v9980_v16 }
0x1f52   :  { %v12643_v62 = vpop.eup %12642  ;;  %12648 = vtanh.f32 %v9988_v58 }
0x1f53   :  { %v10001_v9 = vadd.f32 1.0, %v12643_v62 }
0x1f54   :  { %v12645_v10 = vpop.eup %12644 }
0x1f55   :  { %v10009_v24 = vmul.f32 %v10001_v9, %v9945_v48  ;;  %v10002_v52 = vadd.f32 1.0, %v12645_v10  ;;  %v10688_v48 = vld [vmem:[%s15339_s16] ss:$0 sm:$0xff] }
0x1f57   :  { %v10037_v12 = vrot.slane %v10009_v24, 4  ;;  %v10010_v6 = vmul.f32 %v10002_v52, %v9946_v40 }
0x1f59   :  { %v10038_v30 = vadd.f32 %v10037_v12, %v10009_v24  ;;  %v10043_v44 = vrot.slane %v10010_v6, 4 }
0x1f5a   :  { %v12647_v56 = vpop.eup %12646 }
0x1f5b   :  { %v10039_v19 = vrot.slane %v10038_v30, 2  ;;  %v10044_v49 = vadd.f32 %v10043_v44, %v10010_v6  ;;  %v10003_v46 = vadd.f32 1.0, %v12647_v56 }
0x1f5c   :  { %v12649_v37 = vpop.eup %12648 }
0x1f5d   :  { %v10040_v17 = vadd.f32 %v10039_v19, %v10038_v30  ;;  %v10045_v21 = vrot.slane %v10044_v49, 2  ;;  %v10011_v8 = vmul.f32 %v10003_v46, %v9947_v31  ;;  %v10004_v5 = vadd.f32 1.0, %v12649_v37 }
0x1f5f   :  { %v10041_v54 = vrot.slane %v10040_v17, 1  ;;  %v10046_v61 = vadd.f32 %v10045_v21, %v10044_v49  ;;  %v10049_v1 = vrot.slane %v10011_v8, 4  ;;  %v10012_v3 = vmul.f32 %v10004_v5, %v9948_v33 }
0x1f61   :  { %v10042_v11 = vadd.f32 %v10041_v54, %v10040_v17  ;;  %v10047_v36 = vrot.slane %v10046_v61, 1  ;;  %v10050_v47 = vadd.f32 %v10049_v1, %v10011_v8  ;;  %v10055_v27 = vrot.slane %v10012_v3, 4 }
0x1f63   :  { %v10065_v14 = vmul.f32 0.125, %v10042_v11  ;;  %v10048_v55 = vadd.f32 %v10047_v36, %v10046_v61  ;;  %v10051_v63 = vrot.slane %v10050_v47, 2  ;;  %v10056_v13 = vadd.f32 %v10055_v27, %v10012_v3 }
0x1f65   :  { %v10073_v28 = vpack.c.bf16 %v10065_v14, %v10065_v14  ;;  %v10066_v60 = vmul.f32 0.125, %v10048_v55  ;;  %v10052_v34 = vadd.f32 %v10051_v63, %v10050_v47  ;;  %v10057_v4 = vrot.slane %v10056_v13, 2 }
0x1f67   :  { %v10112_v0 = vunpack.c.l.b16 %v10073_v28  ;;  %v10074_v38 = vpack.c.bf16 %v10066_v60, %v10066_v60  ;;  %v10053_v57 = vrot.slane %v10052_v34, 1  ;;  %v10058_v50 = vadd.f32 %v10057_v4, %v10056_v13 }
0x1f69   :  { %v10123_v18 = vsel %vm10122_vm7, %v10112_v0, %v15293_v29  ;;  %v10113_v15 = vunpack.c.l.b16 %v10074_v38  ;;  %v10054_v2 = vadd.f32 %v10053_v57, %v10052_v34  ;;  %v10059_v43 = vrot.slane %v10058_v50, 1  ;;  %v12313_v29 = vld [vmem:[%s15338_s15 + $0x38] sm:$0xff]  }
0x1f6a   :  { %12070 = vmatpush3.bf16.msra.mxu1 %v12313_v29 }
0x1f6b   :  { %v10125_v59 = vsel %vm10124_vm8, %v10113_v15, %v10123_v18  ;;  %v10067_v20 = vmul.f32 0.125, %v10054_v2  ;;  %v10060_v53 = vadd.f32 %v10059_v43, %v10058_v50 }
0x1f6d   :  { %v10075_v23 = vpack.c.bf16 %v10067_v20, %v10067_v20  ;;  %v10068_v32 = vmul.f32 0.125, %v10060_v53 }
0x1f6f   :  { %v10114_v25 = vunpack.c.l.b16 %v10075_v23  ;;  %v10076_v39 = vpack.c.bf16 %v10068_v32, %v10068_v32 }
0x1f71   :  { %v10127_v7 = vsel %vm10126_vm9, %v10114_v25, %v10125_v59  ;;  %v10115_v51 = vunpack.c.l.b16 %v10076_v39 }
0x1f73   :  { %v10129_v35 = vsel %vm10128_vm10, %v10115_v51, %v10127_v7 }
0x1f74   :  { %v10130_v45 = vpack.c.b16 %v10129_v35, %v10129_v35 }
0x1f76   :  { %12052 = vmatmul.mubr.bf16.vlgmr.msra.gmra.mrb[64].mxu0 %v10130_v45 }
0x2049   :  { %v10214_v42 = vpop.f32.mrb[64].mxu0 }
0x204a   :  { %v10215_v26 = vadd.f32 %v10679_v41, %v10214_v42  ;;  %v12053_v22 = vpop.f32.mrb[65].mxu0 }
0x204b   :  { %v10217_v16 = vpop.f32.mrb[66].mxu0 }
0x204c   :  { %v10220_v58 = vpack.c.bf16 %v10215_v26, %v10215_v26  ;;  %v12054_v62 = vpop.f32.mrb[67].mxu0 }
0x204e   :  { %12072 = vmatmul.mubr.bf16.vlgmr.msra.gmra.mrb[64].mxu1 %v10220_v58 }
0x2121   :  { %v10326_v9 = vpop.f32.mrb[64].mxu1 }
0x2122   :  { %v10327_v10 = vadd.f32 %v10688_v48, %v10326_v9  ;;  %v12073_v24 = vpop.f32.mrb[65].mxu1 }
0x2123   :  { %v10329_v40 = vpop.f32.mrb[66].mxu1 }
0x2124   :  { %10332 = vst [vmem:[%s15340_s17] sm:$0xff] %v10327_v10  ;;  %v12074_v52 = vpop.f32.mrb[67].mxu1 }
0x2125   :  { %10337 = vsyncpa [#allocation3], 1 }
0x2126   :  { %10338 = vsyncpa [#allocation5], 1 }
0x2127   :  { %10339 = vsyncpa [#allocation8], 1 }

</bundles_post_ra>
